<compile_context>
chip_gen: v6e
topology: v6e:2x2x1
jax: 0.10.0
libtpu: 0.0.40
codegen_flags: <defaults>
</compile_context>

<pallas_src>
import functools
import math

import jax
import jax.numpy as jnp
from jax.experimental import pallas as pl
from jax.experimental.pallas import tpu as pltpu


# Parameter ordering shared by the wrapper (flattening) and the kernel
# (unpacking). Per-layer tensors are stacked over the layer axis L.
_ENC_KEYS = ("q_w", "q_b", "k_w", "k_b", "v_w", "v_b", "out_w", "out_b",
             "ln1_g", "ln1_b",
             "lin1_w", "lin1_b", "lin2_w", "lin2_b",
             "ln2_g", "ln2_b")

_DEC_KEYS = ("sa_q_w", "sa_q_b", "sa_k_w", "sa_k_b", "sa_v_w", "sa_v_b",
             "sa_out_w", "sa_out_b",
             "ln1_g", "ln1_b",
             "ca_q_w", "ca_q_b", "ca_k_w", "ca_k_b", "ca_v_w", "ca_v_b",
             "ca_out_w", "ca_out_b",
             "ln2_g", "ln2_b",
             "lin1_w", "lin1_b", "lin2_w", "lin2_b",
             "ln3_g", "ln3_b")

_TOP_KEYS = ("embedding", "enc_norm_g", "enc_norm_b",
             "dec_norm_g", "dec_norm_b", "fc_w", "fc_b")


# ------------------------------ fused kernel --------------------------------

def _qa_fused_kernel(*refs, num_heads):
    out_ref = refs[-1]
    in_refs = refs[:-1]

    # ---- unpack refs (order must match wrapper flattening) ----
    i = 0
    tok_ref = in_refs[i]; i += 1
    enc = {}
    for k in _ENC_KEYS:
        enc[k] = in_refs[i]; i += 1
    dec = {}
    for k in _DEC_KEYS:
        dec[k] = in_refs[i]; i += 1
    (emb_ref, enc_ng_ref, enc_nb_ref, dec_ng_ref, dec_nb_ref,
     fc_w_ref, fc_b_ref) = in_refs[i:i + 7]

    S = tok_ref.shape[0]
    Vp, E = emb_ref.shape
    L = enc["q_w"].shape[0]
    NH = num_heads
    Dh = E // NH
    f32, bf16 = jnp.float32, jnp.bfloat16

    # ---- fused building blocks (all VMEM / vreg resident) ----
    def layer_norm(x, g, b):
        mean = jnp.mean(x, axis=-1, keepdims=True)
        xc = x - mean
        var = jnp.mean(xc * xc, axis=-1, keepdims=True)
        return xc * jax.lax.rsqrt(var + 1e-5) * g + b

    def linear(x, w, b, relu=False):
        # stored weights are bf16; cast activations at the matmul input only,
        # accumulate in f32 on the MXU.
        y = jnp.dot(x.astype(bf16), w, preferred_element_type=f32) + b
        return jnp.maximum(y, 0.0) if relu else y

    def heads(x):                                  # (S, E) -> (NH, S, Dh)
        return jnp.transpose(x.reshape(x.shape[0], NH, Dh), (1, 0, 2))

    def mha(x_q, x_kv, qw, qb, kw, kb, vw, vb, ow, ob):
        # x_q, x_kv: (S, E) f32.  1/sqrt(Dh) is folded into qw/qb at init.
        q = heads(linear(x_q, qw, qb))             # (NH, S, Dh)
        k = heads(linear(x_kv, kw, kb))
        v = heads(linear(x_kv, vw, vb))
        s = jnp.einsum("hqd,hkd->hqk", q.astype(bf16), k.astype(bf16),
                       preferred_element_type=f32)                 # (NH, S, S)
        m = jnp.max(s, axis=-1, keepdims=True)
        p = jnp.exp(s - m)
        denom = jnp.sum(p, axis=-1, keepdims=True)
        p = p * pl.reciprocal(denom, approx=True)  # EUP slot, not VPU divide
        o = jnp.einsum("hqk,hkd->hqd", p.astype(bf16), v.astype(bf16),
                       preferred_element_type=f32)                 # (NH, S, Dh)
        attn = jnp.transpose(o, (1, 0, 2)).reshape(x_q.shape[0], E)
        return linear(attn, ow, ob)

    def attn_weights(d, l, prefix=""):
        return (d[prefix + "q_w"][l], d[prefix + "q_b"][l],
                d[prefix + "k_w"][l], d[prefix + "k_b"][l],
                d[prefix + "v_w"][l], d[prefix + "v_b"][l],
                d[prefix + "out_w"][l], d[prefix + "out_b"][l])

    # ---- embedding lookup: lane-dense one-hot matmul on the (Vp, E) table ----
    tok = tok_ref[...]                                             # (S, 1) int32
    iota = jax.lax.broadcasted_iota(jnp.int32, (S, Vp), 1)
    onehot = (tok == iota).astype(bf16)                            # (S, Vp) = (8, 128)
    emb = jnp.dot(onehot, emb_ref[...], preferred_element_type=f32)  # (S, E)

    # ---- encoder stack (post-norm, eps=1e-5, ReLU FFN) ----
    mem = emb
    for l in range(L):
        a = mha(mem, mem, *attn_weights(enc, l))
        mem = layer_norm(mem + a, enc["ln1_g"][l], enc["ln1_b"][l])
        hid = linear(mem, enc["lin1_w"][l], enc["lin1_b"][l], relu=True)
        ff = linear(hid, enc["lin2_w"][l], enc["lin2_b"][l])
        mem = layer_norm(mem + ff, enc["ln2_g"][l], enc["ln2_b"][l])
    mem = layer_norm(mem, enc_ng_ref[...], enc_nb_ref[...])

    # ---- decoder stack (self-attn -> cross-attn -> FFN, post-norm) ----
    x = emb
    for l in range(L):
        sa = mha(x, x, *attn_weights(dec, l, "sa_"))
        x = layer_norm(x + sa, dec["ln1_g"][l], dec["ln1_b"][l])
        ca = mha(x, mem, *attn_weights(dec, l, "ca_"))
        x = layer_norm(x + ca, dec["ln2_g"][l], dec["ln2_b"][l])
        hid = linear(x, dec["lin1_w"][l], dec["lin1_b"][l], relu=True)
        ff = linear(hid, dec["lin2_w"][l], dec["lin2_b"][l])
        x = layer_norm(x + ff, dec["ln3_g"][l], dec["ln3_b"][l])
    x = layer_norm(x, dec_ng_ref[...], dec_nb_ref[...])

    # ---- final vocab projection: (S, Vp) = (8, 128) lane-dense store ----
    out_ref[...] = linear(x, fc_w_ref[...], fc_b_ref[...]).astype(out_ref.dtype)
    # TODO(synk): for realistic vocab sizes, tile the V dimension (embedding
    # row fetch + fc projection) over an extra grid axis so the kernel fits
    # v7x's 64 MiB VMEM instead of keeping the whole table resident.


# --------------------------------- wrapper -----------------------------------

def _replicated_spec(arr):
    """Full-array VMEM block, same block for every grid step (weights)."""
    nd = arr.ndim
    return pl.BlockSpec(arr.shape, lambda n, _nd=nd: (0,) * _nd)


def qa_model_forward(params, tokens, *, num_heads, vocab_size):
    """tokens: (S, N) int32 -> logits (S, N, vocab), PyTorch batch_first=False."""
    S, N = tokens.shape
    Vp, E = params["embedding"].shape

    # batch-major token ids: row r = n*S + s
    tok_bm = tokens.T.reshape(N * S, 1).astype(jnp.int32)

    flat = [tok_bm]
    flat += [params["enc"][k] for k in _ENC_KEYS]
    flat += [params["dec"][k] for k in _DEC_KEYS]
    flat += [params[k] for k in _TOP_KEYS]

    in_specs = [pl.BlockSpec((S, 1), lambda n: (n, 0))]       # per-batch tokens
    in_specs += [_replicated_spec(a) for a in flat[1:]]       # replicated weights

    grid_spec = pltpu.PrefetchScalarGridSpec(
        num_scalar_prefetch=0,
        grid=(N,),                                            # one step per batch elem
        in_specs=in_specs,
        out_specs=pl.BlockSpec((S, Vp), lambda n: (n, 0)),
    )

    logits_bm = pl.pallas_call(
        functools.partial(_qa_fused_kernel, num_heads=num_heads),
        out_shape=jax.ShapeDtypeStruct((N * S, Vp), jnp.float32),
        grid_spec=grid_spec,
        compiler_params=pltpu.CompilerParams(
            dimension_semantics=("parallel",)),               # megacore on v7x
    )(*flat)

    # (N*S, Vp) -> (S, N, V): drop lane padding, back to seq-first layout.
    return logits_bm.reshape(N, S, Vp)[:, :, :vocab_size].transpose(1, 0, 2)


# ------------------------------ param init -----------------------------------

def init_params(key, vocab_size, embed_size, hidden_size, num_layers, num_heads):
    """Weights pre-transposed (in, out), per-head scale folded into Q, bf16
    matmul weights, f32 biases/LN params, vocab padded to a 128-lane multiple."""
    E, Hf, V, L = embed_size, hidden_size, vocab_size, num_layers
    Dh = E // num_heads
    Vp = max(128, -(-V // 128) * 128)
    q_scale = 1.0 / math.sqrt(Dh)
    init_std = 0.02
    keys = iter(jax.random.split(key, 64))

    def nrm_f32(shape):
        return init_std * jax.random.normal(next(keys), shape, dtype=jnp.float32)

    def w(shape, scale=1.0):
        return (scale * nrm_f32(shape)).astype(jnp.bfloat16)

    def zeros(shape):
        return jnp.zeros(shape, jnp.float32)

    def ones(shape):
        return jnp.ones(shape, jnp.float32)

    def attn(prefix=""):
        return {
            prefix + "q_w": w((L, E, E), q_scale),   # 1/sqrt(Dh) folded in
            prefix + "q_b": zeros((L, 1, E)),
            prefix + "k_w": w((L, E, E)), prefix + "k_b": zeros((L, 1, E)),
            prefix + "v_w": w((L, E, E)), prefix + "v_b": zeros((L, 1, E)),
            prefix + "out_w": w((L, E, E)), prefix + "out_b": zeros((L, 1, E)),
        }

    def ffn():
        return {
            "lin1_w": w((L, E, Hf)), "lin1_b": zeros((L, 1, Hf)),
            "lin2_w": w((L, Hf, E)), "lin2_b": zeros((L, 1, E)),
        }

    enc = {**attn(),
           "ln1_g": ones((L, 1, E)), "ln1_b": zeros((L, 1, E)),
           **ffn(),
           "ln2_g": ones((L, 1, E)), "ln2_b": zeros((L, 1, E))}
    dec = {**attn("sa_"),
           "ln1_g": ones((L, 1, E)), "ln1_b": zeros((L, 1, E)),
           **attn("ca_"),
           "ln2_g": ones((L, 1, E)), "ln2_b": zeros((L, 1, E)),
           **ffn(),
           "ln3_g": ones((L, 1, E)), "ln3_b": zeros((L, 1, E))}

    embedding = (jnp.zeros((Vp, E), jnp.float32)
                 .at[:V].set(nrm_f32((V, E))).astype(jnp.bfloat16))
    fc_w = (jnp.zeros((E, Vp), jnp.float32)
            .at[:, :V].set(nrm_f32((E, V))).astype(jnp.bfloat16))

    return {
        "embedding": embedding,
        "enc": enc,
        "dec": dec,
        "enc_norm_g": ones((1, E)), "enc_norm_b": zeros((1, E)),
        "dec_norm_g": ones((1, E)), "dec_norm_b": zeros((1, E)),
        "fc_w": fc_w, "fc_b": zeros((1, Vp)),
    }


# ----------------------------------- main ------------------------------------

if __name__ == "__main__":
    vocab_size = 64
    embed_size = 32
    hidden_size = 64     # dim_feedforward
    num_layers = 2
    num_heads = 4
    dropout = 0.0        # no-op at inference
    # TODO(synk): dropout > 0 (training mode) is not implemented in the kernel.

    key = jax.random.PRNGKey(0)
    pkey, xkey = jax.random.split(key)
    params = init_params(pkey, vocab_size, embed_size, hidden_size,
                         num_layers, num_heads)

    # Token ids, shape (S=8, N=2): seq-first like nn.Transformer (batch_first=False).
    tokens = jax.random.randint(xkey, (8, 2), 0, vocab_size, dtype=jnp.int32)

    fwd = jax.jit(functools.partial(qa_model_forward, num_heads=num_heads,
                                    vocab_size=vocab_size))
    logits = fwd(params, tokens)
    jax.block_until_ready(logits)

    assert logits.shape == (8, 2, vocab_size)
    assert bool(jnp.all(jnp.isfinite(logits)))
    print("KERNEL_OK")
</pallas_src>

<mosaic_0001>
module attributes {stable_mosaic.version = 11 : i64} {
  func.func @_qa_fused_kernel(%arg0: i32, %arg1: memref<8x1xi32, #tpu.memory_space<vmem>>, %arg2: memref<2x32x32xbf16, #tpu.memory_space<vmem>>, %arg3: memref<2x1x32xf32, #tpu.memory_space<vmem>>, %arg4: memref<2x32x32xbf16, #tpu.memory_space<vmem>>, %arg5: memref<2x1x32xf32, #tpu.memory_space<vmem>>, %arg6: memref<2x32x32xbf16, #tpu.memory_space<vmem>>, %arg7: memref<2x1x32xf32, #tpu.memory_space<vmem>>, %arg8: memref<2x32x32xbf16, #tpu.memory_space<vmem>>, %arg9: memref<2x1x32xf32, #tpu.memory_space<vmem>>, %arg10: memref<2x1x32xf32, #tpu.memory_space<vmem>>, %arg11: memref<2x1x32xf32, #tpu.memory_space<vmem>>, %arg12: memref<2x32x64xbf16, #tpu.memory_space<vmem>>, %arg13: memref<2x1x64xf32, #tpu.memory_space<vmem>>, %arg14: memref<2x64x32xbf16, #tpu.memory_space<vmem>>, %arg15: memref<2x1x32xf32, #tpu.memory_space<vmem>>, %arg16: memref<2x1x32xf32, #tpu.memory_space<vmem>>, %arg17: memref<2x1x32xf32, #tpu.memory_space<vmem>>, %arg18: memref<2x32x32xbf16, #tpu.memory_space<vmem>>, %arg19: memref<2x1x32xf32, #tpu.memory_space<vmem>>, %arg20: memref<2x32x32xbf16, #tpu.memory_space<vmem>>, %arg21: memref<2x1x32xf32, #tpu.memory_space<vmem>>, %arg22: memref<2x32x32xbf16, #tpu.memory_space<vmem>>, %arg23: memref<2x1x32xf32, #tpu.memory_space<vmem>>, %arg24: memref<2x32x32xbf16, #tpu.memory_space<vmem>>, %arg25: memref<2x1x32xf32, #tpu.memory_space<vmem>>, %arg26: memref<2x1x32xf32, #tpu.memory_space<vmem>>, %arg27: memref<2x1x32xf32, #tpu.memory_space<vmem>>, %arg28: memref<2x32x32xbf16, #tpu.memory_space<vmem>>, %arg29: memref<2x1x32xf32, #tpu.memory_space<vmem>>, %arg30: memref<2x32x32xbf16, #tpu.memory_space<vmem>>, %arg31: memref<2x1x32xf32, #tpu.memory_space<vmem>>, %arg32: memref<2x32x32xbf16, #tpu.memory_space<vmem>>, %arg33: memref<2x1x32xf32, #tpu.memory_space<vmem>>, %arg34: memref<2x32x32xbf16, #tpu.memory_space<vmem>>, %arg35: memref<2x1x32xf32, #tpu.memory_space<vmem>>, %arg36: memref<2x1x32xf32, #tpu.memory_space<vmem>>, %arg37: memref<2x1x32xf32, #tpu.memory_space<vmem>>, %arg38: memref<2x32x64xbf16, #tpu.memory_space<vmem>>, %arg39: memref<2x1x64xf32, #tpu.memory_space<vmem>>, %arg40: memref<2x64x32xbf16, #tpu.memory_space<vmem>>, %arg41: memref<2x1x32xf32, #tpu.memory_space<vmem>>, %arg42: memref<2x1x32xf32, #tpu.memory_space<vmem>>, %arg43: memref<2x1x32xf32, #tpu.memory_space<vmem>>, %arg44: memref<128x32xbf16, #tpu.memory_space<vmem>>, %arg45: memref<1x32xf32, #tpu.memory_space<vmem>>, %arg46: memref<1x32xf32, #tpu.memory_space<vmem>>, %arg47: memref<1x32xf32, #tpu.memory_space<vmem>>, %arg48: memref<1x32xf32, #tpu.memory_space<vmem>>, %arg49: memref<32x128xbf16, #tpu.memory_space<vmem>>, %arg50: memref<1x128xf32, #tpu.memory_space<vmem>>, %arg51: memref<8x128xf32, #tpu.memory_space<vmem>>) attributes {dimension_semantics = [#tpu.dimension_semantics<parallel>], iteration_bounds = array<i64: 2>, scalar_prefetch = 0 : i64, scratch_operands = 0 : i64, tpu.core_type = #tpu.core_type<tc>, window_params = [{transform_indices = @transform_0, window_bounds = array<i64: 8, 1>}, {pipeline_mode = #tpu.pipeline_mode<synchronous>, transform_indices = @transform_1, window_bounds = array<i64: 2, 32, 32>}, {pipeline_mode = #tpu.pipeline_mode<synchronous>, transform_indices = @transform_2, window_bounds = array<i64: 2, 1, 32>}, {pipeline_mode = #tpu.pipeline_mode<synchronous>, transform_indices = @transform_3, window_bounds = array<i64: 2, 32, 32>}, {pipeline_mode = #tpu.pipeline_mode<synchronous>, transform_indices = @transform_4, window_bounds = array<i64: 2, 1, 32>}, {pipeline_mode = #tpu.pipeline_mode<synchronous>, transform_indices = @transform_5, window_bounds = array<i64: 2, 32, 32>}, {pipeline_mode = #tpu.pipeline_mode<synchronous>, transform_indices = @transform_6, window_bounds = array<i64: 2, 1, 32>}, {pipeline_mode = #tpu.pipeline_mode<synchronous>, transform_indices = @transform_7, window_bounds = array<i64: 2, 32, 32>}, {pipeline_mode = #tpu.pipeline_mode<synchronous>, transform_indices = @transform_8, window_bounds = array<i64: 2, 1, 32>}, {pipeline_mode = #tpu.pipeline_mode<synchronous>, transform_indices = @transform_9, window_bounds = array<i64: 2, 1, 32>}, {pipeline_mode = #tpu.pipeline_mode<synchronous>, transform_indices = @transform_10, window_bounds = array<i64: 2, 1, 32>}, {pipeline_mode = #tpu.pipeline_mode<synchronous>, transform_indices = @transform_11, window_bounds = array<i64: 2, 32, 64>}, {pipeline_mode = #tpu.pipeline_mode<synchronous>, transform_indices = @transform_12, window_bounds = array<i64: 2, 1, 64>}, {pipeline_mode = #tpu.pipeline_mode<synchronous>, transform_indices = @transform_13, window_bounds = array<i64: 2, 64, 32>}, {pipeline_mode = #tpu.pipeline_mode<synchronous>, transform_indices = @transform_14, window_bounds = array<i64: 2, 1, 32>}, {pipeline_mode = #tpu.pipeline_mode<synchronous>, transform_indices = @transform_15, window_bounds = array<i64: 2, 1, 32>}, {pipeline_mode = #tpu.pipeline_mode<synchronous>, transform_indices = @transform_16, window_bounds = array<i64: 2, 1, 32>}, {pipeline_mode = #tpu.pipeline_mode<synchronous>, transform_indices = @transform_17, window_bounds = array<i64: 2, 32, 32>}, {pipeline_mode = #tpu.pipeline_mode<synchronous>, transform_indices = @transform_18, window_bounds = array<i64: 2, 1, 32>}, {pipeline_mode = #tpu.pipeline_mode<synchronous>, transform_indices = @transform_19, window_bounds = array<i64: 2, 32, 32>}, {pipeline_mode = #tpu.pipeline_mode<synchronous>, transform_indices = @transform_20, window_bounds = array<i64: 2, 1, 32>}, {pipeline_mode = #tpu.pipeline_mode<synchronous>, transform_indices = @transform_21, window_bounds = array<i64: 2, 32, 32>}, {pipeline_mode = #tpu.pipeline_mode<synchronous>, transform_indices = @transform_22, window_bounds = array<i64: 2, 1, 32>}, {pipeline_mode = #tpu.pipeline_mode<synchronous>, transform_indices = @transform_23, window_bounds = array<i64: 2, 32, 32>}, {pipeline_mode = #tpu.pipeline_mode<synchronous>, transform_indices = @transform_24, window_bounds = array<i64: 2, 1, 32>}, {pipeline_mode = #tpu.pipeline_mode<synchronous>, transform_indices = @transform_25, window_bounds = array<i64: 2, 1, 32>}, {pipeline_mode = #tpu.pipeline_mode<synchronous>, transform_indices = @transform_26, window_bounds = array<i64: 2, 1, 32>}, {pipeline_mode = #tpu.pipeline_mode<synchronous>, transform_indices = @transform_27, window_bounds = array<i64: 2, 32, 32>}, {pipeline_mode = #tpu.pipeline_mode<synchronous>, transform_indices = @transform_28, window_bounds = array<i64: 2, 1, 32>}, {pipeline_mode = #tpu.pipeline_mode<synchronous>, transform_indices = @transform_29, window_bounds = array<i64: 2, 32, 32>}, {pipeline_mode = #tpu.pipeline_mode<synchronous>, transform_indices = @transform_30, window_bounds = array<i64: 2, 1, 32>}, {pipeline_mode = #tpu.pipeline_mode<synchronous>, transform_indices = @transform_31, window_bounds = array<i64: 2, 32, 32>}, {pipeline_mode = #tpu.pipeline_mode<synchronous>, transform_indices = @transform_32, window_bounds = array<i64: 2, 1, 32>}, {pipeline_mode = #tpu.pipeline_mode<synchronous>, transform_indices = @transform_33, window_bounds = array<i64: 2, 32, 32>}, {pipeline_mode = #tpu.pipeline_mode<synchronous>, transform_indices = @transform_34, window_bounds = array<i64: 2, 1, 32>}, {pipeline_mode = #tpu.pipeline_mode<synchronous>, transform_indices = @transform_35, window_bounds = array<i64: 2, 1, 32>}, {pipeline_mode = #tpu.pipeline_mode<synchronous>, transform_indices = @transform_36, window_bounds = array<i64: 2, 1, 32>}, {pipeline_mode = #tpu.pipeline_mode<synchronous>, transform_indices = @transform_37, window_bounds = array<i64: 2, 32, 64>}, {pipeline_mode = #tpu.pipeline_mode<synchronous>, transform_indices = @transform_38, window_bounds = array<i64: 2, 1, 64>}, {pipeline_mode = #tpu.pipeline_mode<synchronous>, transform_indices = @transform_39, window_bounds = array<i64: 2, 64, 32>}, {pipeline_mode = #tpu.pipeline_mode<synchronous>, transform_indices = @transform_40, window_bounds = array<i64: 2, 1, 32>}, {pipeline_mode = #tpu.pipeline_mode<synchronous>, transform_indices = @transform_41, window_bounds = array<i64: 2, 1, 32>}, {pipeline_mode = #tpu.pipeline_mode<synchronous>, transform_indices = @transform_42, window_bounds = array<i64: 2, 1, 32>}, {pipeline_mode = #tpu.pipeline_mode<synchronous>, transform_indices = @transform_43, window_bounds = array<i64: 128, 32>}, {pipeline_mode = #tpu.pipeline_mode<synchronous>, transform_indices = @transform_44, window_bounds = array<i64: 1, 32>}, {pipeline_mode = #tpu.pipeline_mode<synchronous>, transform_indices = @transform_45, window_bounds = array<i64: 1, 32>}, {pipeline_mode = #tpu.pipeline_mode<synchronous>, transform_indices = @transform_46, window_bounds = array<i64: 1, 32>}, {pipeline_mode = #tpu.pipeline_mode<synchronous>, transform_indices = @transform_47, window_bounds = array<i64: 1, 32>}, {pipeline_mode = #tpu.pipeline_mode<synchronous>, transform_indices = @transform_48, window_bounds = array<i64: 32, 128>}, {pipeline_mode = #tpu.pipeline_mode<synchronous>, transform_indices = @transform_49, window_bounds = array<i64: 1, 128>}, {transform_indices = @transform_50, window_bounds = array<i64: 8, 128>}]} {
    %c0 = arith.constant 0 : index
    %c0_0 = arith.constant 0 : index
    %0 = vector.load %arg1[%c0, %c0_0] : memref<8x1xi32, #tpu.memory_space<vmem>>, vector<8x1xi32>
    %1 = tpu.iota {dimensions = array<i32: 1>} : vector<8x128xi32>
    %2 = vector.broadcast %0 : vector<8x1xi32> to vector<8x128xi32>
    %3 = arith.cmpi eq, %2, %1 : vector<8x128xi32>
    %4 = arith.extui %3 : vector<8x128xi1> to vector<8x128xi32>
    %5 = arith.sitofp %4 : vector<8x128xi32> to vector<8x128xf32>
    %6 = arith.truncf %5 : vector<8x128xf32> to vector<8x128xbf16>
    %c0_1 = arith.constant 0 : index
    %c0_2 = arith.constant 0 : index
    %7 = vector.load %arg44[%c0_1, %c0_2] : memref<128x32xbf16, #tpu.memory_space<vmem>>, vector<128x32xbf16>
    %cst = arith.constant dense<0.000000e+00> : vector<8x32xf32>
    %8 = tpu.matmul %6, %7, %cst {dimension_numbers = #tpu.dot_dimension_numbers<[1], [0], [0], [1], [0, 0, 1, 1], [], []>} : vector<8x128xbf16>, vector<128x32xbf16>, vector<8x32xf32> -> vector<8x32xf32>
    %c0_3 = arith.constant 0 : index
    %c0_4 = arith.constant 0 : index
    %c0_5 = arith.constant 0 : index
    %9 = vector.load %arg2[%c0_3, %c0_4, %c0_5] : memref<2x32x32xbf16, #tpu.memory_space<vmem>>, vector<1x32x32xbf16>
    %10 = vector.shape_cast %9 : vector<1x32x32xbf16> to vector<32x32xbf16>
    %c0_6 = arith.constant 0 : index
    %c0_7 = arith.constant 0 : index
    %c0_8 = arith.constant 0 : index
    %11 = vector.load %arg3[%c0_6, %c0_7, %c0_8] : memref<2x1x32xf32, #tpu.memory_space<vmem>>, vector<1x1x32xf32>
    %12 = vector.shape_cast %11 : vector<1x1x32xf32> to vector<1x32xf32>
    %c0_9 = arith.constant 0 : index
    %c0_10 = arith.constant 0 : index
    %c0_11 = arith.constant 0 : index
    %13 = vector.load %arg4[%c0_9, %c0_10, %c0_11] : memref<2x32x32xbf16, #tpu.memory_space<vmem>>, vector<1x32x32xbf16>
    %14 = vector.shape_cast %13 : vector<1x32x32xbf16> to vector<32x32xbf16>
    %c0_12 = arith.constant 0 : index
    %c0_13 = arith.constant 0 : index
    %c0_14 = arith.constant 0 : index
    %15 = vector.load %arg5[%c0_12, %c0_13, %c0_14] : memref<2x1x32xf32, #tpu.memory_space<vmem>>, vector<1x1x32xf32>
    %16 = vector.shape_cast %15 : vector<1x1x32xf32> to vector<1x32xf32>
    %c0_15 = arith.constant 0 : index
    %c0_16 = arith.constant 0 : index
    %c0_17 = arith.constant 0 : index
    %17 = vector.load %arg6[%c0_15, %c0_16, %c0_17] : memref<2x32x32xbf16, #tpu.memory_space<vmem>>, vector<1x32x32xbf16>
    %18 = vector.shape_cast %17 : vector<1x32x32xbf16> to vector<32x32xbf16>
    %c0_18 = arith.constant 0 : index
    %c0_19 = arith.constant 0 : index
    %c0_20 = arith.constant 0 : index
    %19 = vector.load %arg7[%c0_18, %c0_19, %c0_20] : memref<2x1x32xf32, #tpu.memory_space<vmem>>, vector<1x1x32xf32>
    %20 = vector.shape_cast %19 : vector<1x1x32xf32> to vector<1x32xf32>
    %c0_21 = arith.constant 0 : index
    %c0_22 = arith.constant 0 : index
    %c0_23 = arith.constant 0 : index
    %21 = vector.load %arg8[%c0_21, %c0_22, %c0_23] : memref<2x32x32xbf16, #tpu.memory_space<vmem>>, vector<1x32x32xbf16>
    %22 = vector.shape_cast %21 : vector<1x32x32xbf16> to vector<32x32xbf16>
    %c0_24 = arith.constant 0 : index
    %c0_25 = arith.constant 0 : index
    %c0_26 = arith.constant 0 : index
    %23 = vector.load %arg9[%c0_24, %c0_25, %c0_26] : memref<2x1x32xf32, #tpu.memory_space<vmem>>, vector<1x1x32xf32>
    %24 = vector.shape_cast %23 : vector<1x1x32xf32> to vector<1x32xf32>
    %25 = arith.truncf %8 : vector<8x32xf32> to vector<8x32xbf16>
    %cst_27 = arith.constant dense<0.000000e+00> : vector<8x32xf32>
    %26 = tpu.matmul %25, %10, %cst_27 {dimension_numbers = #tpu.dot_dimension_numbers<[1], [0], [0], [1], [0, 0, 1, 1], [], []>} : vector<8x32xbf16>, vector<32x32xbf16>, vector<8x32xf32> -> vector<8x32xf32>
    %27 = vector.broadcast %12 : vector<1x32xf32> to vector<8x32xf32>
    %28 = arith.addf %26, %27 : vector<8x32xf32>
    %29 = vector.shape_cast %28 : vector<8x32xf32> to vector<8x4x8xf32>
    %30 = tpu.transpose %29, [1, 0, 2] : vector<8x4x8xf32> -> vector<4x8x8xf32>
    %31 = arith.truncf %8 : vector<8x32xf32> to vector<8x32xbf16>
    %cst_28 = arith.constant dense<0.000000e+00> : vector<8x32xf32>
    %32 = tpu.matmul %31, %14, %cst_28 {dimension_numbers = #tpu.dot_dimension_numbers<[1], [0], [0], [1], [0, 0, 1, 1], [], []>} : vector<8x32xbf16>, vector<32x32xbf16>, vector<8x32xf32> -> vector<8x32xf32>
    %33 = vector.broadcast %16 : vector<1x32xf32> to vector<8x32xf32>
    %34 = arith.addf %32, %33 : vector<8x32xf32>
    %35 = vector.shape_cast %34 : vector<8x32xf32> to vector<8x4x8xf32>
    %36 = tpu.transpose %35, [1, 0, 2] : vector<8x4x8xf32> -> vector<4x8x8xf32>
    %37 = arith.truncf %8 : vector<8x32xf32> to vector<8x32xbf16>
    %cst_29 = arith.constant dense<0.000000e+00> : vector<8x32xf32>
    %38 = tpu.matmul %37, %18, %cst_29 {dimension_numbers = #tpu.dot_dimension_numbers<[1], [0], [0], [1], [0, 0, 1, 1], [], []>} : vector<8x32xbf16>, vector<32x32xbf16>, vector<8x32xf32> -> vector<8x32xf32>
    %39 = vector.broadcast %20 : vector<1x32xf32> to vector<8x32xf32>
    %40 = arith.addf %38, %39 : vector<8x32xf32>
    %41 = vector.shape_cast %40 : vector<8x32xf32> to vector<8x4x8xf32>
    %42 = tpu.transpose %41, [1, 0, 2] : vector<8x4x8xf32> -> vector<4x8x8xf32>
    %43 = arith.truncf %30 : vector<4x8x8xf32> to vector<4x8x8xbf16>
    %44 = arith.truncf %36 : vector<4x8x8xf32> to vector<4x8x8xbf16>
    "tpu.trace_start"() <{level = 10 : i32, message = "hqd,hkd->hqk"}> : () -> ()
    %cst_30 = arith.constant dense<0.000000e+00> : vector<4x8x8xf32>
    %45 = tpu.matmul %43, %44, %cst_30 {dimension_numbers = #tpu.dot_dimension_numbers<[2], [2], [1], [1], [0, 0, 0, 1, 1, 1], [0], [0]>} : vector<4x8x8xbf16>, vector<4x8x8xbf16>, vector<4x8x8xf32> -> vector<4x8x8xf32>
    "tpu.trace_stop"() : () -> ()
    %cst_31 = arith.constant dense<0xFF800000> : vector<4x8xf32>
    %46 = vector.multi_reduction <maximumf>, %45, %cst_31 [2] : vector<4x8x8xf32> to vector<4x8xf32>
    %47 = vector.shape_cast %46 : vector<4x8xf32> to vector<4x8x1xf32>
    %48 = vector.broadcast %47 : vector<4x8x1xf32> to vector<4x8x8xf32>
    %49 = arith.subf %45, %48 : vector<4x8x8xf32>
    %50 = math.exp %49 : vector<4x8x8xf32>
    %cst_32 = arith.constant dense<0.000000e+00> : vector<4x8xf32>
    %51 = vector.multi_reduction <add>, %50, %cst_32 [2] : vector<4x8x8xf32> to vector<4x8xf32>
    %52 = vector.shape_cast %51 : vector<4x8xf32> to vector<4x8x1xf32>
    %53 = tpu.reciprocal %52 {approx = true} : vector<4x8x1xf32> -> vector<4x8x1xf32>
    %54 = vector.broadcast %53 : vector<4x8x1xf32> to vector<4x8x8xf32>
    %55 = arith.mulf %50, %54 : vector<4x8x8xf32>
    %56 = arith.truncf %55 : vector<4x8x8xf32> to vector<4x8x8xbf16>
    %57 = arith.truncf %42 : vector<4x8x8xf32> to vector<4x8x8xbf16>
    "tpu.trace_start"() <{level = 10 : i32, message = "hqk,hkd->hqd"}> : () -> ()
    %cst_33 = arith.constant dense<0.000000e+00> : vector<4x8x8xf32>
    %58 = tpu.matmul %56, %57, %cst_33 {dimension_numbers = #tpu.dot_dimension_numbers<[2], [1], [1], [2], [0, 0, 0, 1, 1, 2], [0], [0]>} : vector<4x8x8xbf16>, vector<4x8x8xbf16>, vector<4x8x8xf32> -> vector<4x8x8xf32>
    "tpu.trace_stop"() : () -> ()
    %59 = tpu.transpose %58, [1, 0, 2] : vector<4x8x8xf32> -> vector<8x4x8xf32>
    %60 = vector.shape_cast %59 : vector<8x4x8xf32> to vector<8x32xf32>
    %61 = arith.truncf %60 : vector<8x32xf32> to vector<8x32xbf16>
    %cst_34 = arith.constant dense<0.000000e+00> : vector<8x32xf32>
    %62 = tpu.matmul %61, %22, %cst_34 {dimension_numbers = #tpu.dot_dimension_numbers<[1], [0], [0], [1], [0, 0, 1, 1], [], []>} : vector<8x32xbf16>, vector<32x32xbf16>, vector<8x32xf32> -> vector<8x32xf32>
    %63 = vector.broadcast %24 : vector<1x32xf32> to vector<8x32xf32>
    %64 = arith.addf %62, %63 : vector<8x32xf32>
    %65 = arith.addf %8, %64 : vector<8x32xf32>
    %c0_35 = arith.constant 0 : index
    %c0_36 = arith.constant 0 : index
    %c0_37 = arith.constant 0 : index
    %66 = vector.load %arg10[%c0_35, %c0_36, %c0_37] : memref<2x1x32xf32, #tpu.memory_space<vmem>>, vector<1x1x32xf32>
    %67 = vector.shape_cast %66 : vector<1x1x32xf32> to vector<1x32xf32>
    %c0_38 = arith.constant 0 : index
    %c0_39 = arith.constant 0 : index
    %c0_40 = arith.constant 0 : index
    %68 = vector.load %arg11[%c0_38, %c0_39, %c0_40] : memref<2x1x32xf32, #tpu.memory_space<vmem>>, vector<1x1x32xf32>
    %69 = vector.shape_cast %68 : vector<1x1x32xf32> to vector<1x32xf32>
    %cst_41 = arith.constant dense<0.000000e+00> : vector<8xf32>
    %70 = vector.multi_reduction <add>, %65, %cst_41 [1] : vector<8x32xf32> to vector<8xf32>
    %71 = vector.shape_cast %70 : vector<8xf32> to vector<8x1xf32>
    %cst_42 = arith.constant 3.200000e+01 : f32
    %72 = vector.broadcast %cst_42 : f32 to vector<8x1xf32>
    %73 = arith.divf %71, %72 : vector<8x1xf32>
    %74 = vector.broadcast %73 : vector<8x1xf32> to vector<8x32xf32>
    %75 = arith.subf %65, %74 : vector<8x32xf32>
    %76 = arith.mulf %75, %75 : vector<8x32xf32>
    %cst_43 = arith.constant dense<0.000000e+00> : vector<8xf32>
    %77 = vector.multi_reduction <add>, %76, %cst_43 [1] : vector<8x32xf32> to vector<8xf32>
    %78 = vector.shape_cast %77 : vector<8xf32> to vector<8x1xf32>
    %cst_44 = arith.constant 3.200000e+01 : f32
    %79 = vector.broadcast %cst_44 : f32 to vector<8x1xf32>
    %80 = arith.divf %78, %79 : vector<8x1xf32>
    %cst_45 = arith.constant 9.99999974E-6 : f32
    %81 = vector.broadcast %cst_45 : f32 to vector<8x1xf32>
    %82 = arith.addf %80, %81 : vector<8x1xf32>
    %83 = math.rsqrt %82 : vector<8x1xf32>
    %84 = vector.broadcast %83 : vector<8x1xf32> to vector<8x32xf32>
    %85 = arith.mulf %75, %84 : vector<8x32xf32>
    %86 = vector.broadcast %67 : vector<1x32xf32> to vector<8x32xf32>
    %87 = arith.mulf %85, %86 : vector<8x32xf32>
    %88 = vector.broadcast %69 : vector<1x32xf32> to vector<8x32xf32>
    %89 = arith.addf %87, %88 : vector<8x32xf32>
    %c0_46 = arith.constant 0 : index
    %c0_47 = arith.constant 0 : index
    %c0_48 = arith.constant 0 : index
    %90 = vector.load %arg12[%c0_46, %c0_47, %c0_48] : memref<2x32x64xbf16, #tpu.memory_space<vmem>>, vector<1x32x64xbf16>
    %91 = vector.shape_cast %90 : vector<1x32x64xbf16> to vector<32x64xbf16>
    %c0_49 = arith.constant 0 : index
    %c0_50 = arith.constant 0 : index
    %c0_51 = arith.constant 0 : index
    %92 = vector.load %arg13[%c0_49, %c0_50, %c0_51] : memref<2x1x64xf32, #tpu.memory_space<vmem>>, vector<1x1x64xf32>
    %93 = vector.shape_cast %92 : vector<1x1x64xf32> to vector<1x64xf32>
    %94 = arith.truncf %89 : vector<8x32xf32> to vector<8x32xbf16>
    %cst_52 = arith.constant dense<0.000000e+00> : vector<8x64xf32>
    %95 = tpu.matmul %94, %91, %cst_52 {dimension_numbers = #tpu.dot_dimension_numbers<[1], [0], [0], [1], [0, 0, 1, 1], [], []>} : vector<8x32xbf16>, vector<32x64xbf16>, vector<8x64xf32> -> vector<8x64xf32>
    %96 = vector.broadcast %93 : vector<1x64xf32> to vector<8x64xf32>
    %97 = arith.addf %95, %96 : vector<8x64xf32>
    %cst_53 = arith.constant 0.000000e+00 : f32
    %98 = vector.broadcast %cst_53 : f32 to vector<8x64xf32>
    %99 = arith.maximumf %97, %98 : vector<8x64xf32>
    %c0_54 = arith.constant 0 : index
    %c0_55 = arith.constant 0 : index
    %c0_56 = arith.constant 0 : index
    %100 = vector.load %arg14[%c0_54, %c0_55, %c0_56] : memref<2x64x32xbf16, #tpu.memory_space<vmem>>, vector<1x64x32xbf16>
    %101 = vector.shape_cast %100 : vector<1x64x32xbf16> to vector<64x32xbf16>
    %c0_57 = arith.constant 0 : index
    %c0_58 = arith.constant 0 : index
    %c0_59 = arith.constant 0 : index
    %102 = vector.load %arg15[%c0_57, %c0_58, %c0_59] : memref<2x1x32xf32, #tpu.memory_space<vmem>>, vector<1x1x32xf32>
    %103 = vector.shape_cast %102 : vector<1x1x32xf32> to vector<1x32xf32>
    %104 = arith.truncf %99 : vector<8x64xf32> to vector<8x64xbf16>
    %cst_60 = arith.constant dense<0.000000e+00> : vector<8x32xf32>
    %105 = tpu.matmul %104, %101, %cst_60 {dimension_numbers = #tpu.dot_dimension_numbers<[1], [0], [0], [1], [0, 0, 1, 1], [], []>} : vector<8x64xbf16>, vector<64x32xbf16>, vector<8x32xf32> -> vector<8x32xf32>
    %106 = vector.broadcast %103 : vector<1x32xf32> to vector<8x32xf32>
    %107 = arith.addf %105, %106 : vector<8x32xf32>
    %108 = arith.addf %89, %107 : vector<8x32xf32>
    %c0_61 = arith.constant 0 : index
    %c0_62 = arith.constant 0 : index
    %c0_63 = arith.constant 0 : index
    %109 = vector.load %arg16[%c0_61, %c0_62, %c0_63] : memref<2x1x32xf32, #tpu.memory_space<vmem>>, vector<1x1x32xf32>
    %110 = vector.shape_cast %109 : vector<1x1x32xf32> to vector<1x32xf32>
    %c0_64 = arith.constant 0 : index
    %c0_65 = arith.constant 0 : index
    %c0_66 = arith.constant 0 : index
    %111 = vector.load %arg17[%c0_64, %c0_65, %c0_66] : memref<2x1x32xf32, #tpu.memory_space<vmem>>, vector<1x1x32xf32>
    %112 = vector.shape_cast %111 : vector<1x1x32xf32> to vector<1x32xf32>
    %cst_67 = arith.constant dense<0.000000e+00> : vector<8xf32>
    %113 = vector.multi_reduction <add>, %108, %cst_67 [1] : vector<8x32xf32> to vector<8xf32>
    %114 = vector.shape_cast %113 : vector<8xf32> to vector<8x1xf32>
    %cst_68 = arith.constant 3.200000e+01 : f32
    %115 = vector.broadcast %cst_68 : f32 to vector<8x1xf32>
    %116 = arith.divf %114, %115 : vector<8x1xf32>
    %117 = vector.broadcast %116 : vector<8x1xf32> to vector<8x32xf32>
    %118 = arith.subf %108, %117 : vector<8x32xf32>
    %119 = arith.mulf %118, %118 : vector<8x32xf32>
    %cst_69 = arith.constant dense<0.000000e+00> : vector<8xf32>
    %120 = vector.multi_reduction <add>, %119, %cst_69 [1] : vector<8x32xf32> to vector<8xf32>
    %121 = vector.shape_cast %120 : vector<8xf32> to vector<8x1xf32>
    %cst_70 = arith.constant 3.200000e+01 : f32
    %122 = vector.broadcast %cst_70 : f32 to vector<8x1xf32>
    %123 = arith.divf %121, %122 : vector<8x1xf32>
    %cst_71 = arith.constant 9.99999974E-6 : f32
    %124 = vector.broadcast %cst_71 : f32 to vector<8x1xf32>
    %125 = arith.addf %123, %124 : vector<8x1xf32>
    %126 = math.rsqrt %125 : vector<8x1xf32>
    %127 = vector.broadcast %126 : vector<8x1xf32> to vector<8x32xf32>
    %128 = arith.mulf %118, %127 : vector<8x32xf32>
    %129 = vector.broadcast %110 : vector<1x32xf32> to vector<8x32xf32>
    %130 = arith.mulf %128, %129 : vector<8x32xf32>
    %131 = vector.broadcast %112 : vector<1x32xf32> to vector<8x32xf32>
    %132 = arith.addf %130, %131 : vector<8x32xf32>
    %c1 = arith.constant 1 : index
    %c0_72 = arith.constant 0 : index
    %c0_73 = arith.constant 0 : index
    %133 = vector.load %arg2[%c1, %c0_72, %c0_73] : memref<2x32x32xbf16, #tpu.memory_space<vmem>>, vector<1x32x32xbf16>
    %134 = vector.shape_cast %133 : vector<1x32x32xbf16> to vector<32x32xbf16>
    %c1_74 = arith.constant 1 : index
    %c0_75 = arith.constant 0 : index
    %c0_76 = arith.constant 0 : index
    %135 = vector.load %arg3[%c1_74, %c0_75, %c0_76] : memref<2x1x32xf32, #tpu.memory_space<vmem>>, vector<1x1x32xf32>
    %136 = vector.shape_cast %135 : vector<1x1x32xf32> to vector<1x32xf32>
    %c1_77 = arith.constant 1 : index
    %c0_78 = arith.constant 0 : index
    %c0_79 = arith.constant 0 : index
    %137 = vector.load %arg4[%c1_77, %c0_78, %c0_79] : memref<2x32x32xbf16, #tpu.memory_space<vmem>>, vector<1x32x32xbf16>
    %138 = vector.shape_cast %137 : vector<1x32x32xbf16> to vector<32x32xbf16>
    %c1_80 = arith.constant 1 : index
    %c0_81 = arith.constant 0 : index
    %c0_82 = arith.constant 0 : index
    %139 = vector.load %arg5[%c1_80, %c0_81, %c0_82] : memref<2x1x32xf32, #tpu.memory_space<vmem>>, vector<1x1x32xf32>
    %140 = vector.shape_cast %139 : vector<1x1x32xf32> to vector<1x32xf32>
    %c1_83 = arith.constant 1 : index
    %c0_84 = arith.constant 0 : index
    %c0_85 = arith.constant 0 : index
    %141 = vector.load %arg6[%c1_83, %c0_84, %c0_85] : memref<2x32x32xbf16, #tpu.memory_space<vmem>>, vector<1x32x32xbf16>
    %142 = vector.shape_cast %141 : vector<1x32x32xbf16> to vector<32x32xbf16>
    %c1_86 = arith.constant 1 : index
    %c0_87 = arith.constant 0 : index
    %c0_88 = arith.constant 0 : index
    %143 = vector.load %arg7[%c1_86, %c0_87, %c0_88] : memref<2x1x32xf32, #tpu.memory_space<vmem>>, vector<1x1x32xf32>
    %144 = vector.shape_cast %143 : vector<1x1x32xf32> to vector<1x32xf32>
    %c1_89 = arith.constant 1 : index
    %c0_90 = arith.constant 0 : index
    %c0_91 = arith.constant 0 : index
    %145 = vector.load %arg8[%c1_89, %c0_90, %c0_91] : memref<2x32x32xbf16, #tpu.memory_space<vmem>>, vector<1x32x32xbf16>
    %146 = vector.shape_cast %145 : vector<1x32x32xbf16> to vector<32x32xbf16>
    %c1_92 = arith.constant 1 : index
    %c0_93 = arith.constant 0 : index
    %c0_94 = arith.constant 0 : index
    %147 = vector.load %arg9[%c1_92, %c0_93, %c0_94] : memref<2x1x32xf32, #tpu.memory_space<vmem>>, vector<1x1x32xf32>
    %148 = vector.shape_cast %147 : vector<1x1x32xf32> to vector<1x32xf32>
    %149 = arith.truncf %132 : vector<8x32xf32> to vector<8x32xbf16>
    %cst_95 = arith.constant dense<0.000000e+00> : vector<8x32xf32>
    %150 = tpu.matmul %149, %134, %cst_95 {dimension_numbers = #tpu.dot_dimension_numbers<[1], [0], [0], [1], [0, 0, 1, 1], [], []>} : vector<8x32xbf16>, vector<32x32xbf16>, vector<8x32xf32> -> vector<8x32xf32>
    %151 = vector.broadcast %136 : vector<1x32xf32> to vector<8x32xf32>
    %152 = arith.addf %150, %151 : vector<8x32xf32>
    %153 = vector.shape_cast %152 : vector<8x32xf32> to vector<8x4x8xf32>
    %154 = tpu.transpose %153, [1, 0, 2] : vector<8x4x8xf32> -> vector<4x8x8xf32>
    %155 = arith.truncf %132 : vector<8x32xf32> to vector<8x32xbf16>
    %cst_96 = arith.constant dense<0.000000e+00> : vector<8x32xf32>
    %156 = tpu.matmul %155, %138, %cst_96 {dimension_numbers = #tpu.dot_dimension_numbers<[1], [0], [0], [1], [0, 0, 1, 1], [], []>} : vector<8x32xbf16>, vector<32x32xbf16>, vector<8x32xf32> -> vector<8x32xf32>
    %157 = vector.broadcast %140 : vector<1x32xf32> to vector<8x32xf32>
    %158 = arith.addf %156, %157 : vector<8x32xf32>
    %159 = vector.shape_cast %158 : vector<8x32xf32> to vector<8x4x8xf32>
    %160 = tpu.transpose %159, [1, 0, 2] : vector<8x4x8xf32> -> vector<4x8x8xf32>
    %161 = arith.truncf %132 : vector<8x32xf32> to vector<8x32xbf16>
    %cst_97 = arith.constant dense<0.000000e+00> : vector<8x32xf32>
    %162 = tpu.matmul %161, %142, %cst_97 {dimension_numbers = #tpu.dot_dimension_numbers<[1], [0], [0], [1], [0, 0, 1, 1], [], []>} : vector<8x32xbf16>, vector<32x32xbf16>, vector<8x32xf32> -> vector<8x32xf32>
    %163 = vector.broadcast %144 : vector<1x32xf32> to vector<8x32xf32>
    %164 = arith.addf %162, %163 : vector<8x32xf32>
    %165 = vector.shape_cast %164 : vector<8x32xf32> to vector<8x4x8xf32>
    %166 = tpu.transpose %165, [1, 0, 2] : vector<8x4x8xf32> -> vector<4x8x8xf32>
    %167 = arith.truncf %154 : vector<4x8x8xf32> to vector<4x8x8xbf16>
    %168 = arith.truncf %160 : vector<4x8x8xf32> to vector<4x8x8xbf16>
    "tpu.trace_start"() <{level = 10 : i32, message = "hqd,hkd->hqk"}> : () -> ()
    %cst_98 = arith.constant dense<0.000000e+00> : vector<4x8x8xf32>
    %169 = tpu.matmul %167, %168, %cst_98 {dimension_numbers = #tpu.dot_dimension_numbers<[2], [2], [1], [1], [0, 0, 0, 1, 1, 1], [0], [0]>} : vector<4x8x8xbf16>, vector<4x8x8xbf16>, vector<4x8x8xf32> -> vector<4x8x8xf32>
    "tpu.trace_stop"() : () -> ()
    %cst_99 = arith.constant dense<0xFF800000> : vector<4x8xf32>
    %170 = vector.multi_reduction <maximumf>, %169, %cst_99 [2] : vector<4x8x8xf32> to vector<4x8xf32>
    %171 = vector.shape_cast %170 : vector<4x8xf32> to vector<4x8x1xf32>
    %172 = vector.broadcast %171 : vector<4x8x1xf32> to vector<4x8x8xf32>
    %173 = arith.subf %169, %172 : vector<4x8x8xf32>
    %174 = math.exp %173 : vector<4x8x8xf32>
    %cst_100 = arith.constant dense<0.000000e+00> : vector<4x8xf32>
    %175 = vector.multi_reduction <add>, %174, %cst_100 [2] : vector<4x8x8xf32> to vector<4x8xf32>
    %176 = vector.shape_cast %175 : vector<4x8xf32> to vector<4x8x1xf32>
    %177 = tpu.reciprocal %176 {approx = true} : vector<4x8x1xf32> -> vector<4x8x1xf32>
    %178 = vector.broadcast %177 : vector<4x8x1xf32> to vector<4x8x8xf32>
    %179 = arith.mulf %174, %178 : vector<4x8x8xf32>
    %180 = arith.truncf %179 : vector<4x8x8xf32> to vector<4x8x8xbf16>
    %181 = arith.truncf %166 : vector<4x8x8xf32> to vector<4x8x8xbf16>
    "tpu.trace_start"() <{level = 10 : i32, message = "hqk,hkd->hqd"}> : () -> ()
    %cst_101 = arith.constant dense<0.000000e+00> : vector<4x8x8xf32>
    %182 = tpu.matmul %180, %181, %cst_101 {dimension_numbers = #tpu.dot_dimension_numbers<[2], [1], [1], [2], [0, 0, 0, 1, 1, 2], [0], [0]>} : vector<4x8x8xbf16>, vector<4x8x8xbf16>, vector<4x8x8xf32> -> vector<4x8x8xf32>
    "tpu.trace_stop"() : () -> ()
    %183 = tpu.transpose %182, [1, 0, 2] : vector<4x8x8xf32> -> vector<8x4x8xf32>
    %184 = vector.shape_cast %183 : vector<8x4x8xf32> to vector<8x32xf32>
    %185 = arith.truncf %184 : vector<8x32xf32> to vector<8x32xbf16>
    %cst_102 = arith.constant dense<0.000000e+00> : vector<8x32xf32>
    %186 = tpu.matmul %185, %146, %cst_102 {dimension_numbers = #tpu.dot_dimension_numbers<[1], [0], [0], [1], [0, 0, 1, 1], [], []>} : vector<8x32xbf16>, vector<32x32xbf16>, vector<8x32xf32> -> vector<8x32xf32>
    %187 = vector.broadcast %148 : vector<1x32xf32> to vector<8x32xf32>
    %188 = arith.addf %186, %187 : vector<8x32xf32>
    %189 = arith.addf %132, %188 : vector<8x32xf32>
    %c1_103 = arith.constant 1 : index
    %c0_104 = arith.constant 0 : index
    %c0_105 = arith.constant 0 : index
    %190 = vector.load %arg10[%c1_103, %c0_104, %c0_105] : memref<2x1x32xf32, #tpu.memory_space<vmem>>, vector<1x1x32xf32>
    %191 = vector.shape_cast %190 : vector<1x1x32xf32> to vector<1x32xf32>
    %c1_106 = arith.constant 1 : index
    %c0_107 = arith.constant 0 : index
    %c0_108 = arith.constant 0 : index
    %192 = vector.load %arg11[%c1_106, %c0_107, %c0_108] : memref<2x1x32xf32, #tpu.memory_space<vmem>>, vector<1x1x32xf32>
    %193 = vector.shape_cast %192 : vector<1x1x32xf32> to vector<1x32xf32>
    %cst_109 = arith.constant dense<0.000000e+00> : vector<8xf32>
    %194 = vector.multi_reduction <add>, %189, %cst_109 [1] : vector<8x32xf32> to vector<8xf32>
    %195 = vector.shape_cast %194 : vector<8xf32> to vector<8x1xf32>
    %cst_110 = arith.constant 3.200000e+01 : f32
    %196 = vector.broadcast %cst_110 : f32 to vector<8x1xf32>
    %197 = arith.divf %195, %196 : vector<8x1xf32>
    %198 = vector.broadcast %197 : vector<8x1xf32> to vector<8x32xf32>
    %199 = arith.subf %189, %198 : vector<8x32xf32>
    %200 = arith.mulf %199, %199 : vector<8x32xf32>
    %cst_111 = arith.constant dense<0.000000e+00> : vector<8xf32>
    %201 = vector.multi_reduction <add>, %200, %cst_111 [1] : vector<8x32xf32> to vector<8xf32>
    %202 = vector.shape_cast %201 : vector<8xf32> to vector<8x1xf32>
    %cst_112 = arith.constant 3.200000e+01 : f32
    %203 = vector.broadcast %cst_112 : f32 to vector<8x1xf32>
    %204 = arith.divf %202, %203 : vector<8x1xf32>
    %cst_113 = arith.constant 9.99999974E-6 : f32
    %205 = vector.broadcast %cst_113 : f32 to vector<8x1xf32>
    %206 = arith.addf %204, %205 : vector<8x1xf32>
    %207 = math.rsqrt %206 : vector<8x1xf32>
    %208 = vector.broadcast %207 : vector<8x1xf32> to vector<8x32xf32>
    %209 = arith.mulf %199, %208 : vector<8x32xf32>
    %210 = vector.broadcast %191 : vector<1x32xf32> to vector<8x32xf32>
    %211 = arith.mulf %209, %210 : vector<8x32xf32>
    %212 = vector.broadcast %193 : vector<1x32xf32> to vector<8x32xf32>
    %213 = arith.addf %211, %212 : vector<8x32xf32>
    %c1_114 = arith.constant 1 : index
    %c0_115 = arith.constant 0 : index
    %c0_116 = arith.constant 0 : index
    %214 = vector.load %arg12[%c1_114, %c0_115, %c0_116] : memref<2x32x64xbf16, #tpu.memory_space<vmem>>, vector<1x32x64xbf16>
    %215 = vector.shape_cast %214 : vector<1x32x64xbf16> to vector<32x64xbf16>
    %c1_117 = arith.constant 1 : index
    %c0_118 = arith.constant 0 : index
    %c0_119 = arith.constant 0 : index
    %216 = vector.load %arg13[%c1_117, %c0_118, %c0_119] : memref<2x1x64xf32, #tpu.memory_space<vmem>>, vector<1x1x64xf32>
    %217 = vector.shape_cast %216 : vector<1x1x64xf32> to vector<1x64xf32>
    %218 = arith.truncf %213 : vector<8x32xf32> to vector<8x32xbf16>
    %cst_120 = arith.constant dense<0.000000e+00> : vector<8x64xf32>
    %219 = tpu.matmul %218, %215, %cst_120 {dimension_numbers = #tpu.dot_dimension_numbers<[1], [0], [0], [1], [0, 0, 1, 1], [], []>} : vector<8x32xbf16>, vector<32x64xbf16>, vector<8x64xf32> -> vector<8x64xf32>
    %220 = vector.broadcast %217 : vector<1x64xf32> to vector<8x64xf32>
    %221 = arith.addf %219, %220 : vector<8x64xf32>
    %cst_121 = arith.constant 0.000000e+00 : f32
    %222 = vector.broadcast %cst_121 : f32 to vector<8x64xf32>
    %223 = arith.maximumf %221, %222 : vector<8x64xf32>
    %c1_122 = arith.constant 1 : index
    %c0_123 = arith.constant 0 : index
    %c0_124 = arith.constant 0 : index
    %224 = vector.load %arg14[%c1_122, %c0_123, %c0_124] : memref<2x64x32xbf16, #tpu.memory_space<vmem>>, vector<1x64x32xbf16>
    %225 = vector.shape_cast %224 : vector<1x64x32xbf16> to vector<64x32xbf16>
    %c1_125 = arith.constant 1 : index
    %c0_126 = arith.constant 0 : index
    %c0_127 = arith.constant 0 : index
    %226 = vector.load %arg15[%c1_125, %c0_126, %c0_127] : memref<2x1x32xf32, #tpu.memory_space<vmem>>, vector<1x1x32xf32>
    %227 = vector.shape_cast %226 : vector<1x1x32xf32> to vector<1x32xf32>
    %228 = arith.truncf %223 : vector<8x64xf32> to vector<8x64xbf16>
    %cst_128 = arith.constant dense<0.000000e+00> : vector<8x32xf32>
    %229 = tpu.matmul %228, %225, %cst_128 {dimension_numbers = #tpu.dot_dimension_numbers<[1], [0], [0], [1], [0, 0, 1, 1], [], []>} : vector<8x64xbf16>, vector<64x32xbf16>, vector<8x32xf32> -> vector<8x32xf32>
    %230 = vector.broadcast %227 : vector<1x32xf32> to vector<8x32xf32>
    %231 = arith.addf %229, %230 : vector<8x32xf32>
    %232 = arith.addf %213, %231 : vector<8x32xf32>
    %c1_129 = arith.constant 1 : index
    %c0_130 = arith.constant 0 : index
    %c0_131 = arith.constant 0 : index
    %233 = vector.load %arg16[%c1_129, %c0_130, %c0_131] : memref<2x1x32xf32, #tpu.memory_space<vmem>>, vector<1x1x32xf32>
    %234 = vector.shape_cast %233 : vector<1x1x32xf32> to vector<1x32xf32>
    %c1_132 = arith.constant 1 : index
    %c0_133 = arith.constant 0 : index
    %c0_134 = arith.constant 0 : index
    %235 = vector.load %arg17[%c1_132, %c0_133, %c0_134] : memref<2x1x32xf32, #tpu.memory_space<vmem>>, vector<1x1x32xf32>
    %236 = vector.shape_cast %235 : vector<1x1x32xf32> to vector<1x32xf32>
    %cst_135 = arith.constant dense<0.000000e+00> : vector<8xf32>
    %237 = vector.multi_reduction <add>, %232, %cst_135 [1] : vector<8x32xf32> to vector<8xf32>
    %238 = vector.shape_cast %237 : vector<8xf32> to vector<8x1xf32>
    %cst_136 = arith.constant 3.200000e+01 : f32
    %239 = vector.broadcast %cst_136 : f32 to vector<8x1xf32>
    %240 = arith.divf %238, %239 : vector<8x1xf32>
    %241 = vector.broadcast %240 : vector<8x1xf32> to vector<8x32xf32>
    %242 = arith.subf %232, %241 : vector<8x32xf32>
    %243 = arith.mulf %242, %242 : vector<8x32xf32>
    %cst_137 = arith.constant dense<0.000000e+00> : vector<8xf32>
    %244 = vector.multi_reduction <add>, %243, %cst_137 [1] : vector<8x32xf32> to vector<8xf32>
    %245 = vector.shape_cast %244 : vector<8xf32> to vector<8x1xf32>
    %cst_138 = arith.constant 3.200000e+01 : f32
    %246 = vector.broadcast %cst_138 : f32 to vector<8x1xf32>
    %247 = arith.divf %245, %246 : vector<8x1xf32>
    %cst_139 = arith.constant 9.99999974E-6 : f32
    %248 = vector.broadcast %cst_139 : f32 to vector<8x1xf32>
    %249 = arith.addf %247, %248 : vector<8x1xf32>
    %250 = math.rsqrt %249 : vector<8x1xf32>
    %251 = vector.broadcast %250 : vector<8x1xf32> to vector<8x32xf32>
    %252 = arith.mulf %242, %251 : vector<8x32xf32>
    %253 = vector.broadcast %234 : vector<1x32xf32> to vector<8x32xf32>
    %254 = arith.mulf %252, %253 : vector<8x32xf32>
    %255 = vector.broadcast %236 : vector<1x32xf32> to vector<8x32xf32>
    %256 = arith.addf %254, %255 : vector<8x32xf32>
    %c0_140 = arith.constant 0 : index
    %c0_141 = arith.constant 0 : index
    %257 = vector.load %arg45[%c0_140, %c0_141] : memref<1x32xf32, #tpu.memory_space<vmem>>, vector<1x32xf32>
    %c0_142 = arith.constant 0 : index
    %c0_143 = arith.constant 0 : index
    %258 = vector.load %arg46[%c0_142, %c0_143] : memref<1x32xf32, #tpu.memory_space<vmem>>, vector<1x32xf32>
    %cst_144 = arith.constant dense<0.000000e+00> : vector<8xf32>
    %259 = vector.multi_reduction <add>, %256, %cst_144 [1] : vector<8x32xf32> to vector<8xf32>
    %260 = vector.shape_cast %259 : vector<8xf32> to vector<8x1xf32>
    %cst_145 = arith.constant 3.200000e+01 : f32
    %261 = vector.broadcast %cst_145 : f32 to vector<8x1xf32>
    %262 = arith.divf %260, %261 : vector<8x1xf32>
    %263 = vector.broadcast %262 : vector<8x1xf32> to vector<8x32xf32>
    %264 = arith.subf %256, %263 : vector<8x32xf32>
    %265 = arith.mulf %264, %264 : vector<8x32xf32>
    %cst_146 = arith.constant dense<0.000000e+00> : vector<8xf32>
    %266 = vector.multi_reduction <add>, %265, %cst_146 [1] : vector<8x32xf32> to vector<8xf32>
    %267 = vector.shape_cast %266 : vector<8xf32> to vector<8x1xf32>
    %cst_147 = arith.constant 3.200000e+01 : f32
    %268 = vector.broadcast %cst_147 : f32 to vector<8x1xf32>
    %269 = arith.divf %267, %268 : vector<8x1xf32>
    %cst_148 = arith.constant 9.99999974E-6 : f32
    %270 = vector.broadcast %cst_148 : f32 to vector<8x1xf32>
    %271 = arith.addf %269, %270 : vector<8x1xf32>
    %272 = math.rsqrt %271 : vector<8x1xf32>
    %273 = vector.broadcast %272 : vector<8x1xf32> to vector<8x32xf32>
    %274 = arith.mulf %264, %273 : vector<8x32xf32>
    %275 = vector.broadcast %257 : vector<1x32xf32> to vector<8x32xf32>
    %276 = arith.mulf %274, %275 : vector<8x32xf32>
    %277 = vector.broadcast %258 : vector<1x32xf32> to vector<8x32xf32>
    %278 = arith.addf %276, %277 : vector<8x32xf32>
    %c0_149 = arith.constant 0 : index
    %c0_150 = arith.constant 0 : index
    %c0_151 = arith.constant 0 : index
    %279 = vector.load %arg18[%c0_149, %c0_150, %c0_151] : memref<2x32x32xbf16, #tpu.memory_space<vmem>>, vector<1x32x32xbf16>
    %280 = vector.shape_cast %279 : vector<1x32x32xbf16> to vector<32x32xbf16>
    %c0_152 = arith.constant 0 : index
    %c0_153 = arith.constant 0 : index
    %c0_154 = arith.constant 0 : index
    %281 = vector.load %arg19[%c0_152, %c0_153, %c0_154] : memref<2x1x32xf32, #tpu.memory_space<vmem>>, vector<1x1x32xf32>
    %282 = vector.shape_cast %281 : vector<1x1x32xf32> to vector<1x32xf32>
    %c0_155 = arith.constant 0 : index
    %c0_156 = arith.constant 0 : index
    %c0_157 = arith.constant 0 : index
    %283 = vector.load %arg20[%c0_155, %c0_156, %c0_157] : memref<2x32x32xbf16, #tpu.memory_space<vmem>>, vector<1x32x32xbf16>
    %284 = vector.shape_cast %283 : vector<1x32x32xbf16> to vector<32x32xbf16>
    %c0_158 = arith.constant 0 : index
    %c0_159 = arith.constant 0 : index
    %c0_160 = arith.constant 0 : index
    %285 = vector.load %arg21[%c0_158, %c0_159, %c0_160] : memref<2x1x32xf32, #tpu.memory_space<vmem>>, vector<1x1x32xf32>
    %286 = vector.shape_cast %285 : vector<1x1x32xf32> to vector<1x32xf32>
    %c0_161 = arith.constant 0 : index
    %c0_162 = arith.constant 0 : index
    %c0_163 = arith.constant 0 : index
    %287 = vector.load %arg22[%c0_161, %c0_162, %c0_163] : memref<2x32x32xbf16, #tpu.memory_space<vmem>>, vector<1x32x32xbf16>
    %288 = vector.shape_cast %287 : vector<1x32x32xbf16> to vector<32x32xbf16>
    %c0_164 = arith.constant 0 : index
    %c0_165 = arith.constant 0 : index
    %c0_166 = arith.constant 0 : index
    %289 = vector.load %arg23[%c0_164, %c0_165, %c0_166] : memref<2x1x32xf32, #tpu.memory_space<vmem>>, vector<1x1x32xf32>
    %290 = vector.shape_cast %289 : vector<1x1x32xf32> to vector<1x32xf32>
    %c0_167 = arith.constant 0 : index
    %c0_168 = arith.constant 0 : index
    %c0_169 = arith.constant 0 : index
    %291 = vector.load %arg24[%c0_167, %c0_168, %c0_169] : memref<2x32x32xbf16, #tpu.memory_space<vmem>>, vector<1x32x32xbf16>
    %292 = vector.shape_cast %291 : vector<1x32x32xbf16> to vector<32x32xbf16>
    %c0_170 = arith.constant 0 : index
    %c0_171 = arith.constant 0 : index
    %c0_172 = arith.constant 0 : index
    %293 = vector.load %arg25[%c0_170, %c0_171, %c0_172] : memref<2x1x32xf32, #tpu.memory_space<vmem>>, vector<1x1x32xf32>
    %294 = vector.shape_cast %293 : vector<1x1x32xf32> to vector<1x32xf32>
    %295 = arith.truncf %8 : vector<8x32xf32> to vector<8x32xbf16>
    %cst_173 = arith.constant dense<0.000000e+00> : vector<8x32xf32>
    %296 = tpu.matmul %295, %280, %cst_173 {dimension_numbers = #tpu.dot_dimension_numbers<[1], [0], [0], [1], [0, 0, 1, 1], [], []>} : vector<8x32xbf16>, vector<32x32xbf16>, vector<8x32xf32> -> vector<8x32xf32>
    %297 = vector.broadcast %282 : vector<1x32xf32> to vector<8x32xf32>
    %298 = arith.addf %296, %297 : vector<8x32xf32>
    %299 = vector.shape_cast %298 : vector<8x32xf32> to vector<8x4x8xf32>
    %300 = tpu.transpose %299, [1, 0, 2] : vector<8x4x8xf32> -> vector<4x8x8xf32>
    %301 = arith.truncf %8 : vector<8x32xf32> to vector<8x32xbf16>
    %cst_174 = arith.constant dense<0.000000e+00> : vector<8x32xf32>
    %302 = tpu.matmul %301, %284, %cst_174 {dimension_numbers = #tpu.dot_dimension_numbers<[1], [0], [0], [1], [0, 0, 1, 1], [], []>} : vector<8x32xbf16>, vector<32x32xbf16>, vector<8x32xf32> -> vector<8x32xf32>
    %303 = vector.broadcast %286 : vector<1x32xf32> to vector<8x32xf32>
    %304 = arith.addf %302, %303 : vector<8x32xf32>
    %305 = vector.shape_cast %304 : vector<8x32xf32> to vector<8x4x8xf32>
    %306 = tpu.transpose %305, [1, 0, 2] : vector<8x4x8xf32> -> vector<4x8x8xf32>
    %307 = arith.truncf %8 : vector<8x32xf32> to vector<8x32xbf16>
    %cst_175 = arith.constant dense<0.000000e+00> : vector<8x32xf32>
    %308 = tpu.matmul %307, %288, %cst_175 {dimension_numbers = #tpu.dot_dimension_numbers<[1], [0], [0], [1], [0, 0, 1, 1], [], []>} : vector<8x32xbf16>, vector<32x32xbf16>, vector<8x32xf32> -> vector<8x32xf32>
    %309 = vector.broadcast %290 : vector<1x32xf32> to vector<8x32xf32>
    %310 = arith.addf %308, %309 : vector<8x32xf32>
    %311 = vector.shape_cast %310 : vector<8x32xf32> to vector<8x4x8xf32>
    %312 = tpu.transpose %311, [1, 0, 2] : vector<8x4x8xf32> -> vector<4x8x8xf32>
    %313 = arith.truncf %300 : vector<4x8x8xf32> to vector<4x8x8xbf16>
    %314 = arith.truncf %306 : vector<4x8x8xf32> to vector<4x8x8xbf16>
    "tpu.trace_start"() <{level = 10 : i32, message = "hqd,hkd->hqk"}> : () -> ()
    %cst_176 = arith.constant dense<0.000000e+00> : vector<4x8x8xf32>
    %315 = tpu.matmul %313, %314, %cst_176 {dimension_numbers = #tpu.dot_dimension_numbers<[2], [2], [1], [1], [0, 0, 0, 1, 1, 1], [0], [0]>} : vector<4x8x8xbf16>, vector<4x8x8xbf16>, vector<4x8x8xf32> -> vector<4x8x8xf32>
    "tpu.trace_stop"() : () -> ()
    %cst_177 = arith.constant dense<0xFF800000> : vector<4x8xf32>
    %316 = vector.multi_reduction <maximumf>, %315, %cst_177 [2] : vector<4x8x8xf32> to vector<4x8xf32>
    %317 = vector.shape_cast %316 : vector<4x8xf32> to vector<4x8x1xf32>
    %318 = vector.broadcast %317 : vector<4x8x1xf32> to vector<4x8x8xf32>
    %319 = arith.subf %315, %318 : vector<4x8x8xf32>
    %320 = math.exp %319 : vector<4x8x8xf32>
    %cst_178 = arith.constant dense<0.000000e+00> : vector<4x8xf32>
    %321 = vector.multi_reduction <add>, %320, %cst_178 [2] : vector<4x8x8xf32> to vector<4x8xf32>
    %322 = vector.shape_cast %321 : vector<4x8xf32> to vector<4x8x1xf32>
    %323 = tpu.reciprocal %322 {approx = true} : vector<4x8x1xf32> -> vector<4x8x1xf32>
    %324 = vector.broadcast %323 : vector<4x8x1xf32> to vector<4x8x8xf32>
    %325 = arith.mulf %320, %324 : vector<4x8x8xf32>
    %326 = arith.truncf %325 : vector<4x8x8xf32> to vector<4x8x8xbf16>
    %327 = arith.truncf %312 : vector<4x8x8xf32> to vector<4x8x8xbf16>
    "tpu.trace_start"() <{level = 10 : i32, message = "hqk,hkd->hqd"}> : () -> ()
    %cst_179 = arith.constant dense<0.000000e+00> : vector<4x8x8xf32>
    %328 = tpu.matmul %326, %327, %cst_179 {dimension_numbers = #tpu.dot_dimension_numbers<[2], [1], [1], [2], [0, 0, 0, 1, 1, 2], [0], [0]>} : vector<4x8x8xbf16>, vector<4x8x8xbf16>, vector<4x8x8xf32> -> vector<4x8x8xf32>
    "tpu.trace_stop"() : () -> ()
    %329 = tpu.transpose %328, [1, 0, 2] : vector<4x8x8xf32> -> vector<8x4x8xf32>
    %330 = vector.shape_cast %329 : vector<8x4x8xf32> to vector<8x32xf32>
    %331 = arith.truncf %330 : vector<8x32xf32> to vector<8x32xbf16>
    %cst_180 = arith.constant dense<0.000000e+00> : vector<8x32xf32>
    %332 = tpu.matmul %331, %292, %cst_180 {dimension_numbers = #tpu.dot_dimension_numbers<[1], [0], [0], [1], [0, 0, 1, 1], [], []>} : vector<8x32xbf16>, vector<32x32xbf16>, vector<8x32xf32> -> vector<8x32xf32>
    %333 = vector.broadcast %294 : vector<1x32xf32> to vector<8x32xf32>
    %334 = arith.addf %332, %333 : vector<8x32xf32>
    %335 = arith.addf %8, %334 : vector<8x32xf32>
    %c0_181 = arith.constant 0 : index
    %c0_182 = arith.constant 0 : index
    %c0_183 = arith.constant 0 : index
    %336 = vector.load %arg26[%c0_181, %c0_182, %c0_183] : memref<2x1x32xf32, #tpu.memory_space<vmem>>, vector<1x1x32xf32>
    %337 = vector.shape_cast %336 : vector<1x1x32xf32> to vector<1x32xf32>
    %c0_184 = arith.constant 0 : index
    %c0_185 = arith.constant 0 : index
    %c0_186 = arith.constant 0 : index
    %338 = vector.load %arg27[%c0_184, %c0_185, %c0_186] : memref<2x1x32xf32, #tpu.memory_space<vmem>>, vector<1x1x32xf32>
    %339 = vector.shape_cast %338 : vector<1x1x32xf32> to vector<1x32xf32>
    %cst_187 = arith.constant dense<0.000000e+00> : vector<8xf32>
    %340 = vector.multi_reduction <add>, %335, %cst_187 [1] : vector<8x32xf32> to vector<8xf32>
    %341 = vector.shape_cast %340 : vector<8xf32> to vector<8x1xf32>
    %cst_188 = arith.constant 3.200000e+01 : f32
    %342 = vector.broadcast %cst_188 : f32 to vector<8x1xf32>
    %343 = arith.divf %341, %342 : vector<8x1xf32>
    %344 = vector.broadcast %343 : vector<8x1xf32> to vector<8x32xf32>
    %345 = arith.subf %335, %344 : vector<8x32xf32>
    %346 = arith.mulf %345, %345 : vector<8x32xf32>
    %cst_189 = arith.constant dense<0.000000e+00> : vector<8xf32>
    %347 = vector.multi_reduction <add>, %346, %cst_189 [1] : vector<8x32xf32> to vector<8xf32>
    %348 = vector.shape_cast %347 : vector<8xf32> to vector<8x1xf32>
    %cst_190 = arith.constant 3.200000e+01 : f32
    %349 = vector.broadcast %cst_190 : f32 to vector<8x1xf32>
    %350 = arith.divf %348, %349 : vector<8x1xf32>
    %cst_191 = arith.constant 9.99999974E-6 : f32
    %351 = vector.broadcast %cst_191 : f32 to vector<8x1xf32>
    %352 = arith.addf %350, %351 : vector<8x1xf32>
    %353 = math.rsqrt %352 : vector<8x1xf32>
    %354 = vector.broadcast %353 : vector<8x1xf32> to vector<8x32xf32>
    %355 = arith.mulf %345, %354 : vector<8x32xf32>
    %356 = vector.broadcast %337 : vector<1x32xf32> to vector<8x32xf32>
    %357 = arith.mulf %355, %356 : vector<8x32xf32>
    %358 = vector.broadcast %339 : vector<1x32xf32> to vector<8x32xf32>
    %359 = arith.addf %357, %358 : vector<8x32xf32>
    %c0_192 = arith.constant 0 : index
    %c0_193 = arith.constant 0 : index
    %c0_194 = arith.constant 0 : index
    %360 = vector.load %arg28[%c0_192, %c0_193, %c0_194] : memref<2x32x32xbf16, #tpu.memory_space<vmem>>, vector<1x32x32xbf16>
    %361 = vector.shape_cast %360 : vector<1x32x32xbf16> to vector<32x32xbf16>
    %c0_195 = arith.constant 0 : index
    %c0_196 = arith.constant 0 : index
    %c0_197 = arith.constant 0 : index
    %362 = vector.load %arg29[%c0_195, %c0_196, %c0_197] : memref<2x1x32xf32, #tpu.memory_space<vmem>>, vector<1x1x32xf32>
    %363 = vector.shape_cast %362 : vector<1x1x32xf32> to vector<1x32xf32>
    %c0_198 = arith.constant 0 : index
    %c0_199 = arith.constant 0 : index
    %c0_200 = arith.constant 0 : index
    %364 = vector.load %arg30[%c0_198, %c0_199, %c0_200] : memref<2x32x32xbf16, #tpu.memory_space<vmem>>, vector<1x32x32xbf16>
    %365 = vector.shape_cast %364 : vector<1x32x32xbf16> to vector<32x32xbf16>
    %c0_201 = arith.constant 0 : index
    %c0_202 = arith.constant 0 : index
    %c0_203 = arith.constant 0 : index
    %366 = vector.load %arg31[%c0_201, %c0_202, %c0_203] : memref<2x1x32xf32, #tpu.memory_space<vmem>>, vector<1x1x32xf32>
    %367 = vector.shape_cast %366 : vector<1x1x32xf32> to vector<1x32xf32>
    %c0_204 = arith.constant 0 : index
    %c0_205 = arith.constant 0 : index
    %c0_206 = arith.constant 0 : index
    %368 = vector.load %arg32[%c0_204, %c0_205, %c0_206] : memref<2x32x32xbf16, #tpu.memory_space<vmem>>, vector<1x32x32xbf16>
    %369 = vector.shape_cast %368 : vector<1x32x32xbf16> to vector<32x32xbf16>
    %c0_207 = arith.constant 0 : index
    %c0_208 = arith.constant 0 : index
    %c0_209 = arith.constant 0 : index
    %370 = vector.load %arg33[%c0_207, %c0_208, %c0_209] : memref<2x1x32xf32, #tpu.memory_space<vmem>>, vector<1x1x32xf32>
    %371 = vector.shape_cast %370 : vector<1x1x32xf32> to vector<1x32xf32>
    %c0_210 = arith.constant 0 : index
    %c0_211 = arith.constant 0 : index
    %c0_212 = arith.constant 0 : index
    %372 = vector.load %arg34[%c0_210, %c0_211, %c0_212] : memref<2x32x32xbf16, #tpu.memory_space<vmem>>, vector<1x32x32xbf16>
    %373 = vector.shape_cast %372 : vector<1x32x32xbf16> to vector<32x32xbf16>
    %c0_213 = arith.constant 0 : index
    %c0_214 = arith.constant 0 : index
    %c0_215 = arith.constant 0 : index
    %374 = vector.load %arg35[%c0_213, %c0_214, %c0_215] : memref<2x1x32xf32, #tpu.memory_space<vmem>>, vector<1x1x32xf32>
    %375 = vector.shape_cast %374 : vector<1x1x32xf32> to vector<1x32xf32>
    %376 = arith.truncf %359 : vector<8x32xf32> to vector<8x32xbf16>
    %cst_216 = arith.constant dense<0.000000e+00> : vector<8x32xf32>
    %377 = tpu.matmul %376, %361, %cst_216 {dimension_numbers = #tpu.dot_dimension_numbers<[1], [0], [0], [1], [0, 0, 1, 1], [], []>} : vector<8x32xbf16>, vector<32x32xbf16>, vector<8x32xf32> -> vector<8x32xf32>
    %378 = vector.broadcast %363 : vector<1x32xf32> to vector<8x32xf32>
    %379 = arith.addf %377, %378 : vector<8x32xf32>
    %380 = vector.shape_cast %379 : vector<8x32xf32> to vector<8x4x8xf32>
    %381 = tpu.transpose %380, [1, 0, 2] : vector<8x4x8xf32> -> vector<4x8x8xf32>
    %382 = arith.truncf %278 : vector<8x32xf32> to vector<8x32xbf16>
    %cst_217 = arith.constant dense<0.000000e+00> : vector<8x32xf32>
    %383 = tpu.matmul %382, %365, %cst_217 {dimension_numbers = #tpu.dot_dimension_numbers<[1], [0], [0], [1], [0, 0, 1, 1], [], []>} : vector<8x32xbf16>, vector<32x32xbf16>, vector<8x32xf32> -> vector<8x32xf32>
    %384 = vector.broadcast %367 : vector<1x32xf32> to vector<8x32xf32>
    %385 = arith.addf %383, %384 : vector<8x32xf32>
    %386 = vector.shape_cast %385 : vector<8x32xf32> to vector<8x4x8xf32>
    %387 = tpu.transpose %386, [1, 0, 2] : vector<8x4x8xf32> -> vector<4x8x8xf32>
    %388 = arith.truncf %278 : vector<8x32xf32> to vector<8x32xbf16>
    %cst_218 = arith.constant dense<0.000000e+00> : vector<8x32xf32>
    %389 = tpu.matmul %388, %369, %cst_218 {dimension_numbers = #tpu.dot_dimension_numbers<[1], [0], [0], [1], [0, 0, 1, 1], [], []>} : vector<8x32xbf16>, vector<32x32xbf16>, vector<8x32xf32> -> vector<8x32xf32>
    %390 = vector.broadcast %371 : vector<1x32xf32> to vector<8x32xf32>
    %391 = arith.addf %389, %390 : vector<8x32xf32>
    %392 = vector.shape_cast %391 : vector<8x32xf32> to vector<8x4x8xf32>
    %393 = tpu.transpose %392, [1, 0, 2] : vector<8x4x8xf32> -> vector<4x8x8xf32>
    %394 = arith.truncf %381 : vector<4x8x8xf32> to vector<4x8x8xbf16>
    %395 = arith.truncf %387 : vector<4x8x8xf32> to vector<4x8x8xbf16>
    "tpu.trace_start"() <{level = 10 : i32, message = "hqd,hkd->hqk"}> : () -> ()
    %cst_219 = arith.constant dense<0.000000e+00> : vector<4x8x8xf32>
    %396 = tpu.matmul %394, %395, %cst_219 {dimension_numbers = #tpu.dot_dimension_numbers<[2], [2], [1], [1], [0, 0, 0, 1, 1, 1], [0], [0]>} : vector<4x8x8xbf16>, vector<4x8x8xbf16>, vector<4x8x8xf32> -> vector<4x8x8xf32>
    "tpu.trace_stop"() : () -> ()
    %cst_220 = arith.constant dense<0xFF800000> : vector<4x8xf32>
    %397 = vector.multi_reduction <maximumf>, %396, %cst_220 [2] : vector<4x8x8xf32> to vector<4x8xf32>
    %398 = vector.shape_cast %397 : vector<4x8xf32> to vector<4x8x1xf32>
    %399 = vector.broadcast %398 : vector<4x8x1xf32> to vector<4x8x8xf32>
    %400 = arith.subf %396, %399 : vector<4x8x8xf32>
    %401 = math.exp %400 : vector<4x8x8xf32>
    %cst_221 = arith.constant dense<0.000000e+00> : vector<4x8xf32>
    %402 = vector.multi_reduction <add>, %401, %cst_221 [2] : vector<4x8x8xf32> to vector<4x8xf32>
    %403 = vector.shape_cast %402 : vector<4x8xf32> to vector<4x8x1xf32>
    %404 = tpu.reciprocal %403 {approx = true} : vector<4x8x1xf32> -> vector<4x8x1xf32>
    %405 = vector.broadcast %404 : vector<4x8x1xf32> to vector<4x8x8xf32>
    %406 = arith.mulf %401, %405 : vector<4x8x8xf32>
    %407 = arith.truncf %406 : vector<4x8x8xf32> to vector<4x8x8xbf16>
    %408 = arith.truncf %393 : vector<4x8x8xf32> to vector<4x8x8xbf16>
    "tpu.trace_start"() <{level = 10 : i32, message = "hqk,hkd->hqd"}> : () -> ()
    %cst_222 = arith.constant dense<0.000000e+00> : vector<4x8x8xf32>
    %409 = tpu.matmul %407, %408, %cst_222 {dimension_numbers = #tpu.dot_dimension_numbers<[2], [1], [1], [2], [0, 0, 0, 1, 1, 2], [0], [0]>} : vector<4x8x8xbf16>, vector<4x8x8xbf16>, vector<4x8x8xf32> -> vector<4x8x8xf32>
    "tpu.trace_stop"() : () -> ()
    %410 = tpu.transpose %409, [1, 0, 2] : vector<4x8x8xf32> -> vector<8x4x8xf32>
    %411 = vector.shape_cast %410 : vector<8x4x8xf32> to vector<8x32xf32>
    %412 = arith.truncf %411 : vector<8x32xf32> to vector<8x32xbf16>
    %cst_223 = arith.constant dense<0.000000e+00> : vector<8x32xf32>
    %413 = tpu.matmul %412, %373, %cst_223 {dimension_numbers = #tpu.dot_dimension_numbers<[1], [0], [0], [1], [0, 0, 1, 1], [], []>} : vector<8x32xbf16>, vector<32x32xbf16>, vector<8x32xf32> -> vector<8x32xf32>
    %414 = vector.broadcast %375 : vector<1x32xf32> to vector<8x32xf32>
    %415 = arith.addf %413, %414 : vector<8x32xf32>
    %416 = arith.addf %359, %415 : vector<8x32xf32>
    %c0_224 = arith.constant 0 : index
    %c0_225 = arith.constant 0 : index
    %c0_226 = arith.constant 0 : index
    %417 = vector.load %arg36[%c0_224, %c0_225, %c0_226] : memref<2x1x32xf32, #tpu.memory_space<vmem>>, vector<1x1x32xf32>
    %418 = vector.shape_cast %417 : vector<1x1x32xf32> to vector<1x32xf32>
    %c0_227 = arith.constant 0 : index
    %c0_228 = arith.constant 0 : index
    %c0_229 = arith.constant 0 : index
    %419 = vector.load %arg37[%c0_227, %c0_228, %c0_229] : memref<2x1x32xf32, #tpu.memory_space<vmem>>, vector<1x1x32xf32>
    %420 = vector.shape_cast %419 : vector<1x1x32xf32> to vector<1x32xf32>
    %cst_230 = arith.constant dense<0.000000e+00> : vector<8xf32>
    %421 = vector.multi_reduction <add>, %416, %cst_230 [1] : vector<8x32xf32> to vector<8xf32>
    %422 = vector.shape_cast %421 : vector<8xf32> to vector<8x1xf32>
    %cst_231 = arith.constant 3.200000e+01 : f32
    %423 = vector.broadcast %cst_231 : f32 to vector<8x1xf32>
    %424 = arith.divf %422, %423 : vector<8x1xf32>
    %425 = vector.broadcast %424 : vector<8x1xf32> to vector<8x32xf32>
    %426 = arith.subf %416, %425 : vector<8x32xf32>
    %427 = arith.mulf %426, %426 : vector<8x32xf32>
    %cst_232 = arith.constant dense<0.000000e+00> : vector<8xf32>
    %428 = vector.multi_reduction <add>, %427, %cst_232 [1] : vector<8x32xf32> to vector<8xf32>
    %429 = vector.shape_cast %428 : vector<8xf32> to vector<8x1xf32>
    %cst_233 = arith.constant 3.200000e+01 : f32
    %430 = vector.broadcast %cst_233 : f32 to vector<8x1xf32>
    %431 = arith.divf %429, %430 : vector<8x1xf32>
    %cst_234 = arith.constant 9.99999974E-6 : f32
    %432 = vector.broadcast %cst_234 : f32 to vector<8x1xf32>
    %433 = arith.addf %431, %432 : vector<8x1xf32>
    %434 = math.rsqrt %433 : vector<8x1xf32>
    %435 = vector.broadcast %434 : vector<8x1xf32> to vector<8x32xf32>
    %436 = arith.mulf %426, %435 : vector<8x32xf32>
    %437 = vector.broadcast %418 : vector<1x32xf32> to vector<8x32xf32>
    %438 = arith.mulf %436, %437 : vector<8x32xf32>
    %439 = vector.broadcast %420 : vector<1x32xf32> to vector<8x32xf32>
    %440 = arith.addf %438, %439 : vector<8x32xf32>
    %c0_235 = arith.constant 0 : index
    %c0_236 = arith.constant 0 : index
    %c0_237 = arith.constant 0 : index
    %441 = vector.load %arg38[%c0_235, %c0_236, %c0_237] : memref<2x32x64xbf16, #tpu.memory_space<vmem>>, vector<1x32x64xbf16>
    %442 = vector.shape_cast %441 : vector<1x32x64xbf16> to vector<32x64xbf16>
    %c0_238 = arith.constant 0 : index
    %c0_239 = arith.constant 0 : index
    %c0_240 = arith.constant 0 : index
    %443 = vector.load %arg39[%c0_238, %c0_239, %c0_240] : memref<2x1x64xf32, #tpu.memory_space<vmem>>, vector<1x1x64xf32>
    %444 = vector.shape_cast %443 : vector<1x1x64xf32> to vector<1x64xf32>
    %445 = arith.truncf %440 : vector<8x32xf32> to vector<8x32xbf16>
    %cst_241 = arith.constant dense<0.000000e+00> : vector<8x64xf32>
    %446 = tpu.matmul %445, %442, %cst_241 {dimension_numbers = #tpu.dot_dimension_numbers<[1], [0], [0], [1], [0, 0, 1, 1], [], []>} : vector<8x32xbf16>, vector<32x64xbf16>, vector<8x64xf32> -> vector<8x64xf32>
    %447 = vector.broadcast %444 : vector<1x64xf32> to vector<8x64xf32>
    %448 = arith.addf %446, %447 : vector<8x64xf32>
    %cst_242 = arith.constant 0.000000e+00 : f32
    %449 = vector.broadcast %cst_242 : f32 to vector<8x64xf32>
    %450 = arith.maximumf %448, %449 : vector<8x64xf32>
    %c0_243 = arith.constant 0 : index
    %c0_244 = arith.constant 0 : index
    %c0_245 = arith.constant 0 : index
    %451 = vector.load %arg40[%c0_243, %c0_244, %c0_245] : memref<2x64x32xbf16, #tpu.memory_space<vmem>>, vector<1x64x32xbf16>
    %452 = vector.shape_cast %451 : vector<1x64x32xbf16> to vector<64x32xbf16>
    %c0_246 = arith.constant 0 : index
    %c0_247 = arith.constant 0 : index
    %c0_248 = arith.constant 0 : index
    %453 = vector.load %arg41[%c0_246, %c0_247, %c0_248] : memref<2x1x32xf32, #tpu.memory_space<vmem>>, vector<1x1x32xf32>
    %454 = vector.shape_cast %453 : vector<1x1x32xf32> to vector<1x32xf32>
    %455 = arith.truncf %450 : vector<8x64xf32> to vector<8x64xbf16>
    %cst_249 = arith.constant dense<0.000000e+00> : vector<8x32xf32>
    %456 = tpu.matmul %455, %452, %cst_249 {dimension_numbers = #tpu.dot_dimension_numbers<[1], [0], [0], [1], [0, 0, 1, 1], [], []>} : vector<8x64xbf16>, vector<64x32xbf16>, vector<8x32xf32> -> vector<8x32xf32>
    %457 = vector.broadcast %454 : vector<1x32xf32> to vector<8x32xf32>
    %458 = arith.addf %456, %457 : vector<8x32xf32>
    %459 = arith.addf %440, %458 : vector<8x32xf32>
    %c0_250 = arith.constant 0 : index
    %c0_251 = arith.constant 0 : index
    %c0_252 = arith.constant 0 : index
    %460 = vector.load %arg42[%c0_250, %c0_251, %c0_252] : memref<2x1x32xf32, #tpu.memory_space<vmem>>, vector<1x1x32xf32>
    %461 = vector.shape_cast %460 : vector<1x1x32xf32> to vector<1x32xf32>
    %c0_253 = arith.constant 0 : index
    %c0_254 = arith.constant 0 : index
    %c0_255 = arith.constant 0 : index
    %462 = vector.load %arg43[%c0_253, %c0_254, %c0_255] : memref<2x1x32xf32, #tpu.memory_space<vmem>>, vector<1x1x32xf32>
    %463 = vector.shape_cast %462 : vector<1x1x32xf32> to vector<1x32xf32>
    %cst_256 = arith.constant dense<0.000000e+00> : vector<8xf32>
    %464 = vector.multi_reduction <add>, %459, %cst_256 [1] : vector<8x32xf32> to vector<8xf32>
    %465 = vector.shape_cast %464 : vector<8xf32> to vector<8x1xf32>
    %cst_257 = arith.constant 3.200000e+01 : f32
    %466 = vector.broadcast %cst_257 : f32 to vector<8x1xf32>
    %467 = arith.divf %465, %466 : vector<8x1xf32>
    %468 = vector.broadcast %467 : vector<8x1xf32> to vector<8x32xf32>
    %469 = arith.subf %459, %468 : vector<8x32xf32>
    %470 = arith.mulf %469, %469 : vector<8x32xf32>
    %cst_258 = arith.constant dense<0.000000e+00> : vector<8xf32>
    %471 = vector.multi_reduction <add>, %470, %cst_258 [1] : vector<8x32xf32> to vector<8xf32>
    %472 = vector.shape_cast %471 : vector<8xf32> to vector<8x1xf32>
    %cst_259 = arith.constant 3.200000e+01 : f32
    %473 = vector.broadcast %cst_259 : f32 to vector<8x1xf32>
    %474 = arith.divf %472, %473 : vector<8x1xf32>
    %cst_260 = arith.constant 9.99999974E-6 : f32
    %475 = vector.broadcast %cst_260 : f32 to vector<8x1xf32>
    %476 = arith.addf %474, %475 : vector<8x1xf32>
    %477 = math.rsqrt %476 : vector<8x1xf32>
    %478 = vector.broadcast %477 : vector<8x1xf32> to vector<8x32xf32>
    %479 = arith.mulf %469, %478 : vector<8x32xf32>
    %480 = vector.broadcast %461 : vector<1x32xf32> to vector<8x32xf32>
    %481 = arith.mulf %479, %480 : vector<8x32xf32>
    %482 = vector.broadcast %463 : vector<1x32xf32> to vector<8x32xf32>
    %483 = arith.addf %481, %482 : vector<8x32xf32>
    %c1_261 = arith.constant 1 : index
    %c0_262 = arith.constant 0 : index
    %c0_263 = arith.constant 0 : index
    %484 = vector.load %arg18[%c1_261, %c0_262, %c0_263] : memref<2x32x32xbf16, #tpu.memory_space<vmem>>, vector<1x32x32xbf16>
    %485 = vector.shape_cast %484 : vector<1x32x32xbf16> to vector<32x32xbf16>
    %c1_264 = arith.constant 1 : index
    %c0_265 = arith.constant 0 : index
    %c0_266 = arith.constant 0 : index
    %486 = vector.load %arg19[%c1_264, %c0_265, %c0_266] : memref<2x1x32xf32, #tpu.memory_space<vmem>>, vector<1x1x32xf32>
    %487 = vector.shape_cast %486 : vector<1x1x32xf32> to vector<1x32xf32>
    %c1_267 = arith.constant 1 : index
    %c0_268 = arith.constant 0 : index
    %c0_269 = arith.constant 0 : index
    %488 = vector.load %arg20[%c1_267, %c0_268, %c0_269] : memref<2x32x32xbf16, #tpu.memory_space<vmem>>, vector<1x32x32xbf16>
    %489 = vector.shape_cast %488 : vector<1x32x32xbf16> to vector<32x32xbf16>
    %c1_270 = arith.constant 1 : index
    %c0_271 = arith.constant 0 : index
    %c0_272 = arith.constant 0 : index
    %490 = vector.load %arg21[%c1_270, %c0_271, %c0_272] : memref<2x1x32xf32, #tpu.memory_space<vmem>>, vector<1x1x32xf32>
    %491 = vector.shape_cast %490 : vector<1x1x32xf32> to vector<1x32xf32>
    %c1_273 = arith.constant 1 : index
    %c0_274 = arith.constant 0 : index
    %c0_275 = arith.constant 0 : index
    %492 = vector.load %arg22[%c1_273, %c0_274, %c0_275] : memref<2x32x32xbf16, #tpu.memory_space<vmem>>, vector<1x32x32xbf16>
    %493 = vector.shape_cast %492 : vector<1x32x32xbf16> to vector<32x32xbf16>
    %c1_276 = arith.constant 1 : index
    %c0_277 = arith.constant 0 : index
    %c0_278 = arith.constant 0 : index
    %494 = vector.load %arg23[%c1_276, %c0_277, %c0_278] : memref<2x1x32xf32, #tpu.memory_space<vmem>>, vector<1x1x32xf32>
    %495 = vector.shape_cast %494 : vector<1x1x32xf32> to vector<1x32xf32>
    %c1_279 = arith.constant 1 : index
    %c0_280 = arith.constant 0 : index
    %c0_281 = arith.constant 0 : index
    %496 = vector.load %arg24[%c1_279, %c0_280, %c0_281] : memref<2x32x32xbf16, #tpu.memory_space<vmem>>, vector<1x32x32xbf16>
    %497 = vector.shape_cast %496 : vector<1x32x32xbf16> to vector<32x32xbf16>
    %c1_282 = arith.constant 1 : index
    %c0_283 = arith.constant 0 : index
    %c0_284 = arith.constant 0 : index
    %498 = vector.load %arg25[%c1_282, %c0_283, %c0_284] : memref<2x1x32xf32, #tpu.memory_space<vmem>>, vector<1x1x32xf32>
    %499 = vector.shape_cast %498 : vector<1x1x32xf32> to vector<1x32xf32>
    %500 = arith.truncf %483 : vector<8x32xf32> to vector<8x32xbf16>
    %cst_285 = arith.constant dense<0.000000e+00> : vector<8x32xf32>
    %501 = tpu.matmul %500, %485, %cst_285 {dimension_numbers = #tpu.dot_dimension_numbers<[1], [0], [0], [1], [0, 0, 1, 1], [], []>} : vector<8x32xbf16>, vector<32x32xbf16>, vector<8x32xf32> -> vector<8x32xf32>
    %502 = vector.broadcast %487 : vector<1x32xf32> to vector<8x32xf32>
    %503 = arith.addf %501, %502 : vector<8x32xf32>
    %504 = vector.shape_cast %503 : vector<8x32xf32> to vector<8x4x8xf32>
    %505 = tpu.transpose %504, [1, 0, 2] : vector<8x4x8xf32> -> vector<4x8x8xf32>
    %506 = arith.truncf %483 : vector<8x32xf32> to vector<8x32xbf16>
    %cst_286 = arith.constant dense<0.000000e+00> : vector<8x32xf32>
    %507 = tpu.matmul %506, %489, %cst_286 {dimension_numbers = #tpu.dot_dimension_numbers<[1], [0], [0], [1], [0, 0, 1, 1], [], []>} : vector<8x32xbf16>, vector<32x32xbf16>, vector<8x32xf32> -> vector<8x32xf32>
    %508 = vector.broadcast %491 : vector<1x32xf32> to vector<8x32xf32>
    %509 = arith.addf %507, %508 : vector<8x32xf32>
    %510 = vector.shape_cast %509 : vector<8x32xf32> to vector<8x4x8xf32>
    %511 = tpu.transpose %510, [1, 0, 2] : vector<8x4x8xf32> -> vector<4x8x8xf32>
    %512 = arith.truncf %483 : vector<8x32xf32> to vector<8x32xbf16>
    %cst_287 = arith.constant dense<0.000000e+00> : vector<8x32xf32>
    %513 = tpu.matmul %512, %493, %cst_287 {dimension_numbers = #tpu.dot_dimension_numbers<[1], [0], [0], [1], [0, 0, 1, 1], [], []>} : vector<8x32xbf16>, vector<32x32xbf16>, vector<8x32xf32> -> vector<8x32xf32>
    %514 = vector.broadcast %495 : vector<1x32xf32> to vector<8x32xf32>
    %515 = arith.addf %513, %514 : vector<8x32xf32>
    %516 = vector.shape_cast %515 : vector<8x32xf32> to vector<8x4x8xf32>
    %517 = tpu.transpose %516, [1, 0, 2] : vector<8x4x8xf32> -> vector<4x8x8xf32>
    %518 = arith.truncf %505 : vector<4x8x8xf32> to vector<4x8x8xbf16>
    %519 = arith.truncf %511 : vector<4x8x8xf32> to vector<4x8x8xbf16>
    "tpu.trace_start"() <{level = 10 : i32, message = "hqd,hkd->hqk"}> : () -> ()
    %cst_288 = arith.constant dense<0.000000e+00> : vector<4x8x8xf32>
    %520 = tpu.matmul %518, %519, %cst_288 {dimension_numbers = #tpu.dot_dimension_numbers<[2], [2], [1], [1], [0, 0, 0, 1, 1, 1], [0], [0]>} : vector<4x8x8xbf16>, vector<4x8x8xbf16>, vector<4x8x8xf32> -> vector<4x8x8xf32>
    "tpu.trace_stop"() : () -> ()
    %cst_289 = arith.constant dense<0xFF800000> : vector<4x8xf32>
    %521 = vector.multi_reduction <maximumf>, %520, %cst_289 [2] : vector<4x8x8xf32> to vector<4x8xf32>
    %522 = vector.shape_cast %521 : vector<4x8xf32> to vector<4x8x1xf32>
    %523 = vector.broadcast %522 : vector<4x8x1xf32> to vector<4x8x8xf32>
    %524 = arith.subf %520, %523 : vector<4x8x8xf32>
    %525 = math.exp %524 : vector<4x8x8xf32>
    %cst_290 = arith.constant dense<0.000000e+00> : vector<4x8xf32>
    %526 = vector.multi_reduction <add>, %525, %cst_290 [2] : vector<4x8x8xf32> to vector<4x8xf32>
    %527 = vector.shape_cast %526 : vector<4x8xf32> to vector<4x8x1xf32>
    %528 = tpu.reciprocal %527 {approx = true} : vector<4x8x1xf32> -> vector<4x8x1xf32>
    %529 = vector.broadcast %528 : vector<4x8x1xf32> to vector<4x8x8xf32>
    %530 = arith.mulf %525, %529 : vector<4x8x8xf32>
    %531 = arith.truncf %530 : vector<4x8x8xf32> to vector<4x8x8xbf16>
    %532 = arith.truncf %517 : vector<4x8x8xf32> to vector<4x8x8xbf16>
    "tpu.trace_start"() <{level = 10 : i32, message = "hqk,hkd->hqd"}> : () -> ()
    %cst_291 = arith.constant dense<0.000000e+00> : vector<4x8x8xf32>
    %533 = tpu.matmul %531, %532, %cst_291 {dimension_numbers = #tpu.dot_dimension_numbers<[2], [1], [1], [2], [0, 0, 0, 1, 1, 2], [0], [0]>} : vector<4x8x8xbf16>, vector<4x8x8xbf16>, vector<4x8x8xf32> -> vector<4x8x8xf32>
    "tpu.trace_stop"() : () -> ()
    %534 = tpu.transpose %533, [1, 0, 2] : vector<4x8x8xf32> -> vector<8x4x8xf32>
    %535 = vector.shape_cast %534 : vector<8x4x8xf32> to vector<8x32xf32>
    %536 = arith.truncf %535 : vector<8x32xf32> to vector<8x32xbf16>
    %cst_292 = arith.constant dense<0.000000e+00> : vector<8x32xf32>
    %537 = tpu.matmul %536, %497, %cst_292 {dimension_numbers = #tpu.dot_dimension_numbers<[1], [0], [0], [1], [0, 0, 1, 1], [], []>} : vector<8x32xbf16>, vector<32x32xbf16>, vector<8x32xf32> -> vector<8x32xf32>
    %538 = vector.broadcast %499 : vector<1x32xf32> to vector<8x32xf32>
    %539 = arith.addf %537, %538 : vector<8x32xf32>
    %540 = arith.addf %483, %539 : vector<8x32xf32>
    %c1_293 = arith.constant 1 : index
    %c0_294 = arith.constant 0 : index
    %c0_295 = arith.constant 0 : index
    %541 = vector.load %arg26[%c1_293, %c0_294, %c0_295] : memref<2x1x32xf32, #tpu.memory_space<vmem>>, vector<1x1x32xf32>
    %542 = vector.shape_cast %541 : vector<1x1x32xf32> to vector<1x32xf32>
    %c1_296 = arith.constant 1 : index
    %c0_297 = arith.constant 0 : index
    %c0_298 = arith.constant 0 : index
    %543 = vector.load %arg27[%c1_296, %c0_297, %c0_298] : memref<2x1x32xf32, #tpu.memory_space<vmem>>, vector<1x1x32xf32>
    %544 = vector.shape_cast %543 : vector<1x1x32xf32> to vector<1x32xf32>
    %cst_299 = arith.constant dense<0.000000e+00> : vector<8xf32>
    %545 = vector.multi_reduction <add>, %540, %cst_299 [1] : vector<8x32xf32> to vector<8xf32>
    %546 = vector.shape_cast %545 : vector<8xf32> to vector<8x1xf32>
    %cst_300 = arith.constant 3.200000e+01 : f32
    %547 = vector.broadcast %cst_300 : f32 to vector<8x1xf32>
    %548 = arith.divf %546, %547 : vector<8x1xf32>
    %549 = vector.broadcast %548 : vector<8x1xf32> to vector<8x32xf32>
    %550 = arith.subf %540, %549 : vector<8x32xf32>
    %551 = arith.mulf %550, %550 : vector<8x32xf32>
    %cst_301 = arith.constant dense<0.000000e+00> : vector<8xf32>
    %552 = vector.multi_reduction <add>, %551, %cst_301 [1] : vector<8x32xf32> to vector<8xf32>
    %553 = vector.shape_cast %552 : vector<8xf32> to vector<8x1xf32>
    %cst_302 = arith.constant 3.200000e+01 : f32
    %554 = vector.broadcast %cst_302 : f32 to vector<8x1xf32>
    %555 = arith.divf %553, %554 : vector<8x1xf32>
    %cst_303 = arith.constant 9.99999974E-6 : f32
    %556 = vector.broadcast %cst_303 : f32 to vector<8x1xf32>
    %557 = arith.addf %555, %556 : vector<8x1xf32>
    %558 = math.rsqrt %557 : vector<8x1xf32>
    %559 = vector.broadcast %558 : vector<8x1xf32> to vector<8x32xf32>
    %560 = arith.mulf %550, %559 : vector<8x32xf32>
    %561 = vector.broadcast %542 : vector<1x32xf32> to vector<8x32xf32>
    %562 = arith.mulf %560, %561 : vector<8x32xf32>
    %563 = vector.broadcast %544 : vector<1x32xf32> to vector<8x32xf32>
    %564 = arith.addf %562, %563 : vector<8x32xf32>
    %c1_304 = arith.constant 1 : index
    %c0_305 = arith.constant 0 : index
    %c0_306 = arith.constant 0 : index
    %565 = vector.load %arg28[%c1_304, %c0_305, %c0_306] : memref<2x32x32xbf16, #tpu.memory_space<vmem>>, vector<1x32x32xbf16>
    %566 = vector.shape_cast %565 : vector<1x32x32xbf16> to vector<32x32xbf16>
    %c1_307 = arith.constant 1 : index
    %c0_308 = arith.constant 0 : index
    %c0_309 = arith.constant 0 : index
    %567 = vector.load %arg29[%c1_307, %c0_308, %c0_309] : memref<2x1x32xf32, #tpu.memory_space<vmem>>, vector<1x1x32xf32>
    %568 = vector.shape_cast %567 : vector<1x1x32xf32> to vector<1x32xf32>
    %c1_310 = arith.constant 1 : index
    %c0_311 = arith.constant 0 : index
    %c0_312 = arith.constant 0 : index
    %569 = vector.load %arg30[%c1_310, %c0_311, %c0_312] : memref<2x32x32xbf16, #tpu.memory_space<vmem>>, vector<1x32x32xbf16>
    %570 = vector.shape_cast %569 : vector<1x32x32xbf16> to vector<32x32xbf16>
    %c1_313 = arith.constant 1 : index
    %c0_314 = arith.constant 0 : index
    %c0_315 = arith.constant 0 : index
    %571 = vector.load %arg31[%c1_313, %c0_314, %c0_315] : memref<2x1x32xf32, #tpu.memory_space<vmem>>, vector<1x1x32xf32>
    %572 = vector.shape_cast %571 : vector<1x1x32xf32> to vector<1x32xf32>
    %c1_316 = arith.constant 1 : index
    %c0_317 = arith.constant 0 : index
    %c0_318 = arith.constant 0 : index
    %573 = vector.load %arg32[%c1_316, %c0_317, %c0_318] : memref<2x32x32xbf16, #tpu.memory_space<vmem>>, vector<1x32x32xbf16>
    %574 = vector.shape_cast %573 : vector<1x32x32xbf16> to vector<32x32xbf16>
    %c1_319 = arith.constant 1 : index
    %c0_320 = arith.constant 0 : index
    %c0_321 = arith.constant 0 : index
    %575 = vector.load %arg33[%c1_319, %c0_320, %c0_321] : memref<2x1x32xf32, #tpu.memory_space<vmem>>, vector<1x1x32xf32>
    %576 = vector.shape_cast %575 : vector<1x1x32xf32> to vector<1x32xf32>
    %c1_322 = arith.constant 1 : index
    %c0_323 = arith.constant 0 : index
    %c0_324 = arith.constant 0 : index
    %577 = vector.load %arg34[%c1_322, %c0_323, %c0_324] : memref<2x32x32xbf16, #tpu.memory_space<vmem>>, vector<1x32x32xbf16>
    %578 = vector.shape_cast %577 : vector<1x32x32xbf16> to vector<32x32xbf16>
    %c1_325 = arith.constant 1 : index
    %c0_326 = arith.constant 0 : index
    %c0_327 = arith.constant 0 : index
    %579 = vector.load %arg35[%c1_325, %c0_326, %c0_327] : memref<2x1x32xf32, #tpu.memory_space<vmem>>, vector<1x1x32xf32>
    %580 = vector.shape_cast %579 : vector<1x1x32xf32> to vector<1x32xf32>
    %581 = arith.truncf %564 : vector<8x32xf32> to vector<8x32xbf16>
    %cst_328 = arith.constant dense<0.000000e+00> : vector<8x32xf32>
    %582 = tpu.matmul %581, %566, %cst_328 {dimension_numbers = #tpu.dot_dimension_numbers<[1], [0], [0], [1], [0, 0, 1, 1], [], []>} : vector<8x32xbf16>, vector<32x32xbf16>, vector<8x32xf32> -> vector<8x32xf32>
    %583 = vector.broadcast %568 : vector<1x32xf32> to vector<8x32xf32>
    %584 = arith.addf %582, %583 : vector<8x32xf32>
    %585 = vector.shape_cast %584 : vector<8x32xf32> to vector<8x4x8xf32>
    %586 = tpu.transpose %585, [1, 0, 2] : vector<8x4x8xf32> -> vector<4x8x8xf32>
    %587 = arith.truncf %278 : vector<8x32xf32> to vector<8x32xbf16>
    %cst_329 = arith.constant dense<0.000000e+00> : vector<8x32xf32>
    %588 = tpu.matmul %587, %570, %cst_329 {dimension_numbers = #tpu.dot_dimension_numbers<[1], [0], [0], [1], [0, 0, 1, 1], [], []>} : vector<8x32xbf16>, vector<32x32xbf16>, vector<8x32xf32> -> vector<8x32xf32>
    %589 = vector.broadcast %572 : vector<1x32xf32> to vector<8x32xf32>
    %590 = arith.addf %588, %589 : vector<8x32xf32>
    %591 = vector.shape_cast %590 : vector<8x32xf32> to vector<8x4x8xf32>
    %592 = tpu.transpose %591, [1, 0, 2] : vector<8x4x8xf32> -> vector<4x8x8xf32>
    %593 = arith.truncf %278 : vector<8x32xf32> to vector<8x32xbf16>
    %cst_330 = arith.constant dense<0.000000e+00> : vector<8x32xf32>
    %594 = tpu.matmul %593, %574, %cst_330 {dimension_numbers = #tpu.dot_dimension_numbers<[1], [0], [0], [1], [0, 0, 1, 1], [], []>} : vector<8x32xbf16>, vector<32x32xbf16>, vector<8x32xf32> -> vector<8x32xf32>
    %595 = vector.broadcast %576 : vector<1x32xf32> to vector<8x32xf32>
    %596 = arith.addf %594, %595 : vector<8x32xf32>
    %597 = vector.shape_cast %596 : vector<8x32xf32> to vector<8x4x8xf32>
    %598 = tpu.transpose %597, [1, 0, 2] : vector<8x4x8xf32> -> vector<4x8x8xf32>
    %599 = arith.truncf %586 : vector<4x8x8xf32> to vector<4x8x8xbf16>
    %600 = arith.truncf %592 : vector<4x8x8xf32> to vector<4x8x8xbf16>
    "tpu.trace_start"() <{level = 10 : i32, message = "hqd,hkd->hqk"}> : () -> ()
    %cst_331 = arith.constant dense<0.000000e+00> : vector<4x8x8xf32>
    %601 = tpu.matmul %599, %600, %cst_331 {dimension_numbers = #tpu.dot_dimension_numbers<[2], [2], [1], [1], [0, 0, 0, 1, 1, 1], [0], [0]>} : vector<4x8x8xbf16>, vector<4x8x8xbf16>, vector<4x8x8xf32> -> vector<4x8x8xf32>
    "tpu.trace_stop"() : () -> ()
    %cst_332 = arith.constant dense<0xFF800000> : vector<4x8xf32>
    %602 = vector.multi_reduction <maximumf>, %601, %cst_332 [2] : vector<4x8x8xf32> to vector<4x8xf32>
    %603 = vector.shape_cast %602 : vector<4x8xf32> to vector<4x8x1xf32>
    %604 = vector.broadcast %603 : vector<4x8x1xf32> to vector<4x8x8xf32>
    %605 = arith.subf %601, %604 : vector<4x8x8xf32>
    %606 = math.exp %605 : vector<4x8x8xf32>
    %cst_333 = arith.constant dense<0.000000e+00> : vector<4x8xf32>
    %607 = vector.multi_reduction <add>, %606, %cst_333 [2] : vector<4x8x8xf32> to vector<4x8xf32>
    %608 = vector.shape_cast %607 : vector<4x8xf32> to vector<4x8x1xf32>
    %609 = tpu.reciprocal %608 {approx = true} : vector<4x8x1xf32> -> vector<4x8x1xf32>
    %610 = vector.broadcast %609 : vector<4x8x1xf32> to vector<4x8x8xf32>
    %611 = arith.mulf %606, %610 : vector<4x8x8xf32>
    %612 = arith.truncf %611 : vector<4x8x8xf32> to vector<4x8x8xbf16>
    %613 = arith.truncf %598 : vector<4x8x8xf32> to vector<4x8x8xbf16>
    "tpu.trace_start"() <{level = 10 : i32, message = "hqk,hkd->hqd"}> : () -> ()
    %cst_334 = arith.constant dense<0.000000e+00> : vector<4x8x8xf32>
    %614 = tpu.matmul %612, %613, %cst_334 {dimension_numbers = #tpu.dot_dimension_numbers<[2], [1], [1], [2], [0, 0, 0, 1, 1, 2], [0], [0]>} : vector<4x8x8xbf16>, vector<4x8x8xbf16>, vector<4x8x8xf32> -> vector<4x8x8xf32>
    "tpu.trace_stop"() : () -> ()
    %615 = tpu.transpose %614, [1, 0, 2] : vector<4x8x8xf32> -> vector<8x4x8xf32>
    %616 = vector.shape_cast %615 : vector<8x4x8xf32> to vector<8x32xf32>
    %617 = arith.truncf %616 : vector<8x32xf32> to vector<8x32xbf16>
    %cst_335 = arith.constant dense<0.000000e+00> : vector<8x32xf32>
    %618 = tpu.matmul %617, %578, %cst_335 {dimension_numbers = #tpu.dot_dimension_numbers<[1], [0], [0], [1], [0, 0, 1, 1], [], []>} : vector<8x32xbf16>, vector<32x32xbf16>, vector<8x32xf32> -> vector<8x32xf32>
    %619 = vector.broadcast %580 : vector<1x32xf32> to vector<8x32xf32>
    %620 = arith.addf %618, %619 : vector<8x32xf32>
    %621 = arith.addf %564, %620 : vector<8x32xf32>
    %c1_336 = arith.constant 1 : index
    %c0_337 = arith.constant 0 : index
    %c0_338 = arith.constant 0 : index
    %622 = vector.load %arg36[%c1_336, %c0_337, %c0_338] : memref<2x1x32xf32, #tpu.memory_space<vmem>>, vector<1x1x32xf32>
    %623 = vector.shape_cast %622 : vector<1x1x32xf32> to vector<1x32xf32>
    %c1_339 = arith.constant 1 : index
    %c0_340 = arith.constant 0 : index
    %c0_341 = arith.constant 0 : index
    %624 = vector.load %arg37[%c1_339, %c0_340, %c0_341] : memref<2x1x32xf32, #tpu.memory_space<vmem>>, vector<1x1x32xf32>
    %625 = vector.shape_cast %624 : vector<1x1x32xf32> to vector<1x32xf32>
    %cst_342 = arith.constant dense<0.000000e+00> : vector<8xf32>
    %626 = vector.multi_reduction <add>, %621, %cst_342 [1] : vector<8x32xf32> to vector<8xf32>
    %627 = vector.shape_cast %626 : vector<8xf32> to vector<8x1xf32>
    %cst_343 = arith.constant 3.200000e+01 : f32
    %628 = vector.broadcast %cst_343 : f32 to vector<8x1xf32>
    %629 = arith.divf %627, %628 : vector<8x1xf32>
    %630 = vector.broadcast %629 : vector<8x1xf32> to vector<8x32xf32>
    %631 = arith.subf %621, %630 : vector<8x32xf32>
    %632 = arith.mulf %631, %631 : vector<8x32xf32>
    %cst_344 = arith.constant dense<0.000000e+00> : vector<8xf32>
    %633 = vector.multi_reduction <add>, %632, %cst_344 [1] : vector<8x32xf32> to vector<8xf32>
    %634 = vector.shape_cast %633 : vector<8xf32> to vector<8x1xf32>
    %cst_345 = arith.constant 3.200000e+01 : f32
    %635 = vector.broadcast %cst_345 : f32 to vector<8x1xf32>
    %636 = arith.divf %634, %635 : vector<8x1xf32>
    %cst_346 = arith.constant 9.99999974E-6 : f32
    %637 = vector.broadcast %cst_346 : f32 to vector<8x1xf32>
    %638 = arith.addf %636, %637 : vector<8x1xf32>
    %639 = math.rsqrt %638 : vector<8x1xf32>
    %640 = vector.broadcast %639 : vector<8x1xf32> to vector<8x32xf32>
    %641 = arith.mulf %631, %640 : vector<8x32xf32>
    %642 = vector.broadcast %623 : vector<1x32xf32> to vector<8x32xf32>
    %643 = arith.mulf %641, %642 : vector<8x32xf32>
    %644 = vector.broadcast %625 : vector<1x32xf32> to vector<8x32xf32>
    %645 = arith.addf %643, %644 : vector<8x32xf32>
    %c1_347 = arith.constant 1 : index
    %c0_348 = arith.constant 0 : index
    %c0_349 = arith.constant 0 : index
    %646 = vector.load %arg38[%c1_347, %c0_348, %c0_349] : memref<2x32x64xbf16, #tpu.memory_space<vmem>>, vector<1x32x64xbf16>
    %647 = vector.shape_cast %646 : vector<1x32x64xbf16> to vector<32x64xbf16>
    %c1_350 = arith.constant 1 : index
    %c0_351 = arith.constant 0 : index
    %c0_352 = arith.constant 0 : index
    %648 = vector.load %arg39[%c1_350, %c0_351, %c0_352] : memref<2x1x64xf32, #tpu.memory_space<vmem>>, vector<1x1x64xf32>
    %649 = vector.shape_cast %648 : vector<1x1x64xf32> to vector<1x64xf32>
    %650 = arith.truncf %645 : vector<8x32xf32> to vector<8x32xbf16>
    %cst_353 = arith.constant dense<0.000000e+00> : vector<8x64xf32>
    %651 = tpu.matmul %650, %647, %cst_353 {dimension_numbers = #tpu.dot_dimension_numbers<[1], [0], [0], [1], [0, 0, 1, 1], [], []>} : vector<8x32xbf16>, vector<32x64xbf16>, vector<8x64xf32> -> vector<8x64xf32>
    %652 = vector.broadcast %649 : vector<1x64xf32> to vector<8x64xf32>
    %653 = arith.addf %651, %652 : vector<8x64xf32>
    %cst_354 = arith.constant 0.000000e+00 : f32
    %654 = vector.broadcast %cst_354 : f32 to vector<8x64xf32>
    %655 = arith.maximumf %653, %654 : vector<8x64xf32>
    %c1_355 = arith.constant 1 : index
    %c0_356 = arith.constant 0 : index
    %c0_357 = arith.constant 0 : index
    %656 = vector.load %arg40[%c1_355, %c0_356, %c0_357] : memref<2x64x32xbf16, #tpu.memory_space<vmem>>, vector<1x64x32xbf16>
    %657 = vector.shape_cast %656 : vector<1x64x32xbf16> to vector<64x32xbf16>
    %c1_358 = arith.constant 1 : index
    %c0_359 = arith.constant 0 : index
    %c0_360 = arith.constant 0 : index
    %658 = vector.load %arg41[%c1_358, %c0_359, %c0_360] : memref<2x1x32xf32, #tpu.memory_space<vmem>>, vector<1x1x32xf32>
    %659 = vector.shape_cast %658 : vector<1x1x32xf32> to vector<1x32xf32>
    %660 = arith.truncf %655 : vector<8x64xf32> to vector<8x64xbf16>
    %cst_361 = arith.constant dense<0.000000e+00> : vector<8x32xf32>
    %661 = tpu.matmul %660, %657, %cst_361 {dimension_numbers = #tpu.dot_dimension_numbers<[1], [0], [0], [1], [0, 0, 1, 1], [], []>} : vector<8x64xbf16>, vector<64x32xbf16>, vector<8x32xf32> -> vector<8x32xf32>
    %662 = vector.broadcast %659 : vector<1x32xf32> to vector<8x32xf32>
    %663 = arith.addf %661, %662 : vector<8x32xf32>
    %664 = arith.addf %645, %663 : vector<8x32xf32>
    %c1_362 = arith.constant 1 : index
    %c0_363 = arith.constant 0 : index
    %c0_364 = arith.constant 0 : index
    %665 = vector.load %arg42[%c1_362, %c0_363, %c0_364] : memref<2x1x32xf32, #tpu.memory_space<vmem>>, vector<1x1x32xf32>
    %666 = vector.shape_cast %665 : vector<1x1x32xf32> to vector<1x32xf32>
    %c1_365 = arith.constant 1 : index
    %c0_366 = arith.constant 0 : index
    %c0_367 = arith.constant 0 : index
    %667 = vector.load %arg43[%c1_365, %c0_366, %c0_367] : memref<2x1x32xf32, #tpu.memory_space<vmem>>, vector<1x1x32xf32>
    %668 = vector.shape_cast %667 : vector<1x1x32xf32> to vector<1x32xf32>
    %cst_368 = arith.constant dense<0.000000e+00> : vector<8xf32>
    %669 = vector.multi_reduction <add>, %664, %cst_368 [1] : vector<8x32xf32> to vector<8xf32>
    %670 = vector.shape_cast %669 : vector<8xf32> to vector<8x1xf32>
    %cst_369 = arith.constant 3.200000e+01 : f32
    %671 = vector.broadcast %cst_369 : f32 to vector<8x1xf32>
    %672 = arith.divf %670, %671 : vector<8x1xf32>
    %673 = vector.broadcast %672 : vector<8x1xf32> to vector<8x32xf32>
    %674 = arith.subf %664, %673 : vector<8x32xf32>
    %675 = arith.mulf %674, %674 : vector<8x32xf32>
    %cst_370 = arith.constant dense<0.000000e+00> : vector<8xf32>
    %676 = vector.multi_reduction <add>, %675, %cst_370 [1] : vector<8x32xf32> to vector<8xf32>
    %677 = vector.shape_cast %676 : vector<8xf32> to vector<8x1xf32>
    %cst_371 = arith.constant 3.200000e+01 : f32
    %678 = vector.broadcast %cst_371 : f32 to vector<8x1xf32>
    %679 = arith.divf %677, %678 : vector<8x1xf32>
    %cst_372 = arith.constant 9.99999974E-6 : f32
    %680 = vector.broadcast %cst_372 : f32 to vector<8x1xf32>
    %681 = arith.addf %679, %680 : vector<8x1xf32>
    %682 = math.rsqrt %681 : vector<8x1xf32>
    %683 = vector.broadcast %682 : vector<8x1xf32> to vector<8x32xf32>
    %684 = arith.mulf %674, %683 : vector<8x32xf32>
    %685 = vector.broadcast %666 : vector<1x32xf32> to vector<8x32xf32>
    %686 = arith.mulf %684, %685 : vector<8x32xf32>
    %687 = vector.broadcast %668 : vector<1x32xf32> to vector<8x32xf32>
    %688 = arith.addf %686, %687 : vector<8x32xf32>
    %c0_373 = arith.constant 0 : index
    %c0_374 = arith.constant 0 : index
    %689 = vector.load %arg47[%c0_373, %c0_374] : memref<1x32xf32, #tpu.memory_space<vmem>>, vector<1x32xf32>
    %c0_375 = arith.constant 0 : index
    %c0_376 = arith.constant 0 : index
    %690 = vector.load %arg48[%c0_375, %c0_376] : memref<1x32xf32, #tpu.memory_space<vmem>>, vector<1x32xf32>
    %cst_377 = arith.constant dense<0.000000e+00> : vector<8xf32>
    %691 = vector.multi_reduction <add>, %688, %cst_377 [1] : vector<8x32xf32> to vector<8xf32>
    %692 = vector.shape_cast %691 : vector<8xf32> to vector<8x1xf32>
    %cst_378 = arith.constant 3.200000e+01 : f32
    %693 = vector.broadcast %cst_378 : f32 to vector<8x1xf32>
    %694 = arith.divf %692, %693 : vector<8x1xf32>
    %695 = vector.broadcast %694 : vector<8x1xf32> to vector<8x32xf32>
    %696 = arith.subf %688, %695 : vector<8x32xf32>
    %697 = arith.mulf %696, %696 : vector<8x32xf32>
    %cst_379 = arith.constant dense<0.000000e+00> : vector<8xf32>
    %698 = vector.multi_reduction <add>, %697, %cst_379 [1] : vector<8x32xf32> to vector<8xf32>
    %699 = vector.shape_cast %698 : vector<8xf32> to vector<8x1xf32>
    %cst_380 = arith.constant 3.200000e+01 : f32
    %700 = vector.broadcast %cst_380 : f32 to vector<8x1xf32>
    %701 = arith.divf %699, %700 : vector<8x1xf32>
    %cst_381 = arith.constant 9.99999974E-6 : f32
    %702 = vector.broadcast %cst_381 : f32 to vector<8x1xf32>
    %703 = arith.addf %701, %702 : vector<8x1xf32>
    %704 = math.rsqrt %703 : vector<8x1xf32>
    %705 = vector.broadcast %704 : vector<8x1xf32> to vector<8x32xf32>
    %706 = arith.mulf %696, %705 : vector<8x32xf32>
    %707 = vector.broadcast %689 : vector<1x32xf32> to vector<8x32xf32>
    %708 = arith.mulf %706, %707 : vector<8x32xf32>
    %709 = vector.broadcast %690 : vector<1x32xf32> to vector<8x32xf32>
    %710 = arith.addf %708, %709 : vector<8x32xf32>
    %c0_382 = arith.constant 0 : index
    %c0_383 = arith.constant 0 : index
    %711 = vector.load %arg49[%c0_382, %c0_383] : memref<32x128xbf16, #tpu.memory_space<vmem>>, vector<32x128xbf16>
    %c0_384 = arith.constant 0 : index
    %c0_385 = arith.constant 0 : index
    %712 = vector.load %arg50[%c0_384, %c0_385] : memref<1x128xf32, #tpu.memory_space<vmem>>, vector<1x128xf32>
    %713 = arith.truncf %710 : vector<8x32xf32> to vector<8x32xbf16>
    %cst_386 = arith.constant dense<0.000000e+00> : vector<8x128xf32>
    %714 = tpu.matmul %713, %711, %cst_386 {dimension_numbers = #tpu.dot_dimension_numbers<[1], [0], [0], [1], [0, 0, 1, 1], [], []>} : vector<8x32xbf16>, vector<32x128xbf16>, vector<8x128xf32> -> vector<8x128xf32>
    %715 = vector.broadcast %712 : vector<1x128xf32> to vector<8x128xf32>
    %716 = arith.addf %714, %715 : vector<8x128xf32>
    %c0_387 = arith.constant 0 : index
    %c0_388 = arith.constant 0 : index
    %717 = vector.load %arg51[%c0_387, %c0_388] : memref<8x128xf32, #tpu.memory_space<vmem>>, vector<8x128xf32>
    tpu.vector_store %arg51[%c0_387, %c0_388], %716 {strides = array<i32>} : memref<8x128xf32, #tpu.memory_space<vmem>>, vector<8x128xf32>,
    return
  }
  func.func @transform_0(%arg0: i32) -> (i32, i32) {
    %c0_i32 = arith.constant 0 : i32
    %c0_i32_0 = arith.constant 0 : i32
    return %arg0, %c0_i32 : i32, i32
  }
  func.func @transform_1(%arg0: i32) -> (i32, i32, i32) {
    %c0_i32 = arith.constant 0 : i32
    %c0_i32_0 = arith.constant 0 : i32
    %c0_i32_1 = arith.constant 0 : i32
    %c0_i32_2 = arith.constant 0 : i32
    return %c0_i32, %c0_i32_0, %c0_i32_1 : i32, i32, i32
  }
  func.func @transform_2(%arg0: i32) -> (i32, i32, i32) {
    %c0_i32 = arith.constant 0 : i32
    %c0_i32_0 = arith.constant 0 : i32
    %c0_i32_1 = arith.constant 0 : i32
    %c0_i32_2 = arith.constant 0 : i32
    return %c0_i32, %c0_i32_0, %c0_i32_1 : i32, i32, i32
  }
  func.func @transform_3(%arg0: i32) -> (i32, i32, i32) {
    %c0_i32 = arith.constant 0 : i32
    %c0_i32_0 = arith.constant 0 : i32
    %c0_i32_1 = arith.constant 0 : i32
    %c0_i32_2 = arith.constant 0 : i32
    return %c0_i32, %c0_i32_0, %c0_i32_1 : i32, i32, i32
  }
  func.func @transform_4(%arg0: i32) -> (i32, i32, i32) {
    %c0_i32 = arith.constant 0 : i32
    %c0_i32_0 = arith.constant 0 : i32
    %c0_i32_1 = arith.constant 0 : i32
    %c0_i32_2 = arith.constant 0 : i32
    return %c0_i32, %c0_i32_0, %c0_i32_1 : i32, i32, i32
  }
  func.func @transform_5(%arg0: i32) -> (i32, i32, i32) {
    %c0_i32 = arith.constant 0 : i32
    %c0_i32_0 = arith.constant 0 : i32
    %c0_i32_1 = arith.constant 0 : i32
    %c0_i32_2 = arith.constant 0 : i32
    return %c0_i32, %c0_i32_0, %c0_i32_1 : i32, i32, i32
  }
  func.func @transform_6(%arg0: i32) -> (i32, i32, i32) {
    %c0_i32 = arith.constant 0 : i32
    %c0_i32_0 = arith.constant 0 : i32
    %c0_i32_1 = arith.constant 0 : i32
    %c0_i32_2 = arith.constant 0 : i32
    return %c0_i32, %c0_i32_0, %c0_i32_1 : i32, i32, i32
  }
  func.func @transform_7(%arg0: i32) -> (i32, i32, i32) {
    %c0_i32 = arith.constant 0 : i32
    %c0_i32_0 = arith.constant 0 : i32
    %c0_i32_1 = arith.constant 0 : i32
    %c0_i32_2 = arith.constant 0 : i32
    return %c0_i32, %c0_i32_0, %c0_i32_1 : i32, i32, i32
  }
  func.func @transform_8(%arg0: i32) -> (i32, i32, i32) {
    %c0_i32 = arith.constant 0 : i32
    %c0_i32_0 = arith.constant 0 : i32
    %c0_i32_1 = arith.constant 0 : i32
    %c0_i32_2 = arith.constant 0 : i32
    return %c0_i32, %c0_i32_0, %c0_i32_1 : i32, i32, i32
  }
  func.func @transform_9(%arg0: i32) -> (i32, i32, i32) {
    %c0_i32 = arith.constant 0 : i32
    %c0_i32_0 = arith.constant 0 : i32
    %c0_i32_1 = arith.constant 0 : i32
    %c0_i32_2 = arith.constant 0 : i32
    return %c0_i32, %c0_i32_0, %c0_i32_1 : i32, i32, i32
  }
  func.func @transform_10(%arg0: i32) -> (i32, i32, i32) {
    %c0_i32 = arith.constant 0 : i32
    %c0_i32_0 = arith.constant 0 : i32
    %c0_i32_1 = arith.constant 0 : i32
    %c0_i32_2 = arith.constant 0 : i32
    return %c0_i32, %c0_i32_0, %c0_i32_1 : i32, i32, i32
  }
  func.func @transform_11(%arg0: i32) -> (i32, i32, i32) {
    %c0_i32 = arith.constant 0 : i32
    %c0_i32_0 = arith.constant 0 : i32
    %c0_i32_1 = arith.constant 0 : i32
    %c0_i32_2 = arith.constant 0 : i32
    return %c0_i32, %c0_i32_0, %c0_i32_1 : i32, i32, i32
  }
  func.func @transform_12(%arg0: i32) -> (i32, i32, i32) {
    %c0_i32 = arith.constant 0 : i32
    %c0_i32_0 = arith.constant 0 : i32
    %c0_i32_1 = arith.constant 0 : i32
    %c0_i32_2 = arith.constant 0 : i32
    return %c0_i32, %c0_i32_0, %c0_i32_1 : i32, i32, i32
  }
  func.func @transform_13(%arg0: i32) -> (i32, i32, i32) {
    %c0_i32 = arith.constant 0 : i32
    %c0_i32_0 = arith.constant 0 : i32
    %c0_i32_1 = arith.constant 0 : i32
    %c0_i32_2 = arith.constant 0 : i32
    return %c0_i32, %c0_i32_0, %c0_i32_1 : i32, i32, i32
  }
  func.func @transform_14(%arg0: i32) -> (i32, i32, i32) {
    %c0_i32 = arith.constant 0 : i32
    %c0_i32_0 = arith.constant 0 : i32
    %c0_i32_1 = arith.constant 0 : i32
    %c0_i32_2 = arith.constant 0 : i32
    return %c0_i32, %c0_i32_0, %c0_i32_1 : i32, i32, i32
  }
  func.func @transform_15(%arg0: i32) -> (i32, i32, i32) {
    %c0_i32 = arith.constant 0 : i32
    %c0_i32_0 = arith.constant 0 : i32
    %c0_i32_1 = arith.constant 0 : i32
    %c0_i32_2 = arith.constant 0 : i32
    return %c0_i32, %c0_i32_0, %c0_i32_1 : i32, i32, i32
  }
  func.func @transform_16(%arg0: i32) -> (i32, i32, i32) {
    %c0_i32 = arith.constant 0 : i32
    %c0_i32_0 = arith.constant 0 : i32
    %c0_i32_1 = arith.constant 0 : i32
    %c0_i32_2 = arith.constant 0 : i32
    return %c0_i32, %c0_i32_0, %c0_i32_1 : i32, i32, i32
  }
  func.func @transform_17(%arg0: i32) -> (i32, i32, i32) {
    %c0_i32 = arith.constant 0 : i32
    %c0_i32_0 = arith.constant 0 : i32
    %c0_i32_1 = arith.constant 0 : i32
    %c0_i32_2 = arith.constant 0 : i32
    return %c0_i32, %c0_i32_0, %c0_i32_1 : i32, i32, i32
  }
  func.func @transform_18(%arg0: i32) -> (i32, i32, i32) {
    %c0_i32 = arith.constant 0 : i32
    %c0_i32_0 = arith.constant 0 : i32
    %c0_i32_1 = arith.constant 0 : i32
    %c0_i32_2 = arith.constant 0 : i32
    return %c0_i32, %c0_i32_0, %c0_i32_1 : i32, i32, i32
  }
  func.func @transform_19(%arg0: i32) -> (i32, i32, i32) {
    %c0_i32 = arith.constant 0 : i32
    %c0_i32_0 = arith.constant 0 : i32
    %c0_i32_1 = arith.constant 0 : i32
    %c0_i32_2 = arith.constant 0 : i32
    return %c0_i32, %c0_i32_0, %c0_i32_1 : i32, i32, i32
  }
  func.func @transform_20(%arg0: i32) -> (i32, i32, i32) {
    %c0_i32 = arith.constant 0 : i32
    %c0_i32_0 = arith.constant 0 : i32
    %c0_i32_1 = arith.constant 0 : i32
    %c0_i32_2 = arith.constant 0 : i32
    return %c0_i32, %c0_i32_0, %c0_i32_1 : i32, i32, i32
  }
  func.func @transform_21(%arg0: i32) -> (i32, i32, i32) {
    %c0_i32 = arith.constant 0 : i32
    %c0_i32_0 = arith.constant 0 : i32
    %c0_i32_1 = arith.constant 0 : i32
    %c0_i32_2 = arith.constant 0 : i32
    return %c0_i32, %c0_i32_0, %c0_i32_1 : i32, i32, i32
  }
  func.func @transform_22(%arg0: i32) -> (i32, i32, i32) {
    %c0_i32 = arith.constant 0 : i32
    %c0_i32_0 = arith.constant 0 : i32
    %c0_i32_1 = arith.constant 0 : i32
    %c0_i32_2 = arith.constant 0 : i32
    return %c0_i32, %c0_i32_0, %c0_i32_1 : i32, i32, i32
  }
  func.func @transform_23(%arg0: i32) -> (i32, i32, i32) {
    %c0_i32 = arith.constant 0 : i32
    %c0_i32_0 = arith.constant 0 : i32
    %c0_i32_1 = arith.constant 0 : i32
    %c0_i32_2 = arith.constant 0 : i32
    return %c0_i32, %c0_i32_0, %c0_i32_1 : i32, i32, i32
  }
  func.func @transform_24(%arg0: i32) -> (i32, i32, i32) {
    %c0_i32 = arith.constant 0 : i32
    %c0_i32_0 = arith.constant 0 : i32
    %c0_i32_1 = arith.constant 0 : i32
    %c0_i32_2 = arith.constant 0 : i32
    return %c0_i32, %c0_i32_0, %c0_i32_1 : i32, i32, i32
  }
  func.func @transform_25(%arg0: i32) -> (i32, i32, i32) {
    %c0_i32 = arith.constant 0 : i32
    %c0_i32_0 = arith.constant 0 : i32
    %c0_i32_1 = arith.constant 0 : i32
    %c0_i32_2 = arith.constant 0 : i32
    return %c0_i32, %c0_i32_0, %c0_i32_1 : i32, i32, i32
  }
  func.func @transform_26(%arg0: i32) -> (i32, i32, i32) {
    %c0_i32 = arith.constant 0 : i32
    %c0_i32_0 = arith.constant 0 : i32
    %c0_i32_1 = arith.constant 0 : i32
    %c0_i32_2 = arith.constant 0 : i32
    return %c0_i32, %c0_i32_0, %c0_i32_1 : i32, i32, i32
  }
  func.func @transform_27(%arg0: i32) -> (i32, i32, i32) {
    %c0_i32 = arith.constant 0 : i32
    %c0_i32_0 = arith.constant 0 : i32
    %c0_i32_1 = arith.constant 0 : i32
    %c0_i32_2 = arith.constant 0 : i32
    return %c0_i32, %c0_i32_0, %c0_i32_1 : i32, i32, i32
  }
  func.func @transform_28(%arg0: i32) -> (i32, i32, i32) {
    %c0_i32 = arith.constant 0 : i32
    %c0_i32_0 = arith.constant 0 : i32
    %c0_i32_1 = arith.constant 0 : i32
    %c0_i32_2 = arith.constant 0 : i32
    return %c0_i32, %c0_i32_0, %c0_i32_1 : i32, i32, i32
  }
  func.func @transform_29(%arg0: i32) -> (i32, i32, i32) {
    %c0_i32 = arith.constant 0 : i32
    %c0_i32_0 = arith.constant 0 : i32
    %c0_i32_1 = arith.constant 0 : i32
    %c0_i32_2 = arith.constant 0 : i32
    return %c0_i32, %c0_i32_0, %c0_i32_1 : i32, i32, i32
  }
  func.func @transform_30(%arg0: i32) -> (i32, i32, i32) {
    %c0_i32 = arith.constant 0 : i32
    %c0_i32_0 = arith.constant 0 : i32
    %c0_i32_1 = arith.constant 0 : i32
    %c0_i32_2 = arith.constant 0 : i32
    return %c0_i32, %c0_i32_0, %c0_i32_1 : i32, i32, i32
  }
  func.func @transform_31(%arg0: i32) -> (i32, i32, i32) {
    %c0_i32 = arith.constant 0 : i32
    %c0_i32_0 = arith.constant 0 : i32
    %c0_i32_1 = arith.constant 0 : i32
    %c0_i32_2 = arith.constant 0 : i32
    return %c0_i32, %c0_i32_0, %c0_i32_1 : i32, i32, i32
  }
  func.func @transform_32(%arg0: i32) -> (i32, i32, i32) {
    %c0_i32 = arith.constant 0 : i32
    %c0_i32_0 = arith.constant 0 : i32
    %c0_i32_1 = arith.constant 0 : i32
    %c0_i32_2 = arith.constant 0 : i32
    return %c0_i32, %c0_i32_0, %c0_i32_1 : i32, i32, i32
  }
  func.func @transform_33(%arg0: i32) -> (i32, i32, i32) {
    %c0_i32 = arith.constant 0 : i32
    %c0_i32_0 = arith.constant 0 : i32
    %c0_i32_1 = arith.constant 0 : i32
    %c0_i32_2 = arith.constant 0 : i32
    return %c0_i32, %c0_i32_0, %c0_i32_1 : i32, i32, i32
  }
  func.func @transform_34(%arg0: i32) -> (i32, i32, i32) {
    %c0_i32 = arith.constant 0 : i32
    %c0_i32_0 = arith.constant 0 : i32
    %c0_i32_1 = arith.constant 0 : i32
    %c0_i32_2 = arith.constant 0 : i32
    return %c0_i32, %c0_i32_0, %c0_i32_1 : i32, i32, i32
  }
  func.func @transform_35(%arg0: i32) -> (i32, i32, i32) {
    %c0_i32 = arith.constant 0 : i32
    %c0_i32_0 = arith.constant 0 : i32
    %c0_i32_1 = arith.constant 0 : i32
    %c0_i32_2 = arith.constant 0 : i32
    return %c0_i32, %c0_i32_0, %c0_i32_1 : i32, i32, i32
  }
  func.func @transform_36(%arg0: i32) -> (i32, i32, i32) {
    %c0_i32 = arith.constant 0 : i32
    %c0_i32_0 = arith.constant 0 : i32
    %c0_i32_1 = arith.constant 0 : i32
    %c0_i32_2 = arith.constant 0 : i32
    return %c0_i32, %c0_i32_0, %c0_i32_1 : i32, i32, i32
  }
  func.func @transform_37(%arg0: i32) -> (i32, i32, i32) {
    %c0_i32 = arith.constant 0 : i32
    %c0_i32_0 = arith.constant 0 : i32
    %c0_i32_1 = arith.constant 0 : i32
    %c0_i32_2 = arith.constant 0 : i32
    return %c0_i32, %c0_i32_0, %c0_i32_1 : i32, i32, i32
  }
  func.func @transform_38(%arg0: i32) -> (i32, i32, i32) {
    %c0_i32 = arith.constant 0 : i32
    %c0_i32_0 = arith.constant 0 : i32
    %c0_i32_1 = arith.constant 0 : i32
    %c0_i32_2 = arith.constant 0 : i32
    return %c0_i32, %c0_i32_0, %c0_i32_1 : i32, i32, i32
  }
  func.func @transform_39(%arg0: i32) -> (i32, i32, i32) {
    %c0_i32 = arith.constant 0 : i32
    %c0_i32_0 = arith.constant 0 : i32
    %c0_i32_1 = arith.constant 0 : i32
    %c0_i32_2 = arith.constant 0 : i32
    return %c0_i32, %c0_i32_0, %c0_i32_1 : i32, i32, i32
  }
  func.func @transform_40(%arg0: i32) -> (i32, i32, i32) {
    %c0_i32 = arith.constant 0 : i32
    %c0_i32_0 = arith.constant 0 : i32
    %c0_i32_1 = arith.constant 0 : i32
    %c0_i32_2 = arith.constant 0 : i32
    return %c0_i32, %c0_i32_0, %c0_i32_1 : i32, i32, i32
  }
  func.func @transform_41(%arg0: i32) -> (i32, i32, i32) {
    %c0_i32 = arith.constant 0 : i32
    %c0_i32_0 = arith.constant 0 : i32
    %c0_i32_1 = arith.constant 0 : i32
    %c0_i32_2 = arith.constant 0 : i32
    return %c0_i32, %c0_i32_0, %c0_i32_1 : i32, i32, i32
  }
  func.func @transform_42(%arg0: i32) -> (i32, i32, i32) {
    %c0_i32 = arith.constant 0 : i32
    %c0_i32_0 = arith.constant 0 : i32
    %c0_i32_1 = arith.constant 0 : i32
    %c0_i32_2 = arith.constant 0 : i32
    return %c0_i32, %c0_i32_0, %c0_i32_1 : i32, i32, i32
  }
  func.func @transform_43(%arg0: i32) -> (i32, i32) {
    %c0_i32 = arith.constant 0 : i32
    %c0_i32_0 = arith.constant 0 : i32
    %c0_i32_1 = arith.constant 0 : i32
    return %c0_i32, %c0_i32_0 : i32, i32
  }
  func.func @transform_44(%arg0: i32) -> (i32, i32) {
    %c0_i32 = arith.constant 0 : i32
    %c0_i32_0 = arith.constant 0 : i32
    %c0_i32_1 = arith.constant 0 : i32
    return %c0_i32, %c0_i32_0 : i32, i32
  }
  func.func @transform_45(%arg0: i32) -> (i32, i32) {
    %c0_i32 = arith.constant 0 : i32
    %c0_i32_0 = arith.constant 0 : i32
    %c0_i32_1 = arith.constant 0 : i32
    return %c0_i32, %c0_i32_0 : i32, i32
  }
  func.func @transform_46(%arg0: i32) -> (i32, i32) {
    %c0_i32 = arith.constant 0 : i32
    %c0_i32_0 = arith.constant 0 : i32
    %c0_i32_1 = arith.constant 0 : i32
    return %c0_i32, %c0_i32_0 : i32, i32
  }
  func.func @transform_47(%arg0: i32) -> (i32, i32) {
    %c0_i32 = arith.constant 0 : i32
    %c0_i32_0 = arith.constant 0 : i32
    %c0_i32_1 = arith.constant 0 : i32
    return %c0_i32, %c0_i32_0 : i32, i32
  }
  func.func @transform_48(%arg0: i32) -> (i32, i32) {
    %c0_i32 = arith.constant 0 : i32
    %c0_i32_0 = arith.constant 0 : i32
    %c0_i32_1 = arith.constant 0 : i32
    return %c0_i32, %c0_i32_0 : i32, i32
  }
  func.func @transform_49(%arg0: i32) -> (i32, i32) {
    %c0_i32 = arith.constant 0 : i32
    %c0_i32_0 = arith.constant 0 : i32
    %c0_i32_1 = arith.constant 0 : i32
    return %c0_i32, %c0_i32_0 : i32, i32
  }
  func.func @transform_50(%arg0: i32) -> (i32, i32) {
    %c0_i32 = arith.constant 0 : i32
    %c0_i32_0 = arith.constant 0 : i32
    return %arg0, %c0_i32 : i32, i32
  }
}

</mosaic_0001>

<bundles_post_ra>
// kernel: qa_model_forward.1
= control target key start
LH: loop header
LB: loop body
LE: loop exit
PB: predicated region body
PF: predicated region fallthrough
CT: control target
= control target key end

     0   :  { %s13847_s6 = smov 1   ;;  %s13848_s10 = smov 2   ;;  %s15778_s0 = inlined_call_operand.smem [shape: u32[51], index: -1, kind: input, shape index: {}] }
   0x1   :  { %s13952_s5 = sld [smem:[%s15778_s0]]   ;;  %s13849_s14 = smov 3  }
   0x2   :  { %s13957_s9 = sld [smem:[%s15778_s0 + %s13847_s6]]   ;;  %s13850_s18 = smov 4  }
   0x3   :  { %s13962_s13 = sld [smem:[%s15778_s0 + %s13848_s10]]   ;;  %s13851_s22 = smov 5  }
   0x4   :  { %s13967_s17 = sld [smem:[%s15778_s0 + %s13849_s14]]   ;;  %s13852_s26 = smov 6  }
   0x5   :  { %s13972_s21 = sld [smem:[%s15778_s0 + %s13850_s18]]   ;;  %s13853_s30 = smov 7  }
   0x6   :  { %s13977_s25 = sld [smem:[%s15778_s0 + %s13851_s22]]   ;;  %s13854_s4 = smov 8  }
   0x7   :  { %15818 = sst [smem:[#allocation65_spill]] %s13952_s5  ;;  %s13855_s10 = smov 9  }
   0x8   :  { %15819 = sst [smem:[#allocation66_spill]] %s13957_s9  ;;  %s13856_s15 = smov 10  }
   0x9   :  { %15820 = sst [smem:[#allocation67_spill]] %s13962_s13  ;;  %s13857_s20 = smov 11  }
   0xa   :  { %15821 = sst [smem:[#allocation68_spill]] %s13967_s17  ;;  %s13859_s1 = smov 13  }
   0xb   :  { %15822 = sst [smem:[#allocation69_spill]] %s13972_s21  ;;  %s13860_s7 = smov 14  }
   0xc   :  { %15823 = sst [smem:[#allocation70_spill]] %s13977_s25  ;;  %s13862_s22 = smov 16  }
   0xd   :  { %s13982_s29 = sld [smem:[%s15778_s0 + %s13852_s26]]   ;;  %s13858_s26 = smov 12  }
   0xe   :  { %s13987_s3 = sld [smem:[%s15778_s0 + %s13853_s30]]   ;;  %s13863_s28 = smov 17  }
   0xf   :  { %s13992_s8 = sld [smem:[%s15778_s0 + %s13854_s4]]  }
  0x10   :  { %s13997_s14 = sld [smem:[%s15778_s0 + %s13855_s10]]  }
  0x11   :  { %s14002_s19 = sld [smem:[%s15778_s0 + %s13856_s15]]   ;;  %s13861_s15 = smov 15  }
  0x12   :  { %s14007_s24 = sld [smem:[%s15778_s0 + %s13857_s20]]  }
  0x13   :  { %15824 = sst [smem:[#allocation71_spill]] %s13982_s29 }
  0x14   :  { %15825 = sst [smem:[#allocation72_spill]] %s13987_s3 }
  0x15   :  { %15826 = sst [smem:[#allocation73_spill]] %s13992_s8 }
  0x16   :  { %15827 = sst [smem:[#allocation74_spill]] %s13997_s14 }
  0x17   :  { %15828 = sst [smem:[#allocation75_spill]] %s14002_s19 }
  0x18   :  { %15829 = sst [smem:[#allocation76_spill]] %s14007_s24 }
  0x19   :  { %s14012_s30 = sld [smem:[%s15778_s0 + %s13858_s26]]  }
  0x1a   :  { %s14017_s6 = sld [smem:[%s15778_s0 + %s13859_s1]]  }
  0x1b   :  { %s14022_s12 = sld [smem:[%s15778_s0 + %s13860_s7]]   ;;  %s13864_s7 = smov 18  }
  0x1c   :  { %s14027_s20 = sld [smem:[%s15778_s0 + %s13861_s15]]   ;;  %s13865_s15 = smov 19  }
  0x1d   :  { %s14032_s27 = sld [smem:[%s15778_s0 + %s13862_s22]]   ;;  %s13866_s22 = smov 20  }
  0x1e   :  { %s14037_s4 = sld [smem:[%s15778_s0 + %s13863_s28]]   ;;  %s13867_s28 = smov 21  }
  0x1f   :  { %s14047_s24 = sld [smem:[%s15778_s0 + %s13865_s15]]   ;;  %s13869_s15 = smov 23  }
  0x20   :  { %15830 = sst [smem:[#allocation77_spill]] %s14017_s6 }
  0x21   :  { %15831 = sst [smem:[#allocation78_spill]] %s14022_s12 }
  0x22   :  { %s14042_s6 = sld [smem:[%s15778_s0 + %s13864_s7]]   ;;  %s13868_s7 = smov 22  }
  0x23   :  { %15832 = sst [smem:[#allocation79_spill]] %s14032_s27 }
  0x24   :  { %15833 = sst [smem:[#allocation80_spill]] %s14037_s4 }
  0x25   :  { %15835 = sst [smem:[#allocation82_spill]] %s14047_s24 }
  0x26   :  { %s14052_s8 = sld [smem:[%s15778_s0 + %s13866_s22]]   ;;  %s13870_s22 = smov 24  }
  0x27   :  { %s14057_s4 = sld [smem:[%s15778_s0 + %s13867_s28]]   ;;  %s13871_s28 = smov 25  }
  0x28   :  { %15834 = sst [smem:[#allocation81_spill]] %s14042_s6 }
  0x29   :  { %s14062_s3 = sld [smem:[%s15778_s0 + %s13868_s7]]   ;;  %s13872_s7 = smov 26  }
  0x2a   :  { %s14067_s24 = sld [smem:[%s15778_s0 + %s13869_s15]]   ;;  %s13873_s15 = smov 27  }
  0x2b   :  { %s14072_s29 = sld [smem:[%s15778_s0 + %s13870_s22]]   ;;  %s13874_s22 = smov 28  }
  0x2c   :  { %15836 = sst [smem:[#allocation83_spill]] %s14052_s8 }
  0x2d   :  { %15837 = sst [smem:[#allocation84_spill]] %s14057_s4 }
  0x2e   :  { %s14077_s4 = sld [smem:[%s15778_s0 + %s13871_s28]]   ;;  %s13875_s28 = smov 29  }
  0x2f   :  { %15838 = sst [smem:[#allocation85_spill]] %s14062_s3 }
  0x30   :  { %15839 = sst [smem:[#allocation86_spill]] %s14067_s24 }
  0x31   :  { %s14082_s13 = sld [smem:[%s15778_s0 + %s13872_s7]]   ;;  %s13876_s7 = smov 30  }
  0x32   :  { %s14087_s25 = sld [smem:[%s15778_s0 + %s13873_s15]]   ;;  %s13877_s15 = smov 31  }
  0x33   :  { %s14092_s17 = sld [smem:[%s15778_s0 + %s13874_s22]]   ;;  %s13878_s22 = smov 32  }
  0x34   :  { %15840 = sst [smem:[#allocation87_spill]] %s14077_s4 }
  0x35   :  { %s14097_s9 = sld [smem:[%s15778_s0 + %s13875_s28]]   ;;  %s13879_s28 = smov 33  }
  0x36   :  { %s14102_s5 = sld [smem:[%s15778_s0 + %s13876_s7]]   ;;  %s13880_s7 = smov 34  }
  0x37   :  { %s14112_s4 = sld [smem:[%s15778_s0 + %s13878_s22]]   ;;  %s13882_s22 = smov 36  }
  0x38   :  { %15841 = sst [smem:[#allocation88_spill]] %s14087_s25 }
  0x39   :  { %s14107_s25 = sld [smem:[%s15778_s0 + %s13877_s15]]   ;;  %s13881_s15 = smov 35  }
  0x3a   :  { %s14122_s24 = sld [smem:[%s15778_s0 + %s13880_s7]]   ;;  %s13884_s7 = smov 38  }
  0x3b   :  { %15842 = sst [smem:[#allocation89_spill]] %s14097_s9 }
  0x3c   :  { %15843 = sst [smem:[#allocation90_spill]] %s14102_s5 }
  0x3d   :  { %15845 = sst [smem:[#allocation92_spill]] %s14112_s4 }
  0x3e   :  { %s14117_s9 = sld [smem:[%s15778_s0 + %s13879_s28]]   ;;  %s13883_s28 = smov 37  }
  0x3f   :  { %15844 = sst [smem:[#allocation91_spill]] %s14107_s25 }
  0x40   :  { %s14127_s25 = sld [smem:[%s15778_s0 + %s13881_s15]]   ;;  %s13885_s15 = smov 39  }
  0x41   :  { %s14132_s8 = sld [smem:[%s15778_s0 + %s13882_s22]]   ;;  %s13886_s22 = smov 40  }
  0x42   :  { %s14142_s27 = sld [smem:[%s15778_s0 + %s13884_s7]]   ;;  %s13888_s7 = smov 42  }
  0x43   :  { %s14152_s12 = sld [smem:[%s15778_s0 + %s13886_s22]]   ;;  %s13890_s22 = smov 44  }
  0x44   :  { %15846 = sst [smem:[#allocation93_spill]] %s14117_s9 }
  0x45   :  { %s14137_s9 = sld [smem:[%s15778_s0 + %s13883_s28]]   ;;  %s13887_s28 = smov 41  }
  0x46   :  { %15847 = sst [smem:[#allocation94_spill]] %s14127_s25 }
  0x47   :  { %s14147_s25 = sld [smem:[%s15778_s0 + %s13885_s15]]   ;;  %s13889_s15 = smov 43  }
  0x48   :  { %s14162_s19 = sld [smem:[%s15778_s0 + %s13888_s7]]   ;;  %s13892_s7 = smov 46  }
  0x49   :  { %15850 = sst [smem:[#allocation97_spill]] %s14152_s12 }
  0x4a   :  { %s14172_s12 = sld [smem:[%s15778_s0 + %s13890_s22]]   ;;  %s13894_s22 = smov 48  }
  0x4b   :  { %15848 = sst [smem:[#allocation95_spill]] %s14137_s9 }
  0x4c   :  { %s14157_s9 = sld [smem:[%s15778_s0 + %s13887_s28]]   ;;  %s13891_s28 = smov 45  }
  0x4d   :  { %15849 = sst [smem:[#allocation96_spill]] %s14147_s25 }
  0x4e   :  { %15851 = sst [smem:[#allocation98_spill]] %s14162_s19 }
  0x4f   :  { %s14167_s25 = sld [smem:[%s15778_s0 + %s13889_s15]]   ;;  %s13893_s15 = smov 47  }
  0x50   :  { %15853 = sst [smem:[#allocation100_spill]] %s14172_s12 }
  0x51   :  { %s14177_s21 = sld [smem:[%s15778_s0 + %s13891_s28]]   ;;  %s13895_s28 = smov 49  }
  0x52   :  { %s14182_s19 = sld [smem:[%s15778_s0 + %s13892_s7]]   ;;  %s13896_s7 = smov 50  }
  0x53   :  { %s14192_s12 = sld [smem:[%s15778_s0 + %s13894_s22]]  }
  0x55   :  { %15852 = sst [smem:[#allocation99_spill]] %s14167_s25 }
  0x56   :  { %s14187_s25 = sld [smem:[%s15778_s0 + %s13893_s15]]  }
  0x57   :  { %15854 = sst [smem:[#allocation101_spill]] %s14177_s21 }
  0x58   :  { %15855 = sst [smem:[#allocation102_spill]] %s14182_s19 }
  0x59   :  { %s14197_s21 = sld [smem:[%s15778_s0 + %s13895_s28]]  }
  0x5a   :  { %s14202_s19 = sld [smem:[%s15778_s0 + %s13896_s7]]  }
  0x5b   :  { %106 = vsyncpa [#allocation3], 0 }
  0x5c   :  { %107 = vsyncpa [#allocation5], 0 }
  0x5d   :  { %108 = vsyncpa [#allocation8], 0 }
  0x5e   :  { %109 = vsyncpa [#allocation11], 0 }
  0x5f   :  { %110 = vsyncpa [#allocation14], 0 }
  0x60   :  { %111 = vsyncpa [#allocation17], 0 }
  0x61   :  { %112 = vsyncpa [#allocation20], 0 }
  0x62   :  { %113 = vsyncpa [#allocation23], 0 }
  0x63   :  { %114 = vsyncpa [#allocation26], 0 }
  0x64   :  { %115 = vsyncpa [#allocation29], 0 }
  0x65   :  { %116 = vsyncpa [#allocation32], 0 }
  0x66   :  { %117 = vsyncpa [#allocation35], 0 }
  0x67   :  { %118 = vsyncpa [#allocation38], 0 }
  0x68   :  { %119 = vsyncpa [#allocation41], 0 }
  0x69   :  { %120 = vsyncpa [#allocation44], 0 }
  0x6a   :  { %121 = vsyncpa [#allocation47], 0  ;;  %s14204_s15 = smov 0  }
  0x6b LB: > { %s14210_s0 = sadd.s32 4294967295, %s13845_s15   ;;  %p11190_p0 = scmp.ge.s32.totalorder %s13845_s15, 1  ;;  %s13845_s15 = sphi %s14204_s15, %s127_s15  }
  0x6c   : > { %p1213_p1 = scmp.lt.s32.totalorder %s13845_s15, 3  ;;  %p15793_p2 = scmp.eq.s32.totalorder %s14210_s0, 0 }
  0x6d   : > { %s13897_s18 = smov [#allocation4]   ;;  %s13898_s23 = smov [#allocation7]  }
  0x6e   : > { %p14215_p3 = pnand %p11190_p0, %p1213_p1  ;;  %s1259_s22 = sshll.u32 %s13897_s18, 4  ;;  %s1260_s22 = int_to_ptr.vmem [resolvable:$true] %s1259_s22 }
  0x6f   : > { %s1288_s26 = sshll.u32 %s13898_s23, 4  ;;  %s13899_s1 = smov [#allocation10]   ;;  %s14221_s26 = int_to_ptr.vmem [resolvable:$true] %s1288_s26 }
  0x70   : > { %s15856_s16 = scalar_select %p14215_p3, 1, 0 }
  0x71   : > { %p12505_p4 = pneg %p14215_p3  ;;  %s1317_s2 = sshll.u32 %s13899_s1, 4  ;;  %s14229_s2 = int_to_ptr.vmem [resolvable:$true] %s1317_s2 }
  0x72   : > { %s12980_s10 = scalar_lea.vmem %s1260_s22, 32  ;;  %p12988_p10 = scmp.lt.s32.totalorder %s1260_s22, %s1260_s22 }
  0x73   : > { %p14225_p5 = pnand %p15793_p2, %p12505_p4  ;;  %p12981_p7 = scmp.ne.s32.totalorder %s1260_s22, %s12980_s10 }
  0x74   : > { %p12989_p11 = scmp.lt.s32.totalorder %s12980_s10, %s12980_s10 }
  0x75   : > { %p14233_p6 = pneg %p14225_p5 }
  0x76   : > { %p12990_p12 = por %p12989_p11, %p12988_p10 }
  0x77   : > { %p12983_p8 = pnand %p12981_p7, %p14233_p6 }
  0x79   : > { %p12984_p9 = pneg %p12983_p8 }
  0x7b   : > { %p12991_p13 = pnand %p12990_p12, %p12984_p9 }
  0x7d   : > { %12994 = shalt.err (!%p12991_p13)
}
  0x7e   : > { %s15795_s11 = smov 16   ;;  %s15859_s14 = sld [smem:[#allocation74_spill]] }
  0x7f   : > { %s15797_s18 = smov 1   ;;  %s13006_s23 = scalar_lea.vmem %s14221_s26, 32 }
  0x80   : > { %p13007_p0 = scmp.ne.s32.totalorder %s14221_s26, %s13006_s23  ;;  %p13014_p7 = scmp.lt.s32.totalorder %s14221_s26, %s14221_s26 }
  0x81   : > { %p13015_p8 = scmp.lt.s32.totalorder %s13006_s23, %s13006_s23 }
  0x82   : > { %p13009_p1 = pnand %p13007_p0, %p14233_p6 }
  0x83   : > { %p13016_p9 = por %p13015_p8, %p13014_p7 }
  0x84   : > { %12511 = dma.hbm_to_vmem [thread:$0]  (!%p14225_p5), %s15859_s14, 32, %s1260_s22, [#allocation5], %s15795_s11, %s15795_s11, %s15797_s18  }
  0x85   : > { %p13010_p4 = pneg %p13009_p1 }
  0x87   : > { %p13017_p10 = pnand %p13016_p9, %p13010_p4 }
  0x89   : > { %13020 = shalt.err (!%p13017_p10)
}
  0x8a   : > { %12517 = dma.hbm_to_vmem [thread:$0]  (!%p14225_p5), %s14012_s30, 32, %s14221_s26, [#allocation8], %s15795_s11, %s15795_s11, %s15797_s18  }
  0x8b   : > { %s13032_s22 = scalar_lea.vmem %s14229_s2, 32  ;;  %p13040_p0 = scmp.lt.s32.totalorder %s14229_s2, %s14229_s2 }
  0x8c   : > { %p13033_p11 = scmp.ne.s32.totalorder %s14229_s2, %s13032_s22  ;;  %p13041_p1 = scmp.lt.s32.totalorder %s13032_s22, %s13032_s22 }
  0x8e   : > { %p13035_p12 = pnand %p13033_p11, %p14233_p6  ;;  %p13042_p4 = por %p13041_p1, %p13040_p0 }
  0x90   : > { %p13036_p13 = pneg %p13035_p12 }
  0x92   : > { %p13043_p7 = pnand %p13042_p4, %p13036_p13 }
  0x94   : > { %13046 = shalt.err (!%p13043_p7)
}
  0x95   : > { %12523 = dma.hbm_to_vmem [thread:$0]  (!%p14225_p5), %s14027_s20, 32, %s14229_s2, [#allocation11], %s15795_s11, %s15795_s11, %s15797_s18  }
  0x96   : > { %s13902_s26 = smov [#allocation13]   ;;  %s13903_s10 = smov [#allocation16]  }
  0x97   : > { %s1346_s1 = sshll.u32 %s13902_s26, 4  ;;  %s1378_s23 = sshll.u32 %s13903_s10, 4  ;;  %s1347_s1 = int_to_ptr.vmem [resolvable:$true] %s1346_s1  ;;  %s1379_s23 = int_to_ptr.vmem [resolvable:$true] %s1378_s23 }
  0x98   : > { %s13058_s14 = scalar_lea.vmem %s1347_s1, 32  ;;  %p13066_p11 = scmp.lt.s32.totalorder %s1347_s1, %s1347_s1 }
  0x99   : > { %p13059_p8 = scmp.ne.s32.totalorder %s1347_s1, %s13058_s14  ;;  %p13067_p12 = scmp.lt.s32.totalorder %s13058_s14, %s13058_s14 }
  0x9b   : > { %p13061_p9 = pnand %p13059_p8, %p14233_p6  ;;  %p13068_p13 = por %p13067_p12, %p13066_p11 }
  0x9d   : > { %p13062_p10 = pneg %p13061_p9 }
  0x9f   : > { %p13069_p0 = pnand %p13068_p13, %p13062_p10 }
  0xa1   : > { %13072 = shalt.err (!%p13069_p0)
}
  0xa2   : > { %s15860_s6 = sld [smem:[#allocation81_spill]]  ;;  %s13084_s2 = scalar_lea.vmem %s1379_s23, 32 }
  0xa3   : > { %p13085_p1 = scmp.ne.s32.totalorder %s1379_s23, %s13084_s2  ;;  %p13092_p8 = scmp.lt.s32.totalorder %s1379_s23, %s1379_s23 }
  0xa4   : > { %p13093_p9 = scmp.lt.s32.totalorder %s13084_s2, %s13084_s2 }
  0xa5   : > { %p13087_p4 = pnand %p13085_p1, %p14233_p6 }
  0xa6   : > { %p13094_p2 = por %p13093_p9, %p13092_p8 }
  0xa7   : > { %p13088_p7 = pneg %p13087_p4 }
  0xa8   : > { %12529 = dma.hbm_to_vmem [thread:$0]  (!%p14225_p5), %s15860_s6, 32, %s1347_s1, [#allocation14], %s15795_s11, %s15795_s11, %s15797_s18  }
  0xa9   : > { %p13095_p11 = pnand %p13094_p2, %p13088_p7 }
  0xab   : > { %13098 = shalt.err (!%p13095_p11)
}
  0xac   : > { %s15861_s3 = sld [smem:[#allocation85_spill]]  ;;  %s13904_s14 = smov [#allocation19]  }
  0xad   : > { %s1404_s22 = sshll.u32 %s13904_s14, 4  ;;  %s13905_s26 = smov [#allocation22]   ;;  %s1405_s22 = int_to_ptr.vmem [resolvable:$true] %s1404_s22 }
  0xae   : > { %s1430_s1 = sshll.u32 %s13905_s26, 4  ;;  %s13110_s10 = scalar_lea.vmem %s1405_s22, 32  ;;  %s1431_s1 = int_to_ptr.vmem [resolvable:$true] %s1430_s1 }
  0xaf   : > { %p13111_p10 = scmp.ne.s32.totalorder %s1405_s22, %s13110_s10  ;;  %p13118_p2 = scmp.lt.s32.totalorder %s1405_s22, %s1405_s22 }
  0xb0   : > { %p13119_p0 = scmp.lt.s32.totalorder %s13110_s10, %s13110_s10 }
  0xb1   : > { %p13113_p12 = pnand %p13111_p10, %p14233_p6 }
  0xb2   : > { %12535 = dma.hbm_to_vmem [thread:$0]  (!%p14225_p5), %s15861_s3, 32, %s1379_s23, [#allocation17], %s15795_s11, %s15795_s11, %s15797_s18  }
  0xb3   : > { %p13114_p13 = pneg %p13113_p12  ;;  %p13120_p1 = por %p13119_p0, %p13118_p2 }
  0xb5   : > { %p13121_p4 = pnand %p13120_p1, %p13114_p13 }
  0xb7   : > { %13124 = shalt.err (!%p13121_p4)
}
  0xb8   : > { %12541 = dma.hbm_to_vmem [thread:$0]  (!%p14225_p5), %s14072_s29, 32, %s1405_s22, [#allocation20], %s15795_s11, %s15795_s11, %s15797_s18  }
  0xb9   : > { %s13136_s23 = scalar_lea.vmem %s1431_s1, 32  ;;  %p13144_p11 = scmp.lt.s32.totalorder %s1431_s1, %s1431_s1 }
  0xba   : > { %p13137_p7 = scmp.ne.s32.totalorder %s1431_s1, %s13136_s23  ;;  %p13145_p10 = scmp.lt.s32.totalorder %s13136_s23, %s13136_s23 }
  0xbc   : > { %p13139_p8 = pnand %p13137_p7, %p14233_p6  ;;  %p13146_p12 = por %p13145_p10, %p13144_p11 }
  0xbe   : > { %p13140_p9 = pneg %p13139_p8 }
  0xc0   : > { %p13147_p2 = pnand %p13146_p12, %p13140_p9 }
  0xc2   : > { %13150 = shalt.err (!%p13147_p2)
}
  0xc3   : > { %12547 = dma.hbm_to_vmem [thread:$0]  (!%p14225_p5), %s14082_s13, 32, %s1431_s1, [#allocation23], %s15795_s11, %s15795_s11, %s15797_s18  }
  0xc4   : > { %s13906_s2 = smov [#allocation25]   ;;  %s13907_s22 = smov [#allocation28]  }
  0xc5   : > { %s1456_s14 = sshll.u32 %s13906_s2, 4  ;;  %s1482_s26 = sshll.u32 %s13907_s22, 4  ;;  %s1457_s14 = int_to_ptr.vmem [resolvable:$true] %s1456_s14  ;;  %s1483_s26 = int_to_ptr.vmem [resolvable:$true] %s1482_s26 }
  0xc6   : > { %s13162_s10 = scalar_lea.vmem %s1457_s14, 32  ;;  %p13170_p4 = scmp.lt.s32.totalorder %s1457_s14, %s1457_s14 }
  0xc7   : > { %p13163_p13 = scmp.ne.s32.totalorder %s1457_s14, %s13162_s10  ;;  %p13171_p7 = scmp.lt.s32.totalorder %s13162_s10, %s13162_s10 }
  0xc9   : > { %p13165_p0 = pnand %p13163_p13, %p14233_p6  ;;  %p13172_p8 = por %p13171_p7, %p13170_p4 }
  0xcb   : > { %p13166_p1 = pneg %p13165_p0 }
  0xcd   : > { %p13173_p9 = pnand %p13172_p8, %p13166_p1 }
  0xcf   : > { %13176 = shalt.err (!%p13173_p9)
}
  0xd0   : > { %12553 = dma.hbm_to_vmem [thread:$0]  (!%p14225_p5), %s14092_s17, 32, %s1457_s14, [#allocation26], %s15795_s11, %s15795_s11, %s15797_s18  }
  0xd1   : > { %s13188_s1 = scalar_lea.vmem %s1483_s26, 32  ;;  %p13196_p2 = scmp.lt.s32.totalorder %s1483_s26, %s1483_s26 }
  0xd2   : > { %p13189_p11 = scmp.ne.s32.totalorder %s1483_s26, %s13188_s1  ;;  %p13197_p13 = scmp.lt.s32.totalorder %s13188_s1, %s13188_s1 }
  0xd4   : > { %p13191_p10 = pnand %p13189_p11, %p14233_p6  ;;  %p13198_p0 = por %p13197_p13, %p13196_p2 }
  0xd6   : > { %p13192_p12 = pneg %p13191_p10 }
  0xd8   : > { %p13199_p4 = pnand %p13198_p0, %p13192_p12 }
  0xda   : > { %13202 = shalt.err (!%p13199_p4)
}
  0xdb   : > { %s15862_s5 = sld [smem:[#allocation90_spill]]  ;;  %s13908_s23 = smov [#allocation31]  }
  0xdc   : > { %s1508_s2 = sshll.u32 %s13908_s23, 4  ;;  %s13909_s14 = smov [#allocation34]   ;;  %s1509_s2 = int_to_ptr.vmem [resolvable:$true] %s1508_s2 }
  0xdd   : > { %s1534_s22 = sshll.u32 %s13909_s14, 4  ;;  %s13214_s10 = scalar_lea.vmem %s1509_s2, 32  ;;  %s1535_s22 = int_to_ptr.vmem [resolvable:$true] %s1534_s22 }
  0xde   : > { %p13215_p1 = scmp.ne.s32.totalorder %s1509_s2, %s13214_s10  ;;  %p13222_p9 = scmp.lt.s32.totalorder %s1509_s2, %s1509_s2 }
  0xdf   : > { %p13223_p11 = scmp.lt.s32.totalorder %s13214_s10, %s13214_s10 }
  0xe0   : > { %p13217_p7 = pnand %p13215_p1, %p14233_p6 }
  0xe1   : > { %12559 = dma.hbm_to_vmem [thread:$0]  (!%p14225_p5), %s15862_s5, 32, %s1483_s26, [#allocation29], %s15795_s11, %s15795_s11, %s15797_s18  }
  0xe2   : > { %p13218_p8 = pneg %p13217_p7  ;;  %p13224_p10 = por %p13223_p11, %p13222_p9 }
  0xe4   : > { %p13225_p12 = pnand %p13224_p10, %p13218_p8 }
  0xe6   : > { %13228 = shalt.err (!%p13225_p12)
}
  0xe7   : > { %s15863_s4 = sld [smem:[#allocation92_spill]]  ;;  %s13240_s26 = scalar_lea.vmem %s1535_s22, 32 }
  0xe8   : > { %p13241_p2 = scmp.ne.s32.totalorder %s1535_s22, %s13240_s26  ;;  %p13248_p4 = scmp.lt.s32.totalorder %s1535_s22, %s1535_s22 }
  0xe9   : > { %p13249_p1 = scmp.lt.s32.totalorder %s13240_s26, %s13240_s26 }
  0xea   : > { %p13243_p13 = pnand %p13241_p2, %p14233_p6 }
  0xeb   : > { %p13250_p7 = por %p13249_p1, %p13248_p4 }
  0xec   : > { %p13244_p0 = pneg %p13243_p13 }
  0xed   : > { %12565 = dma.hbm_to_vmem [thread:$0]  (!%p14225_p5), %s15863_s4, 32, %s1509_s2, [#allocation32], %s15795_s11, %s15795_s11, %s15797_s18  }
  0xee   : > { %p13251_p9 = pnand %p13250_p7, %p13244_p0 }
  0xf0   : > { %13254 = shalt.err (!%p13251_p9)
}
  0xf1   : > { %12571 = dma.hbm_to_vmem [thread:$0]  (!%p14225_p5), %s14122_s24, 32, %s1535_s22, [#allocation35], %s15795_s11, %s15795_s11, %s15797_s18  }
  0xf2   : > { %s13910_s1 = smov [#allocation37]   ;;  %s13911_s2 = smov [#allocation40]  }
  0xf3   : > { %s1560_s23 = sshll.u32 %s13910_s1, 4  ;;  %s1586_s14 = sshll.u32 %s13911_s2, 4  ;;  %s1561_s23 = int_to_ptr.vmem [resolvable:$true] %s1560_s23  ;;  %s1587_s14 = int_to_ptr.vmem [resolvable:$true] %s1586_s14 }
  0xf4   : > { %s13266_s10 = scalar_lea.vmem %s1561_s23, 32  ;;  %p13274_p12 = scmp.lt.s32.totalorder %s1561_s23, %s1561_s23 }
  0xf5   : > { %p13267_p8 = scmp.ne.s32.totalorder %s1561_s23, %s13266_s10  ;;  %p13275_p2 = scmp.lt.s32.totalorder %s13266_s10, %s13266_s10 }
  0xf7   : > { %p13269_p11 = pnand %p13267_p8, %p14233_p6  ;;  %p13276_p13 = por %p13275_p2, %p13274_p12 }
  0xf9   : > { %p13270_p10 = pneg %p13269_p11 }
  0xfb   : > { %p13277_p0 = pnand %p13276_p13, %p13270_p10 }
  0xfd   : > { %13280 = shalt.err (!%p13277_p0)
}
  0xfe   : > { %12577 = dma.hbm_to_vmem [thread:$0]  (!%p14225_p5), %s14132_s8, 32, %s1561_s23, [#allocation38], %s15795_s11, %s15795_s11, %s15797_s18  }
  0xff   : > { %s13292_s22 = scalar_lea.vmem %s1587_s14, 32  ;;  %p13300_p9 = scmp.lt.s32.totalorder %s1587_s14, %s1587_s14 }
 0x100   : > { %p13293_p4 = scmp.ne.s32.totalorder %s1587_s14, %s13292_s22  ;;  %p13301_p8 = scmp.lt.s32.totalorder %s13292_s22, %s13292_s22 }
 0x102   : > { %p13295_p1 = pnand %p13293_p4, %p14233_p6  ;;  %p13302_p11 = por %p13301_p8, %p13300_p9 }
 0x104   : > { %p13296_p7 = pneg %p13295_p1 }
 0x106   : > { %p13303_p12 = pnand %p13302_p11, %p13296_p7 }
 0x108   : > { %13306 = shalt.err (!%p13303_p12)
}
 0x109   : > { %12583 = dma.hbm_to_vmem [thread:$0]  (!%p14225_p5), %s14142_s27, 32, %s1587_s14, [#allocation41], %s15795_s11, %s15795_s11, %s15797_s18  }
 0x10a   : > { %s13912_s26 = smov [#allocation43]   ;;  %s13913_s23 = smov [#allocation46]  }
 0x10b   : > { %s1615_s1 = sshll.u32 %s13912_s26, 4  ;;  %s1651_s2 = sshll.u32 %s13913_s23, 4  ;;  %s1616_s1 = int_to_ptr.vmem [resolvable:$true] %s1615_s1  ;;  %s1652_s2 = int_to_ptr.vmem [resolvable:$true] %s1651_s2 }
 0x10c   : > { %s13318_s10 = scalar_lea.vmem %s1616_s1, 32  ;;  %p13326_p0 = scmp.lt.s32.totalorder %s1616_s1, %s1616_s1 }
 0x10d   : > { %p13319_p10 = scmp.ne.s32.totalorder %s1616_s1, %s13318_s10  ;;  %p13327_p4 = scmp.lt.s32.totalorder %s13318_s10, %s13318_s10 }
 0x10f   : > { %p13321_p2 = pnand %p13319_p10, %p14233_p6  ;;  %p13328_p1 = por %p13327_p4, %p13326_p0 }
 0x111   : > { %p13322_p13 = pneg %p13321_p2 }
 0x113   : > { %p13329_p7 = pnand %p13328_p1, %p13322_p13 }
 0x115   : > { %13332 = shalt.err (!%p13329_p7)
}
 0x116   : > { %12589 = dma.hbm_to_vmem [thread:$0]  (!%p14225_p5), %s14157_s9, 32, %s1616_s1, [#allocation44], %s15795_s11, %s15795_s11, %s15797_s18  }
 0x117   : > { %s13344_s14 = scalar_lea.vmem %s1652_s2, 16  ;;  %s13351_s22 = scalar_lea.vmem %s1652_s2, 32 }
 0x118   : > { %p13345_p9 = scmp.ne.s32.totalorder %s1652_s2, %s13344_s14  ;;  %p13352_p12 = scmp.lt.s32.totalorder %s1652_s2, %s1652_s2 }
 0x119   : > { %p13353_p10 = scmp.lt.s32.totalorder %s13351_s22, %s13344_s14 }
 0x11a   : > { %p13347_p8 = pnand %p13345_p9, %p14233_p6 }
 0x11b   : > { %p13354_p2 = por %p13353_p10, %p13352_p12 }
 0x11c   : > { %p13348_p11 = pneg %p13347_p8 }
 0x11e   : > { %p13355_p13 = pnand %p13354_p2, %p13348_p11 }
 0x120   : > { %13358 = shalt.err (!%p13355_p13)
}
 0x121   : > { %s15864_s26 = sld [smem:[#allocation102_spill]]  ;;  %s13914_s23 = smov [#allocation2]  }
 0x122   : > { %s1234_s10 = sshll.u32 %s13914_s23, 4  ;;  %s1235_s10 = int_to_ptr.vmem [resolvable:$true] %s1234_s10 }
 0x123   : > { %s13370_s1 = scalar_lea.vmem %s1235_s10, 32  ;;  %p13378_p7 = scmp.lt.s32.totalorder %s1235_s10, %s1235_s10 }
 0x124   : > { %p13371_p0 = scmp.ne.s32.totalorder %s1235_s10, %s13370_s1  ;;  %p13379_p9 = scmp.lt.s32.totalorder %s13370_s1, %s13370_s1 }
 0x126   : > { %p13373_p4 = pnand %p13371_p0, %p14233_p6  ;;  %p13380_p8 = por %p13379_p9, %p13378_p7 }
 0x127   : > { %12595 = dma.hbm_to_vmem [thread:$0]  (!%p14225_p5), %s15864_s26, 16, %s1652_s2, [#allocation47]  }
 0x128   : > { %p13374_p1 = pneg %p13373_p4 }
 0x12a   : > { %p13381_p3 = pnand %p13380_p8, %p13374_p1 }
 0x12c   : > { %13384 = shalt.err (!%p13381_p3)
}
 0x12d   : > { %s15865_s14 = sld [smem:[#allocation69_spill]]  ;;  %s13915_s2 = smov [#allocation6]  }
 0x12e   : > { %s1272_s22 = sshll.u32 %s13915_s2, 4  ;;  %s13916_s26 = smov [#allocation9]   ;;  %s1273_s22 = int_to_ptr.vmem [resolvable:$true] %s1272_s22 }
 0x12f   : > { %s1304_s23 = sshll.u32 %s13916_s26, 4  ;;  %s13396_s3 = scalar_lea.vmem %s1273_s22, 32  ;;  %s1305_s23 = int_to_ptr.vmem [resolvable:$true] %s1304_s23 }
 0x130   : > { %p13397_p11 = scmp.ne.s32.totalorder %s1273_s22, %s13396_s3  ;;  %p13404_p2 = scmp.lt.s32.totalorder %s1273_s22, %s1273_s22 }
 0x131   : > { %p13405_p3 = scmp.lt.s32.totalorder %s13396_s3, %s13396_s3 }
 0x132   : > { %p13399_p12 = pnand %p13397_p11, %p14233_p6 }
 0x133   : > { %12508 = dma.hbm_to_vmem [thread:$0]  (!%p14225_p5), %s15865_s14, 32, %s1235_s10, [#allocation3], %s15795_s11, %s15795_s11, %s15797_s18  }
 0x134   : > { %p13400_p10 = pneg %p13399_p12  ;;  %p13406_p13 = por %p13405_p3, %p13404_p2 }
 0x136   : > { %p13407_p0 = pnand %p13406_p13, %p13400_p10 }
 0x138   : > { %13410 = shalt.err (!%p13407_p0)
}
 0x139   : > { %s15866_s10 = sld [smem:[#allocation75_spill]]  ;;  %s13422_s1 = scalar_lea.vmem %s1305_s23, 32 }
 0x13a   : > { %p13423_p4 = scmp.ne.s32.totalorder %s1305_s23, %s13422_s1  ;;  %p13430_p9 = scmp.lt.s32.totalorder %s1305_s23, %s1305_s23 }
 0x13b   : > { %p13431_p8 = scmp.lt.s32.totalorder %s13422_s1, %s13422_s1 }
 0x13c   : > { %p13425_p1 = pnand %p13423_p4, %p14233_p6 }
 0x13d   : > { %p13432_p11 = por %p13431_p8, %p13430_p9 }
 0x13e   : > { %p13426_p7 = pneg %p13425_p1 }
 0x13f   : > { %12514 = dma.hbm_to_vmem [thread:$0]  (!%p14225_p5), %s15866_s10, 32, %s1273_s22, [#allocation5], %s15795_s11, %s15795_s11, %s15797_s18  }
 0x140   : > { %p13433_p12 = pnand %p13432_p11, %p13426_p7 }
 0x142   : > { %13436 = shalt.err (!%p13433_p12)
}
 0x143   : > { %s15867_s3 = sld [smem:[#allocation78_spill]]  ;;  %s13917_s14 = smov [#allocation12]  }
 0x144   : > { %s1330_s2 = sshll.u32 %s13917_s14, 4  ;;  %s13918_s22 = smov [#allocation15]   ;;  %s1331_s2 = int_to_ptr.vmem [resolvable:$true] %s1330_s2 }
 0x145   : > { %s1362_s26 = sshll.u32 %s13918_s22, 4  ;;  %s13448_s10 = scalar_lea.vmem %s1331_s2, 32  ;;  %s1363_s26 = int_to_ptr.vmem [resolvable:$true] %s1362_s26 }
 0x146   : > { %p13449_p10 = scmp.ne.s32.totalorder %s1331_s2, %s13448_s10  ;;  %p13456_p13 = scmp.lt.s32.totalorder %s1331_s2, %s1331_s2 }
 0x147   : > { %p13457_p0 = scmp.lt.s32.totalorder %s13448_s10, %s13448_s10 }
 0x148   : > { %p13451_p2 = pnand %p13449_p10, %p14233_p6 }
 0x149   : > { %12520 = dma.hbm_to_vmem [thread:$0]  (!%p14225_p5), %s15867_s3, 32, %s1305_s23, [#allocation8], %s15795_s11, %s15795_s11, %s15797_s18  }
 0x14a   : > { %p13452_p3 = pneg %p13451_p2  ;;  %p13458_p4 = por %p13457_p0, %p13456_p13 }
 0x14c   : > { %p13459_p1 = pnand %p13458_p4, %p13452_p3 }
 0x14e   : > { %13462 = shalt.err (!%p13459_p1)
}
 0x14f   : > { %s15868_s23 = sld [smem:[#allocation79_spill]]  ;;  %s13474_s1 = scalar_lea.vmem %s1363_s26, 32 }
 0x150   : > { %p13475_p7 = scmp.ne.s32.totalorder %s1363_s26, %s13474_s1  ;;  %p13482_p11 = scmp.lt.s32.totalorder %s1363_s26, %s1363_s26 }
 0x151   : > { %p13483_p12 = scmp.lt.s32.totalorder %s13474_s1, %s13474_s1 }
 0x152   : > { %p13477_p9 = pnand %p13475_p7, %p14233_p6 }
 0x153   : > { %p13484_p10 = por %p13483_p12, %p13482_p11 }
 0x154   : > { %p13478_p8 = pneg %p13477_p9 }
 0x155   : > { %12526 = dma.hbm_to_vmem [thread:$0]  (!%p14225_p5), %s15868_s23, 32, %s1331_s2, [#allocation11], %s15795_s11, %s15795_s11, %s15797_s18  }
 0x156   : > { %p13485_p2 = pnand %p13484_p10, %p13478_p8 }
 0x158   : > { %13488 = shalt.err (!%p13485_p2)
}
 0x159   : > { %s15869_s3 = sld [smem:[#allocation83_spill]]  ;;  %s13919_s14 = smov [#allocation18]  }
 0x15a   : > { %s1391_s2 = sshll.u32 %s13919_s14, 4  ;;  %s1392_s2 = int_to_ptr.vmem [resolvable:$true] %s1391_s2 }
 0x15b   : > { %s13500_s22 = scalar_lea.vmem %s1392_s2, 512  ;;  %p13508_p4 = scmp.lt.s32.totalorder %s1392_s2, %s1392_s2 }
 0x15c   : > { %p13501_p3 = scmp.ne.s32.totalorder %s1392_s2, %s13500_s22  ;;  %p13509_p1 = scmp.lt.s32.totalorder %s13500_s22, %s13500_s22 }
 0x15e   : > { %p13503_p13 = pnand %p13501_p3, %p14233_p6  ;;  %p13510_p7 = por %p13509_p1, %p13508_p4 }
 0x15f   : > { %12532 = dma.hbm_to_vmem [thread:$0]  (!%p14225_p5), %s15869_s3, 32, %s1363_s26, [#allocation14], %s15795_s11, %s15795_s11, %s15797_s18  }
 0x160   : > { %p13504_p0 = pneg %p13503_p13 }
 0x162   : > { %p13511_p9 = pnand %p13510_p7, %p13504_p0 }
 0x164   : > { %13514 = shalt.err (!%p13511_p9)
}
 0x165   : > { %s15799_s10 = smov 64   ;;  %s15870_s23 = sld [smem:[#allocation86_spill]] }
 0x166   : > { %s13921_s1 = smov 4   ;;  %s13922_s26 = smov [#allocation21]  }
 0x167   : > { %s1417_s3 = sshll.u32 %s13922_s26, 4  ;;  %s13923_s14 = smov [#allocation24]   ;;  %s1418_s3 = int_to_ptr.vmem [resolvable:$true] %s1417_s3 }
 0x168   : > { %s1443_s11 = sshll.u32 %s13923_s14, 4  ;;  %s13526_s22 = scalar_lea.vmem %s1418_s3, 32  ;;  %s1444_s11 = int_to_ptr.vmem [resolvable:$true] %s1443_s11 }
 0x169   : > { %p13527_p8 = scmp.ne.s32.totalorder %s1418_s3, %s13526_s22  ;;  %p13534_p10 = scmp.lt.s32.totalorder %s1418_s3, %s1418_s3 }
 0x16a   : > { %p13535_p2 = scmp.lt.s32.totalorder %s13526_s22, %s13526_s22 }
 0x16b   : > { %12538 = dma.hbm_to_vmem [thread:$0]  (!%p14225_p5), %s15870_s23, 512, %s1392_s2, [#allocation17], %s15799_s10, %s15799_s10, %s13921_s1  }
 0x16c   : > { %p13529_p11 = pnand %p13527_p8, %p14233_p6  ;;  %p13536_p3 = por %p13535_p2, %p13534_p10 }
 0x16e   : > { %p13530_p12 = pneg %p13529_p11 }
 0x170   : > { %p13537_p13 = pnand %p13536_p3, %p13530_p12 }
 0x172   : > { %13540 = shalt.err (!%p13537_p13)
}
 0x173   : > { %s15871_s2 = smov 16   ;;  %s15872_s23 = sld [smem:[#allocation87_spill]] }
 0x174   : > { %s13552_s26 = scalar_lea.vmem %s1444_s11, 512  ;;  %p13560_p7 = scmp.lt.s32.totalorder %s1444_s11, %s1444_s11 }
 0x175   : > { %p13553_p0 = scmp.ne.s32.totalorder %s1444_s11, %s13552_s26  ;;  %p13561_p9 = scmp.lt.s32.totalorder %s13552_s26, %s13552_s26 }
 0x177   : > { %p13555_p4 = pnand %p13553_p0, %p14233_p6  ;;  %p13562_p8 = por %p13561_p9, %p13560_p7 }
 0x179   : > { %12544 = dma.hbm_to_vmem [thread:$0]  (!%p14225_p5), %s15872_s23, 32, %s1418_s3, [#allocation20], %s15871_s2, %s15871_s2, %s15797_s18  }
 0x17a   : > { %p13556_p1 = pneg %p13555_p4 }
 0x17c   : > { %p13563_p11 = pnand %p13562_p8, %p13556_p1 }
 0x17e   : > { %13566 = shalt.err (!%p13563_p11)
}
 0x17f   : > { %s15873_s14 = sld [smem:[#allocation88_spill]]  ;;  %s13924_s22 = smov [#allocation27]  }
 0x180   : > { %s1469_s3 = sshll.u32 %s13924_s22, 4  ;;  %s13925_s23 = smov [#allocation30]   ;;  %s1470_s3 = int_to_ptr.vmem [resolvable:$true] %s1469_s3 }
 0x181   : > { %s1495_s18 = sshll.u32 %s13925_s23, 4  ;;  %s13578_s4 = scalar_lea.vmem %s1470_s3, 512  ;;  %s1496_s18 = int_to_ptr.vmem [resolvable:$true] %s1495_s18 }
 0x182   : > { %p13579_p12 = scmp.ne.s32.totalorder %s1470_s3, %s13578_s4  ;;  %p13586_p3 = scmp.lt.s32.totalorder %s1470_s3, %s1470_s3 }
 0x183   : > { %p13587_p13 = scmp.lt.s32.totalorder %s13578_s4, %s13578_s4 }
 0x184   : > { %p13581_p10 = pnand %p13579_p12, %p14233_p6 }
 0x185   : > { %12550 = dma.hbm_to_vmem [thread:$0]  (!%p14225_p5), %s15873_s14, 512, %s1444_s11, [#allocation23], %s15799_s10, %s15799_s10, %s13921_s1  }
 0x186   : > { %p13582_p2 = pneg %p13581_p10  ;;  %p13588_p0 = por %p13587_p13, %p13586_p3 }
 0x188   : > { %p13589_p4 = pnand %p13588_p0, %p13582_p2 }
 0x18a   : > { %13592 = shalt.err (!%p13589_p4)
}
 0x18b   : > { %s15874_s11 = sld [smem:[#allocation89_spill]]  ;;  %s13604_s26 = scalar_lea.vmem %s1496_s18, 512 }
 0x18c   : > { %p13605_p1 = scmp.ne.s32.totalorder %s1496_s18, %s13604_s26  ;;  %p13612_p8 = scmp.lt.s32.totalorder %s1496_s18, %s1496_s18 }
 0x18d   : > { %p13613_p11 = scmp.lt.s32.totalorder %s13604_s26, %s13604_s26 }
 0x18e   : > { %p13607_p7 = pnand %p13605_p1, %p14233_p6 }
 0x18f   : > { %p13614_p12 = por %p13613_p11, %p13612_p8 }
 0x190   : > { %p13608_p9 = pneg %p13607_p7 }
 0x191   : > { %12556 = dma.hbm_to_vmem [thread:$0]  (!%p14225_p5), %s15874_s11, 512, %s1470_s3, [#allocation26], %s15799_s10, %s15799_s10, %s13921_s1  }
 0x192   : > { %p13615_p10 = pnand %p13614_p12, %p13608_p9 }
 0x194   : > { %13618 = shalt.err (!%p13615_p10)
}
 0x195   : > { %s15875_s4 = sld [smem:[#allocation91_spill]]  ;;  %s13926_s14 = smov [#allocation33]  }
 0x196   : > { %s1521_s22 = sshll.u32 %s13926_s14, 4  ;;  %s13927_s3 = smov [#allocation36]   ;;  %s1522_s22 = int_to_ptr.vmem [resolvable:$true] %s1521_s22 }
 0x197   : > { %s1547_s23 = sshll.u32 %s13927_s3, 4  ;;  %s13630_s11 = scalar_lea.vmem %s1522_s22, 512  ;;  %s1548_s23 = int_to_ptr.vmem [resolvable:$true] %s1547_s23 }
 0x198   : > { %p13631_p2 = scmp.ne.s32.totalorder %s1522_s22, %s13630_s11  ;;  %p13638_p0 = scmp.lt.s32.totalorder %s1522_s22, %s1522_s22 }
 0x199   : > { %p13639_p4 = scmp.lt.s32.totalorder %s13630_s11, %s13630_s11 }
 0x19a   : > { %p13633_p3 = pnand %p13631_p2, %p14233_p6 }
 0x19b   : > { %12562 = dma.hbm_to_vmem [thread:$0]  (!%p14225_p5), %s15875_s4, 512, %s1496_s18, [#allocation29], %s15799_s10, %s15799_s10, %s13921_s1  }
 0x19c   : > { %p13634_p13 = pneg %p13633_p3  ;;  %p13640_p1 = por %p13639_p4, %p13638_p0 }
 0x19e   : > { %p13641_p7 = pnand %p13640_p1, %p13634_p13 }
 0x1a0   : > { %13644 = shalt.err (!%p13641_p7)
}
 0x1a1   : > { %s15876_s18 = sld [smem:[#allocation93_spill]]  ;;  %s13656_s26 = scalar_lea.vmem %s1548_s23, 32 }
 0x1a2   : > { %p13657_p9 = scmp.ne.s32.totalorder %s1548_s23, %s13656_s26  ;;  %p13664_p12 = scmp.lt.s32.totalorder %s1548_s23, %s1548_s23 }
 0x1a3   : > { %p13665_p10 = scmp.lt.s32.totalorder %s13656_s26, %s13656_s26 }
 0x1a4   : > { %p13659_p8 = pnand %p13657_p9, %p14233_p6 }
 0x1a5   : > { %p13666_p2 = por %p13665_p10, %p13664_p12 }
 0x1a6   : > { %p13660_p11 = pneg %p13659_p8 }
 0x1a7   : > { %12568 = dma.hbm_to_vmem [thread:$0]  (!%p14225_p5), %s15876_s18, 512, %s1522_s22, [#allocation32], %s15799_s10, %s15799_s10, %s13921_s1  }
 0x1a8   : > { %p13667_p3 = pnand %p13666_p2, %p13660_p11 }
 0x1aa   : > { %13670 = shalt.err (!%p13667_p3)
}
 0x1ab   : > { %s15877_s4 = smov 1   ;;  %s15878_s14 = sld [smem:[#allocation94_spill]] }
 0x1ac   : > { %s13928_s3 = smov [#allocation39]   ;;  %s13929_s11 = smov [#allocation42]  }
 0x1ad   : > { %s1573_s22 = sshll.u32 %s13928_s3, 4  ;;  %s1602_s18 = sshll.u32 %s13929_s11, 4  ;;  %s1574_s22 = int_to_ptr.vmem [resolvable:$true] %s1573_s22  ;;  %s1603_s18 = int_to_ptr.vmem [resolvable:$true] %s1602_s18 }
 0x1ae   : > { %s13682_s10 = scalar_lea.vmem %s1574_s22, 512  ;;  %p13690_p1 = scmp.lt.s32.totalorder %s1574_s22, %s1574_s22 }
 0x1af   : > { %p13683_p13 = scmp.ne.s32.totalorder %s1574_s22, %s13682_s10  ;;  %p13691_p7 = scmp.lt.s32.totalorder %s13682_s10, %s13682_s10 }
 0x1b1   : > { %12574 = dma.hbm_to_vmem [thread:$0]  (!%p14225_p5), %s15878_s14, 32, %s1548_s23, [#allocation35], %s15871_s2, %s15871_s2, %s15877_s4  }
 0x1b2   : > { %p13685_p0 = pnand %p13683_p13, %p14233_p6  ;;  %p13692_p9 = por %p13691_p7, %p13690_p1 }
 0x1b4   : > { %p13686_p4 = pneg %p13685_p0 }
 0x1b6   : > { %p13693_p8 = pnand %p13692_p9, %p13686_p4 }
 0x1b8   : > { %13696 = shalt.err (!%p13693_p8)
}
 0x1b9   : > { %s15879_s23 = smov 64   ;;  %s15880_s26 = sld [smem:[#allocation95_spill]] }
 0x1ba   : > { %s13708_s14 = scalar_lea.vmem %s1603_s18, 32  ;;  %p13716_p2 = scmp.lt.s32.totalorder %s1603_s18, %s1603_s18 }
 0x1bb   : > { %p13709_p11 = scmp.ne.s32.totalorder %s1603_s18, %s13708_s14  ;;  %p13717_p3 = scmp.lt.s32.totalorder %s13708_s14, %s13708_s14 }
 0x1bd   : > { %p13711_p12 = pnand %p13709_p11, %p14233_p6  ;;  %p13718_p13 = por %p13717_p3, %p13716_p2 }
 0x1bf   : > { %12580 = dma.hbm_to_vmem [thread:$0]  (!%p14225_p5), %s15880_s26, 512, %s1574_s22, [#allocation38], %s15879_s23, %s15879_s23, %s13921_s1  }
 0x1c0   : > { %p13712_p10 = pneg %p13711_p12 }
 0x1c2   : > { %p13719_p0 = pnand %p13718_p13, %p13712_p10 }
 0x1c4   : > { %13722 = shalt.err (!%p13719_p0)
}
 0x1c5   : > { %s15881_s10 = sld [smem:[#allocation97_spill]]  ;;  %s13930_s3 = smov [#allocation45]  }
 0x1c6   : > { %s1628_s1 = sshll.u32 %s13930_s3, 4  ;;  %s13931_s22 = smov [#allocation48]   ;;  %s1629_s1 = int_to_ptr.vmem [resolvable:$true] %s1628_s1 }
 0x1c7   : > { %s1662_s11 = sshll.u32 %s13931_s22, 4  ;;  %s13734_s23 = scalar_lea.vmem %s1629_s1, 32  ;;  %s1663_s11 = int_to_ptr.vmem [resolvable:$true] %s1662_s11 }
 0x1c8   : > { %p13735_p4 = scmp.ne.s32.totalorder %s1629_s1, %s13734_s23  ;;  %p13742_p9 = scmp.lt.s32.totalorder %s1629_s1, %s1629_s1 }
 0x1c9   : > { %p13743_p8 = scmp.lt.s32.totalorder %s13734_s23, %s13734_s23 }
 0x1ca   : > { %p13737_p1 = pnand %p13735_p4, %p14233_p6 }
 0x1cb   : > { %12586 = dma.hbm_to_vmem [thread:$0]  (!%p14225_p5), %s15881_s10, 32, %s1603_s18, [#allocation41], %s15871_s2, %s15871_s2, %s15877_s4  }
 0x1cc   : > { %p13738_p7 = pneg %p13737_p1  ;;  %p13744_p11 = por %p13743_p8, %p13742_p9 }
 0x1ce   : > { %p13745_p12 = pnand %p13744_p11, %p13738_p7 }
 0x1d0   : > { %13748 = shalt.err (!%p13745_p12)
}
 0x1d1   : > { %s15882_s18 = sld [smem:[#allocation98_spill]]  ;;  %s13760_s26 = scalar_lea.vmem %s1663_s11, 16 }
 0x1d2   : > { %p13761_p10 = scmp.ne.s32.totalorder %s1663_s11, %s13760_s26  ;;  %s13767_s14 = scalar_lea.vmem %s1663_s11, 32 }
 0x1d3   : > { %p13768_p13 = scmp.lt.s32.totalorder %s1663_s11, %s1663_s11  ;;  %p13769_p0 = scmp.lt.s32.totalorder %s13767_s14, %s13760_s26 }
 0x1d4   : > { %p13763_p2 = pnand %p13761_p10, %p14233_p6 }
 0x1d5   : > { %p13770_p4 = por %p13769_p0, %p13768_p13 }
 0x1d6   : > { %p13764_p3 = pneg %p13763_p2 }
 0x1d7   : > { %12592 = dma.hbm_to_vmem [thread:$0]  (!%p14225_p5), %s15882_s18, 32, %s1629_s1, [#allocation44], %s15871_s2, %s15871_s2, %s15877_s4  }
 0x1d8   : > { %p13771_p1 = pnand %p13770_p4, %p13764_p3 }
 0x1da   : > { %13774 = shalt.err (!%p13771_p1)
}
 0x1db   : > { %12598 = dma.hbm_to_vmem [thread:$0]  (!%p14225_p5), %s14187_s25, 16, %s1663_s11, [#allocation47]  }
 0x1dc   : > { %p15883_p7 = scmp.ne.s32.totalorder %s15856_s16, 0 }
 0x1dd   : > { %p15884_p9 = scmp.eq.s32.totalorder (!%p15883_p7), %s14210_s0, 0 }
 0x1de   : > { %1688 = sbr.rel (%p15883_p7) target bundleno = 13999 (0x36af), region = 220 }
 0x1e3   : > { %13780 = dma.done.wait (%p15884_p9), [#allocation3], 32   ;;  %p15885_p8 = pmov %p15884_p9 }
 0x1e5   : > { %13782 = vsyncadd (%p15885_p8), [#allocation3], 4294967264  ;;  %p15886_p6 = pmov %p15885_p8 }
 0x1e7   : > { %13784 = dma.done.wait (%p15886_p6), [#allocation5], 64   ;;  %p15887_p11 = pmov %p15886_p6 }
 0x1e8   : > { %p15888_p12 = pmov %p15886_p6 }
 0x1e9   : > { %13786 = vsyncadd (%p15887_p11), [#allocation5], 4294967232 }
 0x1ea   : > { %13788 = dma.done.wait (%p15888_p12), [#allocation8], 64   ;;  %p15889_p5 = pmov %p15886_p6 }
 0x1ec   : > { %13790 = vsyncadd (%p15889_p5), [#allocation8], 4294967232  ;;  %p15890_p10 = pmov %p15889_p5 }
 0x1ed   : > { %p15891_p2 = pmov %p15889_p5 }
 0x1ee   : > { %13792 = dma.done.wait (%p15890_p10), [#allocation11], 64  }
 0x1ef   : > { %13794 = vsyncadd (%p15891_p2), [#allocation11], 4294967232  ;;  %p15892_p3 = pmov %p15891_p2 }
 0x1f0   : > { %p15893_p13 = pmov %p15891_p2 }
 0x1f1   : > { %13796 = dma.done.wait (%p15892_p3), [#allocation14], 64  }
 0x1f2   : > { %13798 = vsyncadd (%p15893_p13), [#allocation14], 4294967232  ;;  %p15894_p0 = pmov %p15891_p2 }
 0x1f4   : > { %13800 = dma.done.wait (%p15894_p0), [#allocation17], 544   ;;  %p15895_p4 = pmov %p15894_p0 }
 0x1f5   : > { %p15896_p1 = pmov %p15894_p0 }
 0x1f6   : > { %13802 = vsyncadd (%p15895_p4), [#allocation17], 4294966752 }
 0x1f7   : > { %13804 = dma.done.wait (%p15896_p1), [#allocation20], 64   ;;  %p15897_p7 = pmov %p15894_p0 }
 0x1f8   : > { %p15898_p9 = pmov %p15894_p0 }
 0x1f9   : > { %13806 = vsyncadd (%p15897_p7), [#allocation20], 4294967232 }
 0x1fa   : > { %13808 = dma.done.wait (%p15898_p9), [#allocation23], 544   ;;  %p15899_p8 = pmov %p15894_p0 }
 0x1fb   : > { %p15900_p6 = pmov %p15894_p0 }
 0x1fc   : > { %13810 = vsyncadd (%p15899_p8), [#allocation23], 4294966752 }
 0x1fd   : > { %13812 = dma.done.wait (%p15900_p6), [#allocation26], 544   ;;  %p15901_p11 = pmov %p15894_p0 }
 0x1fe   : > { %p15902_p12 = pmov %p15894_p0 }
 0x1ff   : > { %13814 = vsyncadd (%p15901_p11), [#allocation26], 4294966752 }
 0x200   : > { %13816 = dma.done.wait (%p15902_p12), [#allocation29], 544   ;;  %p15903_p5 = pmov %p15894_p0 }
 0x201   : > { %p15904_p10 = pmov %p15894_p0 }
 0x202   : > { %13818 = vsyncadd (%p15903_p5), [#allocation29], 4294966752 }
 0x203   : > { %13820 = dma.done.wait (%p15904_p10), [#allocation32], 544   ;;  %p15905_p2 = pmov %p15894_p0 }
 0x204   : > { %p15906_p3 = pmov %p15894_p0 }
 0x205   : > { %13822 = vsyncadd (%p15905_p2), [#allocation32], 4294966752 }
 0x206   : > { %13824 = dma.done.wait (%p15906_p3), [#allocation35], 64   ;;  %p15907_p13 = pmov %p15894_p0 }
 0x208   : > { %13826 = vsyncadd (%p15907_p13), [#allocation35], 4294967232 }
 0x209   : > { %13828 = dma.done.wait (%p15894_p0), [#allocation38], 544   ;;  %p15908_p4 = pmov %p15894_p0 }
 0x20a   : > { %p15909_p1 = pmov %p15894_p0 }
 0x20b   : > { %13830 = vsyncadd (%p15908_p4), [#allocation38], 4294966752 }
 0x20c   : > { %13832 = dma.done.wait (%p15909_p1), [#allocation41], 64   ;;  %p15910_p7 = pmov %p15894_p0 }
 0x20d   : > { %p15911_p9 = pmov %p15894_p0 }
 0x20e   : > { %13834 = vsyncadd (%p15910_p7), [#allocation41], 4294967232 }
 0x20f   : > { %13836 = dma.done.wait (%p15911_p9), [#allocation44], 64   ;;  %p15912_p8 = pmov %p15894_p0 }
 0x210   : > { %p15913_p6 = pmov %p15894_p0 }
 0x211   : > { %13838 = vsyncadd (%p15912_p8), [#allocation44], 4294967232 }
 0x212   : > { %13840 = dma.done.wait (%p15913_p6), [#allocation47], 32   ;;  %p15914_p11 = pmov %p15894_p0 }
 0x213   : > { %s15915_s16 = sld [smem:[#allocation65_spill]]  ;;  %p1924_p12 = scmp.lt.s32.totalorder %s14210_s0, 1  ;;  %v13932_v0 = vmov 0   ;;  %v13933_v1 = vmov 0.0   ;;  %vm13934_vm0 = vmmov 0   ;;  %v1934_v12 = vlaneseq }
 0x214   : > { %13842 = vsyncadd (%p15914_p11), [#allocation47], 4294967264  ;;  %s15916_s28 = sld [smem:[#allocation99_spill]]  ;;  %12766 = vset.pattern.permute.xlu0 %v13932_v0  ;;  %11793 = vmatprep.subr.bf16.mxu0 %v13933_v1  ;;  %v13935_v15 = vmov 1.0|1.0   ;;  %vm2086_vm3 = vcmask 261120  }
 0x215   : > { %s15940_s0 = smov (!%p1924_p12, %s14210_s0), 1  ;;  %11813 = vmatprep.subr.bf16.mxu1 %v13933_v1  ;;  %s15917_s7 = sld [smem:[#allocation66_spill]]  ;;  %11809 = vmatprep.mubr.msk.bf16.mxu0 %vm13934_vm0, %v13933_v1  ;;  %v1935_v13 = vand.u32 127, %v1934_v12  ;;  %v11274_v30 = vld [vmem:[#allocation2] ss:$0 sm:$0xff]  ;;  %v2146_v47 = vshrl.u32 %v1934_v12, 7 }
 0x216   : > { %s15800_s2 = sshll.u32 %s15940_s0, 3  ;;  %11817 = vmatprep.mubr.msk.bf16.mxu1 %vm13934_vm0, %v13933_v1  ;;  %s15918_s10 = sld [smem:[#allocation68_spill]]  ;;  %v13939_v42 = vmov 1983009808   ;;  %v13940_v44 = vmov 1934713408  }
 0x217   : > { %s15919_s3 = sld [smem:[#allocation70_spill]]  ;;  %s15811_s22 = smov 112   ;;  %v2143_v43 = vunpack.c.l.s4 %v13939_v42  ;;  %v2175_v45 = vunpack.c.l.s4 %v13940_v44  ;;  %vm2692_vm4 = vcmask 64512   ;;  %vm2932_vm5 = vcmask 1043456  }
 0x218   : > { %s15920_s1 = sld [smem:[#allocation67_spill]]  ;;  %s15807_s11 = smov 120   ;;  %vm3263_vm6 = vcmask 130048   ;;  %vm3265_vm7 = vcmask 195584   ;;  %vm3468_vm8 = vcmask 523264  }
 0x219   : > { %s1927_s4 = scalar_lea.vmem %s15915_s16, %s15800_s2  ;;  %s15805_s23 = smov 104   ;;  %v2144_v46 = vunpack.c.0.s8 %v2143_v43  ;;  %v2176_v50 = vunpack.c.0.s8 %v2175_v45 }
 0x21a   : > { %v1933_v2 = vld [vmem:[%s1927_s4] sm:$0xff]  ;;  %v12767_v3 = vld [vmem:[%s15916_s28 + $0x38] sm:$0xff]   ;;  %v12768_v4 = vld [vmem:[%s15916_s28 + $0x30] sm:$0xff]   ;;  %s15921_s18 = sld [smem:[#allocation71_spill]]  ;;  %s15809_s14 = smov 16  }
 0x21b   : > { %1937 = vperm.xlu0 %12766, %v1933_v2   ;;  %11794 = vmatpush3.bf16.msra.mxu0 %v12767_v3  ;;  %v12769_v5 = vld [vmem:[%s15916_s28 + $0x28] sm:$0xff]   ;;  %v12770_v6 = vld [vmem:[%s15916_s28 + $0x20] sm:$0xff]   ;;  %v12771_v8 = vld [vmem:[%s15916_s28 + $0x18] sm:$0xff]   ;;  %v14628_v51 = vsub.s32 %v2144_v46, %v2146_v47  ;;  %v14630_v58 = vsub.s32 %v2176_v50, %v2146_v47  ;;  %s15922_s26 = sld [smem:[#allocation72_spill]]  ;;  %s15801_s16 = smov 8  }
 0x21c   : > { %11795 = vmatprep.subr.bf16.mxu0 %v13933_v1  ;;  %v12775_v7 = vld [vmem:[%s15917_s7 + $0x8] sm:$0xff]   ;;  %v12772_v9 = vld [vmem:[%s15916_s28 + $0x10] sm:$0xff]   ;;  %v12774_v11 = vld [vmem:[%s15916_s28] sm:$0xff]   ;;  %s15923_s4 = sld [smem:[#allocation73_spill]]  ;;  %s15803_s2 = smov 24  }
 0x21d   : > { %11814 = vmatpush3.bf16.msra.mxu1 %v12775_v7  ;;  %v12773_v10 = vld [vmem:[%s15916_s28 + $0x8] sm:$0xff]   ;;  %v12776_v16 = vld [vmem:[%s15917_s7] sm:$0xff]   ;;  %s15934_s5 = smov 16   ;;  %s15935_s6 = sld [smem:[#allocation100_spill]] }
 0x21e   : > { %11815 = vmatprep.subr.bf16.mxu1 %v13933_v1  ;;  %v12777_v18 = vld [vmem:[%s15918_s10 + $0x8] sm:$0xff]   ;;  %v12778_v22 = vld [vmem:[%s15918_s10] sm:$0xff]  }
 0x21f   : > { %11796 = vmatpush3.bf16.msra.mxu0 %v12768_v4  ;;  %v12779_v24 = vld [vmem:[%s15919_s3 + $0x8] sm:$0xff]   ;;  %v12780_v25 = vld [vmem:[%s15919_s3] sm:$0xff]  }
 0x220   : > { %11797 = vmatprep.subr.bf16.mxu0 %v13933_v1  ;;  %v11268_v33 = vld [vmem:[%s15920_s1] ss:$0 sm:$0xff] }
 0x221   : > { %11816 = vmatpush3.bf16.msra.mxu1 %v12776_v16 }
 0x222   : > { %11821 = vmatprep.subr.bf16.mxu1 %v13933_v1 }
 0x223   : > { %11798 = vmatpush3.bf16.msra.mxu0 %v12769_v5 }
 0x224   : > { %11799 = vmatprep.subr.bf16.mxu0 %v13933_v1 }
 0x227   : > { %11800 = vmatpush3.bf16.msra.mxu0 %v12770_v6 }
 0x228   : > { %11801 = vmatprep.subr.bf16.mxu0 %v13933_v1 }
 0x22b   : > { %11802 = vmatpush3.bf16.msra.mxu0 %v12771_v8 }
 0x22c   : > { %11803 = vmatprep.subr.bf16.mxu0 %v13933_v1 }
 0x22f   : > { %11804 = vmatpush3.bf16.msra.mxu0 %v12772_v9 }
 0x230   : > { %11805 = vmatprep.subr.bf16.mxu0 %v13933_v1 }
 0x233   : > { %11806 = vmatpush3.bf16.msra.mxu0 %v12773_v10 }
 0x234   : > { %11807 = vmatprep.subr.bf16.mxu0 %v13933_v1 }
 0x237   : > { %11808 = vmatpush3.bf16.msra.mxu0 %v12774_v11 }
 0x238   : > { %11843 = vmatprep.subr.bf16.mxu0 %v13933_v1 }
 0x296   : > { %v1938_v14 = vpop.permute.xlu0 %1937 }
 0x297   : > { %vm1939_vm1 = vcmp.eq.s32.totalorder %v1938_v14, %v1935_v13 }
 0x298   : > { %vm11266_vm2 = vmpackc.low %vm1939_vm1, %vm1939_vm1 }
 0x299   : > { %11810 = vmatmul.mubr.msk.bf16.vlgmr.msra.gmra.mxu0 %vm11266_vm2, %v13935_v15 }
 0x29a   : > { %11845 = vmatprep.mubr.msk.bf16.mxu0 %vm13934_vm0, %v13933_v1 }
 0x359   : > { %v14592_v17 = vpop.f32.mrf.mxu0 }
 0x35a   : > { %v14597_v19 = vpack.c.bf16 %v14592_v17, %v14592_v17 }
 0x35b   : > { %v11811_v20 = vpop.f32.mrf.mxu0 }
 0x35c   : > { %11818 = vmatmul.mubr.msk.bf16.vlgmr.msra.gmra.mxu1 %vm2086_vm3, %v14597_v19 }
 0x35d   : > { %v2044_v21 = vpop.f32.mrf.mxu0  ;;  %11822 = vmatpush3.bf16.msra.mxu1 %v12777_v18  ;;  %11825 = vmatprep.mubr.msk.bf16.mxu1 %vm13934_vm0, %v13933_v1 }
 0x35e   : > { %11823 = vmatprep.subr.bf16.mxu1 %v13933_v1 }
 0x35f   : > { %v11812_v23 = vpop.f32.mrf.mxu0 }
 0x361   : > { %11824 = vmatpush3.bf16.msra.mxu1 %v12778_v22 }
 0x362   : > { %11829 = vmatprep.subr.bf16.mxu1 %v13933_v1 }
 0x364   : > { %11826 = vmatmul.mubr.msk.bf16.vlgmr.msra.gmra.mxu1 %vm2086_vm3, %v14597_v19 }
 0x365   : > { %11830 = vmatpush3.bf16.msra.mxu1 %v12779_v24  ;;  %11833 = vmatprep.mubr.msk.bf16.mxu1 %vm13934_vm0, %v13933_v1 }
 0x366   : > { %11831 = vmatprep.subr.bf16.mxu1 %v13933_v1 }
 0x369   : > { %11832 = vmatpush3.bf16.msra.mxu1 %v12780_v25 }
 0x36a   : > { %11837 = vmatprep.subr.bf16.mxu1 %v13933_v1 }
 0x36c   : > { %11834 = vmatmul.mubr.msk.bf16.vlgmr.msra.gmra.mxu1 %vm2086_vm3, %v14597_v19 }
 0x36d   : > { %11839 = vmatprep.mubr.msk.bf16.mxu1 %vm13934_vm0, %v13933_v1 }
 0x41c   : > { %v2124_v26 = vpop.f32.mrf.mxu1 }
 0x41d   : > { %v2125_v36 = vadd.f32 %v11268_v33, %v2124_v26 }
 0x41e   : > { %v11819_v27 = vpop.f32.mrf.mxu1 }
 0x420   : > { %v2127_v28 = vpop.f32.mrf.mxu1 }
 0x422   : > { %v11820_v29 = vpop.f32.mrf.mxu1 }
 0x424   : > { %v2328_v31 = vpop.f32.mrf.mxu1 }
 0x425   : > { %v2329_v32 = vadd.f32 %v11274_v30, %v2328_v31 }
 0x426   : > { %v11827_v34 = vpop.f32.mrf.mxu1 }
 0x427   : > { %2338 = vrot.lane.b32.xlu1 %v2329_v32, %s15811_s22  ;;  %2335 = vrot.lane.b32.xlu0 %v2329_v32, %s15807_s11 }
 0x428   : > { %v2331_v35 = vpop.f32.mrf.mxu1 }
 0x42a   : > { %v11828_v37 = vpop.f32.mrf.mxu1 }
 0x42b   : > { %2341 = vrot.lane.b32.xlu1 %v2329_v32, %s15805_s23  ;;  %2131 = vrot.lane.b32.xlu0 %v2125_v36, %s15807_s11 }
 0x42c   : > { %v14623_v38 = vpop.f32.mrf.mxu1 }
 0x42e   : > { %v11835_v39 = vpop.f32.mrf.mxu1 }
 0x42f   : > { %2134 = vrot.lane.b32.xlu1 %v2125_v36, %s15811_s22  ;;  %2137 = vrot.lane.b32.xlu0 %v2125_v36, %s15805_s23 }
 0x430   : > { %v2535_v40 = vpop.f32.mrf.mxu1 }
 0x432   : > { %v11836_v41 = vpop.f32.mrf.mxu1 }
 0x499   : > { %v2339_v48 = vpop.permute.xlu1 %2338  ;;  %v2336_v49 = vpop.permute.xlu0 %2335 }
 0x49a   : > { %v2344_v52 = vcombine.low %v2329_v32, %v2339_v48  ;;  %v2345_v53 = vcombine.high %v2329_v32, %v2339_v48 }
 0x49c   : > { %v2352_v59 = vrot.slane %v2344_v52, %v14628_v51  ;;  %v2359_v60 = vrot.slane %v2345_v53, %v14628_v51 }
 0x49d   : > { %v2342_v54 = vpop.permute.xlu1 %2341  ;;  %v2132_v55 = vpop.permute.xlu0 %2131 }
 0x49e   : > { %v2360_v56 = vcombine.low %v2336_v49, %v2342_v54  ;;  %v2361_v57 = vcombine.high %v2336_v49, %v2342_v54 }
 0x4a0   : > { %v2368_v61 = vrot.slane %v2360_v56, %v14628_v51  ;;  %v2375_v62 = vrot.slane %v2361_v57, %v14628_v51 }
 0x4a1   : > { %v2135_v63 = vpop.permute.xlu1 %2134  ;;  %v2138_v0 = vpop.permute.xlu0 %2137 }
 0x4a2   : > { %v2376_v2 = vcombine.low %v2352_v59, %v2368_v61  ;;  %v2377_v3 = vcombine.high %v2352_v59, %v2368_v61  ;;  %v2392_v4 = vcombine.low %v2359_v60, %v2375_v62  ;;  %v2393_v5 = vcombine.high %v2359_v60, %v2375_v62 }
 0x4a3   : > { %v2140_v6 = vcombine.low %v2125_v36, %v2135_v63  ;;  %v2141_v7 = vcombine.high %v2125_v36, %v2135_v63  ;;  %v2156_v8 = vcombine.low %v2132_v55, %v2138_v0  ;;  %v2157_v9 = vcombine.high %v2132_v55, %v2138_v0 }
 0x4a4   : > { %v2384_v10 = vrot.slane %v2376_v2, %v14630_v58  ;;  %v2391_v11 = vrot.slane %v2377_v3, %v14630_v58  ;;  %v2400_v12 = vrot.slane %v2392_v4, %v14630_v58  ;;  %v2407_v13 = vrot.slane %v2393_v5, %v14630_v58 }
 0x4a5   : > { %v2148_v14 = vrot.slane %v2140_v6, %v14628_v51  ;;  %v2155_v15 = vrot.slane %v2141_v7, %v14628_v51  ;;  %v2164_v16 = vrot.slane %v2156_v8, %v14628_v51  ;;  %v2171_v18 = vrot.slane %v2157_v9, %v14628_v51 }
 0x4a6   : > { %v2412_v20 = vcombine.low %v2384_v10, %v2391_v11  ;;  %v11278_v21 = vcombine.high %v2384_v10, %v2391_v11  ;;  %v2428_v22 = vcombine.low %v2400_v12, %v2407_v13  ;;  %v11279_v23 = vcombine.high %v2400_v12, %v2407_v13 }
 0x4a7   : > { %v2172_v24 = vcombine.low %v2148_v14, %v2164_v16  ;;  %v2173_v25 = vcombine.high %v2148_v14, %v2164_v16  ;;  %v2188_v26 = vcombine.low %v2155_v15, %v2171_v18  ;;  %v2189_v27 = vcombine.high %v2155_v15, %v2171_v18 }
 0x4a8   : > { %v2419_v28 = vrot.slane %v2412_v20, %v14628_v51  ;;  %v2427_v29 = vrot.slane %v11278_v21, %v14628_v51  ;;  %v2435_v30 = vrot.slane %v2428_v22, %v14628_v51  ;;  %v2443_v31 = vrot.slane %v11279_v23, %v14628_v51 }
 0x4a9   : > { %v2180_v32 = vrot.slane %v2172_v24, %v14630_v58  ;;  %v2187_v33 = vrot.slane %v2173_v25, %v14630_v58  ;;  %v2196_v34 = vrot.slane %v2188_v26, %v14630_v58  ;;  %v2203_v35 = vrot.slane %v2189_v27, %v14630_v58 }
 0x4aa   : > { %v2444_v36 = vcombine.low %v2419_v28, %v2427_v29  ;;  %v2460_v37 = vcombine.low %v2435_v30, %v2443_v31  ;;  %v2445_v39 = vcombine.high %v2419_v28, %v2427_v29  ;;  %v2461_v40 = vcombine.high %v2435_v30, %v2443_v31 }
 0x4ab   : > { %v2208_v41 = vcombine.low %v2180_v32, %v2187_v33  ;;  %v11272_v42 = vcombine.high %v2180_v32, %v2187_v33  ;;  %v2224_v43 = vcombine.low %v2196_v34, %v2203_v35  ;;  %v11273_v44 = vcombine.high %v2196_v34, %v2203_v35 }
 0x4ac   : > { %v2452_v45 = vrot.slane %v2444_v36, %v14630_v58  ;;  %v2468_v46 = vrot.slane %v2460_v37, %v14630_v58  ;;  %v2459_v54 = vrot.slane %v2445_v39, %v14630_v58  ;;  %v2475_v55 = vrot.slane %v2461_v40, %v14630_v58 }
 0x4ad   : > { %v2215_v47 = vrot.slane %v2208_v41, %v14628_v51  ;;  %v2223_v48 = vrot.slane %v11272_v42, %v14628_v51  ;;  %v2231_v49 = vrot.slane %v2224_v43, %v14628_v51  ;;  %v2239_v50 = vrot.slane %v11273_v44, %v14628_v51  ;;  %v11280_v43 = vld [vmem:[%s15921_s18] ss:$0 sm:$0xff] }
 0x4ae   : > { %v2476_v52 = vcombine.low %v2452_v45, %v2468_v46  ;;  %v2477_v53 = vcombine.high %v2452_v45, %v2468_v46  ;;  %v2478_v2 = vcombine.low %v2459_v54, %v2475_v55  ;;  %v2479_v3 = vcombine.high %v2459_v54, %v2475_v55 }
 0x4af   : > { %v2240_v56 = vcombine.low %v2215_v47, %v2223_v48  ;;  %v2256_v57 = vcombine.low %v2231_v49, %v2239_v50  ;;  %v2241_v4 = vcombine.high %v2215_v47, %v2223_v48  ;;  %v2257_v5 = vcombine.high %v2231_v49, %v2239_v50 }
 0x4b0   : > { %v2688_v59 = vpack.c.bf16 %v2476_v52, %v2476_v52  ;;  %v2689_v60 = vpack.c.bf16 %v2477_v53, %v2477_v53  ;;  %v2690_v8 = vpack.c.bf16 %v2478_v2, %v2478_v2  ;;  %v2691_v9 = vpack.c.bf16 %v2479_v3, %v2479_v3 }
 0x4b1   : > { %v2248_v61 = vrot.slane %v2240_v56, %v14630_v58  ;;  %v2264_v62 = vrot.slane %v2256_v57, %v14630_v58  ;;  %v2255_v12 = vrot.slane %v2241_v4, %v14630_v58  ;;  %v2271_v13 = vrot.slane %v2257_v5, %v14630_v58 }
 0x4b2   : > { %v2697_v63 = vsel %vm2692_vm4, %v2688_v59, 0  ;;  %v2743_v0 = vsel %vm2692_vm4, %v2689_v60, 0  ;;  %v2789_v14 = vsel %vm2692_vm4, %v2690_v8, 0  ;;  %v2835_v15 = vsel %vm2692_vm4, %v2691_v9, 0 }
 0x4b3   : > { %11838 = vmatpush3.bf16.xpose.msra.mxu1 %v2697_v63  ;;  %11844 = vmatpush3.bf16.xpose.msra.mxu0 %v2743_v0  ;;  %v2272_v6 = vcombine.low %v2248_v61, %v2264_v62  ;;  %v2273_v7 = vcombine.high %v2248_v61, %v2264_v62  ;;  %v2274_v16 = vcombine.low %v2255_v12, %v2271_v13 }
 0x4b4   : > { %11849 = vmatprep.subr.bf16.mxu1 %v13933_v1  ;;  %11855 = vmatprep.subr.bf16.mxu0 %v13933_v1  ;;  %v2275_v18 = vcombine.high %v2255_v12, %v2271_v13  ;;  %v2533_v44 = vadd.f32 %v11280_v43, %v14623_v38 }
 0x4b5   : > { %v2684_v10 = vpack.c.bf16 %v2272_v6, %v2272_v6  ;;  %v2685_v11 = vpack.c.bf16 %v2273_v7, %v2273_v7  ;;  %v2686_v20 = vpack.c.bf16 %v2274_v16, %v2274_v16 }
 0x4b6   : > { %v2687_v21 = vpack.c.bf16 %v2275_v18, %v2275_v18 }
 0x4ba   : > { %11840 = vmatmul.mubr.msk.bf16.vlgmr.msra.gmra.mxu1 %vm2692_vm4, %v2684_v10  ;;  %11846 = vmatmul.mubr.msk.bf16.vlgmr.msra.gmra.mxu0 %vm2692_vm4, %v2685_v11 }
 0x4bb   : > { %11850 = vmatpush3.bf16.xpose.msra.mxu1 %v2789_v14  ;;  %11856 = vmatpush3.bf16.xpose.msra.mxu0 %v2835_v15 }
 0x4bc   : > { %11851 = vmatprep.mubr.msk.bf16.mxu1 %vm13934_vm0, %v13933_v1  ;;  %11857 = vmatprep.mubr.msk.bf16.mxu0 %vm13934_vm0, %v13933_v1 }
 0x4bd   : > { %11861 = vmatprep.subr.bf16.mxu1 %v13933_v1  ;;  %11867 = vmatprep.subr.bf16.mxu0 %v13933_v1 }
 0x4c2   : > { %11852 = vmatmul.mubr.msk.bf16.vlgmr.msra.gmra.mxu1 %vm2692_vm4, %v2686_v20  ;;  %11858 = vmatmul.mubr.msk.bf16.vlgmr.msra.gmra.mxu0 %vm2692_vm4, %v2687_v21 }
 0x4c3   : > { %11863 = vmatprep.mubr.msk.bf16.mxu1 %vm13934_vm0, %v13933_v1  ;;  %11869 = vmatprep.mubr.msk.bf16.mxu0 %vm13934_vm0, %v13933_v1 }
 0x57a   : > { %v2733_v22 = vpop.f32.mrf.mxu1  ;;  %v2779_v23 = vpop.f32.mrf.mxu0 }
 0x57b   : > { %v2877_v24 = vsel %vm2692_vm4, %v2733_v22, -inf  ;;  %v2880_v25 = vsel %vm2692_vm4, %v2779_v23, -inf }
 0x57c   : > { %2878 = vmax.xlane.f32.xlu1 %v2877_v24  ;;  %v11841_v26 = vpop.f32.mrf.mxu1  ;;  %2881 = vmax.xlane.f32.xlu0 %v2880_v25  ;;  %v11847_v27 = vpop.f32.mrf.mxu0 }
 0x57e   : > { %v2736_v28 = vpop.f32.mrf.mxu1  ;;  %v2782_v29 = vpop.f32.mrf.mxu0 }
 0x580   : > { %v11842_v30 = vpop.f32.mrf.mxu1  ;;  %v11848_v31 = vpop.f32.mrf.mxu0 }
 0x582   : > { %v2825_v32 = vpop.f32.mrf.mxu1  ;;  %v2871_v33 = vpop.f32.mrf.mxu0 }
 0x583   : > { %v2883_v34 = vsel %vm2692_vm4, %v2825_v32, -inf  ;;  %v2886_v35 = vsel %vm2692_vm4, %v2871_v33, -inf }
 0x584   : > { %v11853_v36 = vpop.f32.mrf.mxu1  ;;  %2884 = vmax.xlane.f32.xlu0 %v2883_v34  ;;  %2887 = vmax.xlane.f32.xlu1 %v2886_v35  ;;  %v11859_v37 = vpop.f32.mrf.mxu0 }
 0x586   : > { %v2828_v39 = vpop.f32.mrf.mxu1  ;;  %v2874_v40 = vpop.f32.mrf.mxu0 }
 0x588   : > { %v11854_v41 = vpop.f32.mrf.mxu1  ;;  %v11860_v42 = vpop.f32.mrf.mxu0 }
 0x595   : > { %2542 = vrot.lane.b32.xlu1 %v2533_v44, %s15811_s22 }
 0x605   : > { %v2879_v45 = vpop.xlane.xlu1 %2878  ;;  %v2882_v46 = vpop.xlane.xlu0 %2881 }
 0x606   : > { %v2889_v47 = vsub.f32 %v2733_v22, %v2879_v45  ;;  %v2890_v48 = vsub.f32 %v2779_v23, %v2882_v46 }
 0x608   : > { %v2893_v49 = vmul.f32 1.442695, %v2889_v47  ;;  %v2895_v50 = vmul.f32 1.442695, %v2890_v48 }
 0x60a   : > { %12849 = vpow2.f32 %v2893_v49 }
 0x60b   : > { %12851 = vpow2.f32 %v2895_v50 }
 0x60d   : > { %v2885_v55 = vpop.xlane.xlu0 %2884  ;;  %v2888_v56 = vpop.xlane.xlu1 %2887 }
 0x60e   : > { %v2891_v57 = vsub.f32 %v2825_v32, %v2885_v55  ;;  %v2892_v59 = vsub.f32 %v2871_v33, %v2888_v56 }
 0x610   : > { %v2897_v60 = vmul.f32 1.442695, %v2891_v57  ;;  %v2899_v61 = vmul.f32 1.442695, %v2892_v59 }
 0x611   : > { %v2543_v3 = vpop.permute.xlu1 %2542 }
 0x612   : > { %12853 = vpow2.f32 %v2897_v60  ;;  %v2548_v6 = vcombine.low %v2533_v44, %v2543_v3  ;;  %v2549_v7 = vcombine.high %v2533_v44, %v2543_v3 }
 0x613   : > { %12855 = vpow2.f32 %v2899_v61 }
 0x614   : > { %v2556_v12 = vrot.slane %v2548_v6, %v14628_v51  ;;  %v2563_v13 = vrot.slane %v2549_v7, %v14628_v51 }
 0x617   : > { %v14691_v52 = vpop.eup %12849 }
 0x618   : > { %v14693_v53 = vpop.eup %12851  ;;  %v2901_v54 = vsel %vm2692_vm4, %v14691_v52, 0.0 }
 0x619   : > { %2902 = vadd.xlane.f32.xlu0 %v2901_v54  ;;  %v2904_v38 = vsel %vm2692_vm4, %v14693_v53, 0.0 }
 0x61a   : > { %2905 = vadd.xlane.f32.xlu1 %v2904_v38 }
 0x61f   : > { %v14701_v62 = vpop.eup %12853 }
 0x620   : > { %v14703_v63 = vpop.eup %12855  ;;  %v2907_v0 = vsel %vm2692_vm4, %v14701_v62, 0.0 }
 0x621   : > { %v2910_v2 = vsel %vm2692_vm4, %v14703_v63, 0.0 }
 0x62b   : > { %2545 = vrot.lane.b32.xlu1 %v2533_v44, %s15805_s23 }
 0x62f   : > { %2539 = vrot.lane.b32.xlu0 %v2533_v44, %s15807_s11 }
 0x64e   : > { %2908 = vadd.xlane.f32.xlu0 %v2907_v0 }
 0x64f   : > { %2911 = vadd.xlane.f32.xlu1 %v2910_v2 }
 0x6a2   : > { %v2903_v4 = vpop.xlane.xlu0 %2902 }
 0x6a3   : > { %v2906_v5 = vpop.xlane.xlu1 %2905  ;;  %12857 = vrcp.f32 %v2903_v4 }
 0x6a4   : > { %12859 = vrcp.f32 %v2906_v5 }
 0x6a6   : > { %v2540_v8 = vpop.permute.xlu0 %2539 }
 0x6a7   : > { %v2546_v9 = vpop.permute.xlu1 %2545 }
 0x6a8   : > { %v2564_v10 = vcombine.low %v2540_v8, %v2546_v9  ;;  %v2565_v11 = vcombine.high %v2540_v8, %v2546_v9 }
 0x6aa   : > { %v2572_v14 = vrot.slane %v2564_v10, %v14628_v51  ;;  %v2579_v15 = vrot.slane %v2565_v11, %v14628_v51 }
 0x6ac   : > { %v2580_v16 = vcombine.low %v2556_v12, %v2572_v14  ;;  %v2581_v18 = vcombine.high %v2556_v12, %v2572_v14  ;;  %v2596_v20 = vcombine.low %v2563_v13, %v2579_v15  ;;  %v2597_v21 = vcombine.high %v2563_v13, %v2579_v15 }
 0x6ae   : > { %v2588_v22 = vrot.slane %v2580_v16, %v14630_v58  ;;  %v2595_v23 = vrot.slane %v2581_v18, %v14630_v58  ;;  %v2604_v24 = vrot.slane %v2596_v20, %v14630_v58  ;;  %v2611_v25 = vrot.slane %v2597_v21, %v14630_v58 }
 0x6b0   : > { %v2616_v26 = vcombine.low %v2588_v22, %v2595_v23  ;;  %v11284_v27 = vcombine.high %v2588_v22, %v2595_v23  ;;  %v2632_v28 = vcombine.low %v2604_v24, %v2611_v25  ;;  %v11285_v29 = vcombine.high %v2604_v24, %v2611_v25  ;;  %v12858_v39 = vpop.eup %12857 }
 0x6b1   : > { %v12860_v44 = vpop.eup %12859  ;;  %v2917_v54 = vmul.f32 %v12858_v39, %v14691_v52 }
 0x6b2   : > { %v2623_v30 = vrot.slane %v2616_v26, %v14628_v51  ;;  %v2631_v31 = vrot.slane %v11284_v27, %v14628_v51  ;;  %v2639_v32 = vrot.slane %v2632_v28, %v14628_v51  ;;  %v2647_v33 = vrot.slane %v11285_v29, %v14628_v51 }
 0x6b3   : > { %v2918_v38 = vmul.f32 %v12860_v44, %v14693_v53  ;;  %v2921_v60 = vpack.c.bf16 %v2917_v54, %v2917_v54 }
 0x6b4   : > { %v2648_v34 = vcombine.low %v2623_v30, %v2631_v31  ;;  %v2664_v35 = vcombine.low %v2639_v32, %v2647_v33  ;;  %v2649_v36 = vcombine.high %v2623_v30, %v2631_v31  ;;  %v2665_v37 = vcombine.high %v2639_v32, %v2647_v33 }
 0x6b5   : > { %v2922_v61 = vpack.c.bf16 %v2918_v38, %v2918_v38 }
 0x6b6   : > { %v2656_v40 = vrot.slane %v2648_v34, %v14630_v58  ;;  %v2672_v41 = vrot.slane %v2664_v35, %v14630_v58  ;;  %v2663_v42 = vrot.slane %v2649_v36, %v14630_v58  ;;  %v2679_v43 = vrot.slane %v2665_v37, %v14630_v58  ;;  %v12781_v36 = vld [vmem:[%s15922_s26 + $0x8] sm:$0xff]  }
 0x6b8   : > { %v2680_v45 = vcombine.low %v2656_v40, %v2672_v41  ;;  %v2681_v46 = vcombine.high %v2656_v40, %v2672_v41  ;;  %v2682_v47 = vcombine.low %v2663_v42, %v2679_v43  ;;  %v2683_v48 = vcombine.high %v2663_v42, %v2679_v43 }
 0x6ba   : > { %v2925_v49 = vpack.c.bf16 %v2680_v45, %v2680_v45  ;;  %v2926_v50 = vpack.c.bf16 %v2681_v46, %v2681_v46  ;;  %v2927_v57 = vpack.c.bf16 %v2682_v47, %v2682_v47  ;;  %v2928_v59 = vpack.c.bf16 %v2683_v48, %v2683_v48  ;;  %v12782_v47 = vld [vmem:[%s15922_s26] sm:$0xff]  }
 0x6bc   : > { %v2934_v55 = vsel %vm2932_vm5, %v2925_v49, 0  ;;  %v2980_v56 = vsel %vm2932_vm5, %v2926_v50, 0  ;;  %v3026_v52 = vsel %vm2932_vm5, %v2927_v57, 0  ;;  %v3072_v53 = vsel %vm2932_vm5, %v2928_v59, 0 }
 0x6bd   : > { %11862 = vmatpush3.bf16.msra.mxu1 %v2934_v55  ;;  %11868 = vmatpush3.bf16.msra.mxu0 %v2980_v56 }
 0x6be   : > { %11873 = vmatprep.subr.bf16.mxu1 %v13933_v1  ;;  %11879 = vmatprep.subr.bf16.mxu0 %v13933_v1 }
 0x6c0   : > { %11864 = vmatmul.mubr.msk.bf16.vlgmr.msra.gmra.mxu1 %vm2692_vm4, %v2921_v60  ;;  %11870 = vmatmul.mubr.msk.bf16.vlgmr.msra.gmra.mxu0 %vm2692_vm4, %v2922_v61 }
 0x6c1   : > { %11874 = vmatpush3.bf16.msra.mxu1 %v3026_v52  ;;  %11880 = vmatpush3.bf16.msra.mxu0 %v3072_v53 }
 0x6c2   : > { %11875 = vmatprep.mubr.msk.bf16.mxu1 %vm13934_vm0, %v13933_v1  ;;  %11881 = vmatprep.mubr.msk.bf16.mxu0 %vm13934_vm0, %v13933_v1 }
 0x6c3   : > { %11885 = vmatprep.subr.bf16.mxu1 %v13933_v1  ;;  %11893 = vmatprep.subr.bf16.mxu0 %v13933_v1 }
 0x6d7   : > { %v2909_v0 = vpop.xlane.xlu0 %2908 }
 0x6d8   : > { %12861 = vrcp.f32 %v2909_v0  ;;  %v2912_v2 = vpop.xlane.xlu1 %2911 }
 0x6d9   : > { %12863 = vrcp.f32 %v2912_v2 }
 0x6e5   : > { %v12862_v3 = vpop.eup %12861 }
 0x6e6   : > { %v12864_v4 = vpop.eup %12863  ;;  %v2919_v5 = vmul.f32 %v12862_v3, %v14701_v62 }
 0x6e7   : > { %v2920_v6 = vmul.f32 %v12864_v4, %v14703_v63 }
 0x6e8   : > { %v2923_v7 = vpack.c.bf16 %v2919_v5, %v2919_v5 }
 0x6e9   : > { %v2924_v8 = vpack.c.bf16 %v2920_v6, %v2920_v6 }
 0x6ea   : > { %11876 = vmatmul.mubr.msk.bf16.vlgmr.msra.gmra.mxu1 %vm2692_vm4, %v2923_v7 }
 0x6eb   : > { %11882 = vmatmul.mubr.msk.bf16.vlgmr.msra.gmra.mxu0 %vm2692_vm4, %v2924_v8  ;;  %11889 = vmatprep.mubr.msk.bf16.mxu1 %vm13934_vm0, %v13933_v1 }
 0x6ec   : > { %11897 = vmatprep.mubr.msk.bf16.mxu0 %vm13934_vm0, %v13933_v1  ;;  %11886 = vmatpush3.bf16.msra.mxu1 %v12781_v36 }
 0x6ed   : > { %11887 = vmatprep.subr.bf16.mxu1 %v13933_v1 }
 0x6f0   : > { %11888 = vmatpush3.bf16.msra.mxu1 %v12782_v47 }
 0x6f1   : > { %11901 = vmatprep.subr.bf16.mxu1 %v13933_v1 }
 0x780   : > { %v2970_v9 = vpop.f32.mrf.mxu1  ;;  %v3016_v10 = vpop.f32.mrf.mxu0 }
 0x782   : > { %v11865_v11 = vpop.f32.mrf.mxu1  ;;  %v11871_v12 = vpop.f32.mrf.mxu0 }
 0x783   : > { %v11296_v11 = vld [vmem:[%s15923_s4] ss:$0 sm:$0xff] }
 0x784   : > { %v2973_v13 = vpop.f32.mrf.mxu1  ;;  %v3019_v62 = vpop.f32.mrf.mxu0 }
 0x786   : > { %v11866_v14 = vpop.f32.mrf.mxu1  ;;  %v11872_v63 = vpop.f32.mrf.mxu0 }
 0x7aa   : > { %v3062_v15 = vpop.f32.mrf.mxu1 }
 0x7ab   : > { %v3114_v16 = vcombine.low %v2970_v9, %v3062_v15  ;;  %v3115_v18 = vcombine.high %v2970_v9, %v3062_v15  ;;  %v3108_v20 = vpop.f32.mrf.mxu0 }
 0x7ac   : > { %v3130_v21 = vcombine.low %v3016_v10, %v3108_v20  ;;  %v3131_v22 = vcombine.high %v3016_v10, %v3108_v20  ;;  %v11877_v23 = vpop.f32.mrf.mxu1 }
 0x7ad   : > { %v3122_v24 = vrot.slane %v3114_v16, %v14628_v51  ;;  %v3129_v25 = vrot.slane %v3115_v18, %v14628_v51  ;;  %v11883_v26 = vpop.f32.mrf.mxu0 }
 0x7ae   : > { %v3138_v27 = vrot.slane %v3130_v21, %v14628_v51  ;;  %v3145_v28 = vrot.slane %v3131_v22, %v14628_v51  ;;  %v3065_v29 = vpop.f32.mrf.mxu1 }
 0x7af   : > { %v3111_v30 = vpop.f32.mrf.mxu0 }
 0x7b0   : > { %v3146_v31 = vcombine.low %v3122_v24, %v3138_v27  ;;  %v3147_v32 = vcombine.high %v3122_v24, %v3138_v27  ;;  %v3162_v33 = vcombine.low %v3129_v25, %v3145_v28  ;;  %v3163_v34 = vcombine.high %v3129_v25, %v3145_v28  ;;  %v11878_v35 = vpop.f32.mrf.mxu1 }
 0x7b1   : > { %v11884_v37 = vpop.f32.mrf.mxu0 }
 0x7b2   : > { %v3154_v39 = vrot.slane %v3146_v31, %v14630_v58  ;;  %v3161_v40 = vrot.slane %v3147_v32, %v14630_v58  ;;  %v3170_v41 = vrot.slane %v3162_v33, %v14630_v58  ;;  %v3177_v42 = vrot.slane %v3163_v34, %v14630_v58  ;;  %v11300_v32 = vld [vmem:[#allocation4] ss:$0 sm:$0xff]  ;;  %v11301_v34 = vld [vmem:[#allocation6] ss:$0 sm:$0xff] }
 0x7b4   : > { %v3182_v43 = vcombine.low %v3154_v39, %v3161_v40  ;;  %v11294_v44 = vcombine.high %v3154_v39, %v3161_v40  ;;  %v3198_v45 = vcombine.low %v3170_v41, %v3177_v42  ;;  %v11295_v46 = vcombine.high %v3170_v41, %v3177_v42  ;;  %v11302_v41 = vld [vmem:[#allocation7] ss:$0 sm:$0xff] }
 0x7b6   : > { %v3189_v48 = vrot.slane %v3182_v43, %v14628_v51  ;;  %v3197_v49 = vrot.slane %v11294_v44, %v14628_v51  ;;  %v3205_v50 = vrot.slane %v3198_v45, %v14628_v51  ;;  %v3213_v54 = vrot.slane %v11295_v46, %v14628_v51 }
 0x7b8   : > { %v3215_v38 = vcombine.high %v3189_v48, %v3197_v49  ;;  %v3231_v55 = vcombine.high %v3205_v50, %v3213_v54  ;;  %v3214_v56 = vcombine.low %v3189_v48, %v3197_v49  ;;  %v3230_v57 = vcombine.low %v3205_v50, %v3213_v54  ;;  %v11306_v49 = vld [vmem:[#allocation9] ss:$0 sm:$0xff] }
 0x7ba   : > { %v3229_v59 = vrot.slane %v3215_v38, %v14630_v58  ;;  %v3245_v60 = vrot.slane %v3231_v55, %v14630_v58  ;;  %v3222_v61 = vrot.slane %v3214_v56, %v14630_v58  ;;  %v3238_v52 = vrot.slane %v3230_v57, %v14630_v58 }
 0x7bc   : > { %v3248_v53 = vcombine.low %v3229_v59, %v3245_v60  ;;  %v3247_v0 = vcombine.high %v3222_v61, %v3238_v52  ;;  %v3246_v2 = vcombine.low %v3222_v61, %v3238_v52  ;;  %v3249_v3 = vcombine.high %v3229_v59, %v3245_v60 }
 0x7be   : > { %3255 = vrot.lane.b32.xlu1 %v3248_v53, %s15809_s14  ;;  %3251 = vrot.lane.b32.xlu0 %v3247_v0, %s15801_s16  ;;  %s15924_s16 = sld [smem:[#allocation76_spill]] }
 0x7c2   : > { %3259 = vrot.lane.b32.xlu0 %v3249_v3, %s15803_s2  ;;  %s15925_s2 = sld [smem:[#allocation77_spill]]  ;;  %v12790_v3 = vld [vmem:[%s15919_s3 + $0x18] sm:$0xff]  }
 0x7c4   : > { %v12783_v24 = vld [vmem:[%s15924_s16 + $0x8] sm:$0xff]   ;;  %v12784_v25 = vld [vmem:[%s15924_s16] sm:$0xff]  }
 0x7c5   : > { %11894 = vmatpush3.bf16.msra.mxu0 %v12783_v24 }
 0x7c6   : > { %11895 = vmatprep.subr.bf16.mxu0 %v13933_v1 }
 0x7c8   : > { %v12785_v26 = vld [vmem:[%s15925_s2 + $0x18] sm:$0xff]   ;;  %v12786_v27 = vld [vmem:[%s15925_s2 + $0x10] sm:$0xff]   ;;  %v12787_v39 = vld [vmem:[%s15925_s2 + $0x8] sm:$0xff]  }
 0x7c9   : > { %11896 = vmatpush3.bf16.msra.mxu0 %v12784_v25  ;;  %v12788_v40 = vld [vmem:[%s15925_s2] sm:$0xff]  }
 0x7ca   : > { %11913 = vmatprep.subr.bf16.mxu0 %v13933_v1 }
 0x830   : > { %v3252_v4 = vpop.permute.xlu0 %3251  ;;  %v3256_v5 = vpop.permute.xlu1 %3255 }
 0x831   : > { %v3262_v6 = vsel %vm2692_vm4, %v3246_v2, %v3252_v4  ;;  %v12789_v2 = vld [vmem:[%s15917_s7 + $0x18] sm:$0xff]   ;;  %v12791_v4 = vld [vmem:[%s15917_s7 + $0x10] sm:$0xff]   ;;  %s15936_s7 = sld [smem:[#allocation101_spill]] }
 0x832   : > { %v3264_v8 = vsel %vm3263_vm6, %v3262_v6, %v3256_v5  ;;  %v12792_v5 = vld [vmem:[%s15919_s3 + $0x10] sm:$0xff]   ;;  %s15932_s3 = smov 120  }
 0x834   : > { %v3260_v7 = vpop.permute.xlu0 %3259 }
 0x835   : > { %v3266_v9 = vsel %vm3265_vm7, %v3264_v8, %v3260_v7 }
 0x836   : > { %v3267_v10 = vpack.c.bf16 %v3266_v9, %v3266_v9 }
 0x838   : > { %11890 = vmatmul.mubr.msk.bf16.vlgmr.msra.gmra.mxu1 %vm2086_vm3, %v3267_v10  ;;  %v11312_v10 = vld [vmem:[#allocation10] ss:$0 sm:$0xff] }
 0x839   : > { %11909 = vmatprep.mubr.msk.bf16.mxu1 %vm13934_vm0, %v13933_v1  ;;  %11902 = vmatpush3.bf16.msra.mxu1 %v12785_v26  ;;  %v11339_v26 = vld [vmem:[#allocation2 + $0x1] ss:$0 sm:$0xff] }
 0x83a   : > { %11903 = vmatprep.subr.bf16.mxu1 %v13933_v1 }
 0x83d   : > { %11904 = vmatpush3.bf16.msra.mxu1 %v12786_v27 }
 0x83e   : > { %11905 = vmatprep.subr.bf16.mxu1 %v13933_v1 }
 0x841   : > { %11906 = vmatpush3.bf16.msra.mxu1 %v12787_v39 }
 0x842   : > { %11907 = vmatprep.subr.bf16.mxu1 %v13933_v1 }
 0x845   : > { %11908 = vmatpush3.bf16.msra.mxu1 %v12788_v40 }
 0x846   : > { %11929 = vmatprep.subr.bf16.mxu1 %v13933_v1 }
 0x8f8   : > { %v3323_v12 = vpop.f32.mrf.mxu1 }
 0x8f9   : > { %v3324_v13 = vadd.f32 %v11296_v11, %v3323_v12  ;;  %v11313_v12 = vld [vmem:[#allocation12] ss:$0 sm:$0xff] }
 0x8fa   : > { %v11891_v62 = vpop.f32.mrf.mxu1 }
 0x8fb   : > { %v3329_v14 = vadd.f32 %v3324_v13, %v14592_v17 }
 0x8fc   : > { %v3326_v63 = vpop.f32.mrf.mxu1 }
 0x8fd   : > { %v3332_v15 = vsel %vm2086_vm3, %v3329_v14, 0.0 }
 0x8fe   : > { %3333 = vadd.xlane.f32.xlu1 %v3332_v15  ;;  %v11892_v16 = vpop.f32.mrf.mxu1  ;;  %v12794_v15 = vld [vmem:[%s15918_s10 + $0x10] sm:$0xff]  }
 0x987   : > { %v3334_v18 = vpop.xlane.xlu1 %3333 }
 0x988   : > { %v3336_v20 = vmul.f32 0.03125, %v3334_v18 }
 0x98a   : > { %v3337_v21 = vsub.f32 %v3329_v14, %v3336_v20  ;;  %v12793_v14 = vld [vmem:[%s15918_s10 + $0x18] sm:$0xff]  }
 0x98c   : > { %v3338_v22 = vmul.f32 %v3337_v21, %v3337_v21 }
 0x98e   : > { %v3339_v23 = vsel %vm2086_vm3, %v3338_v22, 0.0 }
 0x98f   : > { %3340 = vadd.xlane.f32.xlu0 %v3339_v23 }
 0xa18   : > { %v3341_v28 = vpop.xlane.xlu0 %3340 }
 0xa19   : > { %v3342_v29 = vmul.f32 0.03125, %v3341_v28 }
 0xa1b   : > { %v3343_v30 = vadd.f32 1e-05, %v3342_v29  ;;  %v11333_v29 = vld [vmem:[%s15920_s1 + $0x1] ss:$0 sm:$0xff]  ;;  %s15930_s1 = sld [smem:[#allocation84_spill]] }
 0xa1d   : > { %12865 = vrsqrt.f32 %v3343_v30 }
 0xa2a   : > { %v12866_v31 = vpop.eup %12865 }
 0xa2b   : > { %v3345_v33 = vmul.f32 %v12866_v31, %v3337_v21 }
 0xa2d   : > { %v3352_v35 = vmul.f32 %v11300_v32, %v3345_v33 }
 0xa2f   : > { %v3359_v36 = vadd.f32 %v11301_v34, %v3352_v35 }
 0xa31   : > { %v3365_v37 = vpack.c.bf16 %v3359_v36, %v3359_v36 }
 0xa33   : > { %11898 = vmatmul.mubr.msk.bf16.vlgmr.msra.gmra.mxu0 %vm2086_vm3, %v3365_v37 }
 0xa34   : > { %11917 = vmatprep.mubr.msk.bf16.mxu0 %vm13934_vm0, %v13933_v1  ;;  %11914 = vmatpush3.bf16.msra.mxu0 %v12789_v2 }
 0xa35   : > { %11915 = vmatprep.subr.bf16.mxu0 %v13933_v1 }
 0xa38   : > { %11916 = vmatpush3.bf16.msra.mxu0 %v12791_v4 }
 0xa39   : > { %11921 = vmatprep.subr.bf16.mxu0 %v13933_v1 }
 0xaf3   : > { %v3421_v42 = vpop.f32.mrf.mxu0 }
 0xaf4   : > { %v3422_v43 = vadd.f32 %v11302_v41, %v3421_v42 }
 0xaf5   : > { %v11899_v44 = vpop.f32.mrf.mxu0 }
 0xaf6   : > { %v3427_v45 = vmax.f32 %v3422_v43, 0.0 }
 0xaf7   : > { %v3424_v46 = vpop.f32.mrf.mxu0 }
 0xaf8   : > { %v3437_v47 = vpack.c.bf16 %v3427_v45, %v3427_v45 }
 0xaf9   : > { %v11900_v48 = vpop.f32.mrf.mxu0 }
 0xafa   : > { %11910 = vmatmul.mubr.msk.bf16.vlgmr.msra.gmra.mxu1 %vm3468_vm8, %v3437_v47 }
 0xafb   : > { %11933 = vmatprep.mubr.msk.bf16.mxu1 %vm13934_vm0, %v13933_v1  ;;  %11930 = vmatpush3.bf16.msra.mxu1 %v12790_v3 }
 0xafc   : > { %11931 = vmatprep.subr.bf16.mxu1 %v13933_v1 }
 0xaff   : > { %11932 = vmatpush3.bf16.msra.mxu1 %v12792_v5 }
 0xb00   : > { %11943 = vmatprep.subr.bf16.mxu1 %v13933_v1 }
 0xbba   : > { %v3506_v50 = vpop.f32.mrf.mxu1 }
 0xbbb   : > { %v3507_v54 = vadd.f32 %v11306_v49, %v3506_v50 }
 0xbbc   : > { %v11911_v38 = vpop.f32.mrf.mxu1 }
 0xbbd   : > { %v3512_v55 = vadd.f32 %v3507_v54, %v3359_v36 }
 0xbbe   : > { %v3509_v56 = vpop.f32.mrf.mxu1 }
 0xbbf   : > { %v3515_v57 = vsel %vm2086_vm3, %v3512_v55, 0.0 }
 0xbc0   : > { %3516 = vadd.xlane.f32.xlu0 %v3515_v57  ;;  %v11912_v59 = vpop.f32.mrf.mxu1 }
 0xc49   : > { %v3517_v60 = vpop.xlane.xlu0 %3516 }
 0xc4a   : > { %v3518_v61 = vmul.f32 0.03125, %v3517_v60 }
 0xc4c   : > { %v3519_v52 = vsub.f32 %v3512_v55, %v3518_v61 }
 0xc4e   : > { %v3520_v53 = vmul.f32 %v3519_v52, %v3519_v52 }
 0xc50   : > { %v3521_v0 = vsel %vm2086_vm3, %v3520_v53, 0.0 }
 0xc51   : > { %3522 = vadd.xlane.f32.xlu1 %v3521_v0 }
 0xcda   : > { %v3523_v6 = vpop.xlane.xlu1 %3522 }
 0xcdb   : > { %v3524_v7 = vmul.f32 0.03125, %v3523_v6 }
 0xcdd   : > { %v3525_v8 = vadd.f32 1e-05, %v3524_v7 }
 0xcdf   : > { %12867 = vrsqrt.f32 %v3525_v8 }
 0xcec   : > { %v12868_v9 = vpop.eup %12867 }
 0xced   : > { %v3527_v11 = vmul.f32 %v12868_v9, %v3519_v52 }
 0xcef   : > { %v3534_v13 = vmul.f32 %v11312_v10, %v3527_v11 }
 0xcf1   : > { %v14810_v62 = vadd.f32 %v11313_v12, %v3534_v13 }
 0xcf3   : > { %v3570_v63 = vpack.c.bf16 %v14810_v62, %v14810_v62 }
 0xcf5   : > { %11918 = vmatmul.mubr.msk.bf16.vlgmr.msra.gmra.mxu0 %vm2086_vm3, %v3570_v63  ;;  %11934 = vmatmul.mubr.msk.bf16.vlgmr.msra.gmra.mxu1 %vm2086_vm3, %v3570_v63 }
 0xcf6   : > { %11922 = vmatpush3.bf16.msra.mxu0 %v12793_v14  ;;  %11925 = vmatprep.mubr.msk.bf16.mxu0 %vm13934_vm0, %v13933_v1 }
 0xcf7   : > { %11923 = vmatprep.subr.bf16.mxu0 %v13933_v1  ;;  %11945 = vmatprep.mubr.msk.bf16.mxu1 %vm13934_vm0, %v13933_v1 }
 0xcfa   : > { %11924 = vmatpush3.bf16.msra.mxu0 %v12794_v15 }
 0xcfb   : > { %11937 = vmatprep.subr.bf16.mxu0 %v13933_v1 }
 0xcfd   : > { %11926 = vmatmul.mubr.msk.bf16.vlgmr.msra.gmra.mxu0 %vm2086_vm3, %v3570_v63 }
 0xcfe   : > { %11939 = vmatprep.mubr.msk.bf16.mxu0 %vm13934_vm0, %v13933_v1 }
 0xdb5   : > { %v3626_v16 = vpop.f32.mrf.mxu0  ;;  %v14827_v18 = vpop.f32.mrf.mxu1 }
 0xdb6   : > { %v3627_v32 = vadd.f32 %v11333_v29, %v3626_v16 }
 0xdb7   : > { %v11919_v20 = vpop.f32.mrf.mxu0  ;;  %v11935_v21 = vpop.f32.mrf.mxu1 }
 0xdb9   : > { %v3629_v22 = vpop.f32.mrf.mxu0  ;;  %v4037_v23 = vpop.f32.mrf.mxu1 }
 0xdbb   : > { %v11920_v24 = vpop.f32.mrf.mxu0  ;;  %v11936_v25 = vpop.f32.mrf.mxu1 }
 0xdbd   : > { %v3830_v27 = vpop.f32.mrf.mxu0 }
 0xdbe   : > { %v3831_v28 = vadd.f32 %v11339_v26, %v3830_v27 }
 0xdbf   : > { %v11927_v30 = vpop.f32.mrf.mxu0 }
 0xdc0   : > { %3840 = vrot.lane.b32.xlu1 %v3831_v28, %s15811_s22  ;;  %3837 = vrot.lane.b32.xlu0 %v3831_v28, %s15807_s11 }
 0xdc1   : > { %v3833_v31 = vpop.f32.mrf.mxu0 }
 0xdc3   : > { %v11928_v33 = vpop.f32.mrf.mxu0 }
 0xdc4   : > { %3843 = vrot.lane.b32.xlu1 %v3831_v28, %s15805_s23  ;;  %3633 = vrot.lane.b32.xlu0 %v3627_v32, %s15807_s11 }
 0xdc8   : > { %3636 = vrot.lane.b32.xlu1 %v3627_v32, %s15811_s22  ;;  %3639 = vrot.lane.b32.xlu0 %v3627_v32, %s15805_s23 }
 0xe32   : > { %v3841_v34 = vpop.permute.xlu1 %3840  ;;  %v3838_v35 = vpop.permute.xlu0 %3837 }
 0xe33   : > { %v3846_v36 = vcombine.low %v3831_v28, %v3841_v34  ;;  %v3847_v37 = vcombine.high %v3831_v28, %v3841_v34 }
 0xe35   : > { %v3854_v43 = vrot.slane %v3846_v36, %v14628_v51  ;;  %v3861_v44 = vrot.slane %v3847_v37, %v14628_v51 }
 0xe36   : > { %v3844_v39 = vpop.permute.xlu1 %3843  ;;  %v3634_v40 = vpop.permute.xlu0 %3633 }
 0xe37   : > { %v3862_v41 = vcombine.low %v3838_v35, %v3844_v39  ;;  %v3863_v42 = vcombine.high %v3838_v35, %v3844_v39 }
 0xe39   : > { %v3870_v45 = vrot.slane %v3862_v41, %v14628_v51  ;;  %v3877_v46 = vrot.slane %v3863_v42, %v14628_v51 }
 0xe3a   : > { %v3637_v47 = vpop.permute.xlu1 %3636  ;;  %v3640_v48 = vpop.permute.xlu0 %3639 }
 0xe3b   : > { %v3878_v49 = vcombine.low %v3854_v43, %v3870_v45  ;;  %v3879_v50 = vcombine.high %v3854_v43, %v3870_v45  ;;  %v3894_v54 = vcombine.low %v3861_v44, %v3877_v46  ;;  %v3895_v38 = vcombine.high %v3861_v44, %v3877_v46 }
 0xe3c   : > { %v3642_v55 = vcombine.low %v3627_v32, %v3637_v47  ;;  %v3643_v56 = vcombine.high %v3627_v32, %v3637_v47  ;;  %v3658_v57 = vcombine.low %v3634_v40, %v3640_v48  ;;  %v3659_v59 = vcombine.high %v3634_v40, %v3640_v48 }
 0xe3d   : > { %v3886_v60 = vrot.slane %v3878_v49, %v14630_v58  ;;  %v3893_v61 = vrot.slane %v3879_v50, %v14630_v58  ;;  %v3902_v52 = vrot.slane %v3894_v54, %v14630_v58  ;;  %v3909_v53 = vrot.slane %v3895_v38, %v14630_v58 }
 0xe3e   : > { %v3650_v0 = vrot.slane %v3642_v55, %v14628_v51  ;;  %v3657_v2 = vrot.slane %v3643_v56, %v14628_v51  ;;  %v3666_v3 = vrot.slane %v3658_v57, %v14628_v51  ;;  %v3673_v4 = vrot.slane %v3659_v59, %v14628_v51 }
 0xe3f   : > { %v3914_v5 = vcombine.low %v3886_v60, %v3893_v61  ;;  %v11343_v6 = vcombine.high %v3886_v60, %v3893_v61  ;;  %v3930_v7 = vcombine.low %v3902_v52, %v3909_v53  ;;  %v11344_v8 = vcombine.high %v3902_v52, %v3909_v53 }
 0xe40   : > { %v3674_v9 = vcombine.low %v3650_v0, %v3666_v3  ;;  %v3675_v10 = vcombine.high %v3650_v0, %v3666_v3  ;;  %v3690_v11 = vcombine.low %v3657_v2, %v3673_v4  ;;  %v3691_v12 = vcombine.high %v3657_v2, %v3673_v4 }
 0xe41   : > { %v3921_v13 = vrot.slane %v3914_v5, %v14628_v51  ;;  %v3929_v14 = vrot.slane %v11343_v6, %v14628_v51  ;;  %v3937_v63 = vrot.slane %v3930_v7, %v14628_v51  ;;  %v3945_v15 = vrot.slane %v11344_v8, %v14628_v51 }
 0xe42   : > { %v3682_v16 = vrot.slane %v3674_v9, %v14630_v58  ;;  %v3689_v20 = vrot.slane %v3675_v10, %v14630_v58  ;;  %v3698_v21 = vrot.slane %v3690_v11, %v14630_v58  ;;  %v3705_v22 = vrot.slane %v3691_v12, %v14630_v58 }
 0xe43   : > { %v3946_v23 = vcombine.low %v3921_v13, %v3929_v14  ;;  %v3962_v24 = vcombine.low %v3937_v63, %v3945_v15  ;;  %v3947_v25 = vcombine.high %v3921_v13, %v3929_v14  ;;  %v3963_v26 = vcombine.high %v3937_v63, %v3945_v15 }
 0xe44   : > { %v3710_v27 = vcombine.low %v3682_v16, %v3689_v20  ;;  %v11337_v28 = vcombine.high %v3682_v16, %v3689_v20  ;;  %v3726_v29 = vcombine.low %v3698_v21, %v3705_v22  ;;  %v11338_v30 = vcombine.high %v3698_v21, %v3705_v22 }
 0xe45   : > { %v3954_v31 = vrot.slane %v3946_v23, %v14630_v58  ;;  %v3970_v32 = vrot.slane %v3962_v24, %v14630_v58  ;;  %v3961_v40 = vrot.slane %v3947_v25, %v14630_v58  ;;  %v3977_v41 = vrot.slane %v3963_v26, %v14630_v58 }
 0xe46   : > { %v3717_v33 = vrot.slane %v3710_v27, %v14628_v51  ;;  %v3725_v34 = vrot.slane %v11337_v28, %v14628_v51  ;;  %v3733_v35 = vrot.slane %v3726_v29, %v14628_v51  ;;  %v3741_v36 = vrot.slane %v11338_v30, %v14628_v51  ;;  %v11345_v30 = vld [vmem:[%s15921_s18 + $0x1] ss:$0 sm:$0xff] }
 0xe47   : > { %v3978_v37 = vcombine.low %v3954_v31, %v3970_v32  ;;  %v3979_v39 = vcombine.high %v3954_v31, %v3970_v32  ;;  %v3980_v50 = vcombine.low %v3961_v40, %v3977_v41  ;;  %v3981_v54 = vcombine.high %v3961_v40, %v3977_v41 }
 0xe48   : > { %v3742_v42 = vcombine.low %v3717_v33, %v3725_v34  ;;  %v3758_v43 = vcombine.low %v3733_v35, %v3741_v36  ;;  %v3743_v38 = vcombine.high %v3717_v33, %v3725_v34  ;;  %v3759_v55 = vcombine.high %v3733_v35, %v3741_v36 }
 0xe49   : > { %v4190_v44 = vpack.c.bf16 %v3978_v37, %v3978_v37  ;;  %v4191_v45 = vpack.c.bf16 %v3979_v39, %v3979_v39  ;;  %v4192_v59 = vpack.c.bf16 %v3980_v50, %v3980_v50  ;;  %v4193_v60 = vpack.c.bf16 %v3981_v54, %v3981_v54 }
 0xe4a   : > { %v3750_v46 = vrot.slane %v3742_v42, %v14630_v58  ;;  %v3766_v47 = vrot.slane %v3758_v43, %v14630_v58  ;;  %v3757_v53 = vrot.slane %v3743_v38, %v14630_v58  ;;  %v3773_v0 = vrot.slane %v3759_v55, %v14630_v58 }
 0xe4b   : > { %v4198_v48 = vsel %vm2692_vm4, %v4190_v44, 0  ;;  %v4244_v49 = vsel %vm2692_vm4, %v4191_v45, 0  ;;  %v4290_v2 = vsel %vm2692_vm4, %v4192_v59, 0  ;;  %v4336_v3 = vsel %vm2692_vm4, %v4193_v60, 0 }
 0xe4c   : > { %11938 = vmatpush3.bf16.xpose.msra.mxu0 %v4198_v48  ;;  %11944 = vmatpush3.bf16.xpose.msra.mxu1 %v4244_v49  ;;  %v3774_v56 = vcombine.low %v3750_v46, %v3766_v47  ;;  %v3775_v57 = vcombine.high %v3750_v46, %v3766_v47  ;;  %v3776_v4 = vcombine.low %v3757_v53, %v3773_v0 }
 0xe4d   : > { %11949 = vmatprep.subr.bf16.mxu0 %v13933_v1  ;;  %11955 = vmatprep.subr.bf16.mxu1 %v13933_v1  ;;  %v3777_v5 = vcombine.high %v3757_v53, %v3773_v0  ;;  %v4035_v31 = vadd.f32 %v11345_v30, %v14827_v18 }
 0xe4e   : > { %v4186_v61 = vpack.c.bf16 %v3774_v56, %v3774_v56  ;;  %v4187_v52 = vpack.c.bf16 %v3775_v57, %v3775_v57  ;;  %v4188_v6 = vpack.c.bf16 %v3776_v4, %v3776_v4 }
 0xe4f   : > { %v4189_v7 = vpack.c.bf16 %v3777_v5, %v3777_v5 }
 0xe53   : > { %11940 = vmatmul.mubr.msk.bf16.vlgmr.msra.gmra.mxu0 %vm2692_vm4, %v4186_v61  ;;  %11946 = vmatmul.mubr.msk.bf16.vlgmr.msra.gmra.mxu1 %vm2692_vm4, %v4187_v52 }
 0xe54   : > { %11950 = vmatpush3.bf16.xpose.msra.mxu0 %v4290_v2  ;;  %11956 = vmatpush3.bf16.xpose.msra.mxu1 %v4336_v3 }
 0xe55   : > { %11951 = vmatprep.mubr.msk.bf16.mxu0 %vm13934_vm0, %v13933_v1  ;;  %11957 = vmatprep.mubr.msk.bf16.mxu1 %vm13934_vm0, %v13933_v1 }
 0xe56   : > { %11961 = vmatprep.subr.bf16.mxu0 %v13933_v1  ;;  %11967 = vmatprep.subr.bf16.mxu1 %v13933_v1 }
 0xe5b   : > { %11952 = vmatmul.mubr.msk.bf16.vlgmr.msra.gmra.mxu0 %vm2692_vm4, %v4188_v6  ;;  %11958 = vmatmul.mubr.msk.bf16.vlgmr.msra.gmra.mxu1 %vm2692_vm4, %v4189_v7 }
 0xe5c   : > { %11963 = vmatprep.mubr.msk.bf16.mxu0 %vm13934_vm0, %v13933_v1  ;;  %11969 = vmatprep.mubr.msk.bf16.mxu1 %vm13934_vm0, %v13933_v1 }
 0xf13   : > { %v4234_v8 = vpop.f32.mrf.mxu0  ;;  %v4280_v9 = vpop.f32.mrf.mxu1 }
 0xf14   : > { %v4381_v10 = vsel %vm2692_vm4, %v4280_v9, -inf  ;;  %v4378_v11 = vsel %vm2692_vm4, %v4234_v8, -inf }
 0xf15   : > { %4382 = vmax.xlane.f32.xlu0 %v4381_v10  ;;  %v11947_v12 = vpop.f32.mrf.mxu1  ;;  %4379 = vmax.xlane.f32.xlu1 %v4378_v11  ;;  %v11941_v13 = vpop.f32.mrf.mxu0 }
 0xf17   : > { %v4237_v14 = vpop.f32.mrf.mxu0  ;;  %v4283_v63 = vpop.f32.mrf.mxu1 }
 0xf19   : > { %v11942_v15 = vpop.f32.mrf.mxu0  ;;  %v11948_v16 = vpop.f32.mrf.mxu1 }
 0xf1b   : > { %v4326_v20 = vpop.f32.mrf.mxu0  ;;  %v4372_v21 = vpop.f32.mrf.mxu1 }
 0xf1c   : > { %v4387_v22 = vsel %vm2692_vm4, %v4372_v21, -inf  ;;  %v4384_v23 = vsel %vm2692_vm4, %v4326_v20, -inf }
 0xf1d   : > { %v11959_v24 = vpop.f32.mrf.mxu1  ;;  %4388 = vmax.xlane.f32.xlu1 %v4387_v22  ;;  %4385 = vmax.xlane.f32.xlu0 %v4384_v23  ;;  %v11953_v25 = vpop.f32.mrf.mxu0 }
 0xf1f   : > { %v4329_v26 = vpop.f32.mrf.mxu0  ;;  %v4375_v27 = vpop.f32.mrf.mxu1 }
 0xf21   : > { %v11954_v28 = vpop.f32.mrf.mxu0  ;;  %v11960_v29 = vpop.f32.mrf.mxu1 }
 0xf2e   : > { %4044 = vrot.lane.b32.xlu1 %v4035_v31, %s15811_s22  ;;  %s15929_s22 = sld [smem:[#allocation82_spill]] }
 0xf9e   : > { %v4383_v32 = vpop.xlane.xlu0 %4382  ;;  %v4380_v33 = vpop.xlane.xlu1 %4379 }
 0xf9f   : > { %v4391_v34 = vsub.f32 %v4280_v9, %v4383_v32  ;;  %v4390_v35 = vsub.f32 %v4234_v8, %v4380_v33 }
 0xfa1   : > { %v4396_v36 = vmul.f32 1.442695, %v4391_v34  ;;  %v4394_v37 = vmul.f32 1.442695, %v4390_v35 }
 0xfa3   : > { %12869 = vpow2.f32 %v4396_v36 }
 0xfa4   : > { %12871 = vpow2.f32 %v4394_v37 }
 0xfa6   : > { %v4389_v42 = vpop.xlane.xlu1 %4388  ;;  %v4386_v43 = vpop.xlane.xlu0 %4385 }
 0xfa7   : > { %v4393_v44 = vsub.f32 %v4372_v21, %v4389_v42  ;;  %v4392_v45 = vsub.f32 %v4326_v20, %v4386_v43 }
 0xfa9   : > { %v4400_v46 = vmul.f32 1.442695, %v4393_v44  ;;  %v4398_v47 = vmul.f32 1.442695, %v4392_v45 }
 0xfaa   : > { %v4045_v38 = vpop.permute.xlu1 %4044 }
 0xfab   : > { %12873 = vpow2.f32 %v4400_v46  ;;  %v4050_v57 = vcombine.low %v4035_v31, %v4045_v38  ;;  %v4051_v59 = vcombine.high %v4035_v31, %v4045_v38 }
 0xfac   : > { %12875 = vpow2.f32 %v4398_v47 }
 0xfad   : > { %v4058_v0 = vrot.slane %v4050_v57, %v14628_v51  ;;  %v4065_v2 = vrot.slane %v4051_v59, %v14628_v51 }
 0xfb0   : > { %v14895_v39 = vpop.eup %12869 }
 0xfb1   : > { %v14897_v40 = vpop.eup %12871  ;;  %v4405_v41 = vsel %vm2692_vm4, %v14895_v39, 0.0 }
 0xfb2   : > { %4406 = vadd.xlane.f32.xlu1 %v4405_v41  ;;  %v4402_v18 = vsel %vm2692_vm4, %v14897_v40, 0.0 }
 0xfb3   : > { %4403 = vadd.xlane.f32.xlu0 %v4402_v18 }
 0xfb8   : > { %v14905_v48 = vpop.eup %12873 }
 0xfb9   : > { %v14907_v49 = vpop.eup %12875  ;;  %v4411_v50 = vsel %vm2692_vm4, %v14905_v48, 0.0 }
 0xfba   : > { %v4408_v54 = vsel %vm2692_vm4, %v14907_v49, 0.0 }
 0xfc3   : > { %4047 = vrot.lane.b32.xlu1 %v4035_v31, %s15805_s23  ;;  %s15926_s23 = smov 8  }
 0xfc9   : > { %4041 = vrot.lane.b32.xlu0 %v4035_v31, %s15807_s11  ;;  %s15927_s11 = smov 24  }
 0xfe7   : > { %4412 = vadd.xlane.f32.xlu1 %v4411_v50 }
 0xfe8   : > { %4409 = vadd.xlane.f32.xlu0 %v4408_v54 }
0x103b   : > { %v4407_v55 = vpop.xlane.xlu1 %4406 }
0x103c   : > { %v4404_v56 = vpop.xlane.xlu0 %4403  ;;  %12877 = vrcp.f32 %v4407_v55 }
0x103d   : > { %12879 = vrcp.f32 %v4404_v56 }
0x103f   : > { %v4048_v60 = vpop.permute.xlu1 %4047 }
0x1040   : > { %v4042_v61 = vpop.permute.xlu0 %4041 }
0x1041   : > { %v4066_v52 = vcombine.low %v4042_v61, %v4048_v60  ;;  %v4067_v53 = vcombine.high %v4042_v61, %v4048_v60 }
0x1043   : > { %v4074_v3 = vrot.slane %v4066_v52, %v14628_v51  ;;  %v4081_v4 = vrot.slane %v4067_v53, %v14628_v51 }
0x1045   : > { %v4082_v5 = vcombine.low %v4058_v0, %v4074_v3  ;;  %v4083_v6 = vcombine.high %v4058_v0, %v4074_v3  ;;  %v4098_v7 = vcombine.low %v4065_v2, %v4081_v4  ;;  %v4099_v8 = vcombine.high %v4065_v2, %v4081_v4 }
0x1047   : > { %v4090_v9 = vrot.slane %v4082_v5, %v14630_v58  ;;  %v4097_v10 = vrot.slane %v4083_v6, %v14630_v58  ;;  %v4106_v11 = vrot.slane %v4098_v7, %v14630_v58  ;;  %v4113_v12 = vrot.slane %v4099_v8, %v14630_v58 }
0x1049   : > { %v4118_v13 = vcombine.low %v4090_v9, %v4097_v10  ;;  %v11349_v14 = vcombine.high %v4090_v9, %v4097_v10  ;;  %v4134_v63 = vcombine.low %v4106_v11, %v4113_v12  ;;  %v11350_v15 = vcombine.high %v4106_v11, %v4113_v12  ;;  %v12878_v27 = vpop.eup %12877 }
0x104a   : > { %v12880_v32 = vpop.eup %12879  ;;  %v4419_v42 = vmul.f32 %v12878_v27, %v14895_v39 }
0x104b   : > { %v4125_v16 = vrot.slane %v4118_v13, %v14628_v51  ;;  %v4133_v20 = vrot.slane %v11349_v14, %v14628_v51  ;;  %v4141_v21 = vrot.slane %v4134_v63, %v14628_v51  ;;  %v4149_v22 = vrot.slane %v11350_v15, %v14628_v51 }
0x104c   : > { %v4418_v18 = vmul.f32 %v12880_v32, %v14897_v40  ;;  %v4423_v50 = vpack.c.bf16 %v4419_v42, %v4419_v42 }
0x104d   : > { %v4150_v23 = vcombine.low %v4125_v16, %v4133_v20  ;;  %v4166_v24 = vcombine.low %v4141_v21, %v4149_v22  ;;  %v4151_v25 = vcombine.high %v4125_v16, %v4133_v20  ;;  %v4167_v26 = vcombine.high %v4141_v21, %v4149_v22 }
0x104e   : > { %v4422_v47 = vpack.c.bf16 %v4418_v18, %v4418_v18 }
0x104f   : > { %v4158_v28 = vrot.slane %v4150_v23, %v14630_v58  ;;  %v4174_v29 = vrot.slane %v4166_v24, %v14630_v58  ;;  %v4165_v30 = vrot.slane %v4151_v25, %v14630_v58  ;;  %v4181_v31 = vrot.slane %v4167_v26, %v14630_v58  ;;  %v12795_v26 = vld [vmem:[%s15922_s26 + $0x18] sm:$0xff]  }
0x1051   : > { %v4182_v33 = vcombine.low %v4158_v28, %v4174_v29  ;;  %v4183_v34 = vcombine.high %v4158_v28, %v4174_v29  ;;  %v4184_v35 = vcombine.low %v4165_v30, %v4181_v31  ;;  %v4185_v36 = vcombine.high %v4165_v30, %v4181_v31 }
0x1053   : > { %v4426_v37 = vpack.c.bf16 %v4182_v33, %v4182_v33  ;;  %v4427_v41 = vpack.c.bf16 %v4183_v34, %v4183_v34  ;;  %v4428_v45 = vpack.c.bf16 %v4184_v35, %v4184_v35  ;;  %v4429_v46 = vpack.c.bf16 %v4185_v36, %v4185_v36  ;;  %v12796_v36 = vld [vmem:[%s15922_s26 + $0x10] sm:$0xff]  }
0x1055   : > { %v4434_v43 = vsel %vm2932_vm5, %v4426_v37, 0  ;;  %v4480_v44 = vsel %vm2932_vm5, %v4427_v41, 0  ;;  %v4526_v39 = vsel %vm2932_vm5, %v4428_v45, 0  ;;  %v4572_v40 = vsel %vm2932_vm5, %v4429_v46, 0 }
0x1056   : > { %11962 = vmatpush3.bf16.msra.mxu0 %v4434_v43  ;;  %11968 = vmatpush3.bf16.msra.mxu1 %v4480_v44 }
0x1057   : > { %11973 = vmatprep.subr.bf16.mxu0 %v13933_v1  ;;  %11979 = vmatprep.subr.bf16.mxu1 %v13933_v1 }
0x1059   : > { %11964 = vmatmul.mubr.msk.bf16.vlgmr.msra.gmra.mxu0 %vm2692_vm4, %v4422_v47  ;;  %11970 = vmatmul.mubr.msk.bf16.vlgmr.msra.gmra.mxu1 %vm2692_vm4, %v4423_v50 }
0x105a   : > { %11974 = vmatpush3.bf16.msra.mxu0 %v4526_v39  ;;  %11980 = vmatpush3.bf16.msra.mxu1 %v4572_v40 }
0x105b   : > { %11975 = vmatprep.mubr.msk.bf16.mxu0 %vm13934_vm0, %v13933_v1  ;;  %11981 = vmatprep.mubr.msk.bf16.mxu1 %vm13934_vm0, %v13933_v1 }
0x105c   : > { %11985 = vmatprep.subr.bf16.mxu0 %v13933_v1  ;;  %11993 = vmatprep.subr.bf16.mxu1 %v13933_v1 }
0x1070   : > { %v4413_v54 = vpop.xlane.xlu1 %4412 }
0x1071   : > { %12881 = vrcp.f32 %v4413_v54  ;;  %v4410_v38 = vpop.xlane.xlu0 %4409 }
0x1072   : > { %12883 = vrcp.f32 %v4410_v38 }
0x107e   : > { %v12882_v55 = vpop.eup %12881 }
0x107f   : > { %v12884_v56 = vpop.eup %12883  ;;  %v4421_v57 = vmul.f32 %v12882_v55, %v14905_v48 }
0x1080   : > { %v4420_v59 = vmul.f32 %v12884_v56, %v14907_v49 }
0x1081   : > { %v4425_v60 = vpack.c.bf16 %v4421_v57, %v4421_v57 }
0x1082   : > { %v4424_v61 = vpack.c.bf16 %v4420_v59, %v4420_v59 }
0x1083   : > { %11982 = vmatmul.mubr.msk.bf16.vlgmr.msra.gmra.mxu1 %vm2692_vm4, %v4425_v60 }
0x1084   : > { %11976 = vmatmul.mubr.msk.bf16.vlgmr.msra.gmra.mxu0 %vm2692_vm4, %v4424_v61  ;;  %11997 = vmatprep.mubr.msk.bf16.mxu1 %vm13934_vm0, %v13933_v1 }
0x1085   : > { %11989 = vmatprep.mubr.msk.bf16.mxu0 %vm13934_vm0, %v13933_v1  ;;  %11986 = vmatpush3.bf16.msra.mxu0 %v12795_v26 }
0x1086   : > { %11987 = vmatprep.subr.bf16.mxu0 %v13933_v1 }
0x1089   : > { %11988 = vmatpush3.bf16.msra.mxu0 %v12796_v36 }
0x108a   : > { %12001 = vmatprep.subr.bf16.mxu0 %v13933_v1 }
0x1119   : > { %v4470_v52 = vpop.f32.mrf.mxu0  ;;  %v4516_v53 = vpop.f32.mrf.mxu1 }
0x111b   : > { %v11965_v0 = vpop.f32.mrf.mxu0  ;;  %v11971_v2 = vpop.f32.mrf.mxu1 }
0x111c   : > { %v11361_v2 = vld [vmem:[%s15923_s4 + $0x1] ss:$0 sm:$0xff]  ;;  %s15933_s4 = smov 104  }
0x111d   : > { %v4473_v3 = vpop.f32.mrf.mxu0  ;;  %v4519_v48 = vpop.f32.mrf.mxu1 }
0x111f   : > { %v11966_v4 = vpop.f32.mrf.mxu0  ;;  %v11972_v49 = vpop.f32.mrf.mxu1 }
0x1143   : > { %v4608_v5 = vpop.f32.mrf.mxu1 }
0x1144   : > { %v4562_v6 = vpop.f32.mrf.mxu0  ;;  %v4630_v7 = vcombine.low %v4516_v53, %v4608_v5  ;;  %v4631_v8 = vcombine.high %v4516_v53, %v4608_v5 }
0x1145   : > { %v4614_v9 = vcombine.low %v4470_v52, %v4562_v6  ;;  %v4615_v10 = vcombine.high %v4470_v52, %v4562_v6  ;;  %v11983_v11 = vpop.f32.mrf.mxu1 }
0x1146   : > { %v4638_v12 = vrot.slane %v4630_v7, %v14628_v51  ;;  %v4645_v13 = vrot.slane %v4631_v8, %v14628_v51  ;;  %v11977_v14 = vpop.f32.mrf.mxu0 }
0x1147   : > { %v4622_v63 = vrot.slane %v4614_v9, %v14628_v51  ;;  %v4629_v15 = vrot.slane %v4615_v10, %v14628_v51  ;;  %v4611_v16 = vpop.f32.mrf.mxu1  ;;  %v12798_v14 = vld [vmem:[%s15924_s16 + $0x10] sm:$0xff]  }
0x1148   : > { %v4565_v20 = vpop.f32.mrf.mxu0 }
0x1149   : > { %v4646_v21 = vcombine.low %v4622_v63, %v4638_v12  ;;  %v4647_v22 = vcombine.high %v4622_v63, %v4638_v12  ;;  %v4662_v23 = vcombine.low %v4629_v15, %v4645_v13  ;;  %v4663_v24 = vcombine.high %v4629_v15, %v4645_v13  ;;  %v11984_v25 = vpop.f32.mrf.mxu1  ;;  %v12797_v13 = vld [vmem:[%s15924_s16 + $0x18] sm:$0xff]   ;;  %v12804_v63 = vld [vmem:[%s15925_s2 + $0x30] sm:$0xff]  }
0x114a   : > { %v11978_v27 = vpop.f32.mrf.mxu0  ;;  %11994 = vmatpush3.bf16.msra.mxu1 %v12797_v13 }
0x114b   : > { %v4654_v28 = vrot.slane %v4646_v21, %v14630_v58  ;;  %v4661_v29 = vrot.slane %v4647_v22, %v14630_v58  ;;  %v4670_v30 = vrot.slane %v4662_v23, %v14630_v58  ;;  %v4677_v31 = vrot.slane %v4663_v24, %v14630_v58  ;;  %11995 = vmatprep.subr.bf16.mxu1 %v13933_v1  ;;  %v11365_v22 = vld [vmem:[#allocation4 + $0x1] ss:$0 sm:$0xff]  ;;  %v11366_v24 = vld [vmem:[#allocation6 + $0x1] ss:$0 sm:$0xff] }
0x114d   : > { %v4682_v32 = vcombine.low %v4654_v28, %v4661_v29  ;;  %v11359_v33 = vcombine.high %v4654_v28, %v4661_v29  ;;  %v4698_v34 = vcombine.low %v4670_v30, %v4677_v31  ;;  %v11360_v35 = vcombine.high %v4670_v30, %v4677_v31  ;;  %v12801_v30 = vld [vmem:[%s15929_s22 + $0x8] sm:$0xff]   ;;  %v12802_v31 = vld [vmem:[%s15929_s22] sm:$0xff]  }
0x114e   : > { %11996 = vmatpush3.bf16.msra.mxu1 %v12798_v14 }
0x114f   : > { %v4689_v37 = vrot.slane %v4682_v32, %v14628_v51  ;;  %v4697_v41 = vrot.slane %v11359_v33, %v14628_v51  ;;  %v4705_v18 = vrot.slane %v4698_v34, %v14628_v51  ;;  %v4713_v42 = vrot.slane %v11360_v35, %v14628_v51  ;;  %12013 = vmatprep.subr.bf16.mxu1 %v13933_v1  ;;  %v12805_v32 = vld [vmem:[%s15925_s2 + $0x28] sm:$0xff]   ;;  %v12806_v33 = vld [vmem:[%s15925_s2 + $0x20] sm:$0xff]  }
0x1150   : > { %v11371_v34 = vld [vmem:[#allocation7 + $0x1] ss:$0 sm:$0xff] }
0x1151   : > { %v4715_v43 = vcombine.high %v4689_v37, %v4697_v41  ;;  %v4731_v44 = vcombine.high %v4705_v18, %v4713_v42  ;;  %v4714_v45 = vcombine.low %v4689_v37, %v4697_v41  ;;  %v4730_v46 = vcombine.low %v4705_v18, %v4713_v42  ;;  %v12807_v42 = vld [vmem:[%s15930_s1 + $0x8] sm:$0xff]  }
0x1153   : > { %v4729_v47 = vrot.slane %v4715_v43, %v14630_v58  ;;  %v4745_v50 = vrot.slane %v4731_v44, %v14630_v58  ;;  %v4722_v39 = vrot.slane %v4714_v45, %v14630_v58  ;;  %v4738_v40 = vrot.slane %v4730_v46, %v14630_v58  ;;  %v12808_v46 = vld [vmem:[%s15930_s1] sm:$0xff]  }
0x1155   : > { %v4748_v54 = vcombine.low %v4729_v47, %v4745_v50  ;;  %v4747_v38 = vcombine.high %v4722_v39, %v4738_v40  ;;  %v4746_v55 = vcombine.low %v4722_v39, %v4738_v40  ;;  %v4749_v56 = vcombine.high %v4729_v47, %v4745_v50  ;;  %v11399_v40 = vld [vmem:[#allocation15] ss:$0 sm:$0xff] }
0x1157   : > { %4755 = vrot.lane.b32.xlu1 %v4748_v54, %s15809_s14  ;;  %4751 = vrot.lane.b32.xlu0 %v4747_v38, %s15926_s23  ;;  %s15928_s14 = sld [smem:[#allocation80_spill]] }
0x115b   : > { %4759 = vrot.lane.b32.xlu0 %v4749_v56, %s15927_s11 }
0x115d   : > { %v12799_v27 = vld [vmem:[%s15928_s14 + $0x8] sm:$0xff]   ;;  %v12800_v29 = vld [vmem:[%s15928_s14] sm:$0xff]  }
0x11c9   : > { %v4752_v57 = vpop.permute.xlu0 %4751  ;;  %v4756_v59 = vpop.permute.xlu1 %4755 }
0x11ca   : > { %v4762_v60 = vsel %vm2692_vm4, %v4746_v55, %v4752_v57  ;;  %v11393_v55 = vld [vmem:[#allocation13] ss:$0 sm:$0xff] }
0x11cb   : > { %v4763_v52 = vsel %vm3263_vm6, %v4762_v60, %v4756_v59 }
0x11cd   : > { %v4760_v61 = vpop.permute.xlu0 %4759 }
0x11ce   : > { %v4764_v53 = vsel %vm3265_vm7, %v4763_v52, %v4760_v61 }
0x11cf   : > { %v4765_v0 = vpack.c.bf16 %v4764_v53, %v4764_v53 }
0x11d1   : > { %11990 = vmatmul.mubr.msk.bf16.vlgmr.msra.gmra.mxu0 %vm2086_vm3, %v4765_v0 }
0x11d2   : > { %12009 = vmatprep.mubr.msk.bf16.mxu0 %vm13934_vm0, %v13933_v1 }
0x1291   : > { %v4821_v3 = vpop.f32.mrf.mxu0 }
0x1292   : > { %v4822_v48 = vadd.f32 %v11361_v2, %v4821_v3 }
0x1293   : > { %v11991_v4 = vpop.f32.mrf.mxu0 }
0x1294   : > { %v4827_v49 = vadd.f32 %v4822_v48, %v14810_v62  ;;  %v12803_v62 = vld [vmem:[%s15925_s2 + $0x38] sm:$0xff]   ;;  %s15931_s2 = smov 112  }
0x1295   : > { %v4824_v5 = vpop.f32.mrf.mxu0  ;;  %12002 = vmatpush3.bf16.msra.mxu0 %v12803_v62 }
0x1296   : > { %v4832_v6 = vsel %vm2086_vm3, %v4827_v49, 0.0  ;;  %12003 = vmatprep.subr.bf16.mxu0 %v13933_v1 }
0x1297   : > { %4833 = vadd.xlane.f32.xlu1 %v4832_v6  ;;  %v11992_v7 = vpop.f32.mrf.mxu0 }
0x1299   : > { %12004 = vmatpush3.bf16.msra.mxu0 %v12804_v63 }
0x129a   : > { %12005 = vmatprep.subr.bf16.mxu0 %v13933_v1 }
0x129d   : > { %12006 = vmatpush3.bf16.msra.mxu0 %v12805_v32 }
0x129e   : > { %12007 = vmatprep.subr.bf16.mxu0 %v13933_v1 }
0x12a1   : > { %12008 = vmatpush3.bf16.msra.mxu0 %v12806_v33 }
0x12a2   : > { %12029 = vmatprep.subr.bf16.mxu0 %v13933_v1 }
0x1320   : > { %v4834_v8 = vpop.xlane.xlu1 %4833 }
0x1321   : > { %v4835_v9 = vmul.f32 0.03125, %v4834_v8 }
0x1323   : > { %v4836_v10 = vsub.f32 %v4827_v49, %v4835_v9 }
0x1325   : > { %v4837_v11 = vmul.f32 %v4836_v10, %v4836_v10 }
0x1327   : > { %v4838_v12 = vsel %vm2086_vm3, %v4837_v11, 0.0 }
0x1328   : > { %4839 = vadd.xlane.f32.xlu0 %v4838_v12 }
0x13b1   : > { %v4840_v15 = vpop.xlane.xlu0 %4839 }
0x13b2   : > { %v4841_v16 = vmul.f32 0.03125, %v4840_v15 }
0x13b4   : > { %v4842_v20 = vadd.f32 1e-05, %v4841_v16 }
0x13b6   : > { %12885 = vrsqrt.f32 %v4842_v20 }
0x13c3   : > { %v12886_v21 = vpop.eup %12885 }
0x13c4   : > { %v4844_v23 = vmul.f32 %v12886_v21, %v4836_v10 }
0x13c6   : > { %v4851_v25 = vmul.f32 %v11365_v22, %v4844_v23 }
0x13c8   : > { %v14994_v26 = vadd.f32 %v11366_v24, %v4851_v25 }
0x13ca   : > { %v4866_v28 = vpack.c.bf16 %v14994_v26, %v14994_v26 }
0x13cc   : > { %11998 = vmatmul.mubr.msk.bf16.vlgmr.msra.gmra.mxu1 %vm2086_vm3, %v4866_v28 }
0x13cd   : > { %12014 = vmatpush3.bf16.msra.mxu1 %v12799_v27  ;;  %12017 = vmatprep.mubr.msk.bf16.mxu1 %vm13934_vm0, %v13933_v1 }
0x13ce   : > { %12015 = vmatprep.subr.bf16.mxu1 %v13933_v1 }
0x13d1   : > { %12016 = vmatpush3.bf16.msra.mxu1 %v12800_v29 }
0x13d2   : > { %12021 = vmatprep.subr.bf16.mxu1 %v13933_v1 }
0x13d4   : > { %12018 = vmatmul.mubr.msk.bf16.vlgmr.msra.gmra.mxu1 %vm2086_vm3, %v14597_v19 }
0x13d5   : > { %12022 = vmatpush3.bf16.msra.mxu1 %v12801_v30  ;;  %12025 = vmatprep.mubr.msk.bf16.mxu1 %vm13934_vm0, %v13933_v1 }
0x13d6   : > { %12023 = vmatprep.subr.bf16.mxu1 %v13933_v1 }
0x13d9   : > { %12024 = vmatpush3.bf16.msra.mxu1 %v12802_v31 }
0x13da   : > { %12037 = vmatprep.subr.bf16.mxu1 %v13933_v1 }
0x13dc   : > { %12026 = vmatmul.mubr.msk.bf16.vlgmr.msra.gmra.mxu1 %vm2086_vm3, %v14597_v19 }
0x13dd   : > { %12039 = vmatprep.mubr.msk.bf16.mxu1 %vm13934_vm0, %v13933_v1 }
0x148c   : > { %v4922_v35 = vpop.f32.mrf.mxu1 }
0x148d   : > { %v4923_v36 = vadd.f32 %v11371_v34, %v4922_v35 }
0x148e   : > { %v11999_v37 = vpop.f32.mrf.mxu1 }
0x148f   : > { %v4928_v41 = vmax.f32 %v4923_v36, 0.0 }
0x1490   : > { %v4925_v18 = vpop.f32.mrf.mxu1 }
0x1491   : > { %v4940_v43 = vpack.c.bf16 %v4928_v41, %v4928_v41 }
0x1492   : > { %v12000_v44 = vpop.f32.mrf.mxu1 }
0x1493   : > { %12010 = vmatmul.mubr.msk.bf16.vlgmr.msra.gmra.mxu0 %vm3468_vm8, %v4940_v43 }
0x1494   : > { %v5147_v45 = vpop.f32.mrf.mxu1  ;;  %12030 = vmatpush3.bf16.msra.mxu0 %v12807_v42  ;;  %12033 = vmatprep.mubr.msk.bf16.mxu0 %vm13934_vm0, %v13933_v1 }
0x1495   : > { %12031 = vmatprep.subr.bf16.mxu0 %v13933_v1  ;;  %v5148_v59 = vadd.f32 %v11393_v55, %v5147_v45 }
0x1496   : > { %v12019_v47 = vpop.f32.mrf.mxu1 }
0x1498   : > { %v5150_v50 = vpop.f32.mrf.mxu1  ;;  %12032 = vmatpush3.bf16.msra.mxu0 %v12808_v46 }
0x1499   : > { %12043 = vmatprep.subr.bf16.mxu0 %v13933_v1 }
0x149a   : > { %v12020_v39 = vpop.f32.mrf.mxu1 }
0x149b   : > { %12034 = vmatmul.mubr.msk.bf16.vlgmr.msra.gmra.mxu0 %vm2086_vm3, %v14597_v19 }
0x149c   : > { %v5351_v54 = vpop.f32.mrf.mxu1  ;;  %12045 = vmatprep.mubr.msk.bf16.mxu0 %vm13934_vm0, %v13933_v1 }
0x149d   : > { %v5352_v38 = vadd.f32 %v11399_v40, %v5351_v54 }
0x149e   : > { %v12027_v56 = vpop.f32.mrf.mxu1 }
0x149f   : > { %5361 = vrot.lane.b32.xlu1 %v5352_v38, %s15931_s2  ;;  %5358 = vrot.lane.b32.xlu0 %v5352_v38, %s15932_s3 }
0x14a0   : > { %v5354_v57 = vpop.f32.mrf.mxu1 }
0x14a2   : > { %v12028_v60 = vpop.f32.mrf.mxu1 }
0x14a3   : > { %5364 = vrot.lane.b32.xlu1 %v5352_v38, %s15933_s4  ;;  %5154 = vrot.lane.b32.xlu0 %v5148_v59, %s15932_s3 }
0x14a7   : > { %5157 = vrot.lane.b32.xlu1 %v5148_v59, %s15931_s2  ;;  %5160 = vrot.lane.b32.xlu0 %v5148_v59, %s15933_s4 }
0x1511   : > { %v5362_v19 = vpop.permute.xlu1 %5361  ;;  %v5359_v61 = vpop.permute.xlu0 %5358 }
0x1512   : > { %v5367_v52 = vcombine.low %v5352_v38, %v5362_v19  ;;  %v5368_v53 = vcombine.high %v5352_v38, %v5362_v19 }
0x1514   : > { %v5375_v4 = vrot.slane %v5367_v52, %v14628_v51  ;;  %v5382_v49 = vrot.slane %v5368_v53, %v14628_v51 }
0x1515   : > { %v5365_v0 = vpop.permute.xlu1 %5364  ;;  %v5155_v2 = vpop.permute.xlu0 %5154 }
0x1516   : > { %v5383_v3 = vcombine.low %v5359_v61, %v5365_v0  ;;  %v5384_v48 = vcombine.high %v5359_v61, %v5365_v0 }
0x1518   : > { %v5391_v5 = vrot.slane %v5383_v3, %v14628_v51  ;;  %v5398_v6 = vrot.slane %v5384_v48, %v14628_v51 }
0x1519   : > { %v5158_v7 = vpop.permute.xlu1 %5157  ;;  %v5161_v8 = vpop.permute.xlu0 %5160 }
0x151a   : > { %v5399_v9 = vcombine.low %v5375_v4, %v5391_v5  ;;  %v5400_v10 = vcombine.high %v5375_v4, %v5391_v5  ;;  %v5415_v11 = vcombine.low %v5382_v49, %v5398_v6  ;;  %v5416_v12 = vcombine.high %v5382_v49, %v5398_v6 }
0x151b   : > { %v5163_v13 = vcombine.low %v5148_v59, %v5158_v7  ;;  %v5164_v14 = vcombine.high %v5148_v59, %v5158_v7  ;;  %v5179_v62 = vcombine.low %v5155_v2, %v5161_v8  ;;  %v5180_v63 = vcombine.high %v5155_v2, %v5161_v8 }
0x151c   : > { %v5407_v15 = vrot.slane %v5399_v9, %v14630_v58  ;;  %v5414_v16 = vrot.slane %v5400_v10, %v14630_v58  ;;  %v5423_v20 = vrot.slane %v5415_v11, %v14630_v58  ;;  %v5430_v21 = vrot.slane %v5416_v12, %v14630_v58 }
0x151d   : > { %v5171_v22 = vrot.slane %v5163_v13, %v14628_v51  ;;  %v5178_v23 = vrot.slane %v5164_v14, %v14628_v51  ;;  %v5187_v24 = vrot.slane %v5179_v62, %v14628_v51  ;;  %v5194_v25 = vrot.slane %v5180_v63, %v14628_v51 }
0x151e   : > { %v5435_v27 = vcombine.low %v5407_v15, %v5414_v16  ;;  %v11403_v28 = vcombine.high %v5407_v15, %v5414_v16  ;;  %v5451_v29 = vcombine.low %v5423_v20, %v5430_v21  ;;  %v11404_v30 = vcombine.high %v5423_v20, %v5430_v21 }
0x151f   : > { %v5195_v31 = vcombine.low %v5171_v22, %v5187_v24  ;;  %v5196_v32 = vcombine.high %v5171_v22, %v5187_v24  ;;  %v5211_v33 = vcombine.low %v5178_v23, %v5194_v25  ;;  %v5212_v34 = vcombine.high %v5178_v23, %v5194_v25 }
0x1520   : > { %v5442_v35 = vrot.slane %v5435_v27, %v14628_v51  ;;  %v5450_v36 = vrot.slane %v11403_v28, %v14628_v51  ;;  %v5458_v37 = vrot.slane %v5451_v29, %v14628_v51  ;;  %v5466_v41 = vrot.slane %v11404_v30, %v14628_v51 }
0x1521   : > { %v5203_v18 = vrot.slane %v5195_v31, %v14630_v58  ;;  %v5210_v42 = vrot.slane %v5196_v32, %v14630_v58  ;;  %v5219_v43 = vrot.slane %v5211_v33, %v14630_v58  ;;  %v5226_v44 = vrot.slane %v5212_v34, %v14630_v58 }
0x1522   : > { %v5467_v45 = vcombine.low %v5442_v35, %v5450_v36  ;;  %v5483_v46 = vcombine.low %v5458_v37, %v5466_v41  ;;  %v5468_v47 = vcombine.high %v5442_v35, %v5450_v36  ;;  %v5484_v50 = vcombine.high %v5458_v37, %v5466_v41 }
0x1523   : > { %v5231_v39 = vcombine.low %v5203_v18, %v5210_v42  ;;  %v11397_v40 = vcombine.high %v5203_v18, %v5210_v42  ;;  %v5247_v54 = vcombine.low %v5219_v43, %v5226_v44  ;;  %v11398_v38 = vcombine.high %v5219_v43, %v5226_v44 }
0x1524   : > { %v5475_v55 = vrot.slane %v5467_v45, %v14630_v58  ;;  %v5491_v56 = vrot.slane %v5483_v46, %v14630_v58  ;;  %v5482_v53 = vrot.slane %v5468_v47, %v14630_v58  ;;  %v5498_v0 = vrot.slane %v5484_v50, %v14630_v58 }
0x1525   : > { %v5238_v57 = vrot.slane %v5231_v39, %v14628_v51  ;;  %v5246_v59 = vrot.slane %v11397_v40, %v14628_v51  ;;  %v5254_v60 = vrot.slane %v5247_v54, %v14628_v51  ;;  %v5262_v19 = vrot.slane %v11398_v38, %v14628_v51 }
0x1526   : > { %v5499_v61 = vcombine.low %v5475_v55, %v5491_v56  ;;  %v5500_v52 = vcombine.high %v5475_v55, %v5491_v56  ;;  %v5501_v8 = vcombine.low %v5482_v53, %v5498_v0  ;;  %v5502_v9 = vcombine.high %v5482_v53, %v5498_v0 }
0x1527   : > { %v5263_v2 = vcombine.low %v5238_v57, %v5246_v59  ;;  %v5279_v3 = vcombine.low %v5254_v60, %v5262_v19  ;;  %v5264_v10 = vcombine.high %v5238_v57, %v5246_v59  ;;  %v5280_v11 = vcombine.high %v5254_v60, %v5262_v19  ;;  %v11405_v19 = vld [vmem:[#allocation16] ss:$0 sm:$0xff] }
0x1528   : > { %v5711_v48 = vpack.c.bf16 %v5499_v61, %v5499_v61  ;;  %v5712_v4 = vpack.c.bf16 %v5500_v52, %v5500_v52  ;;  %v5713_v14 = vpack.c.bf16 %v5501_v8, %v5501_v8  ;;  %v5714_v62 = vpack.c.bf16 %v5502_v9, %v5502_v9 }
0x1529   : > { %v5271_v49 = vrot.slane %v5263_v2, %v14630_v58  ;;  %v5287_v5 = vrot.slane %v5279_v3, %v14630_v58  ;;  %v5278_v16 = vrot.slane %v5264_v10, %v14630_v58  ;;  %v5294_v20 = vrot.slane %v5280_v11, %v14630_v58 }
0x152a   : > { %v5719_v6 = vsel %vm2692_vm4, %v5711_v48, 0  ;;  %v5765_v7 = vsel %vm2692_vm4, %v5712_v4, 0  ;;  %v5811_v21 = vsel %vm2692_vm4, %v5713_v14, 0  ;;  %v5857_v22 = vsel %vm2692_vm4, %v5714_v62, 0 }
0x152b   : > { %12038 = vmatpush3.bf16.xpose.msra.mxu1 %v5719_v6  ;;  %12044 = vmatpush3.bf16.xpose.msra.mxu0 %v5765_v7  ;;  %v5295_v12 = vcombine.low %v5271_v49, %v5287_v5  ;;  %v5296_v13 = vcombine.high %v5271_v49, %v5287_v5  ;;  %v5297_v23 = vcombine.low %v5278_v16, %v5294_v20 }
0x152c   : > { %12049 = vmatprep.subr.bf16.mxu1 %v13933_v1  ;;  %12055 = vmatprep.subr.bf16.mxu0 %v13933_v1  ;;  %v5298_v24 = vcombine.high %v5278_v16, %v5294_v20 }
0x152d   : > { %v5707_v63 = vpack.c.bf16 %v5295_v12, %v5295_v12  ;;  %v5708_v15 = vpack.c.bf16 %v5296_v13, %v5296_v13  ;;  %v5709_v25 = vpack.c.bf16 %v5297_v23, %v5297_v23 }
0x152e   : > { %v5710_v27 = vpack.c.bf16 %v5298_v24, %v5298_v24 }
0x1532   : > { %12040 = vmatmul.mubr.msk.bf16.vlgmr.msra.gmra.mxu1 %vm2692_vm4, %v5707_v63  ;;  %12046 = vmatmul.mubr.msk.bf16.vlgmr.msra.gmra.mxu0 %vm2692_vm4, %v5708_v15 }
0x1533   : > { %12050 = vmatpush3.bf16.xpose.msra.mxu1 %v5811_v21  ;;  %12056 = vmatpush3.bf16.xpose.msra.mxu0 %v5857_v22 }
0x1534   : > { %12051 = vmatprep.mubr.msk.bf16.mxu1 %vm13934_vm0, %v13933_v1  ;;  %12057 = vmatprep.mubr.msk.bf16.mxu0 %vm13934_vm0, %v13933_v1 }
0x1535   : > { %12061 = vmatprep.subr.bf16.mxu1 %v13933_v1  ;;  %12067 = vmatprep.subr.bf16.mxu0 %v13933_v1 }
0x153a   : > { %12052 = vmatmul.mubr.msk.bf16.vlgmr.msra.gmra.mxu1 %vm2692_vm4, %v5709_v25  ;;  %12058 = vmatmul.mubr.msk.bf16.vlgmr.msra.gmra.mxu0 %vm2692_vm4, %v5710_v27 }
0x153b   : > { %12063 = vmatprep.mubr.msk.bf16.mxu1 %vm13934_vm0, %v13933_v1  ;;  %12069 = vmatprep.mubr.msk.bf16.mxu0 %vm13934_vm0, %v13933_v1 }
0x1553   : > { %v15090_v28 = vpop.f32.mrf.mxu0 }
0x1555   : > { %v12011_v29 = vpop.f32.mrf.mxu0 }
0x1557   : > { %v5011_v30 = vpop.f32.mrf.mxu0 }
0x1559   : > { %v12012_v31 = vpop.f32.mrf.mxu0 }
0x155b   : > { %v5555_v32 = vpop.f32.mrf.mxu0 }
0x155c   : > { %v5556_v61 = vadd.f32 %v11405_v19, %v5555_v32 }
0x155d   : > { %v12035_v33 = vpop.f32.mrf.mxu0 }
0x155f   : > { %v5558_v34 = vpop.f32.mrf.mxu0 }
0x1561   : > { %v12036_v35 = vpop.f32.mrf.mxu0 }
0x15f2   : > { %v5755_v36 = vpop.f32.mrf.mxu1  ;;  %v5801_v37 = vpop.f32.mrf.mxu0 }
0x15f3   : > { %v5899_v41 = vsel %vm2692_vm4, %v5755_v36, -inf  ;;  %v5902_v18 = vsel %vm2692_vm4, %v5801_v37, -inf }
0x15f4   : > { %5900 = vmax.xlane.f32.xlu1 %v5899_v41  ;;  %v12041_v42 = vpop.f32.mrf.mxu1  ;;  %5903 = vmax.xlane.f32.xlu0 %v5902_v18  ;;  %v12047_v43 = vpop.f32.mrf.mxu0 }
0x15f6   : > { %v5758_v44 = vpop.f32.mrf.mxu1  ;;  %v5804_v45 = vpop.f32.mrf.mxu0 }
0x15f8   : > { %v12042_v46 = vpop.f32.mrf.mxu1  ;;  %v12048_v47 = vpop.f32.mrf.mxu0 }
0x15fa   : > { %v5847_v50 = vpop.f32.mrf.mxu1  ;;  %v5893_v39 = vpop.f32.mrf.mxu0 }
0x15fb   : > { %v5905_v40 = vsel %vm2692_vm4, %v5847_v50, -inf  ;;  %v5908_v54 = vsel %vm2692_vm4, %v5893_v39, -inf }
0x15fc   : > { %v12053_v38 = vpop.f32.mrf.mxu1  ;;  %5906 = vmax.xlane.f32.xlu0 %v5905_v40  ;;  %5909 = vmax.xlane.f32.xlu1 %v5908_v54  ;;  %v12059_v55 = vpop.f32.mrf.mxu0 }
0x15fe   : > { %v5850_v56 = vpop.f32.mrf.mxu1  ;;  %v5896_v57 = vpop.f32.mrf.mxu0 }
0x1600   : > { %v12054_v59 = vpop.f32.mrf.mxu1  ;;  %v12060_v60 = vpop.f32.mrf.mxu0 }
0x160d   : > { %5565 = vrot.lane.b32.xlu1 %v5556_v61, %s15931_s2 }
0x167d   : > { %v5901_v52 = vpop.xlane.xlu1 %5900  ;;  %v5904_v53 = vpop.xlane.xlu0 %5903 }
0x167e   : > { %v5911_v0 = vsub.f32 %v5755_v36, %v5901_v52  ;;  %v5912_v2 = vsub.f32 %v5801_v37, %v5904_v53 }
0x1680   : > { %v5915_v3 = vmul.f32 1.442695, %v5911_v0  ;;  %v5917_v48 = vmul.f32 1.442695, %v5912_v2 }
0x1682   : > { %12887 = vpow2.f32 %v5915_v3 }
0x1683   : > { %12889 = vpow2.f32 %v5917_v48 }
0x1685   : > { %v5907_v7 = vpop.xlane.xlu0 %5906  ;;  %v5910_v8 = vpop.xlane.xlu1 %5909 }
0x1686   : > { %v5913_v9 = vsub.f32 %v5847_v50, %v5907_v7  ;;  %v5914_v10 = vsub.f32 %v5893_v39, %v5910_v8 }
0x1688   : > { %v5919_v11 = vmul.f32 1.442695, %v5913_v9  ;;  %v5921_v12 = vmul.f32 1.442695, %v5914_v10 }
0x1689   : > { %v5566_v15 = vpop.permute.xlu1 %5565 }
0x168a   : > { %12891 = vpow2.f32 %v5919_v11  ;;  %v5571_v21 = vcombine.low %v5556_v61, %v5566_v15  ;;  %v5572_v22 = vcombine.high %v5556_v61, %v5566_v15 }
0x168b   : > { %12893 = vpow2.f32 %v5921_v12 }
0x168c   : > { %v5579_v29 = vrot.slane %v5571_v21, %v14628_v51  ;;  %v5586_v30 = vrot.slane %v5572_v22, %v14628_v51 }
0x168f   : > { %v15097_v4 = vpop.eup %12887 }
0x1690   : > { %v15099_v49 = vpop.eup %12889  ;;  %v5923_v5 = vsel %vm2692_vm4, %v15097_v4, 0.0 }
0x1691   : > { %5924 = vadd.xlane.f32.xlu0 %v5923_v5  ;;  %v5926_v6 = vsel %vm2692_vm4, %v15099_v49, 0.0 }
0x1692   : > { %5927 = vadd.xlane.f32.xlu1 %v5926_v6 }
0x1697   : > { %v15107_v13 = vpop.eup %12891 }
0x1698   : > { %v15109_v14 = vpop.eup %12893  ;;  %v5929_v62 = vsel %vm2692_vm4, %v15107_v13, 0.0 }
0x1699   : > { %v5932_v63 = vsel %vm2692_vm4, %v15109_v14, 0.0 }
0x16a3   : > { %5568 = vrot.lane.b32.xlu1 %v5556_v61, %s15933_s4 }
0x16a7   : > { %5562 = vrot.lane.b32.xlu0 %v5556_v61, %s15932_s3 }
0x16c6   : > { %5930 = vadd.xlane.f32.xlu0 %v5929_v62 }
0x16c7   : > { %5933 = vadd.xlane.f32.xlu1 %v5932_v63 }
0x171a   : > { %v5925_v16 = vpop.xlane.xlu0 %5924 }
0x171b   : > { %v5928_v20 = vpop.xlane.xlu1 %5927  ;;  %12895 = vrcp.f32 %v5925_v16 }
0x171c   : > { %12897 = vrcp.f32 %v5928_v20 }
0x171e   : > { %v5563_v23 = vpop.permute.xlu0 %5562 }
0x171f   : > { %v5569_v24 = vpop.permute.xlu1 %5568 }
0x1720   : > { %v5587_v25 = vcombine.low %v5563_v23, %v5569_v24  ;;  %v5588_v27 = vcombine.high %v5563_v23, %v5569_v24 }
0x1722   : > { %v5595_v31 = vrot.slane %v5587_v25, %v14628_v51  ;;  %v5602_v32 = vrot.slane %v5588_v27, %v14628_v51 }
0x1724   : > { %v5603_v33 = vcombine.low %v5579_v29, %v5595_v31  ;;  %v5604_v34 = vcombine.high %v5579_v29, %v5595_v31  ;;  %v5619_v35 = vcombine.low %v5586_v30, %v5602_v32  ;;  %v5620_v36 = vcombine.high %v5586_v30, %v5602_v32 }
0x1726   : > { %v5611_v37 = vrot.slane %v5603_v33, %v14630_v58  ;;  %v5618_v41 = vrot.slane %v5604_v34, %v14630_v58  ;;  %v5627_v18 = vrot.slane %v5619_v35, %v14630_v58  ;;  %v5634_v42 = vrot.slane %v5620_v36, %v14630_v58 }
0x1728   : > { %v5639_v43 = vcombine.low %v5611_v37, %v5618_v41  ;;  %v11409_v44 = vcombine.high %v5611_v37, %v5618_v41  ;;  %v5655_v45 = vcombine.low %v5627_v18, %v5634_v42  ;;  %v11410_v46 = vcombine.high %v5627_v18, %v5634_v42  ;;  %v12896_v57 = vpop.eup %12895 }
0x1729   : > { %v12898_v52 = vpop.eup %12897  ;;  %v5939_v6 = vmul.f32 %v12896_v57, %v15097_v4 }
0x172a   : > { %v5646_v47 = vrot.slane %v5639_v43, %v14628_v51  ;;  %v5654_v50 = vrot.slane %v11409_v44, %v14628_v51  ;;  %v5662_v39 = vrot.slane %v5655_v45, %v14628_v51  ;;  %v5670_v40 = vrot.slane %v11410_v46, %v14628_v51 }
0x172b   : > { %v5940_v7 = vmul.f32 %v12898_v52, %v15099_v49  ;;  %v5943_v12 = vpack.c.bf16 %v5939_v6, %v5939_v6 }
0x172c   : > { %v5671_v54 = vcombine.low %v5646_v47, %v5654_v50  ;;  %v5687_v38 = vcombine.low %v5662_v39, %v5670_v40  ;;  %v5672_v55 = vcombine.high %v5646_v47, %v5654_v50  ;;  %v5688_v56 = vcombine.high %v5662_v39, %v5670_v40 }
0x172d   : > { %v5944_v62 = vpack.c.bf16 %v5940_v7, %v5940_v7 }
0x172e   : > { %v5679_v59 = vrot.slane %v5671_v54, %v14630_v58  ;;  %v5695_v60 = vrot.slane %v5687_v38, %v14630_v58  ;;  %v5686_v19 = vrot.slane %v5672_v55, %v14630_v58  ;;  %v5702_v61 = vrot.slane %v5688_v56, %v14630_v58  ;;  %v12809_v56 = vld [vmem:[#allocation18 + $0x8] sm:$0xff]  }
0x1730   : > { %v5703_v53 = vcombine.low %v5679_v59, %v5695_v60  ;;  %v5704_v0 = vcombine.high %v5679_v59, %v5695_v60  ;;  %v5705_v2 = vcombine.low %v5686_v19, %v5702_v61  ;;  %v5706_v3 = vcombine.high %v5686_v19, %v5702_v61 }
0x1732   : > { %v5947_v48 = vpack.c.bf16 %v5703_v53, %v5703_v53  ;;  %v5948_v5 = vpack.c.bf16 %v5704_v0, %v5704_v0  ;;  %v5949_v10 = vpack.c.bf16 %v5705_v2, %v5705_v2  ;;  %v5950_v11 = vpack.c.bf16 %v5706_v3, %v5706_v3  ;;  %v12810_v3 = vld [vmem:[#allocation18] sm:$0xff]  }
0x1734   : > { %v5955_v8 = vsel %vm2932_vm5, %v5947_v48, 0  ;;  %v6001_v9 = vsel %vm2932_vm5, %v5948_v5, 0  ;;  %v6047_v4 = vsel %vm2932_vm5, %v5949_v10, 0  ;;  %v6093_v49 = vsel %vm2932_vm5, %v5950_v11, 0 }
0x1735   : > { %12062 = vmatpush3.bf16.msra.mxu1 %v5955_v8  ;;  %12068 = vmatpush3.bf16.msra.mxu0 %v6001_v9 }
0x1736   : > { %12073 = vmatprep.subr.bf16.mxu1 %v13933_v1  ;;  %12079 = vmatprep.subr.bf16.mxu0 %v13933_v1 }
0x1738   : > { %12064 = vmatmul.mubr.msk.bf16.vlgmr.msra.gmra.mxu1 %vm2692_vm4, %v5943_v12  ;;  %12070 = vmatmul.mubr.msk.bf16.vlgmr.msra.gmra.mxu0 %vm2692_vm4, %v5944_v62 }
0x1739   : > { %12074 = vmatpush3.bf16.msra.mxu1 %v6047_v4  ;;  %12080 = vmatpush3.bf16.msra.mxu0 %v6093_v49 }
0x173a   : > { %12075 = vmatprep.mubr.msk.bf16.mxu1 %vm13934_vm0, %v13933_v1  ;;  %12081 = vmatprep.mubr.msk.bf16.mxu0 %vm13934_vm0, %v13933_v1 }
0x173b   : > { %12085 = vmatprep.subr.bf16.mxu1 %v13933_v1  ;;  %12093 = vmatprep.subr.bf16.mxu0 %v13933_v1 }
0x174f   : > { %v5931_v63 = vpop.xlane.xlu0 %5930 }
0x1750   : > { %12899 = vrcp.f32 %v5931_v63  ;;  %v5934_v15 = vpop.xlane.xlu1 %5933 }
0x1751   : > { %12901 = vrcp.f32 %v5934_v15 }
0x175d   : > { %v12900_v16 = vpop.eup %12899 }
0x175e   : > { %v12902_v20 = vpop.eup %12901  ;;  %v5941_v21 = vmul.f32 %v12900_v16, %v15107_v13 }
0x175f   : > { %v5942_v22 = vmul.f32 %v12902_v20, %v15109_v14 }
0x1760   : > { %v5945_v23 = vpack.c.bf16 %v5941_v21, %v5941_v21  ;;  %v11383_v21 = vld [vmem:[#allocation9 + $0x1] ss:$0 sm:$0xff] }
0x1761   : > { %v5946_v24 = vpack.c.bf16 %v5942_v22, %v5942_v22  ;;  %v5009_v22 = vadd.f32 %v11383_v21, %v15090_v28 }
0x1762   : > { %12076 = vmatmul.mubr.msk.bf16.vlgmr.msra.gmra.mxu1 %vm2692_vm4, %v5945_v23 }
0x1763   : > { %12082 = vmatmul.mubr.msk.bf16.vlgmr.msra.gmra.mxu0 %vm2692_vm4, %v5946_v24  ;;  %12089 = vmatprep.mubr.msk.bf16.mxu1 %vm13934_vm0, %v13933_v1  ;;  %v5014_v23 = vadd.f32 %v5009_v22, %v14994_v26  ;;  %v12816_v22 = vld [vmem:[#allocation30] sm:$0xff]  }
0x1764   : > { %12097 = vmatprep.mubr.msk.bf16.mxu0 %vm13934_vm0, %v13933_v1  ;;  %12086 = vmatpush3.bf16.msra.mxu1 %v12809_v56 }
0x1765   : > { %12087 = vmatprep.subr.bf16.mxu1 %v13933_v1  ;;  %v5019_v24 = vsel %vm2086_vm3, %v5014_v23, 0.0 }
0x1768   : > { %12088 = vmatpush3.bf16.msra.mxu1 %v12810_v3  ;;  %v12811_v3 = vld [vmem:[#allocation24 + $0x8] sm:$0xff]  }
0x1769   : > { %12101 = vmatprep.subr.bf16.mxu1 %v13933_v1  ;;  %12094 = vmatpush3.bf16.msra.mxu0 %v12811_v3 }
0x176a   : > { %12095 = vmatprep.subr.bf16.mxu0 %v13933_v1 }
0x17f8   : > { %v5991_v25 = vpop.f32.mrf.mxu1  ;;  %v6037_v27 = vpop.f32.mrf.mxu0 }
0x17fa   : > { %v12065_v29 = vpop.f32.mrf.mxu1  ;;  %v12071_v30 = vpop.f32.mrf.mxu0 }
0x17fc   : > { %v5994_v31 = vpop.f32.mrf.mxu1  ;;  %v6040_v13 = vpop.f32.mrf.mxu0 }
0x17fe   : > { %v12066_v32 = vpop.f32.mrf.mxu1  ;;  %v12072_v14 = vpop.f32.mrf.mxu0 }
0x1822   : > { %v6083_v33 = vpop.f32.mrf.mxu1 }
0x1823   : > { %v6135_v34 = vcombine.low %v5991_v25, %v6083_v33  ;;  %v6136_v35 = vcombine.high %v5991_v25, %v6083_v33  ;;  %v6129_v36 = vpop.f32.mrf.mxu0 }
0x1824   : > { %v6151_v37 = vcombine.low %v6037_v27, %v6129_v36  ;;  %v6152_v41 = vcombine.high %v6037_v27, %v6129_v36  ;;  %v12077_v18 = vpop.f32.mrf.mxu1 }
0x1825   : > { %v6143_v42 = vrot.slane %v6135_v34, %v14628_v51  ;;  %v6150_v43 = vrot.slane %v6136_v35, %v14628_v51  ;;  %v12083_v44 = vpop.f32.mrf.mxu0  ;;  %v11421_v35 = vld [vmem:[#allocation19] ss:$0 sm:$0xff] }
0x1826   : > { %v6159_v45 = vrot.slane %v6151_v37, %v14628_v51  ;;  %v6166_v46 = vrot.slane %v6152_v41, %v14628_v51  ;;  %v6086_v47 = vpop.f32.mrf.mxu1 }
0x1827   : > { %v6132_v50 = vpop.f32.mrf.mxu0 }
0x1828   : > { %v6167_v39 = vcombine.low %v6143_v42, %v6159_v45  ;;  %v6168_v40 = vcombine.high %v6143_v42, %v6159_v45  ;;  %v6183_v54 = vcombine.low %v6150_v43, %v6166_v46  ;;  %v6184_v38 = vcombine.high %v6150_v43, %v6166_v46  ;;  %v12078_v55 = vpop.f32.mrf.mxu1 }
0x1829   : > { %v12084_v57 = vpop.f32.mrf.mxu0 }
0x182a   : > { %v6175_v59 = vrot.slane %v6167_v39, %v14630_v58  ;;  %v6182_v60 = vrot.slane %v6168_v40, %v14630_v58  ;;  %v6191_v19 = vrot.slane %v6183_v54, %v14630_v58  ;;  %v6198_v61 = vrot.slane %v6184_v38, %v14630_v58  ;;  %v11389_v39 = vld [vmem:[#allocation10 + $0x1] ss:$0 sm:$0xff]  ;;  %v11390_v54 = vld [vmem:[#allocation12 + $0x1] ss:$0 sm:$0xff] }
0x182c   : > { %v6203_v52 = vcombine.low %v6175_v59, %v6182_v60  ;;  %v11419_v53 = vcombine.high %v6175_v59, %v6182_v60  ;;  %v6219_v0 = vcombine.low %v6191_v19, %v6198_v61  ;;  %v11420_v2 = vcombine.high %v6191_v19, %v6198_v61 }
0x182e   : > { %v6210_v48 = vrot.slane %v6203_v52, %v14628_v51  ;;  %v6218_v5 = vrot.slane %v11419_v53, %v14628_v51  ;;  %v6226_v6 = vrot.slane %v6219_v0, %v14628_v51  ;;  %v6234_v7 = vrot.slane %v11420_v2, %v14628_v51 }
0x1830   : > { %v6236_v8 = vcombine.high %v6210_v48, %v6218_v5  ;;  %v6252_v9 = vcombine.high %v6226_v6, %v6234_v7  ;;  %v6235_v10 = vcombine.low %v6210_v48, %v6218_v5  ;;  %v6251_v11 = vcombine.low %v6226_v6, %v6234_v7  ;;  %v12812_v48 = vld [vmem:[#allocation24] sm:$0xff]   ;;  %v12813_v5 = vld [vmem:[#allocation27 + $0x8] sm:$0xff]  }
0x1831   : > { %12096 = vmatpush3.bf16.msra.mxu0 %v12812_v48  ;;  %v12815_v6 = vld [vmem:[#allocation27] sm:$0xff]  }
0x1832   : > { %v6250_v12 = vrot.slane %v6236_v8, %v14630_v58  ;;  %v6266_v62 = vrot.slane %v6252_v9, %v14630_v58  ;;  %v6243_v4 = vrot.slane %v6235_v10, %v14630_v58  ;;  %v6259_v49 = vrot.slane %v6251_v11, %v14630_v58  ;;  %12109 = vmatprep.subr.bf16.mxu0 %v13933_v1  ;;  %v11425_v11 = vld [vmem:[#allocation21] ss:$0 sm:$0xff] }
0x1834   : > { %v6269_v63 = vcombine.low %v6250_v12, %v6266_v62  ;;  %v6268_v15 = vcombine.high %v6243_v4, %v6259_v49  ;;  %v6267_v16 = vcombine.low %v6243_v4, %v6259_v49  ;;  %v6270_v20 = vcombine.high %v6250_v12, %v6266_v62  ;;  %v11426_v62 = vld [vmem:[#allocation22] ss:$0 sm:$0xff] }
0x1836   : > { %6276 = vrot.lane.b32.xlu1 %v6269_v63, %s15934_s5  ;;  %6272 = vrot.lane.b32.xlu0 %v6268_v15, %s15926_s23  ;;  %v12814_v15 = vld [vmem:[#allocation30 + $0x8] sm:$0xff]  }
0x183a   : > { %6280 = vrot.lane.b32.xlu0 %v6270_v20, %s15927_s11 }
0x185a   : > { %5020 = vadd.xlane.f32.xlu1 %v5019_v24  ;;  %v11391_v24 = vld [vmem:[%s15935_s6] ss:$0 sm:$0xff]  ;;  %s15937_s6 = sld [smem:[#allocation96_spill]] }
0x18a8   : > { %v6273_v25 = vpop.permute.xlu0 %6272  ;;  %v6277_v27 = vpop.permute.xlu1 %6276 }
0x18a9   : > { %v6283_v29 = vsel %vm2692_vm4, %v6267_v16, %v6273_v25 }
0x18aa   : > { %v6284_v31 = vsel %vm3263_vm6, %v6283_v29, %v6277_v27  ;;  %v11392_v27 = vld [vmem:[%s15936_s7] ss:$0 sm:$0xff] }
0x18ac   : > { %v6281_v30 = vpop.permute.xlu0 %6280 }
0x18ad   : > { %v6285_v13 = vsel %vm3265_vm7, %v6284_v31, %v6281_v30 }
0x18ae   : > { %v6286_v32 = vpack.c.bf16 %v6285_v13, %v6285_v13 }
0x18b0   : > { %12090 = vmatmul.mubr.msk.bf16.vlgmr.msra.gmra.mxu1 %vm2086_vm3, %v6286_v32 }
0x18b1   : > { %12105 = vmatprep.mubr.msk.bf16.mxu1 %vm13934_vm0, %v13933_v1  ;;  %12102 = vmatpush3.bf16.msra.mxu1 %v12813_v5 }
0x18b2   : > { %12103 = vmatprep.subr.bf16.mxu1 %v13933_v1 }
0x18b5   : > { %12104 = vmatpush3.bf16.msra.mxu1 %v12815_v6 }
0x18b6   : > { %12117 = vmatprep.subr.bf16.mxu1 %v13933_v1 }
0x18e3   : > { %v5021_v28 = vpop.xlane.xlu1 %5020 }
0x18e4   : > { %v5022_v26 = vmul.f32 0.03125, %v5021_v28 }
0x18e6   : > { %v5023_v14 = vsub.f32 %v5014_v23, %v5022_v26 }
0x18e8   : > { %v5024_v33 = vmul.f32 %v5023_v14, %v5023_v14 }
0x18ea   : > { %v5025_v34 = vsel %vm2086_vm3, %v5024_v33, 0.0 }
0x18eb   : > { %5026 = vadd.xlane.f32.xlu0 %v5025_v34 }
0x1970   : > { %v6342_v36 = vpop.f32.mrf.mxu1 }
0x1971   : > { %v6343_v37 = vadd.f32 %v11421_v35, %v6342_v36  ;;  %v11427_v36 = vld [vmem:[#allocation25] ss:$0 sm:$0xff] }
0x1972   : > { %v12091_v41 = vpop.f32.mrf.mxu1 }
0x1973   : > { %v6348_v18 = vadd.f32 %v6343_v37, %v14592_v17 }
0x1974   : > { %v5027_v42 = vpop.xlane.xlu0 %5026  ;;  %v6345_v43 = vpop.f32.mrf.mxu1 }
0x1975   : > { %v5028_v44 = vmul.f32 0.03125, %v5027_v42  ;;  %v6351_v45 = vsel %vm2086_vm3, %v6348_v18, 0.0 }
0x1976   : > { %6352 = vadd.xlane.f32.xlu1 %v6351_v45  ;;  %v12092_v46 = vpop.f32.mrf.mxu1 }
0x1977   : > { %v5029_v47 = vadd.f32 1e-05, %v5028_v44 }
0x1979   : > { %12903 = vrsqrt.f32 %v5029_v47 }
0x1986   : > { %v12904_v50 = vpop.eup %12903 }
0x1987   : > { %v5031_v40 = vmul.f32 %v12904_v50, %v5023_v14  ;;  %v11433_v14 = vld [vmem:[#allocation28] ss:$0 sm:$0xff] }
0x1989   : > { %v5038_v38 = vmul.f32 %v11389_v39, %v5031_v40 }
0x198b   : > { %v5045_v55 = vadd.f32 %v11390_v54, %v5038_v38 }
0x198d   : > { %v5048_v56 = vsel %vm2086_vm3, %v5045_v55, 0.0 }
0x198e   : > { %5049 = vadd.xlane.f32.xlu0 %v5048_v56 }
0x19ff   : > { %v6353_v57 = vpop.xlane.xlu1 %6352 }
0x1a00   : > { %v6354_v17 = vmul.f32 0.03125, %v6353_v57 }
0x1a02   : > { %v6355_v59 = vsub.f32 %v6348_v18, %v6354_v17 }
0x1a04   : > { %v6356_v60 = vmul.f32 %v6355_v59, %v6355_v59 }
0x1a06   : > { %v6357_v19 = vsel %vm2086_vm3, %v6356_v60, 0.0 }
0x1a07   : > { %6358 = vadd.xlane.f32.xlu1 %v6357_v19 }
0x1a17   : > { %v5050_v61 = vpop.xlane.xlu0 %5049 }
0x1a18   : > { %v5051_v52 = vmul.f32 0.03125, %v5050_v61 }
0x1a1a   : > { %v5052_v53 = vsub.f32 %v5045_v55, %v5051_v52 }
0x1a1c   : > { %v5053_v0 = vmul.f32 %v5052_v53, %v5052_v53 }
0x1a1e   : > { %v5054_v2 = vsel %vm2086_vm3, %v5053_v0, 0.0 }
0x1a1f   : > { %5055 = vadd.xlane.f32.xlu0 %v5054_v2 }
0x1a90   : > { %v6359_v7 = vpop.xlane.xlu1 %6358 }
0x1a91   : > { %v6360_v8 = vmul.f32 0.03125, %v6359_v7 }
0x1a93   : > { %v6361_v9 = vadd.f32 1e-05, %v6360_v8 }
0x1a95   : > { %12905 = vrsqrt.f32 %v6361_v9 }
0x1aa2   : > { %v12906_v10 = vpop.eup %12905 }
0x1aa3   : > { %v6363_v12 = vmul.f32 %v12906_v10, %v6355_v59 }
0x1aa5   : > { %v6370_v4 = vmul.f32 %v11425_v11, %v6363_v12 }
0x1aa7   : > { %v15195_v49 = vadd.f32 %v11426_v62, %v6370_v4 }
0x1aa8   : > { %v5056_v63 = vpop.xlane.xlu0 %5055 }
0x1aa9   : > { %v5057_v16 = vmul.f32 0.03125, %v5056_v63  ;;  %v6398_v20 = vpack.c.bf16 %v15195_v49, %v15195_v49 }
0x1aab   : > { %v5058_v21 = vadd.f32 1e-05, %v5057_v16  ;;  %12098 = vmatmul.mubr.msk.bf16.vlgmr.msra.gmra.mxu0 %vm2086_vm3, %v6398_v20 }
0x1aac   : > { %12110 = vmatpush3.bf16.msra.mxu0 %v12814_v15  ;;  %12113 = vmatprep.mubr.msk.bf16.mxu0 %vm13934_vm0, %v13933_v1 }
0x1aad   : > { %12907 = vrsqrt.f32 %v5058_v21  ;;  %12111 = vmatprep.subr.bf16.mxu0 %v13933_v1 }
0x1ab0   : > { %12112 = vmatpush3.bf16.msra.mxu0 %v12816_v22 }
0x1ab1   : > { %12123 = vmatprep.subr.bf16.mxu0 %v13933_v1 }
0x1aba   : > { %v12908_v23 = vpop.eup %12907 }
0x1abb   : > { %v5060_v25 = vmul.f32 %v12908_v23, %v5052_v53 }
0x1abd   : > { %v5067_v29 = vmul.f32 %v11391_v24, %v5060_v25 }
0x1abf   : > { %v5074_v30 = vadd.f32 %v11392_v27, %v5067_v29 }
0x1ac1   : > { %v15206_v31 = vpack.c.bf16 %v5074_v30, %v5074_v30 }
0x1ac3   : > { %12106 = vmatmul.mubr.msk.bf16.vlgmr.msra.gmra.mxu1 %vm2086_vm3, %v15206_v31  ;;  %12114 = vmatmul.mubr.msk.bf16.vlgmr.msra.gmra.mxu0 %vm2086_vm3, %v15206_v31 }
0x1ac4   : > { %12119 = vmatprep.mubr.msk.bf16.mxu1 %vm13934_vm0, %v13933_v1  ;;  %12125 = vmatprep.mubr.msk.bf16.mxu0 %vm13934_vm0, %v13933_v1 }
0x1b6b   : > { %v6454_v13 = vpop.f32.mrf.mxu0 }
0x1b6c   : > { %v6455_v43 = vadd.f32 %v11427_v36, %v6454_v13 }
0x1b6d   : > { %v12099_v32 = vpop.f32.mrf.mxu0 }
0x1b6f   : > { %v6457_v28 = vpop.f32.mrf.mxu0 }
0x1b71   : > { %v12100_v26 = vpop.f32.mrf.mxu0 }
0x1b83   : > { %v6662_v33 = vpop.f32.mrf.mxu1  ;;  %v15216_v34 = vpop.f32.mrf.mxu0 }
0x1b84   : > { %v6663_v35 = vadd.f32 %v11433_v14, %v6662_v33 }
0x1b85   : > { %v12107_v37 = vpop.f32.mrf.mxu1  ;;  %v12115_v41 = vpop.f32.mrf.mxu0 }
0x1b86   : > { %6672 = vrot.lane.b32.xlu1 %v6663_v35, %s15931_s2  ;;  %6669 = vrot.lane.b32.xlu0 %v6663_v35, %s15932_s3 }
0x1b87   : > { %v6665_v18 = vpop.f32.mrf.mxu1  ;;  %v6869_v42 = vpop.f32.mrf.mxu0 }
0x1b89   : > { %v12108_v44 = vpop.f32.mrf.mxu1  ;;  %v12116_v45 = vpop.f32.mrf.mxu0 }
0x1b8a   : > { %6675 = vrot.lane.b32.xlu1 %v6663_v35, %s15933_s4  ;;  %6461 = vrot.lane.b32.xlu0 %v6455_v43, %s15932_s3 }
0x1b8e   : > { %6464 = vrot.lane.b32.xlu1 %v6455_v43, %s15931_s2  ;;  %6467 = vrot.lane.b32.xlu0 %v6455_v43, %s15933_s4 }
0x1bf8   : > { %v6673_v46 = vpop.permute.xlu1 %6672  ;;  %v6670_v47 = vpop.permute.xlu0 %6669 }
0x1bf9   : > { %v6678_v50 = vcombine.low %v6663_v35, %v6673_v46  ;;  %v6679_v39 = vcombine.high %v6663_v35, %v6673_v46 }
0x1bfb   : > { %v6686_v56 = vrot.slane %v6678_v50, %v14628_v51  ;;  %v6693_v57 = vrot.slane %v6679_v39, %v14628_v51 }
0x1bfc   : > { %v6676_v40 = vpop.permute.xlu1 %6675  ;;  %v6462_v54 = vpop.permute.xlu0 %6461 }
0x1bfd   : > { %v6694_v38 = vcombine.low %v6670_v47, %v6676_v40  ;;  %v6695_v55 = vcombine.high %v6670_v47, %v6676_v40 }
0x1bff   : > { %v6702_v17 = vrot.slane %v6694_v38, %v14628_v51  ;;  %v6709_v59 = vrot.slane %v6695_v55, %v14628_v51 }
0x1c00   : > { %v6465_v60 = vpop.permute.xlu1 %6464  ;;  %v6468_v19 = vpop.permute.xlu0 %6467 }
0x1c01   : > { %v6710_v61 = vcombine.low %v6686_v56, %v6702_v17  ;;  %v6711_v52 = vcombine.high %v6686_v56, %v6702_v17  ;;  %v6726_v53 = vcombine.low %v6693_v57, %v6709_v59  ;;  %v6727_v0 = vcombine.high %v6693_v57, %v6709_v59 }
0x1c02   : > { %v6470_v2 = vcombine.low %v6455_v43, %v6465_v60  ;;  %v6471_v3 = vcombine.high %v6455_v43, %v6465_v60  ;;  %v6486_v48 = vcombine.low %v6462_v54, %v6468_v19  ;;  %v6487_v5 = vcombine.high %v6462_v54, %v6468_v19 }
0x1c03   : > { %v6718_v6 = vrot.slane %v6710_v61, %v14630_v58  ;;  %v6725_v7 = vrot.slane %v6711_v52, %v14630_v58  ;;  %v6734_v8 = vrot.slane %v6726_v53, %v14630_v58  ;;  %v6741_v9 = vrot.slane %v6727_v0, %v14630_v58 }
0x1c04   : > { %v6478_v10 = vrot.slane %v6470_v2, %v14628_v51  ;;  %v6485_v11 = vrot.slane %v6471_v3, %v14628_v51  ;;  %v6494_v12 = vrot.slane %v6486_v48, %v14628_v51  ;;  %v6501_v62 = vrot.slane %v6487_v5, %v14628_v51 }
0x1c05   : > { %v6746_v4 = vcombine.low %v6718_v6, %v6725_v7  ;;  %v11437_v63 = vcombine.high %v6718_v6, %v6725_v7  ;;  %v6762_v15 = vcombine.low %v6734_v8, %v6741_v9  ;;  %v11438_v16 = vcombine.high %v6734_v8, %v6741_v9 }
0x1c06   : > { %v6502_v20 = vcombine.low %v6478_v10, %v6494_v12  ;;  %v6503_v21 = vcombine.high %v6478_v10, %v6494_v12  ;;  %v6518_v22 = vcombine.low %v6485_v11, %v6501_v62  ;;  %v6519_v23 = vcombine.high %v6485_v11, %v6501_v62 }
0x1c07   : > { %v6753_v24 = vrot.slane %v6746_v4, %v14628_v51  ;;  %v6761_v25 = vrot.slane %v11437_v63, %v14628_v51  ;;  %v6769_v27 = vrot.slane %v6762_v15, %v14628_v51  ;;  %v6777_v29 = vrot.slane %v11438_v16, %v14628_v51 }
0x1c08   : > { %v6510_v30 = vrot.slane %v6502_v20, %v14630_v58  ;;  %v6517_v13 = vrot.slane %v6503_v21, %v14630_v58  ;;  %v6526_v32 = vrot.slane %v6518_v22, %v14630_v58  ;;  %v6533_v28 = vrot.slane %v6519_v23, %v14630_v58 }
0x1c09   : > { %v6778_v26 = vcombine.low %v6753_v24, %v6761_v25  ;;  %v6794_v14 = vcombine.low %v6769_v27, %v6777_v29  ;;  %v6779_v33 = vcombine.high %v6753_v24, %v6761_v25  ;;  %v6795_v35 = vcombine.high %v6769_v27, %v6777_v29 }
0x1c0a   : > { %v6538_v36 = vcombine.low %v6510_v30, %v6517_v13  ;;  %v11431_v37 = vcombine.high %v6510_v30, %v6517_v13  ;;  %v6554_v41 = vcombine.low %v6526_v32, %v6533_v28  ;;  %v11432_v18 = vcombine.high %v6526_v32, %v6533_v28 }
0x1c0b   : > { %v6786_v42 = vrot.slane %v6778_v26, %v14630_v58  ;;  %v6802_v43 = vrot.slane %v6794_v14, %v14630_v58  ;;  %v6793_v40 = vrot.slane %v6779_v33, %v14630_v58  ;;  %v6809_v54 = vrot.slane %v6795_v35, %v14630_v58 }
0x1c0c   : > { %v6545_v44 = vrot.slane %v6538_v36, %v14628_v51  ;;  %v6553_v45 = vrot.slane %v11431_v37, %v14628_v51  ;;  %v6561_v46 = vrot.slane %v6554_v41, %v14628_v51  ;;  %v6569_v47 = vrot.slane %v11432_v18, %v14628_v51  ;;  %v11439_v41 = vld [vmem:[#allocation31] ss:$0 sm:$0xff] }
0x1c0d   : > { %v6810_v50 = vcombine.low %v6786_v42, %v6802_v43  ;;  %v6811_v39 = vcombine.high %v6786_v42, %v6802_v43  ;;  %v6812_v61 = vcombine.low %v6793_v40, %v6809_v54  ;;  %v6813_v52 = vcombine.high %v6793_v40, %v6809_v54 }
0x1c0e   : > { %v6570_v38 = vcombine.low %v6545_v44, %v6553_v45  ;;  %v6586_v55 = vcombine.low %v6561_v46, %v6569_v47  ;;  %v6571_v53 = vcombine.high %v6545_v44, %v6553_v45  ;;  %v6587_v0 = vcombine.high %v6561_v46, %v6569_v47 }
0x1c0f   : > { %v7022_v56 = vpack.c.bf16 %v6810_v50, %v6810_v50  ;;  %v7023_v57 = vpack.c.bf16 %v6811_v39, %v6811_v39  ;;  %v7024_v48 = vpack.c.bf16 %v6812_v61, %v6812_v61  ;;  %v7025_v5 = vpack.c.bf16 %v6813_v52, %v6813_v52 }
0x1c10   : > { %v6578_v17 = vrot.slane %v6570_v38, %v14630_v58  ;;  %v6594_v59 = vrot.slane %v6586_v55, %v14630_v58  ;;  %v6585_v8 = vrot.slane %v6571_v53, %v14630_v58  ;;  %v6601_v9 = vrot.slane %v6587_v0, %v14630_v58 }
0x1c11   : > { %v7030_v60 = vsel %vm2692_vm4, %v7022_v56, 0  ;;  %v7076_v19 = vsel %vm2692_vm4, %v7023_v57, 0  ;;  %v7122_v10 = vsel %vm2692_vm4, %v7024_v48, 0  ;;  %v7168_v11 = vsel %vm2692_vm4, %v7025_v5, 0 }
0x1c12   : > { %12118 = vmatpush3.bf16.xpose.msra.mxu1 %v7030_v60  ;;  %12124 = vmatpush3.bf16.xpose.msra.mxu0 %v7076_v19  ;;  %v6602_v2 = vcombine.low %v6578_v17, %v6594_v59  ;;  %v6603_v3 = vcombine.high %v6578_v17, %v6594_v59  ;;  %v6604_v12 = vcombine.low %v6585_v8, %v6601_v9 }
0x1c13   : > { %12129 = vmatprep.subr.bf16.mxu1 %v13933_v1  ;;  %12135 = vmatprep.subr.bf16.mxu0 %v13933_v1  ;;  %v6605_v62 = vcombine.high %v6585_v8, %v6601_v9  ;;  %v6867_v18 = vadd.f32 %v11439_v41, %v15216_v34 }
0x1c14   : > { %v7018_v6 = vpack.c.bf16 %v6602_v2, %v6602_v2  ;;  %v7019_v7 = vpack.c.bf16 %v6603_v3, %v6603_v3  ;;  %v7020_v4 = vpack.c.bf16 %v6604_v12, %v6604_v12 }
0x1c15   : > { %v7021_v63 = vpack.c.bf16 %v6605_v62, %v6605_v62 }
0x1c19   : > { %12120 = vmatmul.mubr.msk.bf16.vlgmr.msra.gmra.mxu1 %vm2692_vm4, %v7018_v6  ;;  %12126 = vmatmul.mubr.msk.bf16.vlgmr.msra.gmra.mxu0 %vm2692_vm4, %v7019_v7 }
0x1c1a   : > { %12130 = vmatpush3.bf16.xpose.msra.mxu1 %v7122_v10  ;;  %12136 = vmatpush3.bf16.xpose.msra.mxu0 %v7168_v11 }
0x1c1b   : > { %12131 = vmatprep.mubr.msk.bf16.mxu1 %vm13934_vm0, %v13933_v1  ;;  %12137 = vmatprep.mubr.msk.bf16.mxu0 %vm13934_vm0, %v13933_v1 }
0x1c1c   : > { %12141 = vmatprep.subr.bf16.mxu1 %v13933_v1  ;;  %12147 = vmatprep.subr.bf16.mxu0 %v13933_v1 }
0x1c21   : > { %12132 = vmatmul.mubr.msk.bf16.vlgmr.msra.gmra.mxu1 %vm2692_vm4, %v7020_v4  ;;  %12138 = vmatmul.mubr.msk.bf16.vlgmr.msra.gmra.mxu0 %vm2692_vm4, %v7021_v63 }
0x1c22   : > { %12143 = vmatprep.mubr.msk.bf16.mxu1 %vm13934_vm0, %v13933_v1  ;;  %12149 = vmatprep.mubr.msk.bf16.mxu0 %vm13934_vm0, %v13933_v1 }
0x1cd9   : > { %v7066_v15 = vpop.f32.mrf.mxu1  ;;  %v7112_v16 = vpop.f32.mrf.mxu0 }
0x1cda   : > { %v7210_v20 = vsel %vm2692_vm4, %v7066_v15, -inf  ;;  %v7213_v21 = vsel %vm2692_vm4, %v7112_v16, -inf }
0x1cdb   : > { %7211 = vmax.xlane.f32.xlu1 %v7210_v20  ;;  %v12121_v22 = vpop.f32.mrf.mxu1  ;;  %7214 = vmax.xlane.f32.xlu0 %v7213_v21  ;;  %v12127_v23 = vpop.f32.mrf.mxu0 }
0x1cdd   : > { %v7069_v24 = vpop.f32.mrf.mxu1  ;;  %v7115_v25 = vpop.f32.mrf.mxu0 }
0x1cdf   : > { %v12122_v27 = vpop.f32.mrf.mxu1  ;;  %v12128_v29 = vpop.f32.mrf.mxu0 }
0x1ce1   : > { %v7158_v30 = vpop.f32.mrf.mxu1  ;;  %v7204_v13 = vpop.f32.mrf.mxu0 }
0x1ce2   : > { %v7216_v32 = vsel %vm2692_vm4, %v7158_v30, -inf  ;;  %v7219_v28 = vsel %vm2692_vm4, %v7204_v13, -inf }
0x1ce3   : > { %v12133_v26 = vpop.f32.mrf.mxu1  ;;  %7217 = vmax.xlane.f32.xlu0 %v7216_v32  ;;  %7220 = vmax.xlane.f32.xlu1 %v7219_v28  ;;  %v12139_v14 = vpop.f32.mrf.mxu0 }
0x1ce5   : > { %v7161_v33 = vpop.f32.mrf.mxu1  ;;  %v7207_v35 = vpop.f32.mrf.mxu0 }
0x1ce7   : > { %v12134_v36 = vpop.f32.mrf.mxu1  ;;  %v12140_v37 = vpop.f32.mrf.mxu0 }
0x1cf4   : > { %6876 = vrot.lane.b32.xlu1 %v6867_v18, %s15931_s2 }
0x1d64   : > { %v7212_v42 = vpop.xlane.xlu1 %7211  ;;  %v7215_v43 = vpop.xlane.xlu0 %7214 }
0x1d65   : > { %v7222_v44 = vsub.f32 %v7066_v15, %v7212_v42  ;;  %v7223_v45 = vsub.f32 %v7112_v16, %v7215_v43 }
0x1d67   : > { %v7226_v46 = vmul.f32 1.442695, %v7222_v44  ;;  %v7228_v47 = vmul.f32 1.442695, %v7223_v45 }
0x1d69   : > { %12909 = vpow2.f32 %v7226_v46 }
0x1d6a   : > { %12911 = vpow2.f32 %v7228_v47 }
0x1d6c   : > { %v7218_v54 = vpop.xlane.xlu0 %7217  ;;  %v7221_v38 = vpop.xlane.xlu1 %7220 }
0x1d6d   : > { %v7224_v55 = vsub.f32 %v7158_v30, %v7218_v54  ;;  %v7225_v56 = vsub.f32 %v7204_v13, %v7221_v38 }
0x1d6f   : > { %v7230_v57 = vmul.f32 1.442695, %v7224_v55  ;;  %v7232_v17 = vmul.f32 1.442695, %v7225_v56 }
0x1d70   : > { %v6877_v52 = vpop.permute.xlu1 %6876 }
0x1d71   : > { %12913 = vpow2.f32 %v7230_v57  ;;  %v6882_v2 = vcombine.low %v6867_v18, %v6877_v52  ;;  %v6883_v3 = vcombine.high %v6867_v18, %v6877_v52 }
0x1d72   : > { %12915 = vpow2.f32 %v7232_v17 }
0x1d73   : > { %v6890_v8 = vrot.slane %v6882_v2, %v14628_v51  ;;  %v6897_v9 = vrot.slane %v6883_v3, %v14628_v51 }
0x1d76   : > { %v15282_v50 = vpop.eup %12909 }
0x1d77   : > { %v15284_v39 = vpop.eup %12911  ;;  %v7234_v40 = vsel %vm2692_vm4, %v15282_v50, 0.0 }
0x1d78   : > { %7235 = vadd.xlane.f32.xlu0 %v7234_v40  ;;  %v7237_v34 = vsel %vm2692_vm4, %v15284_v39, 0.0 }
0x1d79   : > { %7238 = vadd.xlane.f32.xlu1 %v7237_v34 }
0x1d7e   : > { %v15292_v59 = vpop.eup %12913 }
0x1d7f   : > { %v15294_v60 = vpop.eup %12915  ;;  %v7240_v19 = vsel %vm2692_vm4, %v15292_v59, 0.0 }
0x1d80   : > { %v7243_v61 = vsel %vm2692_vm4, %v15294_v60, 0.0 }
0x1d8a   : > { %6879 = vrot.lane.b32.xlu1 %v6867_v18, %s15933_s4 }
0x1d8e   : > { %6873 = vrot.lane.b32.xlu0 %v6867_v18, %s15932_s3 }
0x1dad   : > { %7241 = vadd.xlane.f32.xlu0 %v7240_v19 }
0x1dae   : > { %7244 = vadd.xlane.f32.xlu1 %v7243_v61 }
0x1e01   : > { %v7236_v53 = vpop.xlane.xlu0 %7235 }
0x1e02   : > { %v7239_v0 = vpop.xlane.xlu1 %7238  ;;  %12917 = vrcp.f32 %v7236_v53 }
0x1e03   : > { %12919 = vrcp.f32 %v7239_v0 }
0x1e05   : > { %v6874_v48 = vpop.permute.xlu0 %6873 }
0x1e06   : > { %v6880_v5 = vpop.permute.xlu1 %6879 }
0x1e07   : > { %v6898_v6 = vcombine.low %v6874_v48, %v6880_v5  ;;  %v6899_v7 = vcombine.high %v6874_v48, %v6880_v5 }
0x1e09   : > { %v6906_v10 = vrot.slane %v6898_v6, %v14628_v51  ;;  %v6913_v11 = vrot.slane %v6899_v7, %v14628_v51 }
0x1e0b   : > { %v6914_v12 = vcombine.low %v6890_v8, %v6906_v10  ;;  %v6915_v62 = vcombine.high %v6890_v8, %v6906_v10  ;;  %v6930_v4 = vcombine.low %v6897_v9, %v6913_v11  ;;  %v6931_v63 = vcombine.high %v6897_v9, %v6913_v11 }
0x1e0d   : > { %v6922_v15 = vrot.slane %v6914_v12, %v14630_v58  ;;  %v6929_v16 = vrot.slane %v6915_v62, %v14630_v58  ;;  %v6938_v20 = vrot.slane %v6930_v4, %v14630_v58  ;;  %v6945_v21 = vrot.slane %v6931_v63, %v14630_v58 }
0x1e0f   : > { %v6950_v22 = vcombine.low %v6922_v15, %v6929_v16  ;;  %v11443_v23 = vcombine.high %v6922_v15, %v6929_v16  ;;  %v6966_v24 = vcombine.low %v6938_v20, %v6945_v21  ;;  %v11444_v25 = vcombine.high %v6938_v20, %v6945_v21  ;;  %v12918_v33 = vpop.eup %12917 }
0x1e10   : > { %v12920_v18 = vpop.eup %12919  ;;  %v7250_v40 = vmul.f32 %v12918_v33, %v15282_v50 }
0x1e11   : > { %v6957_v27 = vrot.slane %v6950_v22, %v14628_v51  ;;  %v6965_v29 = vrot.slane %v11443_v23, %v14628_v51  ;;  %v6973_v30 = vrot.slane %v6966_v24, %v14628_v51  ;;  %v6981_v13 = vrot.slane %v11444_v25, %v14628_v51 }
0x1e12   : > { %v7251_v34 = vmul.f32 %v12920_v18, %v15284_v39  ;;  %v7254_v57 = vpack.c.bf16 %v7250_v40, %v7250_v40 }
0x1e13   : > { %v6982_v32 = vcombine.low %v6957_v27, %v6965_v29  ;;  %v6998_v28 = vcombine.low %v6973_v30, %v6981_v13  ;;  %v6983_v26 = vcombine.high %v6957_v27, %v6965_v29  ;;  %v6999_v14 = vcombine.high %v6973_v30, %v6981_v13 }
0x1e14   : > { %v7255_v17 = vpack.c.bf16 %v7251_v34, %v7251_v34 }
0x1e15   : > { %v6990_v35 = vrot.slane %v6982_v32, %v14630_v58  ;;  %v7006_v36 = vrot.slane %v6998_v28, %v14630_v58  ;;  %v6997_v37 = vrot.slane %v6983_v26, %v14630_v58  ;;  %v7013_v41 = vrot.slane %v6999_v14, %v14630_v58  ;;  %v12817_v26 = vld [vmem:[#allocation33 + $0x8] sm:$0xff]  }
0x1e17   : > { %v7014_v42 = vcombine.low %v6990_v35, %v7006_v36  ;;  %v7015_v43 = vcombine.high %v6990_v35, %v7006_v36  ;;  %v7016_v44 = vcombine.low %v6997_v37, %v7013_v41  ;;  %v7017_v45 = vcombine.high %v6997_v37, %v7013_v41 }
0x1e19   : > { %v7258_v46 = vpack.c.bf16 %v7014_v42, %v7014_v42  ;;  %v7259_v47 = vpack.c.bf16 %v7015_v43, %v7015_v43  ;;  %v7260_v55 = vpack.c.bf16 %v7016_v44, %v7016_v44  ;;  %v7261_v56 = vpack.c.bf16 %v7017_v45, %v7017_v45  ;;  %v12818_v44 = vld [vmem:[#allocation33] sm:$0xff]  }
0x1e1b   : > { %v7266_v54 = vsel %vm2932_vm5, %v7258_v46, 0  ;;  %v7312_v38 = vsel %vm2932_vm5, %v7259_v47, 0  ;;  %v7358_v50 = vsel %vm2932_vm5, %v7260_v55, 0  ;;  %v7404_v39 = vsel %vm2932_vm5, %v7261_v56, 0 }
0x1e1c   : > { %12142 = vmatpush3.bf16.msra.mxu1 %v7266_v54  ;;  %12148 = vmatpush3.bf16.msra.mxu0 %v7312_v38 }
0x1e1d   : > { %12153 = vmatprep.subr.bf16.mxu1 %v13933_v1  ;;  %12159 = vmatprep.subr.bf16.mxu0 %v13933_v1 }
0x1e1f   : > { %12144 = vmatmul.mubr.msk.bf16.vlgmr.msra.gmra.mxu1 %vm2692_vm4, %v7254_v57  ;;  %12150 = vmatmul.mubr.msk.bf16.vlgmr.msra.gmra.mxu0 %vm2692_vm4, %v7255_v17 }
0x1e20   : > { %12154 = vmatpush3.bf16.msra.mxu1 %v7358_v50  ;;  %12160 = vmatpush3.bf16.msra.mxu0 %v7404_v39 }
0x1e21   : > { %12155 = vmatprep.mubr.msk.bf16.mxu1 %vm13934_vm0, %v13933_v1  ;;  %12161 = vmatprep.mubr.msk.bf16.mxu0 %vm13934_vm0, %v13933_v1 }
0x1e22   : > { %12165 = vmatprep.subr.bf16.mxu1 %v13933_v1  ;;  %12173 = vmatprep.subr.bf16.mxu0 %v13933_v1 }
0x1e36   : > { %v7242_v19 = vpop.xlane.xlu0 %7241 }
0x1e37   : > { %12921 = vrcp.f32 %v7242_v19  ;;  %v7245_v61 = vpop.xlane.xlu1 %7244 }
0x1e38   : > { %12923 = vrcp.f32 %v7245_v61 }
0x1e44   : > { %v12922_v52 = vpop.eup %12921 }
0x1e45   : > { %v12924_v53 = vpop.eup %12923  ;;  %v7252_v0 = vmul.f32 %v12922_v52, %v15292_v59 }
0x1e46   : > { %v7253_v2 = vmul.f32 %v12924_v53, %v15294_v60 }
0x1e47   : > { %v7256_v3 = vpack.c.bf16 %v7252_v0, %v7252_v0 }
0x1e48   : > { %v7257_v48 = vpack.c.bf16 %v7253_v2, %v7253_v2 }
0x1e49   : > { %12156 = vmatmul.mubr.msk.bf16.vlgmr.msra.gmra.mxu1 %vm2692_vm4, %v7256_v3 }
0x1e4a   : > { %12162 = vmatmul.mubr.msk.bf16.vlgmr.msra.gmra.mxu0 %vm2692_vm4, %v7257_v48  ;;  %12169 = vmatprep.mubr.msk.bf16.mxu1 %vm13934_vm0, %v13933_v1 }
0x1e4b   : > { %12177 = vmatprep.mubr.msk.bf16.mxu0 %vm13934_vm0, %v13933_v1  ;;  %12166 = vmatpush3.bf16.msra.mxu1 %v12817_v26 }
0x1e4c   : > { %12167 = vmatprep.subr.bf16.mxu1 %v13933_v1 }
0x1e4f   : > { %12168 = vmatpush3.bf16.msra.mxu1 %v12818_v44 }
0x1e50   : > { %12181 = vmatprep.subr.bf16.mxu1 %v13933_v1 }
0x1edf   : > { %v7302_v5 = vpop.f32.mrf.mxu1  ;;  %v7348_v6 = vpop.f32.mrf.mxu0 }
0x1ee1   : > { %v12145_v7 = vpop.f32.mrf.mxu1  ;;  %v12151_v8 = vpop.f32.mrf.mxu0 }
0x1ee2   : > { %v11455_v7 = vld [vmem:[#allocation34] ss:$0 sm:$0xff] }
0x1ee3   : > { %v7305_v9 = vpop.f32.mrf.mxu1  ;;  %v7351_v59 = vpop.f32.mrf.mxu0 }
0x1ee5   : > { %v12146_v10 = vpop.f32.mrf.mxu1  ;;  %v12152_v60 = vpop.f32.mrf.mxu0 }
0x1f09   : > { %v7394_v11 = vpop.f32.mrf.mxu1 }
0x1f0a   : > { %v7446_v12 = vcombine.low %v7302_v5, %v7394_v11  ;;  %v7447_v62 = vcombine.high %v7302_v5, %v7394_v11  ;;  %v7440_v4 = vpop.f32.mrf.mxu0 }
0x1f0b   : > { %v7462_v63 = vcombine.low %v7348_v6, %v7440_v4  ;;  %v7463_v15 = vcombine.high %v7348_v6, %v7440_v4  ;;  %v12157_v16 = vpop.f32.mrf.mxu1 }
0x1f0c   : > { %v7454_v20 = vrot.slane %v7446_v12, %v14628_v51  ;;  %v7461_v21 = vrot.slane %v7447_v62, %v14628_v51  ;;  %v12163_v22 = vpop.f32.mrf.mxu0 }
0x1f0d   : > { %v7470_v23 = vrot.slane %v7462_v63, %v14628_v51  ;;  %v7477_v24 = vrot.slane %v7463_v15, %v14628_v51  ;;  %v7397_v25 = vpop.f32.mrf.mxu1  ;;  %v12822_v22 = vld [vmem:[%s15937_s6 + $0x10] sm:$0xff]  }
0x1f0e   : > { %v7443_v27 = vpop.f32.mrf.mxu0 }
0x1f0f   : > { %v7478_v29 = vcombine.low %v7454_v20, %v7470_v23  ;;  %v7479_v30 = vcombine.high %v7454_v20, %v7470_v23  ;;  %v7494_v13 = vcombine.low %v7461_v21, %v7477_v24  ;;  %v7495_v32 = vcombine.high %v7461_v21, %v7477_v24  ;;  %v12158_v28 = vpop.f32.mrf.mxu1  ;;  %v12819_v20 = vld [vmem:[#allocation39 + $0x8] sm:$0xff]   ;;  %v12820_v21 = vld [vmem:[#allocation39] sm:$0xff]  }
0x1f10   : > { %v12164_v14 = vpop.f32.mrf.mxu0  ;;  %12174 = vmatpush3.bf16.msra.mxu0 %v12819_v20 }
0x1f11   : > { %v7486_v33 = vrot.slane %v7478_v29, %v14630_v58  ;;  %v7493_v35 = vrot.slane %v7479_v30, %v14630_v58  ;;  %v7502_v36 = vrot.slane %v7494_v13, %v14630_v58  ;;  %v7509_v37 = vrot.slane %v7495_v32, %v14630_v58  ;;  %12175 = vmatprep.subr.bf16.mxu0 %v13933_v1  ;;  %v11459_v29 = vld [vmem:[#allocation36] ss:$0 sm:$0xff]  ;;  %v11460_v13 = vld [vmem:[#allocation37] ss:$0 sm:$0xff]  ;;  %v12823_v14 = vld [vmem:[%s15937_s6 + $0x8] sm:$0xff]  }
0x1f13   : > { %v7514_v41 = vcombine.low %v7486_v33, %v7493_v35  ;;  %v11453_v18 = vcombine.high %v7486_v33, %v7493_v35  ;;  %v7530_v42 = vcombine.low %v7502_v36, %v7509_v37  ;;  %v11454_v43 = vcombine.high %v7502_v36, %v7509_v37  ;;  %v12824_v33 = vld [vmem:[%s15937_s6] sm:$0xff]  }
0x1f14   : > { %12176 = vmatpush3.bf16.msra.mxu0 %v12820_v21  ;;  %v11461_v35 = vld [vmem:[#allocation40] ss:$0 sm:$0xff]  ;;  %v11491_v21 = vld [vmem:[#allocation15 + $0x1] ss:$0 sm:$0xff] }
0x1f15   : > { %v7521_v45 = vrot.slane %v7514_v41, %v14628_v51  ;;  %v7529_v46 = vrot.slane %v11453_v18, %v14628_v51  ;;  %v7537_v47 = vrot.slane %v7530_v42, %v14628_v51  ;;  %v7545_v40 = vrot.slane %v11454_v43, %v14628_v51  ;;  %12193 = vmatprep.subr.bf16.mxu0 %v13933_v1 }
0x1f17   : > { %v7547_v34 = vcombine.high %v7521_v45, %v7529_v46  ;;  %v7563_v54 = vcombine.high %v7537_v47, %v7545_v40  ;;  %v7546_v38 = vcombine.low %v7521_v45, %v7529_v46  ;;  %v7562_v55 = vcombine.low %v7537_v47, %v7545_v40  ;;  %v11465_v45 = vld [vmem:[#allocation42] ss:$0 sm:$0xff] }
0x1f19   : > { %v7561_v56 = vrot.slane %v7547_v34, %v14630_v58  ;;  %v7577_v57 = vrot.slane %v7563_v54, %v14630_v58  ;;  %v7554_v17 = vrot.slane %v7546_v38, %v14630_v58  ;;  %v7570_v50 = vrot.slane %v7562_v55, %v14630_v58 }
0x1f1b   : > { %v7580_v39 = vcombine.low %v7561_v56, %v7577_v57  ;;  %v7579_v19 = vcombine.high %v7554_v17, %v7570_v50  ;;  %v7578_v61 = vcombine.low %v7554_v17, %v7570_v50  ;;  %v7581_v52 = vcombine.high %v7561_v56, %v7577_v57 }
0x1f1d   : > { %7587 = vrot.lane.b32.xlu1 %v7580_v39, %s15934_s5  ;;  %7583 = vrot.lane.b32.xlu0 %v7579_v19, %s15926_s23  ;;  %v12825_v19 = vld [vmem:[%s15928_s14 + $0x18] sm:$0xff]  }
0x1f21   : > { %7591 = vrot.lane.b32.xlu0 %v7581_v52, %s15927_s11  ;;  %v12827_v52 = vld [vmem:[%s15928_s14 + $0x10] sm:$0xff]  }
0x1f8f   : > { %v7584_v53 = vpop.permute.xlu0 %7583  ;;  %v7588_v0 = vpop.permute.xlu1 %7587 }
0x1f90   : > { %v7594_v2 = vsel %vm2692_vm4, %v7578_v61, %v7584_v53  ;;  %v12826_v61 = vld [vmem:[%s15930_s1 + $0x18] sm:$0xff]   ;;  %v12828_v53 = vld [vmem:[%s15930_s1 + $0x10] sm:$0xff]  }
0x1f91   : > { %v7595_v48 = vsel %vm3263_vm6, %v7594_v2, %v7588_v0 }
0x1f93   : > { %v7592_v3 = vpop.permute.xlu0 %7591 }
0x1f94   : > { %v7596_v5 = vsel %vm3265_vm7, %v7595_v48, %v7592_v3 }
0x1f95   : > { %v7597_v6 = vpack.c.bf16 %v7596_v5, %v7596_v5  ;;  %v11471_v5 = vld [vmem:[#allocation43] ss:$0 sm:$0xff] }
0x1f97   : > { %12170 = vmatmul.mubr.msk.bf16.vlgmr.msra.gmra.mxu1 %vm2086_vm3, %v7597_v6 }
0x1f98   : > { %12189 = vmatprep.mubr.msk.bf16.mxu1 %vm13934_vm0, %v13933_v1 }
0x2057   : > { %v7653_v8 = vpop.f32.mrf.mxu1 }
0x2058   : > { %v7654_v9 = vadd.f32 %v11455_v7, %v7653_v8  ;;  %v11472_v7 = vld [vmem:[#allocation45] ss:$0 sm:$0xff] }
0x2059   : > { %v12171_v59 = vpop.f32.mrf.mxu1 }
0x205a   : > { %v7659_v10 = vadd.f32 %v7654_v9, %v15195_v49  ;;  %v12821_v49 = vld [vmem:[%s15937_s6 + $0x18] sm:$0xff]  }
0x205b   : > { %v7656_v60 = vpop.f32.mrf.mxu1  ;;  %12182 = vmatpush3.bf16.msra.mxu1 %v12821_v49  ;;  %v12829_v59 = vld [vmem:[%s15929_s22 + $0x18] sm:$0xff]  }
0x205c   : > { %v7662_v11 = vsel %vm2086_vm3, %v7659_v10, 0.0  ;;  %12183 = vmatprep.subr.bf16.mxu1 %v13933_v1  ;;  %v12830_v60 = vld [vmem:[%s15929_s22 + $0x10] sm:$0xff]  }
0x205d   : > { %7663 = vadd.xlane.f32.xlu1 %v7662_v11  ;;  %v12172_v12 = vpop.f32.mrf.mxu1 }
0x205f   : > { %12184 = vmatpush3.bf16.msra.mxu1 %v12822_v22 }
0x2060   : > { %12185 = vmatprep.subr.bf16.mxu1 %v13933_v1 }
0x2063   : > { %12186 = vmatpush3.bf16.msra.mxu1 %v12823_v14 }
0x2064   : > { %12187 = vmatprep.subr.bf16.mxu1 %v13933_v1 }
0x2067   : > { %12188 = vmatpush3.bf16.msra.mxu1 %v12824_v33 }
0x2068   : > { %12209 = vmatprep.subr.bf16.mxu1 %v13933_v1 }
0x20e6   : > { %v7664_v62 = vpop.xlane.xlu1 %7663 }
0x20e7   : > { %v7665_v4 = vmul.f32 0.03125, %v7664_v62 }
0x20e9   : > { %v7666_v63 = vsub.f32 %v7659_v10, %v7665_v4 }
0x20eb   : > { %v7667_v15 = vmul.f32 %v7666_v63, %v7666_v63 }
0x20ed   : > { %v7668_v16 = vsel %vm2086_vm3, %v7667_v15, 0.0 }
0x20ee   : > { %7669 = vadd.xlane.f32.xlu0 %v7668_v16 }
0x2177   : > { %v7670_v23 = vpop.xlane.xlu0 %7669 }
0x2178   : > { %v7671_v24 = vmul.f32 0.03125, %v7670_v23  ;;  %v11485_v23 = vld [vmem:[#allocation13 + $0x1] ss:$0 sm:$0xff] }
0x217a   : > { %v7672_v25 = vadd.f32 1e-05, %v7671_v24 }
0x217c   : > { %12925 = vrsqrt.f32 %v7672_v25 }
0x2189   : > { %v12926_v27 = vpop.eup %12925 }
0x218a   : > { %v7674_v30 = vmul.f32 %v12926_v27, %v7666_v63 }
0x218c   : > { %v7681_v32 = vmul.f32 %v11459_v29, %v7674_v30 }
0x218e   : > { %v7688_v28 = vadd.f32 %v11460_v13, %v7681_v32 }
0x2190   : > { %v7694_v26 = vpack.c.bf16 %v7688_v28, %v7688_v28 }
0x2192   : > { %12178 = vmatmul.mubr.msk.bf16.vlgmr.msra.gmra.mxu0 %vm2086_vm3, %v7694_v26 }
0x2193   : > { %12197 = vmatprep.mubr.msk.bf16.mxu0 %vm13934_vm0, %v13933_v1  ;;  %12194 = vmatpush3.bf16.msra.mxu0 %v12825_v19 }
0x2194   : > { %12195 = vmatprep.subr.bf16.mxu0 %v13933_v1 }
0x2197   : > { %12196 = vmatpush3.bf16.msra.mxu0 %v12827_v52 }
0x2198   : > { %12201 = vmatprep.subr.bf16.mxu0 %v13933_v1 }
0x2252   : > { %v7750_v36 = vpop.f32.mrf.mxu0 }
0x2253   : > { %v7751_v37 = vadd.f32 %v11461_v35, %v7750_v36 }
0x2254   : > { %v12179_v41 = vpop.f32.mrf.mxu0 }
0x2255   : > { %v7756_v18 = vmax.f32 %v7751_v37, 0.0 }
0x2256   : > { %v7753_v42 = vpop.f32.mrf.mxu0 }
0x2257   : > { %v7766_v43 = vpack.c.bf16 %v7756_v18, %v7756_v18 }
0x2258   : > { %v12180_v44 = vpop.f32.mrf.mxu0 }
0x2259   : > { %12190 = vmatmul.mubr.msk.bf16.vlgmr.msra.gmra.mxu1 %vm3468_vm8, %v7766_v43 }
0x225a   : > { %12213 = vmatprep.mubr.msk.bf16.mxu1 %vm13934_vm0, %v13933_v1  ;;  %12210 = vmatpush3.bf16.msra.mxu1 %v12826_v61 }
0x225b   : > { %12211 = vmatprep.subr.bf16.mxu1 %v13933_v1 }
0x225e   : > { %12212 = vmatpush3.bf16.msra.mxu1 %v12828_v53 }
0x225f   : > { %12223 = vmatprep.subr.bf16.mxu1 %v13933_v1 }
0x2319   : > { %v7834_v46 = vpop.f32.mrf.mxu1 }
0x231a   : > { %v7835_v47 = vadd.f32 %v11465_v45, %v7834_v46 }
0x231b   : > { %v12191_v40 = vpop.f32.mrf.mxu1 }
0x231c   : > { %v7840_v34 = vadd.f32 %v7835_v47, %v7688_v28 }
0x231d   : > { %v7837_v54 = vpop.f32.mrf.mxu1 }
0x231e   : > { %v7843_v38 = vsel %vm2086_vm3, %v7840_v34, 0.0 }
0x231f   : > { %7844 = vadd.xlane.f32.xlu0 %v7843_v38  ;;  %v12192_v55 = vpop.f32.mrf.mxu1 }
0x23a8   : > { %v7845_v56 = vpop.xlane.xlu0 %7844 }
0x23a9   : > { %v7846_v57 = vmul.f32 0.03125, %v7845_v56 }
0x23ab   : > { %v7847_v17 = vsub.f32 %v7840_v34, %v7846_v57 }
0x23ad   : > { %v7848_v50 = vmul.f32 %v7847_v17, %v7847_v17 }
0x23af   : > { %v7849_v39 = vsel %vm2086_vm3, %v7848_v50, 0.0 }
0x23b0   : > { %7850 = vadd.xlane.f32.xlu1 %v7849_v39 }
0x2439   : > { %v7851_v0 = vpop.xlane.xlu1 %7850 }
0x243a   : > { %v7852_v2 = vmul.f32 0.03125, %v7851_v0 }
0x243c   : > { %v7853_v3 = vadd.f32 1e-05, %v7852_v2 }
0x243e   : > { %12927 = vrsqrt.f32 %v7853_v3 }
0x244b   : > { %v12928_v48 = vpop.eup %12927 }
0x244c   : > { %v7855_v6 = vmul.f32 %v12928_v48, %v7847_v17 }
0x244e   : > { %v7862_v8 = vmul.f32 %v11471_v5, %v7855_v6 }
0x2450   : > { %v15396_v9 = vadd.f32 %v11472_v7, %v7862_v8 }
0x2452   : > { %v7898_v10 = vpack.c.bf16 %v15396_v9, %v15396_v9 }
0x2454   : > { %12198 = vmatmul.mubr.msk.bf16.vlgmr.msra.gmra.mxu0 %vm2086_vm3, %v7898_v10  ;;  %12214 = vmatmul.mubr.msk.bf16.vlgmr.msra.gmra.mxu1 %vm2086_vm3, %v7898_v10 }
0x2455   : > { %12202 = vmatpush3.bf16.msra.mxu0 %v12829_v59  ;;  %12205 = vmatprep.mubr.msk.bf16.mxu0 %vm13934_vm0, %v13933_v1 }
0x2456   : > { %12203 = vmatprep.subr.bf16.mxu0 %v13933_v1  ;;  %12225 = vmatprep.mubr.msk.bf16.mxu1 %vm13934_vm0, %v13933_v1 }
0x2459   : > { %12204 = vmatpush3.bf16.msra.mxu0 %v12830_v60 }
0x245a   : > { %12217 = vmatprep.subr.bf16.mxu0 %v13933_v1 }
0x245c   : > { %12206 = vmatmul.mubr.msk.bf16.vlgmr.msra.gmra.mxu0 %vm2086_vm3, %v7898_v10 }
0x245d   : > { %12219 = vmatprep.mubr.msk.bf16.mxu0 %vm13934_vm0, %v13933_v1 }
0x2514   : > { %v7954_v11 = vpop.f32.mrf.mxu0  ;;  %v15413_v12 = vpop.f32.mrf.mxu1 }
0x2515   : > { %v7955_v27 = vadd.f32 %v11485_v23, %v7954_v11 }
0x2516   : > { %v12199_v62 = vpop.f32.mrf.mxu0  ;;  %v12215_v4 = vpop.f32.mrf.mxu1 }
0x2518   : > { %v7957_v63 = vpop.f32.mrf.mxu0  ;;  %v8365_v15 = vpop.f32.mrf.mxu1 }
0x251a   : > { %v12200_v16 = vpop.f32.mrf.mxu0  ;;  %v12216_v20 = vpop.f32.mrf.mxu1 }
0x251c   : > { %v8158_v49 = vpop.f32.mrf.mxu0 }
0x251d   : > { %v8159_v22 = vadd.f32 %v11491_v21, %v8158_v49 }
0x251e   : > { %v12207_v24 = vpop.f32.mrf.mxu0 }
0x251f   : > { %8168 = vrot.lane.b32.xlu1 %v8159_v22, %s15931_s2  ;;  %8165 = vrot.lane.b32.xlu0 %v8159_v22, %s15932_s3 }
0x2520   : > { %v8161_v25 = vpop.f32.mrf.mxu0 }
0x2522   : > { %v12208_v29 = vpop.f32.mrf.mxu0 }
0x2523   : > { %8171 = vrot.lane.b32.xlu1 %v8159_v22, %s15933_s4  ;;  %7961 = vrot.lane.b32.xlu0 %v7955_v27, %s15932_s3 }
0x2527   : > { %7964 = vrot.lane.b32.xlu1 %v7955_v27, %s15931_s2  ;;  %7967 = vrot.lane.b32.xlu0 %v7955_v27, %s15933_s4 }
0x2591   : > { %v8169_v30 = vpop.permute.xlu1 %8168  ;;  %v8166_v13 = vpop.permute.xlu0 %8165 }
0x2592   : > { %v8174_v32 = vcombine.low %v8159_v22, %v8169_v30  ;;  %v8175_v28 = vcombine.high %v8159_v22, %v8169_v30 }
0x2594   : > { %v8182_v36 = vrot.slane %v8174_v32, %v14628_v51  ;;  %v8189_v37 = vrot.slane %v8175_v28, %v14628_v51 }
0x2595   : > { %v8172_v26 = vpop.permute.xlu1 %8171  ;;  %v7962_v14 = vpop.permute.xlu0 %7961 }
0x2596   : > { %v8190_v33 = vcombine.low %v8166_v13, %v8172_v26  ;;  %v8191_v35 = vcombine.high %v8166_v13, %v8172_v26 }
0x2598   : > { %v8198_v41 = vrot.slane %v8190_v33, %v14628_v51  ;;  %v8205_v18 = vrot.slane %v8191_v35, %v14628_v51 }
0x2599   : > { %v7965_v42 = vpop.permute.xlu1 %7964  ;;  %v7968_v43 = vpop.permute.xlu0 %7967 }
0x259a   : > { %v8206_v44 = vcombine.low %v8182_v36, %v8198_v41  ;;  %v8207_v45 = vcombine.high %v8182_v36, %v8198_v41  ;;  %v8222_v46 = vcombine.low %v8189_v37, %v8205_v18  ;;  %v8223_v47 = vcombine.high %v8189_v37, %v8205_v18 }
0x259b   : > { %v7970_v40 = vcombine.low %v7955_v27, %v7965_v42  ;;  %v7971_v34 = vcombine.high %v7955_v27, %v7965_v42  ;;  %v7986_v54 = vcombine.low %v7962_v14, %v7968_v43  ;;  %v7987_v38 = vcombine.high %v7962_v14, %v7968_v43 }
0x259c   : > { %v8214_v55 = vrot.slane %v8206_v44, %v14630_v58  ;;  %v8221_v56 = vrot.slane %v8207_v45, %v14630_v58  ;;  %v8230_v57 = vrot.slane %v8222_v46, %v14630_v58  ;;  %v8237_v17 = vrot.slane %v8223_v47, %v14630_v58 }
0x259d   : > { %v7978_v50 = vrot.slane %v7970_v40, %v14628_v51  ;;  %v7985_v39 = vrot.slane %v7971_v34, %v14628_v51  ;;  %v7994_v19 = vrot.slane %v7986_v54, %v14628_v51  ;;  %v8001_v61 = vrot.slane %v7987_v38, %v14628_v51 }
0x259e   : > { %v8242_v52 = vcombine.low %v8214_v55, %v8221_v56  ;;  %v11495_v53 = vcombine.high %v8214_v55, %v8221_v56  ;;  %v8258_v0 = vcombine.low %v8230_v57, %v8237_v17  ;;  %v11496_v2 = vcombine.high %v8230_v57, %v8237_v17 }
0x259f   : > { %v8002_v3 = vcombine.low %v7978_v50, %v7994_v19  ;;  %v8003_v48 = vcombine.high %v7978_v50, %v7994_v19  ;;  %v8018_v5 = vcombine.low %v7985_v39, %v8001_v61  ;;  %v8019_v6 = vcombine.high %v7985_v39, %v8001_v61 }
0x25a0   : > { %v8249_v7 = vrot.slane %v8242_v52, %v14628_v51  ;;  %v8257_v8 = vrot.slane %v11495_v53, %v14628_v51  ;;  %v8265_v59 = vrot.slane %v8258_v0, %v14628_v51  ;;  %v8273_v10 = vrot.slane %v11496_v2, %v14628_v51 }
0x25a1   : > { %v8010_v60 = vrot.slane %v8002_v3, %v14630_v58  ;;  %v8017_v11 = vrot.slane %v8003_v48, %v14630_v58  ;;  %v8026_v62 = vrot.slane %v8018_v5, %v14630_v58  ;;  %v8033_v4 = vrot.slane %v8019_v6, %v14630_v58 }
0x25a2   : > { %v8274_v63 = vcombine.low %v8249_v7, %v8257_v8  ;;  %v8290_v15 = vcombine.low %v8265_v59, %v8273_v10  ;;  %v8275_v16 = vcombine.high %v8249_v7, %v8257_v8  ;;  %v8291_v20 = vcombine.high %v8265_v59, %v8273_v10 }
0x25a3   : > { %v8038_v21 = vcombine.low %v8010_v60, %v8017_v11  ;;  %v11489_v49 = vcombine.high %v8010_v60, %v8017_v11  ;;  %v8054_v22 = vcombine.low %v8026_v62, %v8033_v4  ;;  %v11490_v23 = vcombine.high %v8026_v62, %v8033_v4 }
0x25a4   : > { %v8282_v24 = vrot.slane %v8274_v63, %v14630_v58  ;;  %v8298_v25 = vrot.slane %v8290_v15, %v14630_v58  ;;  %v8289_v26 = vrot.slane %v8275_v16, %v14630_v58  ;;  %v8305_v14 = vrot.slane %v8291_v20, %v14630_v58 }
0x25a5   : > { %v8045_v27 = vrot.slane %v8038_v21, %v14628_v51  ;;  %v8053_v29 = vrot.slane %v11489_v49, %v14628_v51  ;;  %v8061_v30 = vrot.slane %v8054_v22, %v14628_v51  ;;  %v8069_v13 = vrot.slane %v11490_v23, %v14628_v51  ;;  %v11497_v22 = vld [vmem:[#allocation16 + $0x1] ss:$0 sm:$0xff] }
0x25a6   : > { %v8306_v32 = vcombine.low %v8282_v24, %v8298_v25  ;;  %v8307_v28 = vcombine.high %v8282_v24, %v8298_v25  ;;  %v8308_v44 = vcombine.low %v8289_v26, %v8305_v14  ;;  %v8309_v45 = vcombine.high %v8289_v26, %v8305_v14 }
0x25a7   : > { %v8070_v33 = vcombine.low %v8045_v27, %v8053_v29  ;;  %v8086_v35 = vcombine.low %v8061_v30, %v8069_v13  ;;  %v8071_v46 = vcombine.high %v8045_v27, %v8053_v29  ;;  %v8087_v47 = vcombine.high %v8061_v30, %v8069_v13 }
0x25a8   : > { %v8518_v36 = vpack.c.bf16 %v8306_v32, %v8306_v32  ;;  %v8519_v37 = vpack.c.bf16 %v8307_v28, %v8307_v28  ;;  %v8520_v54 = vpack.c.bf16 %v8308_v44, %v8308_v44  ;;  %v8521_v38 = vpack.c.bf16 %v8309_v45, %v8309_v45 }
0x25a9   : > { %v8078_v41 = vrot.slane %v8070_v33, %v14630_v58  ;;  %v8094_v18 = vrot.slane %v8086_v35, %v14630_v58  ;;  %v8085_v55 = vrot.slane %v8071_v46, %v14630_v58  ;;  %v8101_v56 = vrot.slane %v8087_v47, %v14630_v58 }
0x25aa   : > { %v8526_v42 = vsel %vm2692_vm4, %v8518_v36, 0  ;;  %v8572_v43 = vsel %vm2692_vm4, %v8519_v37, 0  ;;  %v8618_v50 = vsel %vm2692_vm4, %v8520_v54, 0  ;;  %v8664_v39 = vsel %vm2692_vm4, %v8521_v38, 0 }
0x25ab   : > { %12218 = vmatpush3.bf16.xpose.msra.mxu0 %v8526_v42  ;;  %v8102_v40 = vcombine.low %v8078_v41, %v8094_v18  ;;  %12224 = vmatpush3.bf16.xpose.msra.mxu1 %v8572_v43  ;;  %v8103_v34 = vcombine.high %v8078_v41, %v8094_v18  ;;  %v8104_v19 = vcombine.low %v8085_v55, %v8101_v56 }
0x25ac   : > { %12229 = vmatprep.subr.bf16.mxu0 %v13933_v1  ;;  %12235 = vmatprep.subr.bf16.mxu1 %v13933_v1  ;;  %v8105_v61 = vcombine.high %v8085_v55, %v8101_v56  ;;  %v8363_v23 = vadd.f32 %v11497_v22, %v15413_v12 }
0x25ad   : > { %v8514_v57 = vpack.c.bf16 %v8102_v40, %v8102_v40  ;;  %v8515_v17 = vpack.c.bf16 %v8103_v34, %v8103_v34  ;;  %v8516_v52 = vpack.c.bf16 %v8104_v19, %v8104_v19 }
0x25ae   : > { %v8517_v53 = vpack.c.bf16 %v8105_v61, %v8105_v61 }
0x25b2   : > { %12220 = vmatmul.mubr.msk.bf16.vlgmr.msra.gmra.mxu0 %vm2692_vm4, %v8514_v57  ;;  %12226 = vmatmul.mubr.msk.bf16.vlgmr.msra.gmra.mxu1 %vm2692_vm4, %v8515_v17 }
0x25b3   : > { %12230 = vmatpush3.bf16.xpose.msra.mxu0 %v8618_v50  ;;  %12236 = vmatpush3.bf16.xpose.msra.mxu1 %v8664_v39 }
0x25b4   : > { %12231 = vmatprep.mubr.msk.bf16.mxu0 %vm13934_vm0, %v13933_v1  ;;  %12237 = vmatprep.mubr.msk.bf16.mxu1 %vm13934_vm0, %v13933_v1 }
0x25b5   : > { %12241 = vmatprep.subr.bf16.mxu0 %v13933_v1  ;;  %12247 = vmatprep.subr.bf16.mxu1 %v13933_v1 }
0x25ba   : > { %12232 = vmatmul.mubr.msk.bf16.vlgmr.msra.gmra.mxu0 %vm2692_vm4, %v8516_v52  ;;  %12238 = vmatmul.mubr.msk.bf16.vlgmr.msra.gmra.mxu1 %vm2692_vm4, %v8517_v53 }
0x25bb   : > { %12243 = vmatprep.mubr.msk.bf16.mxu0 %vm13934_vm0, %v13933_v1  ;;  %12249 = vmatprep.mubr.msk.bf16.mxu1 %vm13934_vm0, %v13933_v1 }
0x2672   : > { %v8562_v0 = vpop.f32.mrf.mxu0  ;;  %v8608_v2 = vpop.f32.mrf.mxu1 }
0x2673   : > { %v8706_v3 = vsel %vm2692_vm4, %v8562_v0, -inf  ;;  %v8709_v48 = vsel %vm2692_vm4, %v8608_v2, -inf }
0x2674   : > { %8707 = vmax.xlane.f32.xlu1 %v8706_v3  ;;  %v12221_v5 = vpop.f32.mrf.mxu0  ;;  %8710 = vmax.xlane.f32.xlu0 %v8709_v48  ;;  %v12227_v6 = vpop.f32.mrf.mxu1 }
0x2676   : > { %v8565_v7 = vpop.f32.mrf.mxu0  ;;  %v8611_v8 = vpop.f32.mrf.mxu1 }
0x2678   : > { %v12222_v59 = vpop.f32.mrf.mxu0  ;;  %v12228_v10 = vpop.f32.mrf.mxu1 }
0x267a   : > { %v8654_v60 = vpop.f32.mrf.mxu0  ;;  %v8700_v11 = vpop.f32.mrf.mxu1 }
0x267b   : > { %v8712_v62 = vsel %vm2692_vm4, %v8654_v60, -inf  ;;  %v8715_v4 = vsel %vm2692_vm4, %v8700_v11, -inf }
0x267c   : > { %8713 = vmax.xlane.f32.xlu0 %v8712_v62  ;;  %v12233_v63 = vpop.f32.mrf.mxu0  ;;  %v12239_v15 = vpop.f32.mrf.mxu1  ;;  %8716 = vmax.xlane.f32.xlu1 %v8715_v4 }
0x267e   : > { %v8657_v16 = vpop.f32.mrf.mxu0  ;;  %v8703_v20 = vpop.f32.mrf.mxu1 }
0x2680   : > { %v12234_v21 = vpop.f32.mrf.mxu0  ;;  %v12240_v49 = vpop.f32.mrf.mxu1 }
0x268d   : > { %8372 = vrot.lane.b32.xlu1 %v8363_v23, %s15931_s2 }
0x26fd   : > { %v8708_v24 = vpop.xlane.xlu1 %8707  ;;  %v8711_v25 = vpop.xlane.xlu0 %8710 }
0x26fe   : > { %v8718_v27 = vsub.f32 %v8562_v0, %v8708_v24  ;;  %v8719_v29 = vsub.f32 %v8608_v2, %v8711_v25 }
0x2700   : > { %v8722_v30 = vmul.f32 1.442695, %v8718_v27  ;;  %v8724_v13 = vmul.f32 1.442695, %v8719_v29 }
0x2702   : > { %12929 = vpow2.f32 %v8722_v30 }
0x2703   : > { %12931 = vpow2.f32 %v8724_v13 }
0x2705   : > { %v8714_v14 = vpop.xlane.xlu0 %8713  ;;  %v8717_v33 = vpop.xlane.xlu1 %8716 }
0x2706   : > { %v8720_v35 = vsub.f32 %v8654_v60, %v8714_v14  ;;  %v8721_v36 = vsub.f32 %v8700_v11, %v8717_v33 }
0x2708   : > { %v8726_v37 = vmul.f32 1.442695, %v8720_v35  ;;  %v8728_v41 = vmul.f32 1.442695, %v8721_v36 }
0x2709   : > { %v8373_v45 = vpop.permute.xlu1 %8372 }
0x270a   : > { %12933 = vpow2.f32 %v8726_v37  ;;  %v8378_v40 = vcombine.low %v8363_v23, %v8373_v45  ;;  %v8379_v34 = vcombine.high %v8363_v23, %v8373_v45 }
0x270b   : > { %12935 = vpow2.f32 %v8728_v41 }
0x270c   : > { %v8386_v57 = vrot.slane %v8378_v40, %v14628_v51  ;;  %v8393_v17 = vrot.slane %v8379_v34, %v14628_v51 }
0x270f   : > { %v15479_v32 = vpop.eup %12929 }
0x2710   : > { %v15481_v28 = vpop.eup %12931  ;;  %v8730_v26 = vsel %vm2692_vm4, %v15479_v32, 0.0 }
0x2711   : > { %v8733_v12 = vsel %vm2692_vm4, %v15481_v28, 0.0  ;;  %8731 = vadd.xlane.f32.xlu0 %v8730_v26 }
0x2712   : > { %8734 = vadd.xlane.f32.xlu1 %v8733_v12 }
0x2717   : > { %v15489_v18 = vpop.eup %12933 }
0x2718   : > { %v15491_v42 = vpop.eup %12935  ;;  %v8736_v43 = vsel %vm2692_vm4, %v15489_v18, 0.0 }
0x2719   : > { %v8739_v44 = vsel %vm2692_vm4, %v15491_v42, 0.0 }
0x2723   : > { %8375 = vrot.lane.b32.xlu1 %v8363_v23, %s15933_s4 }
0x2727   : > { %8369 = vrot.lane.b32.xlu0 %v8363_v23, %s15932_s3 }
0x2746   : > { %8737 = vadd.xlane.f32.xlu0 %v8736_v43 }
0x2747   : > { %8740 = vadd.xlane.f32.xlu1 %v8739_v44 }
0x279a   : > { %v8732_v46 = vpop.xlane.xlu0 %8731 }
0x279b   : > { %v8735_v47 = vpop.xlane.xlu1 %8734  ;;  %12937 = vrcp.f32 %v8732_v46 }
0x279c   : > { %12939 = vrcp.f32 %v8735_v47 }
0x279e   : > { %v8370_v54 = vpop.permute.xlu0 %8369 }
0x279f   : > { %v8376_v38 = vpop.permute.xlu1 %8375 }
0x27a0   : > { %v8394_v55 = vcombine.low %v8370_v54, %v8376_v38  ;;  %v8395_v56 = vcombine.high %v8370_v54, %v8376_v38 }
0x27a2   : > { %v8402_v50 = vrot.slane %v8394_v55, %v14628_v51  ;;  %v8409_v39 = vrot.slane %v8395_v56, %v14628_v51 }
0x27a4   : > { %v8410_v19 = vcombine.low %v8386_v57, %v8402_v50  ;;  %v8411_v61 = vcombine.high %v8386_v57, %v8402_v50  ;;  %v8426_v52 = vcombine.low %v8393_v17, %v8409_v39  ;;  %v8427_v53 = vcombine.high %v8393_v17, %v8409_v39 }
0x27a6   : > { %v8418_v0 = vrot.slane %v8410_v19, %v14630_v58  ;;  %v8425_v2 = vrot.slane %v8411_v61, %v14630_v58  ;;  %v8434_v3 = vrot.slane %v8426_v52, %v14630_v58  ;;  %v8441_v48 = vrot.slane %v8427_v53, %v14630_v58 }
0x27a8   : > { %v8446_v5 = vcombine.low %v8418_v0, %v8425_v2  ;;  %v11501_v6 = vcombine.high %v8418_v0, %v8425_v2  ;;  %v8462_v7 = vcombine.low %v8434_v3, %v8441_v48  ;;  %v11502_v8 = vcombine.high %v8434_v3, %v8441_v48  ;;  %v12938_v21 = vpop.eup %12937 }
0x27a9   : > { %v12940_v23 = vpop.eup %12939  ;;  %v8746_v13 = vmul.f32 %v12938_v21, %v15479_v32 }
0x27aa   : > { %v8453_v59 = vrot.slane %v8446_v5, %v14628_v51  ;;  %v8461_v10 = vrot.slane %v11501_v6, %v14628_v51  ;;  %v8469_v60 = vrot.slane %v8462_v7, %v14628_v51  ;;  %v8477_v11 = vrot.slane %v11502_v8, %v14628_v51 }
0x27ab   : > { %v8747_v30 = vmul.f32 %v12940_v23, %v15481_v28  ;;  %v8750_v41 = vpack.c.bf16 %v8746_v13, %v8746_v13 }
0x27ac   : > { %v8478_v62 = vcombine.low %v8453_v59, %v8461_v10  ;;  %v8479_v4 = vcombine.high %v8453_v59, %v8461_v10  ;;  %v8494_v63 = vcombine.low %v8469_v60, %v8477_v11  ;;  %v8495_v15 = vcombine.high %v8469_v60, %v8477_v11 }
0x27ad   : > { %v8751_v37 = vpack.c.bf16 %v8747_v30, %v8747_v30 }
0x27ae   : > { %v8486_v16 = vrot.slane %v8478_v62, %v14630_v58  ;;  %v8493_v20 = vrot.slane %v8479_v4, %v14630_v58  ;;  %v8502_v49 = vrot.slane %v8494_v63, %v14630_v58  ;;  %v8509_v22 = vrot.slane %v8495_v15, %v14630_v58  ;;  %v12831_v63 = vld [vmem:[#allocation18 + $0x18] sm:$0xff]  }
0x27b0   : > { %v8510_v24 = vcombine.low %v8486_v16, %v8502_v49  ;;  %v8511_v25 = vcombine.high %v8486_v16, %v8502_v49  ;;  %v8512_v27 = vcombine.low %v8493_v20, %v8509_v22  ;;  %v8513_v29 = vcombine.high %v8493_v20, %v8509_v22 }
0x27b2   : > { %v8754_v26 = vpack.c.bf16 %v8510_v24, %v8510_v24  ;;  %v8755_v12 = vpack.c.bf16 %v8511_v25, %v8511_v25  ;;  %v8756_v35 = vpack.c.bf16 %v8512_v27, %v8512_v27  ;;  %v8757_v36 = vpack.c.bf16 %v8513_v29, %v8513_v29  ;;  %v12832_v27 = vld [vmem:[#allocation18 + $0x10] sm:$0xff]  }
0x27b4   : > { %v8762_v14 = vsel %vm2932_vm5, %v8754_v26, 0  ;;  %v8808_v33 = vsel %vm2932_vm5, %v8755_v12, 0  ;;  %v8854_v32 = vsel %vm2932_vm5, %v8756_v35, 0  ;;  %v8900_v28 = vsel %vm2932_vm5, %v8757_v36, 0 }
0x27b5   : > { %12242 = vmatpush3.bf16.msra.mxu0 %v8762_v14  ;;  %12248 = vmatpush3.bf16.msra.mxu1 %v8808_v33 }
0x27b6   : > { %12253 = vmatprep.subr.bf16.mxu0 %v13933_v1  ;;  %12259 = vmatprep.subr.bf16.mxu1 %v13933_v1 }
0x27b8   : > { %12244 = vmatmul.mubr.msk.bf16.vlgmr.msra.gmra.mxu0 %vm2692_vm4, %v8750_v41  ;;  %12250 = vmatmul.mubr.msk.bf16.vlgmr.msra.gmra.mxu1 %vm2692_vm4, %v8751_v37 }
0x27b9   : > { %12254 = vmatpush3.bf16.msra.mxu0 %v8854_v32  ;;  %12260 = vmatpush3.bf16.msra.mxu1 %v8900_v28 }
0x27ba   : > { %12255 = vmatprep.mubr.msk.bf16.mxu0 %vm13934_vm0, %v13933_v1  ;;  %12261 = vmatprep.mubr.msk.bf16.mxu1 %vm13934_vm0, %v13933_v1 }
0x27bb   : > { %12265 = vmatprep.subr.bf16.mxu0 %v13933_v1  ;;  %12273 = vmatprep.subr.bf16.mxu1 %v13933_v1 }
0x27cf   : > { %v8738_v43 = vpop.xlane.xlu0 %8737 }
0x27d0   : > { %v8741_v44 = vpop.xlane.xlu1 %8740  ;;  %12941 = vrcp.f32 %v8738_v43 }
0x27d1   : > { %12943 = vrcp.f32 %v8741_v44 }
0x27dd   : > { %v12942_v45 = vpop.eup %12941 }
0x27de   : > { %v12944_v46 = vpop.eup %12943  ;;  %v8748_v47 = vmul.f32 %v12942_v45, %v15489_v18 }
0x27df   : > { %v8749_v40 = vmul.f32 %v12944_v46, %v15491_v42 }
0x27e0   : > { %v8752_v34 = vpack.c.bf16 %v8748_v47, %v8748_v47 }
0x27e1   : > { %v8753_v54 = vpack.c.bf16 %v8749_v40, %v8749_v40 }
0x27e2   : > { %12256 = vmatmul.mubr.msk.bf16.vlgmr.msra.gmra.mxu0 %vm2692_vm4, %v8752_v34 }
0x27e3   : > { %12262 = vmatmul.mubr.msk.bf16.vlgmr.msra.gmra.mxu1 %vm2692_vm4, %v8753_v54  ;;  %12269 = vmatprep.mubr.msk.bf16.mxu0 %vm13934_vm0, %v13933_v1 }
0x27e4   : > { %12277 = vmatprep.mubr.msk.bf16.mxu1 %vm13934_vm0, %v13933_v1  ;;  %12266 = vmatpush3.bf16.msra.mxu0 %v12831_v63 }
0x27e5   : > { %12267 = vmatprep.subr.bf16.mxu0 %v13933_v1 }
0x27e8   : > { %12268 = vmatpush3.bf16.msra.mxu0 %v12832_v27 }
0x27e9   : > { %12281 = vmatprep.subr.bf16.mxu0 %v13933_v1 }
0x2878   : > { %v8798_v38 = vpop.f32.mrf.mxu0  ;;  %v8844_v55 = vpop.f32.mrf.mxu1 }
0x287a   : > { %v12245_v56 = vpop.f32.mrf.mxu0  ;;  %v12251_v57 = vpop.f32.mrf.mxu1 }
0x287b   : > { %v12834_v57 = vld [vmem:[#allocation27 + $0x10] sm:$0xff]  }
0x287c   : > { %v8801_v17 = vpop.f32.mrf.mxu0  ;;  %v8847_v18 = vpop.f32.mrf.mxu1 }
0x287d   : > { %v11513_v17 = vld [vmem:[#allocation19 + $0x1] ss:$0 sm:$0xff] }
0x287e   : > { %v12246_v50 = vpop.f32.mrf.mxu0  ;;  %v12252_v42 = vpop.f32.mrf.mxu1 }
0x28a2   : > { %v8890_v39 = vpop.f32.mrf.mxu0 }
0x28a3   : > { %v8942_v19 = vcombine.low %v8798_v38, %v8890_v39  ;;  %v8943_v61 = vcombine.high %v8798_v38, %v8890_v39  ;;  %v8936_v52 = vpop.f32.mrf.mxu1 }
0x28a4   : > { %v8958_v53 = vcombine.low %v8844_v55, %v8936_v52  ;;  %v8959_v0 = vcombine.high %v8844_v55, %v8936_v52  ;;  %v12257_v2 = vpop.f32.mrf.mxu0  ;;  %v12833_v55 = vld [vmem:[#allocation27 + $0x18] sm:$0xff]  }
0x28a5   : > { %v8950_v3 = vrot.slane %v8942_v19, %v14628_v51  ;;  %v8957_v48 = vrot.slane %v8943_v61, %v14628_v51  ;;  %v12263_v5 = vpop.f32.mrf.mxu1 }
0x28a6   : > { %v8966_v6 = vrot.slane %v8958_v53, %v14628_v51  ;;  %v8973_v7 = vrot.slane %v8959_v0, %v14628_v51  ;;  %v8893_v8 = vpop.f32.mrf.mxu0 }
0x28a7   : > { %v8939_v59 = vpop.f32.mrf.mxu1 }
0x28a8   : > { %v8974_v10 = vcombine.low %v8950_v3, %v8966_v6  ;;  %v8975_v60 = vcombine.high %v8950_v3, %v8966_v6  ;;  %v8990_v11 = vcombine.low %v8957_v48, %v8973_v7  ;;  %v8991_v62 = vcombine.high %v8957_v48, %v8973_v7  ;;  %v12258_v4 = vpop.f32.mrf.mxu0  ;;  %v11525_v48 = vld [vmem:[#allocation28 + $0x1] ss:$0 sm:$0xff] }
0x28a9   : > { %v12264_v15 = vpop.f32.mrf.mxu1 }
0x28aa   : > { %v8982_v16 = vrot.slane %v8974_v10, %v14630_v58  ;;  %v8989_v20 = vrot.slane %v8975_v60, %v14630_v58  ;;  %v8998_v21 = vrot.slane %v8990_v11, %v14630_v58  ;;  %v9005_v49 = vrot.slane %v8991_v62, %v14630_v58  ;;  %v12835_v10 = vld [vmem:[#allocation24 + $0x18] sm:$0xff]   ;;  %v12836_v60 = vld [vmem:[#allocation24 + $0x10] sm:$0xff]  }
0x28ab   : > { %12274 = vmatpush3.bf16.msra.mxu1 %v12835_v10 }
0x28ac   : > { %v9010_v22 = vcombine.low %v8982_v16, %v8989_v20  ;;  %v11511_v23 = vcombine.high %v8982_v16, %v8989_v20  ;;  %v9026_v24 = vcombine.low %v8998_v21, %v9005_v49  ;;  %v11512_v25 = vcombine.high %v8998_v21, %v9005_v49  ;;  %12275 = vmatprep.subr.bf16.mxu1 %v13933_v1 }
0x28ae   : > { %v9017_v29 = vrot.slane %v9010_v22, %v14628_v51  ;;  %v9025_v30 = vrot.slane %v11511_v23, %v14628_v51  ;;  %v9033_v13 = vrot.slane %v9026_v24, %v14628_v51  ;;  %v9041_v26 = vrot.slane %v11512_v25, %v14628_v51 }
0x28af   : > { %12276 = vmatpush3.bf16.msra.mxu1 %v12836_v60 }
0x28b0   : > { %v9043_v12 = vcombine.high %v9017_v29, %v9025_v30  ;;  %v9059_v14 = vcombine.high %v9033_v13, %v9041_v26  ;;  %v9042_v33 = vcombine.low %v9017_v29, %v9025_v30  ;;  %v9058_v35 = vcombine.low %v9033_v13, %v9041_v26  ;;  %12289 = vmatprep.subr.bf16.mxu1 %v13933_v1 }
0x28b2   : > { %v9057_v36 = vrot.slane %v9043_v12, %v14630_v58  ;;  %v9073_v37 = vrot.slane %v9059_v14, %v14630_v58  ;;  %v9050_v41 = vrot.slane %v9042_v33, %v14630_v58  ;;  %v9066_v32 = vrot.slane %v9058_v35, %v14630_v58 }
0x28b4   : > { %v9076_v28 = vcombine.low %v9057_v36, %v9073_v37  ;;  %v9075_v43 = vcombine.high %v9050_v41, %v9066_v32  ;;  %v9074_v44 = vcombine.low %v9050_v41, %v9066_v32  ;;  %v9077_v45 = vcombine.high %v9057_v36, %v9073_v37 }
0x28b6   : > { %9083 = vrot.lane.b32.xlu1 %v9076_v28, %s15934_s5  ;;  %9079 = vrot.lane.b32.xlu0 %v9075_v43, %s15926_s23 }
0x28ba   : > { %9087 = vrot.lane.b32.xlu0 %v9077_v45, %s15927_s11 }
0x2928   : > { %v9080_v46 = vpop.permute.xlu0 %9079  ;;  %v9084_v47 = vpop.permute.xlu1 %9083 }
0x2929   : > { %v9090_v40 = vsel %vm2692_vm4, %v9074_v44, %v9080_v46 }
0x292a   : > { %v9091_v54 = vsel %vm3263_vm6, %v9090_v40, %v9084_v47 }
0x292c   : > { %v9088_v34 = vpop.permute.xlu0 %9087 }
0x292d   : > { %v9092_v38 = vsel %vm3265_vm7, %v9091_v54, %v9088_v34 }
0x292e   : > { %v9093_v56 = vpack.c.bf16 %v9092_v38, %v9092_v38  ;;  %v11517_v38 = vld [vmem:[#allocation21 + $0x1] ss:$0 sm:$0xff] }
0x2930   : > { %12270 = vmatmul.mubr.msk.bf16.vlgmr.msra.gmra.mxu0 %vm2086_vm3, %v9093_v56 }
0x2931   : > { %12282 = vmatpush3.bf16.msra.mxu0 %v12833_v55  ;;  %12285 = vmatprep.mubr.msk.bf16.mxu0 %vm13934_vm0, %v13933_v1 }
0x2932   : > { %12283 = vmatprep.subr.bf16.mxu0 %v13933_v1 }
0x2935   : > { %12284 = vmatpush3.bf16.msra.mxu0 %v12834_v57 }
0x2936   : > { %12297 = vmatprep.subr.bf16.mxu0 %v13933_v1 }
0x2938   : > { %12286 = vmatmul.mubr.msk.bf16.vlgmr.msra.gmra.mxu0 %vm2086_vm3, %v15206_v31 }
0x2939   : > { %12299 = vmatprep.mubr.msk.bf16.mxu0 %vm13934_vm0, %v13933_v1 }
0x29f0   : > { %v9149_v18 = vpop.f32.mrf.mxu0 }
0x29f1   : > { %v9150_v50 = vadd.f32 %v11513_v17, %v9149_v18  ;;  %v11518_v18 = vld [vmem:[#allocation22 + $0x1] ss:$0 sm:$0xff] }
0x29f2   : > { %v12271_v42 = vpop.f32.mrf.mxu0 }
0x29f3   : > { %v9155_v39 = vadd.f32 %v9150_v50, %v15396_v9 }
0x29f4   : > { %v9152_v19 = vpop.f32.mrf.mxu0 }
0x29f5   : > { %v9160_v61 = vsel %vm2086_vm3, %v9155_v39, 0.0 }
0x29f6   : > { %9161 = vadd.xlane.f32.xlu1 %v9160_v61  ;;  %v12272_v52 = vpop.f32.mrf.mxu0 }
0x29f8   : > { %v9475_v53 = vpop.f32.mrf.mxu0 }
0x29f9   : > { %v9476_v5 = vadd.f32 %v11525_v48, %v9475_v53 }
0x29fa   : > { %v12287_v0 = vpop.f32.mrf.mxu0 }
0x29fb   : > { %v12837_v0 = vld [vmem:[#allocation30 + $0x18] sm:$0xff]  }
0x29fc   : > { %v9478_v2 = vpop.f32.mrf.mxu0 }
0x29fe   : > { %v12288_v3 = vpop.f32.mrf.mxu0 }
0x2a07   : > { %9485 = vrot.lane.b32.xlu1 %v9476_v5, %s15931_s2 }
0x2a0b   : > { %9488 = vrot.lane.b32.xlu1 %v9476_v5, %s15933_s4 }
0x2a7f   : > { %v9162_v6 = vpop.xlane.xlu1 %9161 }
0x2a80   : > { %v9163_v7 = vmul.f32 0.03125, %v9162_v6 }
0x2a82   : > { %v9164_v8 = vsub.f32 %v9155_v39, %v9163_v7 }
0x2a83   : > { %v9486_v11 = vpop.permute.xlu1 %9485 }
0x2a84   : > { %v9165_v59 = vmul.f32 %v9164_v8, %v9164_v8  ;;  %v9491_v63 = vcombine.low %v9476_v5, %v9486_v11  ;;  %v9492_v15 = vcombine.high %v9476_v5, %v9486_v11 }
0x2a86   : > { %v9166_v9 = vsel %vm2086_vm3, %v9165_v59, 0.0  ;;  %v9499_v23 = vrot.slane %v9491_v63, %v14628_v51  ;;  %v9506_v24 = vrot.slane %v9492_v15, %v14628_v51 }
0x2a87   : > { %9167 = vadd.xlane.f32.xlu0 %v9166_v9  ;;  %v9489_v20 = vpop.permute.xlu1 %9488 }
0x2a9d   : > { %9482 = vrot.lane.b32.xlu0 %v9476_v5, %s15932_s3  ;;  %v12838_v5 = vld [vmem:[#allocation30 + $0x10] sm:$0xff]  }
0x2b10   : > { %v9168_v62 = vpop.xlane.xlu0 %9167 }
0x2b11   : > { %v9169_v4 = vmul.f32 0.03125, %v9168_v62 }
0x2b13   : > { %v9170_v16 = vadd.f32 1e-05, %v9169_v4 }
0x2b14   : > { %v9483_v21 = vpop.permute.xlu0 %9482 }
0x2b15   : > { %12945 = vrsqrt.f32 %v9170_v16  ;;  %v9507_v49 = vcombine.low %v9483_v21, %v9489_v20  ;;  %v9508_v22 = vcombine.high %v9483_v21, %v9489_v20 }
0x2b17   : > { %v9515_v25 = vrot.slane %v9507_v49, %v14628_v51  ;;  %v9522_v27 = vrot.slane %v9508_v22, %v14628_v51 }
0x2b19   : > { %v9523_v29 = vcombine.low %v9499_v23, %v9515_v25  ;;  %v9524_v30 = vcombine.high %v9499_v23, %v9515_v25  ;;  %v9539_v13 = vcombine.low %v9506_v24, %v9522_v27  ;;  %v9540_v26 = vcombine.high %v9506_v24, %v9522_v27 }
0x2b1b   : > { %v9531_v12 = vrot.slane %v9523_v29, %v14630_v58  ;;  %v9538_v14 = vrot.slane %v9524_v30, %v14630_v58  ;;  %v9547_v33 = vrot.slane %v9539_v13, %v14630_v58  ;;  %v9554_v35 = vrot.slane %v9540_v26, %v14630_v58 }
0x2b1d   : > { %v9559_v36 = vcombine.low %v9531_v12, %v9538_v14  ;;  %v11529_v37 = vcombine.high %v9531_v12, %v9538_v14  ;;  %v9575_v41 = vcombine.low %v9547_v33, %v9554_v35  ;;  %v11530_v32 = vcombine.high %v9547_v33, %v9554_v35 }
0x2b1f   : > { %v9566_v28 = vrot.slane %v9559_v36, %v14628_v51  ;;  %v9574_v43 = vrot.slane %v11529_v37, %v14628_v51  ;;  %v9582_v44 = vrot.slane %v9575_v41, %v14628_v51  ;;  %v9590_v45 = vrot.slane %v11530_v32, %v14628_v51 }
0x2b21   : > { %v9591_v46 = vcombine.low %v9566_v28, %v9574_v43  ;;  %v9607_v47 = vcombine.low %v9582_v44, %v9590_v45  ;;  %v9592_v40 = vcombine.high %v9566_v28, %v9574_v43  ;;  %v9608_v34 = vcombine.high %v9582_v44, %v9590_v45 }
0x2b22   : > { %v12946_v54 = vpop.eup %12945 }
0x2b23   : > { %v9172_v55 = vmul.f32 %v12946_v54, %v9164_v8  ;;  %v9599_v56 = vrot.slane %v9591_v46, %v14630_v58  ;;  %v9615_v57 = vrot.slane %v9607_v47, %v14630_v58  ;;  %v9606_v17 = vrot.slane %v9592_v40, %v14630_v58  ;;  %v11519_v8 = vld [vmem:[#allocation25 + $0x1] ss:$0 sm:$0xff] }
0x2b24   : > { %v9622_v50 = vrot.slane %v9608_v34, %v14630_v58 }
0x2b25   : > { %v9179_v42 = vmul.f32 %v11517_v38, %v9172_v55  ;;  %v9623_v39 = vcombine.low %v9599_v56, %v9615_v57  ;;  %v9624_v48 = vcombine.high %v9599_v56, %v9615_v57 }
0x2b26   : > { %v15594_v19 = vcombine.low %v9606_v17, %v9622_v50  ;;  %v15596_v61 = vcombine.high %v9606_v17, %v9622_v50 }
0x2b27   : > { %v9835_v52 = vpack.c.bf16 %v9623_v39, %v9623_v39  ;;  %v15598_v53 = vadd.f32 %v11518_v18, %v9179_v42  ;;  %v9836_v6 = vpack.c.bf16 %v9624_v48, %v9624_v48 }
0x2b28   : > { %v9837_v17 = vpack.c.bf16 %v15594_v19, %v15594_v19  ;;  %v9838_v18 = vpack.c.bf16 %v15596_v61, %v15596_v61 }
0x2b29   : > { %v9843_v2 = vsel %vm2692_vm4, %v9835_v52, 0  ;;  %v9215_v3 = vpack.c.bf16 %v15598_v53, %v15598_v53  ;;  %v9889_v7 = vsel %vm2692_vm4, %v9836_v6, 0 }
0x2b2a   : > { %12298 = vmatpush3.bf16.xpose.msra.mxu0 %v9843_v2  ;;  %v9981_v2 = vsel %vm2692_vm4, %v9838_v18, 0 }
0x2b2b   : > { %12278 = vmatmul.mubr.msk.bf16.vlgmr.msra.gmra.mxu1 %vm2086_vm3, %v9215_v3  ;;  %12309 = vmatprep.subr.bf16.mxu0 %v13933_v1 }
0x2b2c   : > { %12290 = vmatpush3.bf16.msra.mxu1 %v12837_v0  ;;  %12293 = vmatprep.mubr.msk.bf16.mxu1 %vm13934_vm0, %v13933_v1  ;;  %v9935_v0 = vsel %vm2692_vm4, %v9837_v17, 0 }
0x2b2d   : > { %12291 = vmatprep.subr.bf16.mxu1 %v13933_v1 }
0x2b30   : > { %12292 = vmatpush3.bf16.msra.mxu1 %v12838_v5 }
0x2b31   : > { %12303 = vmatprep.subr.bf16.mxu1 %v13933_v1 }
0x2b33   : > { %12294 = vmatmul.mubr.msk.bf16.vlgmr.msra.gmra.mxu1 %vm2086_vm3, %v15206_v31 }
0x2b34   : > { %12304 = vmatpush3.bf16.xpose.msra.mxu1 %v9889_v7  ;;  %12305 = vmatprep.mubr.msk.bf16.mxu1 %vm13934_vm0, %v13933_v1 }
0x2b35   : > { %12315 = vmatprep.subr.bf16.mxu1 %v13933_v1 }
0x2beb   : > { %v9271_v59 = vpop.f32.mrf.mxu1 }
0x2bec   : > { %v9272_v9 = vadd.f32 %v11519_v8, %v9271_v59 }
0x2bed   : > { %v12279_v10 = vpop.f32.mrf.mxu1 }
0x2bee   : > { %9281 = vrot.lane.b32.xlu1 %v9272_v9, %s15931_s2  ;;  %9278 = vrot.lane.b32.xlu0 %v9272_v9, %s15932_s3 }
0x2bef   : > { %v9274_v60 = vpop.f32.mrf.mxu1 }
0x2bf1   : > { %v12280_v11 = vpop.f32.mrf.mxu1 }
0x2bf2   : > { %9284 = vrot.lane.b32.xlu0 %v9272_v9, %s15933_s4 }
0x2bf3   : > { %v15618_v31 = vpop.f32.mrf.mxu1 }
0x2bf5   : > { %v12295_v62 = vpop.f32.mrf.mxu1 }
0x2bf7   : > { %v9682_v4 = vpop.f32.mrf.mxu1 }
0x2bf9   : > { %v12296_v63 = vpop.f32.mrf.mxu1 }
0x2c60   : > { %v9282_v15 = vpop.permute.xlu1 %9281  ;;  %v9279_v16 = vpop.permute.xlu0 %9278 }
0x2c61   : > { %v9287_v20 = vcombine.low %v9272_v9, %v9282_v15  ;;  %v9288_v21 = vcombine.high %v9272_v9, %v9282_v15 }
0x2c63   : > { %v9295_v24 = vrot.slane %v9287_v20, %v14628_v51  ;;  %v9302_v25 = vrot.slane %v9288_v21, %v14628_v51 }
0x2c64   : > { %v9285_v49 = vpop.permute.xlu0 %9284 }
0x2c65   : > { %v9303_v22 = vcombine.low %v9279_v16, %v9285_v49  ;;  %v9304_v23 = vcombine.high %v9279_v16, %v9285_v49 }
0x2c67   : > { %v9311_v27 = vrot.slane %v9303_v22, %v14628_v51  ;;  %v9318_v29 = vrot.slane %v9304_v23, %v14628_v51 }
0x2c69   : > { %v9319_v30 = vcombine.low %v9295_v24, %v9311_v27  ;;  %v9320_v13 = vcombine.high %v9295_v24, %v9311_v27  ;;  %v9335_v26 = vcombine.low %v9302_v25, %v9318_v29  ;;  %v9336_v12 = vcombine.high %v9302_v25, %v9318_v29  ;;  %v11531_v25 = vld [vmem:[#allocation31 + $0x1] ss:$0 sm:$0xff] }
0x2c6a   : > { %v9680_v27 = vadd.f32 %v11531_v25, %v15618_v31 }
0x2c6b   : > { %v9327_v14 = vrot.slane %v9319_v30, %v14630_v58  ;;  %v9334_v33 = vrot.slane %v9320_v13, %v14630_v58  ;;  %v9343_v35 = vrot.slane %v9335_v26, %v14630_v58  ;;  %v9350_v36 = vrot.slane %v9336_v12, %v14630_v58 }
0x2c6d   : > { %v9355_v37 = vcombine.low %v9327_v14, %v9334_v33  ;;  %v11523_v41 = vcombine.high %v9327_v14, %v9334_v33  ;;  %v9371_v32 = vcombine.low %v9343_v35, %v9350_v36  ;;  %v11524_v28 = vcombine.high %v9343_v35, %v9350_v36 }
0x2c6f   : > { %v9362_v43 = vrot.slane %v9355_v37, %v14628_v51  ;;  %v9370_v44 = vrot.slane %v11523_v41, %v14628_v51  ;;  %v9378_v45 = vrot.slane %v9371_v32, %v14628_v51  ;;  %v9386_v46 = vrot.slane %v11524_v28, %v14628_v51 }
0x2c71   : > { %v9387_v47 = vcombine.low %v9362_v43, %v9370_v44  ;;  %v9403_v40 = vcombine.low %v9378_v45, %v9386_v46  ;;  %v9388_v34 = vcombine.high %v9362_v43, %v9370_v44  ;;  %v9404_v38 = vcombine.high %v9378_v45, %v9386_v46 }
0x2c73   : > { %v9395_v54 = vrot.slane %v9387_v47, %v14630_v58  ;;  %v9411_v55 = vrot.slane %v9403_v40, %v14630_v58  ;;  %v9402_v50 = vrot.slane %v9388_v34, %v14630_v58  ;;  %v9418_v42 = vrot.slane %v9404_v38, %v14630_v58 }
0x2c75   : > { %v9419_v56 = vcombine.low %v9395_v54, %v9411_v55  ;;  %v9420_v57 = vcombine.high %v9395_v54, %v9411_v55  ;;  %v9421_v19 = vcombine.low %v9402_v50, %v9418_v42  ;;  %v9422_v3 = vcombine.high %v9402_v50, %v9418_v42 }
0x2c77   : > { %v9831_v39 = vpack.c.bf16 %v9419_v56, %v9419_v56  ;;  %v9832_v52 = vpack.c.bf16 %v9420_v57, %v9420_v57  ;;  %v9833_v61 = vpack.c.bf16 %v9421_v19, %v9421_v19  ;;  %v9834_v48 = vpack.c.bf16 %v9422_v3, %v9422_v3 }
0x2c79   : > { %12300 = vmatmul.mubr.msk.bf16.vlgmr.msra.gmra.mxu0 %vm2692_vm4, %v9831_v39  ;;  %12306 = vmatmul.mubr.msk.bf16.vlgmr.msra.gmra.mxu1 %vm2692_vm4, %v9832_v52 }
0x2c7a   : > { %12310 = vmatpush3.bf16.xpose.msra.mxu0 %v9935_v0  ;;  %12316 = vmatpush3.bf16.xpose.msra.mxu1 %v9981_v2 }
0x2c7b   : > { %12311 = vmatprep.mubr.msk.bf16.mxu0 %vm13934_vm0, %v13933_v1  ;;  %12317 = vmatprep.mubr.msk.bf16.mxu1 %vm13934_vm0, %v13933_v1 }
0x2c7c   : > { %12321 = vmatprep.subr.bf16.mxu0 %v13933_v1  ;;  %12327 = vmatprep.subr.bf16.mxu1 %v13933_v1 }
0x2c81   : > { %12312 = vmatmul.mubr.msk.bf16.vlgmr.msra.gmra.mxu0 %vm2692_vm4, %v9833_v61  ;;  %12318 = vmatmul.mubr.msk.bf16.vlgmr.msra.gmra.mxu1 %vm2692_vm4, %v9834_v48 }
0x2c82   : > { %12323 = vmatprep.mubr.msk.bf16.mxu0 %vm13934_vm0, %v13933_v1  ;;  %12329 = vmatprep.mubr.msk.bf16.mxu1 %vm13934_vm0, %v13933_v1 }
0x2d39   : > { %v9879_v5 = vpop.f32.mrf.mxu0  ;;  %v9925_v6 = vpop.f32.mrf.mxu1 }
0x2d3a   : > { %v10026_v7 = vsel %vm2692_vm4, %v9925_v6, -inf  ;;  %v10023_v8 = vsel %vm2692_vm4, %v9879_v5, -inf }
0x2d3b   : > { %10027 = vmax.xlane.f32.xlu0 %v10026_v7  ;;  %v12307_v59 = vpop.f32.mrf.mxu1  ;;  %10024 = vmax.xlane.f32.xlu1 %v10023_v8  ;;  %v12301_v9 = vpop.f32.mrf.mxu0 }
0x2d3d   : > { %v9882_v10 = vpop.f32.mrf.mxu0  ;;  %v9928_v60 = vpop.f32.mrf.mxu1 }
0x2d3f   : > { %v12302_v11 = vpop.f32.mrf.mxu0  ;;  %v12308_v62 = vpop.f32.mrf.mxu1 }
0x2d41   : > { %v9971_v4 = vpop.f32.mrf.mxu0  ;;  %v10017_v63 = vpop.f32.mrf.mxu1 }
0x2d42   : > { %v10032_v15 = vsel %vm2692_vm4, %v10017_v63, -inf  ;;  %v10029_v16 = vsel %vm2692_vm4, %v9971_v4, -inf }
0x2d43   : > { %v12319_v20 = vpop.f32.mrf.mxu1  ;;  %10033 = vmax.xlane.f32.xlu1 %v10032_v15  ;;  %10030 = vmax.xlane.f32.xlu0 %v10029_v16  ;;  %v12313_v21 = vpop.f32.mrf.mxu0 }
0x2d45   : > { %v9974_v49 = vpop.f32.mrf.mxu0  ;;  %v10020_v22 = vpop.f32.mrf.mxu1 }
0x2d47   : > { %v12314_v23 = vpop.f32.mrf.mxu0  ;;  %v12320_v24 = vpop.f32.mrf.mxu1 }
0x2d54   : > { %9689 = vrot.lane.b32.xlu1 %v9680_v27, %s15931_s2 }
0x2dc4   : > { %v10028_v29 = vpop.xlane.xlu0 %10027  ;;  %v10025_v30 = vpop.xlane.xlu1 %10024 }
0x2dc5   : > { %v10036_v13 = vsub.f32 %v9925_v6, %v10028_v29  ;;  %v10035_v26 = vsub.f32 %v9879_v5, %v10025_v30 }
0x2dc7   : > { %v10041_v12 = vmul.f32 1.442695, %v10036_v13  ;;  %v10039_v14 = vmul.f32 1.442695, %v10035_v26 }
0x2dc9   : > { %12947 = vpow2.f32 %v10041_v12 }
0x2dca   : > { %12949 = vpow2.f32 %v10039_v14 }
0x2dcc   : > { %v10034_v37 = vpop.xlane.xlu1 %10033  ;;  %v10031_v41 = vpop.xlane.xlu0 %10030 }
0x2dcd   : > { %v10038_v32 = vsub.f32 %v10017_v63, %v10034_v37  ;;  %v10037_v28 = vsub.f32 %v9971_v4, %v10031_v41 }
0x2dcf   : > { %v10045_v43 = vmul.f32 1.442695, %v10038_v32  ;;  %v10043_v44 = vmul.f32 1.442695, %v10037_v28 }
0x2dd0   : > { %v9690_v34 = vpop.permute.xlu1 %9689 }
0x2dd1   : > { %12951 = vpow2.f32 %v10045_v43  ;;  %v9695_v55 = vcombine.low %v9680_v27, %v9690_v34  ;;  %v9696_v56 = vcombine.high %v9680_v27, %v9690_v34 }
0x2dd2   : > { %12953 = vpow2.f32 %v10043_v44 }
0x2dd3   : > { %v9703_v42 = vrot.slane %v9695_v55, %v14628_v51  ;;  %v9710_v39 = vrot.slane %v9696_v56, %v14628_v51 }
0x2dd6   : > { %v15662_v33 = vpop.eup %12947 }
0x2dd7   : > { %v15664_v35 = vpop.eup %12949  ;;  %v10050_v36 = vsel %vm2692_vm4, %v15662_v33, 0.0 }
0x2dd8   : > { %10051 = vadd.xlane.f32.xlu1 %v10050_v36  ;;  %v10047_v31 = vsel %vm2692_vm4, %v15664_v35, 0.0 }
0x2dd9   : > { %10048 = vadd.xlane.f32.xlu0 %v10047_v31 }
0x2dde   : > { %v15672_v45 = vpop.eup %12951 }
0x2ddf   : > { %v15674_v46 = vpop.eup %12953  ;;  %v10056_v47 = vsel %vm2692_vm4, %v15672_v45, 0.0 }
0x2de0   : > { %v10053_v40 = vsel %vm2692_vm4, %v15674_v46, 0.0 }
0x2de9   : > { %9692 = vrot.lane.b32.xlu1 %v9680_v27, %s15933_s4 }
0x2def   : > { %9686 = vrot.lane.b32.xlu0 %v9680_v27, %s15932_s3 }
0x2e0d   : > { %10057 = vadd.xlane.f32.xlu1 %v10056_v47 }
0x2e0e   : > { %10054 = vadd.xlane.f32.xlu0 %v10053_v40 }
0x2e61   : > { %v10052_v54 = vpop.xlane.xlu1 %10051 }
0x2e62   : > { %v10049_v38 = vpop.xlane.xlu0 %10048  ;;  %12955 = vrcp.f32 %v10052_v54 }
0x2e63   : > { %12957 = vrcp.f32 %v10049_v38 }
0x2e65   : > { %v9693_v57 = vpop.permute.xlu1 %9692 }
0x2e66   : > { %v9687_v17 = vpop.permute.xlu0 %9686 }
0x2e67   : > { %v9711_v18 = vcombine.low %v9687_v17, %v9693_v57  ;;  %v9712_v50 = vcombine.high %v9687_v17, %v9693_v57 }
0x2e69   : > { %v9719_v52 = vrot.slane %v9711_v18, %v14628_v51  ;;  %v9726_v0 = vrot.slane %v9712_v50, %v14628_v51 }
0x2e6b   : > { %v9727_v2 = vcombine.low %v9703_v42, %v9719_v52  ;;  %v9728_v19 = vcombine.high %v9703_v42, %v9719_v52  ;;  %v9743_v3 = vcombine.low %v9710_v39, %v9726_v0  ;;  %v9744_v61 = vcombine.high %v9710_v39, %v9726_v0 }
0x2e6d   : > { %v9735_v48 = vrot.slane %v9727_v2, %v14630_v58  ;;  %v9742_v5 = vrot.slane %v9728_v19, %v14630_v58  ;;  %v9751_v6 = vrot.slane %v9743_v3, %v14630_v58  ;;  %v9758_v7 = vrot.slane %v9744_v61, %v14630_v58 }
0x2e6f   : > { %v9763_v8 = vcombine.low %v9735_v48, %v9742_v5  ;;  %v11535_v59 = vcombine.high %v9735_v48, %v9742_v5  ;;  %v9779_v9 = vcombine.low %v9751_v6, %v9758_v7  ;;  %v11536_v10 = vcombine.high %v9751_v6, %v9758_v7  ;;  %v12956_v22 = vpop.eup %12955 }
0x2e70   : > { %v12958_v25 = vpop.eup %12957  ;;  %v10064_v26 = vmul.f32 %v12956_v22, %v15662_v33 }
0x2e71   : > { %v9770_v60 = vrot.slane %v9763_v8, %v14628_v51  ;;  %v9778_v11 = vrot.slane %v11535_v59, %v14628_v51  ;;  %v9786_v62 = vrot.slane %v9779_v9, %v14628_v51  ;;  %v9794_v4 = vrot.slane %v11536_v10, %v14628_v51 }
0x2e72   : > { %v10063_v12 = vmul.f32 %v12958_v25, %v15664_v35  ;;  %v10068_v28 = vpack.c.bf16 %v10064_v26, %v10064_v26 }
0x2e73   : > { %v9795_v63 = vcombine.low %v9770_v60, %v9778_v11  ;;  %v9796_v15 = vcombine.high %v9770_v60, %v9778_v11  ;;  %v9811_v16 = vcombine.low %v9786_v62, %v9794_v4  ;;  %v9812_v20 = vcombine.high %v9786_v62, %v9794_v4 }
0x2e74   : > { %v10067_v43 = vpack.c.bf16 %v10063_v12, %v10063_v12 }
0x2e75   : > { %v9803_v21 = vrot.slane %v9795_v63, %v14630_v58  ;;  %v9810_v49 = vrot.slane %v9796_v15, %v14630_v58  ;;  %v9819_v23 = vrot.slane %v9811_v16, %v14630_v58  ;;  %v9826_v24 = vrot.slane %v9812_v20, %v14630_v58  ;;  %v12839_v15 = vld [vmem:[#allocation33 + $0x18] sm:$0xff]  }
0x2e77   : > { %v9827_v27 = vcombine.low %v9803_v21, %v9819_v23  ;;  %v9828_v29 = vcombine.high %v9803_v21, %v9819_v23  ;;  %v9829_v30 = vcombine.low %v9810_v49, %v9826_v24  ;;  %v9830_v13 = vcombine.high %v9810_v49, %v9826_v24 }
0x2e79   : > { %v10071_v14 = vpack.c.bf16 %v9827_v27, %v9827_v27  ;;  %v10072_v36 = vpack.c.bf16 %v9828_v29, %v9828_v29  ;;  %v10073_v41 = vpack.c.bf16 %v9829_v30, %v9829_v30  ;;  %v10074_v32 = vpack.c.bf16 %v9830_v13, %v9830_v13  ;;  %v12840_v29 = vld [vmem:[#allocation33 + $0x10] sm:$0xff]  }
0x2e7b   : > { %v10079_v31 = vsel %vm2932_vm5, %v10071_v14, 0  ;;  %v10125_v37 = vsel %vm2932_vm5, %v10072_v36, 0  ;;  %v10171_v33 = vsel %vm2932_vm5, %v10073_v41, 0  ;;  %v10217_v35 = vsel %vm2932_vm5, %v10074_v32, 0 }
0x2e7c   : > { %12322 = vmatpush3.bf16.msra.mxu0 %v10079_v31  ;;  %12328 = vmatpush3.bf16.msra.mxu1 %v10125_v37 }
0x2e7d   : > { %12333 = vmatprep.subr.bf16.mxu0 %v13933_v1  ;;  %12339 = vmatprep.subr.bf16.mxu1 %v13933_v1 }
0x2e7f   : > { %12324 = vmatmul.mubr.msk.bf16.vlgmr.msra.gmra.mxu0 %vm2692_vm4, %v10067_v43  ;;  %12330 = vmatmul.mubr.msk.bf16.vlgmr.msra.gmra.mxu1 %vm2692_vm4, %v10068_v28 }
0x2e80   : > { %12334 = vmatpush3.bf16.msra.mxu0 %v10171_v33  ;;  %12340 = vmatpush3.bf16.msra.mxu1 %v10217_v35 }
0x2e81   : > { %12335 = vmatprep.mubr.msk.bf16.mxu0 %vm13934_vm0, %v13933_v1  ;;  %12341 = vmatprep.mubr.msk.bf16.mxu1 %vm13934_vm0, %v13933_v1 }
0x2e82   : > { %12345 = vmatprep.subr.bf16.mxu0 %v13933_v1  ;;  %12353 = vmatprep.subr.bf16.mxu1 %v13933_v1 }
0x2e96   : > { %v10058_v44 = vpop.xlane.xlu1 %10057 }
0x2e97   : > { %12959 = vrcp.f32 %v10058_v44  ;;  %v10055_v47 = vpop.xlane.xlu0 %10054 }
0x2e98   : > { %12961 = vrcp.f32 %v10055_v47 }
0x2ea4   : > { %v12960_v40 = vpop.eup %12959 }
0x2ea5   : > { %v12962_v34 = vpop.eup %12961  ;;  %v10066_v54 = vmul.f32 %v12960_v40, %v15672_v45 }
0x2ea6   : > { %v10065_v38 = vmul.f32 %v12962_v34, %v15674_v46 }
0x2ea7   : > { %v10070_v55 = vpack.c.bf16 %v10066_v54, %v10066_v54 }
0x2ea8   : > { %v10069_v56 = vpack.c.bf16 %v10065_v38, %v10065_v38 }
0x2ea9   : > { %12342 = vmatmul.mubr.msk.bf16.vlgmr.msra.gmra.mxu1 %vm2692_vm4, %v10070_v55 }
0x2eaa   : > { %12336 = vmatmul.mubr.msk.bf16.vlgmr.msra.gmra.mxu0 %vm2692_vm4, %v10069_v56  ;;  %12357 = vmatprep.mubr.msk.bf16.mxu1 %vm13934_vm0, %v13933_v1  ;;  %v11547_v56 = vld [vmem:[#allocation34 + $0x1] ss:$0 sm:$0xff] }
0x2eab   : > { %12349 = vmatprep.mubr.msk.bf16.mxu0 %vm13934_vm0, %v13933_v1  ;;  %12346 = vmatpush3.bf16.msra.mxu0 %v12839_v15  ;;  %v11553_v15 = vld [vmem:[#allocation40 + $0x1] ss:$0 sm:$0xff] }
0x2eac   : > { %12347 = vmatprep.subr.bf16.mxu0 %v13933_v1 }
0x2eaf   : > { %12348 = vmatpush3.bf16.msra.mxu0 %v12840_v29 }
0x2eb0   : > { %12361 = vmatprep.subr.bf16.mxu0 %v13933_v1 }
0x2f3f   : > { %v10115_v57 = vpop.f32.mrf.mxu0  ;;  %v10161_v17 = vpop.f32.mrf.mxu1 }
0x2f41   : > { %v12325_v18 = vpop.f32.mrf.mxu0  ;;  %v12331_v50 = vpop.f32.mrf.mxu1 }
0x2f43   : > { %v10118_v42 = vpop.f32.mrf.mxu0  ;;  %v10164_v45 = vpop.f32.mrf.mxu1 }
0x2f45   : > { %v12326_v39 = vpop.f32.mrf.mxu0  ;;  %v12332_v46 = vpop.f32.mrf.mxu1 }
0x2f69   : > { %v10253_v52 = vpop.f32.mrf.mxu1 }
0x2f6a   : > { %v10207_v0 = vpop.f32.mrf.mxu0  ;;  %v10275_v2 = vcombine.low %v10161_v17, %v10253_v52  ;;  %v10276_v19 = vcombine.high %v10161_v17, %v10253_v52 }
0x2f6b   : > { %v10259_v3 = vcombine.low %v10115_v57, %v10207_v0  ;;  %v10260_v61 = vcombine.high %v10115_v57, %v10207_v0  ;;  %v12343_v48 = vpop.f32.mrf.mxu1 }
0x2f6c   : > { %v10283_v5 = vrot.slane %v10275_v2, %v14628_v51  ;;  %v10290_v6 = vrot.slane %v10276_v19, %v14628_v51  ;;  %v12337_v7 = vpop.f32.mrf.mxu0  ;;  %v12844_v48 = vld [vmem:[%s15937_s6 + $0x30] sm:$0xff]  }
0x2f6d   : > { %v10267_v8 = vrot.slane %v10259_v3, %v14628_v51  ;;  %v10274_v59 = vrot.slane %v10260_v61, %v14628_v51  ;;  %v10256_v9 = vpop.f32.mrf.mxu1  ;;  %v12841_v3 = vld [vmem:[#allocation39 + $0x18] sm:$0xff]   ;;  %v12842_v61 = vld [vmem:[#allocation39 + $0x10] sm:$0xff]  }
0x2f6e   : > { %v10210_v10 = vpop.f32.mrf.mxu0  ;;  %12354 = vmatpush3.bf16.msra.mxu1 %v12841_v3 }
0x2f6f   : > { %v10291_v60 = vcombine.low %v10267_v8, %v10283_v5  ;;  %v10292_v11 = vcombine.high %v10267_v8, %v10283_v5  ;;  %v10307_v62 = vcombine.low %v10274_v59, %v10290_v6  ;;  %v10308_v4 = vcombine.high %v10274_v59, %v10290_v6  ;;  %v12344_v63 = vpop.f32.mrf.mxu1  ;;  %12355 = vmatprep.subr.bf16.mxu1 %v13933_v1  ;;  %v11551_v59 = vld [vmem:[#allocation36 + $0x1] ss:$0 sm:$0xff]  ;;  %v11552_v10 = vld [vmem:[#allocation37 + $0x1] ss:$0 sm:$0xff] }
0x2f70   : > { %v12338_v16 = vpop.f32.mrf.mxu0  ;;  %v12846_v63 = vld [vmem:[%s15937_s6 + $0x20] sm:$0xff]  }
0x2f71   : > { %v10299_v20 = vrot.slane %v10291_v60, %v14630_v58  ;;  %v10306_v21 = vrot.slane %v10292_v11, %v14630_v58  ;;  %v10315_v49 = vrot.slane %v10307_v62, %v14630_v58  ;;  %v10322_v22 = vrot.slane %v10308_v4, %v14630_v58  ;;  %v12845_v4 = vld [vmem:[%s15937_s6 + $0x28] sm:$0xff]  }
0x2f72   : > { %12356 = vmatpush3.bf16.msra.mxu1 %v12842_v61  ;;  %v11575_v61 = vld [vmem:[%s14197_s21] ss:$0 sm:$0xff] }
0x2f73   : > { %v10327_v23 = vcombine.low %v10299_v20, %v10306_v21  ;;  %v11545_v24 = vcombine.high %v10299_v20, %v10306_v21  ;;  %v10343_v25 = vcombine.low %v10315_v49, %v10322_v22  ;;  %v11546_v27 = vcombine.high %v10315_v49, %v10322_v22  ;;  %12373 = vmatprep.subr.bf16.mxu1 %v13933_v1 }
0x2f75   : > { %v10334_v30 = vrot.slane %v10327_v23, %v14628_v51  ;;  %v10342_v13 = vrot.slane %v11545_v24, %v14628_v51  ;;  %v10350_v26 = vrot.slane %v10343_v25, %v14628_v51  ;;  %v10358_v12 = vrot.slane %v11546_v27, %v14628_v51  ;;  %v11565_v25 = vld [vmem:[#allocation42 + $0x1] ss:$0 sm:$0xff] }
0x2f77   : > { %v10360_v14 = vcombine.high %v10334_v30, %v10342_v13  ;;  %v10376_v36 = vcombine.high %v10350_v26, %v10358_v12  ;;  %v10359_v31 = vcombine.low %v10334_v30, %v10342_v13  ;;  %v10375_v37 = vcombine.low %v10350_v26, %v10358_v12 }
0x2f79   : > { %v10374_v41 = vrot.slane %v10360_v14, %v14630_v58  ;;  %v10390_v32 = vrot.slane %v10376_v36, %v14630_v58  ;;  %v10367_v28 = vrot.slane %v10359_v31, %v14630_v58  ;;  %v10383_v43 = vrot.slane %v10375_v37, %v14630_v58 }
0x2f7b   : > { %v10393_v33 = vcombine.low %v10374_v41, %v10390_v32  ;;  %v10392_v35 = vcombine.high %v10367_v28, %v10383_v43  ;;  %v10391_v44 = vcombine.low %v10367_v28, %v10383_v43  ;;  %v10394_v51 = vcombine.high %v10374_v41, %v10390_v32 }
0x2f7d   : > { %10400 = vrot.lane.b32.xlu1 %v10393_v33, %s15934_s5  ;;  %10396 = vrot.lane.b32.xlu0 %v10392_v35, %s15926_s23  ;;  %s15938_s5 = sshll.u32 %s15940_s0, 3 }
0x2f7e   : > { %s1931_s7 = scalar_lea.vmem %s14202_s19, %s15938_s5 }
0x2f81   : > { %10404 = vrot.lane.b32.xlu0 %v10394_v51, %s15927_s11 }
0x2fef   : > { %v10397_v47 = vpop.permute.xlu0 %10396  ;;  %v10401_v40 = vpop.permute.xlu1 %10400 }
0x2ff0   : > { %v10407_v34 = vsel %vm2692_vm4, %v10391_v44, %v10397_v47  ;;  %v11571_v44 = vld [vmem:[#allocation43 + $0x1] ss:$0 sm:$0xff]  ;;  %v11572_v47 = vld [vmem:[#allocation45 + $0x1] ss:$0 sm:$0xff] }
0x2ff1   : > { %v10408_v38 = vsel %vm3263_vm6, %v10407_v34, %v10401_v40 }
0x2ff3   : > { %v10405_v54 = vpop.permute.xlu0 %10404 }
0x2ff4   : > { %v10409_v55 = vsel %vm3265_vm7, %v10408_v38, %v10405_v54 }
0x2ff5   : > { %v10410_v58 = vpack.c.bf16 %v10409_v55, %v10409_v55 }
0x2ff7   : > { %12350 = vmatmul.mubr.msk.bf16.vlgmr.msra.gmra.mxu0 %vm2086_vm3, %v10410_v58 }
0x2ff8   : > { %12369 = vmatprep.mubr.msk.bf16.mxu0 %vm13934_vm0, %v13933_v1 }
0x30b7   : > { %v10466_v57 = vpop.f32.mrf.mxu0 }
0x30b8   : > { %v10467_v17 = vadd.f32 %v11547_v56, %v10466_v57 }
0x30b9   : > { %v12351_v18 = vpop.f32.mrf.mxu0 }
0x30ba   : > { %v10472_v50 = vadd.f32 %v10467_v17, %v15598_v53  ;;  %v12843_v53 = vld [vmem:[%s15937_s6 + $0x38] sm:$0xff]   ;;  %v12847_v17 = vld [vmem:[%s14192_s12 + $0x8] sm:$0xff]   ;;  %v12848_v18 = vld [vmem:[%s14192_s12] sm:$0xff]  }
0x30bb   : > { %v10469_v42 = vpop.f32.mrf.mxu0  ;;  %12362 = vmatpush3.bf16.msra.mxu0 %v12843_v53 }
0x30bc   : > { %v10477_v45 = vsel %vm2086_vm3, %v10472_v50, 0.0  ;;  %12363 = vmatprep.subr.bf16.mxu0 %v13933_v1 }
0x30bd   : > { %10478 = vadd.xlane.f32.xlu1 %v10477_v45  ;;  %v12352_v39 = vpop.f32.mrf.mxu0 }
0x30bf   : > { %12364 = vmatpush3.bf16.msra.mxu0 %v12844_v48 }
0x30c0   : > { %12365 = vmatprep.subr.bf16.mxu0 %v13933_v1 }
0x30c3   : > { %12366 = vmatpush3.bf16.msra.mxu0 %v12845_v4 }
0x30c4   : > { %12367 = vmatprep.subr.bf16.mxu0 %v13933_v1 }
0x30c7   : > { %12368 = vmatpush3.bf16.msra.mxu0 %v12846_v63 }
0x3146   : > { %v10479_v46 = vpop.xlane.xlu1 %10478 }
0x3147   : > { %v10480_v52 = vmul.f32 0.03125, %v10479_v46  ;;  %v11573_v46 = vld [vmem:[#allocation46] ss:$0 sm:$0xff] }
0x3149   : > { %v10481_v0 = vsub.f32 %v10472_v50, %v10480_v52 }
0x314b   : > { %v10482_v2 = vmul.f32 %v10481_v0, %v10481_v0 }
0x314d   : > { %v10483_v19 = vsel %vm2086_vm3, %v10482_v2, 0.0 }
0x314e   : > { %10484 = vadd.xlane.f32.xlu0 %v10483_v19 }
0x31d7   : > { %v10485_v5 = vpop.xlane.xlu0 %10484 }
0x31d8   : > { %v10486_v6 = vmul.f32 0.03125, %v10485_v5 }
0x31da   : > { %v10487_v7 = vadd.f32 1e-05, %v10486_v6 }
0x31dc   : > { %12963 = vrsqrt.f32 %v10487_v7 }
0x31e9   : > { %v12964_v8 = vpop.eup %12963 }
0x31ea   : > { %v10489_v9 = vmul.f32 %v12964_v8, %v10481_v0  ;;  %v11574_v0 = vld [vmem:[#allocation48] ss:$0 sm:$0xff] }
0x31ec   : > { %v10496_v60 = vmul.f32 %v11551_v59, %v10489_v9 }
0x31ee   : > { %v10503_v11 = vadd.f32 %v11552_v10, %v10496_v60 }
0x31f0   : > { %v10511_v62 = vpack.c.bf16 %v10503_v11, %v10503_v11 }
0x31f2   : > { %12358 = vmatmul.mubr.msk.bf16.vlgmr.msra.gmra.mxu1 %vm2086_vm3, %v10511_v62 }
0x31f3   : > { %12377 = vmatprep.mubr.msk.bf16.mxu1 %vm13934_vm0, %v13933_v1  ;;  %12374 = vmatpush3.bf16.msra.mxu1 %v12847_v17 }
0x31f4   : > { %12375 = vmatprep.subr.bf16.mxu1 %v13933_v1 }
0x31f7   : > { %12376 = vmatpush3.bf16.msra.mxu1 %v12848_v18 }
0x32b2   : > { %v10567_v16 = vpop.f32.mrf.mxu1 }
0x32b3   : > { %v10568_v20 = vadd.f32 %v11553_v15, %v10567_v16 }
0x32b4   : > { %v12359_v21 = vpop.f32.mrf.mxu1 }
0x32b5   : > { %v10573_v49 = vmax.f32 %v10568_v20, 0.0 }
0x32b6   : > { %v10570_v22 = vpop.f32.mrf.mxu1 }
0x32b7   : > { %v10585_v23 = vpack.c.bf16 %v10573_v49, %v10573_v49 }
0x32b8   : > { %v12360_v24 = vpop.f32.mrf.mxu1 }
0x32b9   : > { %12370 = vmatmul.mubr.msk.bf16.vlgmr.msra.gmra.mxu0 %vm3468_vm8, %v10585_v23 }
0x3379   : > { %v10653_v27 = vpop.f32.mrf.mxu0 }
0x337a   : > { %v10654_v29 = vadd.f32 %v11565_v25, %v10653_v27 }
0x337b   : > { %v12371_v30 = vpop.f32.mrf.mxu0 }
0x337c   : > { %v10659_v13 = vadd.f32 %v10654_v29, %v10503_v11 }
0x337d   : > { %v10656_v26 = vpop.f32.mrf.mxu0 }
0x337e   : > { %v10664_v12 = vsel %vm2086_vm3, %v10659_v13, 0.0 }
0x337f   : > { %10665 = vadd.xlane.f32.xlu0 %v10664_v12  ;;  %v12372_v14 = vpop.f32.mrf.mxu0 }
0x3408   : > { %v10666_v36 = vpop.xlane.xlu0 %10665 }
0x3409   : > { %v10667_v31 = vmul.f32 0.03125, %v10666_v36 }
0x340b   : > { %v10668_v37 = vsub.f32 %v10659_v13, %v10667_v31 }
0x340d   : > { %v10669_v41 = vmul.f32 %v10668_v37, %v10668_v37 }
0x340f   : > { %v10670_v32 = vsel %vm2086_vm3, %v10669_v41, 0.0 }
0x3410   : > { %10671 = vadd.xlane.f32.xlu1 %v10670_v32 }
0x3499   : > { %v10672_v28 = vpop.xlane.xlu1 %10671 }
0x349a   : > { %v10673_v43 = vmul.f32 0.03125, %v10672_v28 }
0x349c   : > { %v10674_v33 = vadd.f32 1e-05, %v10673_v43 }
0x349e   : > { %12965 = vrsqrt.f32 %v10674_v33 }
0x34ab   : > { %v12966_v35 = vpop.eup %12965 }
0x34ac   : > { %v10676_v51 = vmul.f32 %v12966_v35, %v10668_v37 }
0x34ae   : > { %v10683_v40 = vmul.f32 %v11571_v44, %v10676_v51 }
0x34b0   : > { %v10690_v34 = vadd.f32 %v11572_v47, %v10683_v40 }
0x34b2   : > { %v10693_v54 = vsel %vm2086_vm3, %v10690_v34, 0.0 }
0x34b3   : > { %10694 = vadd.xlane.f32.xlu0 %v10693_v54 }
0x353c   : > { %v10695_v38 = vpop.xlane.xlu0 %10694 }
0x353d   : > { %v10696_v55 = vmul.f32 0.03125, %v10695_v38 }
0x353f   : > { %v10697_v58 = vsub.f32 %v10690_v34, %v10696_v55 }
0x3541   : > { %v10698_v56 = vmul.f32 %v10697_v58, %v10697_v58 }
0x3543   : > { %v10699_v57 = vsel %vm2086_vm3, %v10698_v56, 0.0 }
0x3544   : > { %10700 = vadd.xlane.f32.xlu1 %v10699_v57 }
0x35cd   : > { %v10701_v50 = vpop.xlane.xlu1 %10700 }
0x35ce   : > { %v10702_v42 = vmul.f32 0.03125, %v10701_v50 }
0x35d0   : > { %v10703_v45 = vadd.f32 1e-05, %v10702_v42 }
0x35d2   : > { %12967 = vrsqrt.f32 %v10703_v45 }
0x35df   : > { %v12968_v39 = vpop.eup %12967 }
0x35e0   : > { %v10705_v52 = vmul.f32 %v12968_v39, %v10697_v58 }
0x35e2   : > { %v10712_v2 = vmul.f32 %v11573_v46, %v10705_v52 }
0x35e4   : > { %v10719_v19 = vadd.f32 %v11574_v0, %v10712_v2 }
0x35e6   : > { %v10725_v3 = vpack.c.bf16 %v10719_v19, %v10719_v19 }
0x35e8   : > { %12378 = vmatmul.mubr.msk.bf16.vlgmr.msra.gmra.mxu1 %vm2086_vm3, %v10725_v3 }
0x36a8   : > { %v10781_v53 = vpop.f32.mrf.mxu1 }
0x36a9   : > { %v10782_v48 = vadd.f32 %v11575_v61, %v10781_v53 }
0x36aa   : > { %v12379_v1 = vpop.f32.mrf.mxu1 }
0x36ab   : > { %10787 = vst [vmem:[%s1931_s7] sm:$0xff] %v10782_v48 }
0x36ac   : > { %v10784_v5 = vpop.f32.mrf.mxu1 }
0x36ae   : > { %v12380_v6 = vpop.f32.mrf.mxu1 }
0x36af PF: > { %s127_s15 = sadd.s32 1, %s13845_s15  }
0x36b0   : > { %p124_p5 = scmp.ge.s32.totalorder %s127_s15, 4  }
0x36b2   :  { %126 = sbr.rel (!%p124_p5) target bundleno = 107 (0x6b), region = 467 }
0x36b7   :  { %10807 = vsyncpa [#allocation3], 1 }
0x36b8   :  { %10809 = vsyncpa [#allocation3 + $0x1], 1 }
0x36b9   :  { %10810 = vsyncpa [#allocation5], 1 }
0x36ba   :  { %10811 = vsyncpa [#allocation8], 1 }
0x36bb   :  { %10812 = vsyncpa [#allocation11], 1 }
0x36bc   :  { %10813 = vsyncpa [#allocation14], 1 }
0x36bd   :  { %10814 = vsyncpa [#allocation17], 1 }
0x36be   :  { %10815 = vsyncpa [#allocation20], 1 }
0x36bf   :  { %10816 = vsyncpa [#allocation23], 1 }
0x36c0   :  { %10817 = vsyncpa [#allocation26], 1 }
0x36c1   :  { %10818 = vsyncpa [#allocation29], 1 }
0x36c2   :  { %10819 = vsyncpa [#allocation32], 1 }
0x36c3   :  { %10820 = vsyncpa [#allocation35], 1 }
0x36c4   :  { %10821 = vsyncpa [#allocation38], 1 }
0x36c5   :  { %10822 = vsyncpa [#allocation41], 1 }
0x36c6   :  { %10823 = vsyncpa [#allocation44], 1 }
0x36c7   :  { %10824 = vsyncpa [#allocation47], 1 }

</bundles_post_ra>
